<compile_context>
chip_gen: v7x
topology: tpu7x:2x2x1
jax: 0.10.0
libtpu: 0.0.40
codegen_flags: <defaults>
</compile_context>

<pallas_src>
import math

import numpy as np

import jax
import jax.numpy as jnp
from jax.experimental import pallas as pl
from jax.experimental.pallas import tpu as pltpu
from jax.scipy.linalg import block_diag

NUM_NODES = 5
NHEADS = 2              # TRANSFORMER_NHEADS
DIM_FF = 256            # TRANSFORMER_DIM_FF
NLAYERS = 2             # TRANSFORMER_LAYERS
LN_EPS = 1e-5           # PyTorch LayerNorm default
OUT_DIM = (NUM_NODES - 1) * (NUM_NODES - 1)

# bf16 MXU operands + f32 accumulation: the MXU consumes bf16 natively on
# every generation (v5e included), so bf16 is the right choice everywhere.
MATMUL_DTYPE = jnp.bfloat16

# Batch rows per grid step (multiple of 8; blocks are balanced, see
# _pick_batch_block).
MAX_BATCH_BLOCK = 512

_KW_ORDER = ("wqkv", "bqkv", "wo", "bo", "w1", "b1", "w2", "b2",
             "ln1w", "ln1b", "ln2w", "ln2b",
             "repmat", "scoresel", "pbcast", "denbcast", "sumsel", "avgmat")


# ----------------------------------------------------------------------------
# Kernel
# ----------------------------------------------------------------------------
def encoder_kernel(x_ref,
                   wqkv_ref, bqkv_ref, wo_ref, bo_ref,
                   w1_ref, b1_ref, w2_ref, b2_ref,
                   ln1w_ref, ln1b_ref, ln2w_ref, ln2b_ref,
                   repmat_ref, scoresel_ref, pbcast_ref,
                   denbcast_ref, sumsel_ref, avgmat_ref,
                   o_ref):
    """2-layer post-LN TransformerEncoder for one block of batch rows.

    x_ref / o_ref: (B_blk, N*D); node n's features live on lanes
    [n*D, (n+1)*D) -- identical to torch's row-major .view(B, N, D).
    Packed 800-lane axis: p = n*ND + m*D + h*hd + j.
    Packed score axis:    s = n*(N*H) + h*N + m.
    """
    ND = x_ref.shape[-1]                  # N * D
    N = NUM_NODES

    repmat = repmat_ref[...]              # (ND, N*ND)   query block-repeat
    scoresel = scoresel_ref[...]          # (N*ND, N*N*H) segmented head-dot (1/sqrt(hd) baked in)
    pbcast = pbcast_ref[...]              # (N*N*H, N*ND) prob -> per-key-lane broadcast
    denbcast = denbcast_ref[...]          # (N*N*H, ND)   softmax-denominator broadcast
    sumsel = sumsel_ref[...]              # (N*ND, ND)    sum over key nodes
    avgmat = avgmat_ref[...]              # (ND, ND)      per-node block average (1/D)

    def mm(a, w):
        # bf16 operands, f32 accumulation on the MXU (weights pre-cast on host).
        return jnp.dot(a.astype(w.dtype), w, preferred_element_type=jnp.float32)

    def layernorm(x, w, b):
        mean_b = mm(x, avgmat)                         # per-node mean, broadcast over its lanes
        c = x - mean_b
        var_b = mm(c * c, avgmat)                      # per-node E[(x-mean)^2], broadcast
        return c * jax.lax.rsqrt(var_b + LN_EPS) * w + b

    h = x_ref[...].astype(jnp.float32)                 # (B, ND)

    for l in range(NLAYERS):
        # ---- fused Q/K/V projection for all nodes: (B, ND) @ (ND, 3*ND) -----
        qkv = mm(h, wqkv_ref[l]) + bqkv_ref[l]         # (B, 3*ND)
        q = qkv[:, :ND]
        k = qkv[:, ND:2 * ND]
        v = qkv[:, 2 * ND:]

        # ---- lane-packed attention scores for all (n, h, m) at once ---------
        # qt[:, n*ND + m*D + d] = q[:, n*D + d];  kt[:, n*ND + c] = k[:, c]
        qt = mm(q, repmat)                             # (B, N*ND)
        kt = jnp.concatenate([k] * N, axis=1)          # (B, N*ND)
        scores = mm(qt * kt, scoresel)                 # (B, N*N*H), pre-scaled

        # One softmax for all 50 scores.  The max is global per row; softmax
        # is shift-invariant within each (n, h) group so this is exact, and
        # scores here are O(1) (no exp underflow risk).
        mx = jnp.max(scores, axis=-1, keepdims=True)
        e = jnp.exp(scores - mx)                       # (B, N*N*H)

        # ---- weighted sum over keys, all nodes/heads at once -----------------
        e_b = mm(e, pbcast)                            # (B, N*ND) prob per key lane
        vt = jnp.concatenate([v] * N, axis=1)          # (B, N*ND)
        attn_un = mm(e_b * vt, sumsel)                 # (B, ND)   un-normalized
        denom_b = mm(e, denbcast)                      # (B, ND)   per-(node, head) sums
        attn = attn_un / denom_b                       # exact normalization

        # ---- fused out-projection + LN1, fused FFN (ReLU) + LN2 --------------
        sa = mm(attn, wo_ref[l]) + bo_ref[l]           # (B, ND)
        h1 = layernorm(h + sa, ln1w_ref[l], ln1b_ref[l])
        hid = jnp.maximum(mm(h1, w1_ref[l]) + b1_ref[l], 0.0)   # (B, N*DIM_FF)
        ff = mm(hid, w2_ref[l]) + b2_ref[l]            # (B, ND)
        h = layernorm(h1 + ff, ln2w_ref[l], ln2b_ref[l])

    # Single lane-dense (B_blk, ND) store.
    o_ref[...] = h.astype(o_ref.dtype)


# ----------------------------------------------------------------------------
# Host-side parameter / selector preparation
# ----------------------------------------------------------------------------
def _build_selectors(num_nodes, d, nheads):
    """Constant 0/1 (and 1/sqrt(hd), 1/D) matrices; all exactly bf16-representable."""
    N, D, H = num_nodes, d, nheads
    hd = D // H
    ND = N * D
    P = N * ND              # packed lanes: p = n*ND + m*D + h*hd + j
    S = N * N * H           # scores:       s = n*(N*H) + h*N + m
    scale = 1.0 / math.sqrt(hd)

    repmat = np.zeros((ND, P), np.float32)
    sumsel = np.zeros((P, ND), np.float32)
    avgmat = np.zeros((ND, ND), np.float32)
    scoresel = np.zeros((P, S), np.float32)
    pbcast = np.zeros((S, P), np.float32)
    denbcast = np.zeros((S, ND), np.float32)

    eye = np.eye(D, dtype=np.float32)
    for n in range(N):
        avgmat[n * D:(n + 1) * D, n * D:(n + 1) * D] = 1.0 / D
        for m in range(N):
            repmat[n * D:(n + 1) * D, n * ND + m * D:n * ND + (m + 1) * D] = eye
            sumsel[n * ND + m * D:n * ND + (m + 1) * D, n * D:(n + 1) * D] = eye
            for hh in range(H):
                s = n * (N * H) + hh * N + m
                p0 = n * ND + m * D + hh * hd
                scoresel[p0:p0 + hd, s] = scale
                pbcast[s, p0:p0 + hd] = 1.0
                denbcast[s, n * D + hh * hd:n * D + (hh + 1) * hd] = 1.0

    return dict(repmat=repmat, scoresel=scoresel, pbcast=pbcast,
                denbcast=denbcast, sumsel=sumsel, avgmat=avgmat)


def init_params(key, input_dim, num_nodes=NUM_NODES):
    """Deterministic synthetic parameters (logical, torch-equivalent layouts).

    wqkv  = in_proj_weight.T (columns [q | k | v]);  wo = out_proj.weight.T
    w1/w2 = linear1.weight.T / linear2.weight.T;     w_out = output_layer.weight.T
    """
    D = input_dim // num_nodes
    assert D % NHEADS == 0
    shapes = {
        "wqkv": (NLAYERS, D, 3 * D), "bqkv": (NLAYERS, 1, 3 * D),
        "wo": (NLAYERS, D, D), "bo": (NLAYERS, 1, D),
        "w1": (NLAYERS, D, DIM_FF), "b1": (NLAYERS, 1, DIM_FF),
        "w2": (NLAYERS, DIM_FF, D), "b2": (NLAYERS, 1, D),
        "w_out": (num_nodes * D, OUT_DIM), "b_out": (1, OUT_DIM),
    }
    params = {}
    names = sorted(shapes)
    keys = jax.random.split(key, len(names))
    for k_, name in zip(keys, names):
        params[name] = 0.05 * jax.random.normal(k_, shapes[name], jnp.float32)
    # LayerNorm params: PyTorch default init (ones / zeros).
    params["ln1w"] = jnp.ones((NLAYERS, 1, D), jnp.float32)
    params["ln1b"] = jnp.zeros((NLAYERS, 1, D), jnp.float32)
    params["ln2w"] = jnp.ones((NLAYERS, 1, D), jnp.float32)
    params["ln2b"] = jnp.zeros((NLAYERS, 1, D), jnp.float32)
    return params


def prepare_kernel_weights(params, num_nodes=NUM_NODES):
    """Host-side (once): block-diagonal / lane-tiled bf16 weights + selectors."""
    N = num_nodes
    D = params["ln1w"].shape[-1]

    def bd(w):                      # (r, c) -> block-diagonal (N*r, N*c)
        return block_diag(*([w] * N))

    def tile(b):                    # (1, c) -> (1, N*c)
        return jnp.tile(b, (1, N))

    per_layer = {k: [] for k in ("wqkv", "bqkv", "wo", "bo", "w1", "b1",
                                 "w2", "b2", "ln1w", "ln1b", "ln2w", "ln2b")}
    for l in range(NLAYERS):
        wq, wk, wv = (params["wqkv"][l][:, i * D:(i + 1) * D] for i in range(3))
        bq, bk, bv = (params["bqkv"][l][:, i * D:(i + 1) * D] for i in range(3))
        per_layer["wqkv"].append(jnp.concatenate([bd(wq), bd(wk), bd(wv)], axis=1))
        per_layer["bqkv"].append(jnp.concatenate([tile(bq), tile(bk), tile(bv)], axis=1))
        per_layer["wo"].append(bd(params["wo"][l]))
        per_layer["bo"].append(tile(params["bo"][l]))
        per_layer["w1"].append(bd(params["w1"][l]))
        per_layer["b1"].append(tile(params["b1"][l]))
        per_layer["w2"].append(bd(params["w2"][l]))
        per_layer["b2"].append(tile(params["b2"][l]))
        for k in ("ln1w", "ln1b", "ln2w", "ln2b"):
            per_layer[k].append(tile(params[k][l]))

    kw = {}
    for k, v in per_layer.items():
        stacked = jnp.stack(v)
        if k in ("wqkv", "wo", "w1", "w2"):
            stacked = stacked.astype(MATMUL_DTYPE)      # pre-cast matmul weights once
        kw[k] = stacked
    for k, v in _build_selectors(N, D, NHEADS).items():
        kw[k] = jnp.asarray(v, dtype=MATMUL_DTYPE)       # 0 / 1 / 0.25 / (1/32): exact in bf16
    kw["w_out"] = params["w_out"]
    kw["b_out"] = params["b_out"]
    return kw


# ----------------------------------------------------------------------------
# Wrapper
# ----------------------------------------------------------------------------
def _pick_batch_block(batch, max_block=MAX_BATCH_BLOCK):
    """Balanced batch blocks: multiple of 8, <= max_block, minimal zero padding,
    and >= 2 grid steps whenever the batch allows (keeps both v7x TCs busy)."""
    min_grid = 2 if batch >= 16 else 1
    nblocks = max(-(-batch // max_block), min_grid)
    bb = -(-batch // nblocks)
    bb = max(8, min(-(-bb // 8) * 8, max_block))
    grid = -(-batch // bb)
    return bb, grid


def topology_optimizer_forward(x, kw, num_nodes=NUM_NODES,
                               max_batch_block=MAX_BATCH_BLOCK):
    B, input_dim = x.shape
    assert input_dim % num_nodes == 0, "input_dim must be divisible by num_nodes"
    N = num_nodes
    D = input_dim // N
    ND = N * D

    bb, grid = _pick_batch_block(B, max_batch_block)
    Bp = bb * grid
    xp = (jnp.concatenate([x, jnp.zeros((Bp - B, ND), x.dtype)], axis=0)
          if Bp != B else x)

    weights = [kw[name] for name in _KW_ORDER]
    in_specs = [pl.BlockSpec((bb, ND), lambda b: (b, 0))]
    # Weights / selectors are grid-invariant (constant index maps -> fetched once).
    in_specs += [pl.BlockSpec(w.shape, lambda b, nd=w.ndim: (0,) * nd)
                 for w in weights]

    enc = pl.pallas_call(
        encoder_kernel,
        out_shape=jax.ShapeDtypeStruct((Bp, ND), jnp.float32),
        grid=(grid,),
        in_specs=in_specs,
        out_specs=pl.BlockSpec((bb, ND), lambda b: (b, 0)),
        compiler_params=pltpu.CompilerParams(
            dimension_semantics=("parallel",),
            vmem_limit_bytes=40 * 1024 * 1024),
    )(xp, *weights)

    enc = enc[:B].reshape(B, N, D)
    # torch: transformer_output.permute(1, 0, 2).contiguous().view(B, -1)
    # (deliberately mixes rows across the whole batch -> reproduced exactly
    # outside the batch-blocked kernel)
    out_flat = jnp.transpose(enc, (1, 0, 2)).reshape(B, ND)
    # Tiny (B, 160) @ (160, 16) output Linear: plain XLA (fuses with the
    # transpose; avoids a second pallas_call with a 16-wide masked store).
    logits = jnp.dot(out_flat, kw["w_out"],
                     preferred_element_type=jnp.float32) + kw["b_out"]
    return logits.reshape(-1, N - 1, N - 1)


# ----------------------------------------------------------------------------
# Pure-JAX reference (validation only)
# ----------------------------------------------------------------------------
def _layernorm_ref(x, w, b):
    mu = jnp.mean(x, axis=-1, keepdims=True)
    var = jnp.mean(jnp.square(x - mu), axis=-1, keepdims=True)
    return (x - mu) * jax.lax.rsqrt(var + LN_EPS) * w + b


def reference_forward(x, params, num_nodes=NUM_NODES):
    B, input_dim = x.shape
    N = num_nodes
    D = input_dim // N
    hd = D // NHEADS
    h = x.reshape(B, N, D)
    for l in range(NLAYERS):
        qkv = h @ params["wqkv"][l] + params["bqkv"][l]
        q, k, v = qkv[..., :D], qkv[..., D:2 * D], qkv[..., 2 * D:]
        heads = []
        for hh in range(NHEADS):
            sl = slice(hh * hd, (hh + 1) * hd)
            s = jnp.einsum("bnd,bmd->bnm", q[..., sl], k[..., sl]) / math.sqrt(hd)
            p = jax.nn.softmax(s, axis=-1)
            heads.append(jnp.einsum("bnm,bmd->bnd", p, v[..., sl]))
        sa = jnp.concatenate(heads, axis=-1) @ params["wo"][l] + params["bo"][l]
        h = _layernorm_ref(h + sa, params["ln1w"][l], params["ln1b"][l])
        ff = (jnp.maximum(h @ params["w1"][l] + params["b1"][l], 0.0)
              @ params["w2"][l] + params["b2"][l])
        h = _layernorm_ref(h + ff, params["ln2w"][l], params["ln2b"][l])
    out_flat = jnp.transpose(h, (1, 0, 2)).reshape(B, N * D)
    logits = out_flat @ params["w_out"] + params["b_out"]
    return logits.reshape(-1, N - 1, N - 1)


if __name__ == "__main__":
    # TODO(synk): dropout (p=0.1) is omitted -- eval-mode (identity) semantics.
    key = jax.random.PRNGKey(0)
    kx, kp = jax.random.split(key)

    B = 2
    node_feat_dim = 32                      # divisible by nhead=2
    input_dim = NUM_NODES * node_feat_dim   # 160

    x = jax.random.normal(kx, (B, input_dim), jnp.float32)
    params = init_params(kp, input_dim)
    kernel_weights = prepare_kernel_weights(params)    # host-side, once

    fwd = jax.jit(topology_optimizer_forward)
    out = jax.block_until_ready(fwd(x, kernel_weights))

    assert out.shape == (B, NUM_NODES - 1, NUM_NODES - 1)
    assert out.dtype == jnp.float32

    ref = reference_forward(x, params)
    err = float(jnp.max(jnp.abs(out - ref)))
    assert err < 5e-2, f"kernel vs reference max abs err {err}"

    # Exercise the multi-block grid + zero-padding path once (B=20 -> 2 blocks).
    x2 = jax.random.normal(kx, (20, input_dim), jnp.float32)
    out2 = jax.block_until_ready(fwd(x2, kernel_weights))
    ref2 = reference_forward(x2, params)
    err2 = float(jnp.max(jnp.abs(out2 - ref2)))
    assert err2 < 5e-2, f"multi-block kernel vs reference max abs err {err2}"

    print("KERNEL_OK")
</pallas_src>

<mosaic_0001>
module attributes {stable_mosaic.version = 11 : i64} {
  func.func @encoder_kernel(%arg0: i32, %arg1: memref<8x160xf32, #tpu.memory_space<vmem>>, %arg2: memref<2x160x480xbf16, #tpu.memory_space<vmem>>, %arg3: memref<2x1x480xf32, #tpu.memory_space<vmem>>, %arg4: memref<2x160x160xbf16, #tpu.memory_space<vmem>>, %arg5: memref<2x1x160xf32, #tpu.memory_space<vmem>>, %arg6: memref<2x160x1280xbf16, #tpu.memory_space<vmem>>, %arg7: memref<2x1x1280xf32, #tpu.memory_space<vmem>>, %arg8: memref<2x1280x160xbf16, #tpu.memory_space<vmem>>, %arg9: memref<2x1x160xf32, #tpu.memory_space<vmem>>, %arg10: memref<2x1x160xf32, #tpu.memory_space<vmem>>, %arg11: memref<2x1x160xf32, #tpu.memory_space<vmem>>, %arg12: memref<2x1x160xf32, #tpu.memory_space<vmem>>, %arg13: memref<2x1x160xf32, #tpu.memory_space<vmem>>, %arg14: memref<160x800xbf16, #tpu.memory_space<vmem>>, %arg15: memref<800x50xbf16, #tpu.memory_space<vmem>>, %arg16: memref<50x800xbf16, #tpu.memory_space<vmem>>, %arg17: memref<50x160xbf16, #tpu.memory_space<vmem>>, %arg18: memref<800x160xbf16, #tpu.memory_space<vmem>>, %arg19: memref<160x160xbf16, #tpu.memory_space<vmem>>, %arg20: memref<8x160xf32, #tpu.memory_space<vmem>>) attributes {dimension_semantics = [#tpu.dimension_semantics<parallel>], iteration_bounds = array<i64: 1>, scalar_prefetch = 0 : i64, scratch_operands = 0 : i64, tpu.core_type = #tpu.core_type<tc>, window_params = [{transform_indices = @transform_0, window_bounds = array<i64: 8, 160>}, {pipeline_mode = #tpu.pipeline_mode<synchronous>, transform_indices = @transform_1, window_bounds = array<i64: 2, 160, 480>}, {pipeline_mode = #tpu.pipeline_mode<synchronous>, transform_indices = @transform_2, window_bounds = array<i64: 2, 1, 480>}, {pipeline_mode = #tpu.pipeline_mode<synchronous>, transform_indices = @transform_3, window_bounds = array<i64: 2, 160, 160>}, {pipeline_mode = #tpu.pipeline_mode<synchronous>, transform_indices = @transform_4, window_bounds = array<i64: 2, 1, 160>}, {pipeline_mode = #tpu.pipeline_mode<synchronous>, transform_indices = @transform_5, window_bounds = array<i64: 2, 160, 1280>}, {pipeline_mode = #tpu.pipeline_mode<synchronous>, transform_indices = @transform_6, window_bounds = array<i64: 2, 1, 1280>}, {pipeline_mode = #tpu.pipeline_mode<synchronous>, transform_indices = @transform_7, window_bounds = array<i64: 2, 1280, 160>}, {pipeline_mode = #tpu.pipeline_mode<synchronous>, transform_indices = @transform_8, window_bounds = array<i64: 2, 1, 160>}, {pipeline_mode = #tpu.pipeline_mode<synchronous>, transform_indices = @transform_9, window_bounds = array<i64: 2, 1, 160>}, {pipeline_mode = #tpu.pipeline_mode<synchronous>, transform_indices = @transform_10, window_bounds = array<i64: 2, 1, 160>}, {pipeline_mode = #tpu.pipeline_mode<synchronous>, transform_indices = @transform_11, window_bounds = array<i64: 2, 1, 160>}, {pipeline_mode = #tpu.pipeline_mode<synchronous>, transform_indices = @transform_12, window_bounds = array<i64: 2, 1, 160>}, {pipeline_mode = #tpu.pipeline_mode<synchronous>, transform_indices = @transform_13, window_bounds = array<i64: 160, 800>}, {pipeline_mode = #tpu.pipeline_mode<synchronous>, transform_indices = @transform_14, window_bounds = array<i64: 800, 50>}, {pipeline_mode = #tpu.pipeline_mode<synchronous>, transform_indices = @transform_15, window_bounds = array<i64: 50, 800>}, {pipeline_mode = #tpu.pipeline_mode<synchronous>, transform_indices = @transform_16, window_bounds = array<i64: 50, 160>}, {pipeline_mode = #tpu.pipeline_mode<synchronous>, transform_indices = @transform_17, window_bounds = array<i64: 800, 160>}, {pipeline_mode = #tpu.pipeline_mode<synchronous>, transform_indices = @transform_18, window_bounds = array<i64: 160, 160>}, {transform_indices = @transform_19, window_bounds = array<i64: 8, 160>}]} {
    %c0 = arith.constant 0 : index
    %c0_0 = arith.constant 0 : index
    %0 = vector.load %arg14[%c0, %c0_0] : memref<160x800xbf16, #tpu.memory_space<vmem>>, vector<160x800xbf16>
    %c0_1 = arith.constant 0 : index
    %c0_2 = arith.constant 0 : index
    %1 = vector.load %arg15[%c0_1, %c0_2] : memref<800x50xbf16, #tpu.memory_space<vmem>>, vector<800x50xbf16>
    %c0_3 = arith.constant 0 : index
    %c0_4 = arith.constant 0 : index
    %2 = vector.load %arg16[%c0_3, %c0_4] : memref<50x800xbf16, #tpu.memory_space<vmem>>, vector<50x800xbf16>
    %c0_5 = arith.constant 0 : index
    %c0_6 = arith.constant 0 : index
    %3 = vector.load %arg17[%c0_5, %c0_6] : memref<50x160xbf16, #tpu.memory_space<vmem>>, vector<50x160xbf16>
    %c0_7 = arith.constant 0 : index
    %c0_8 = arith.constant 0 : index
    %4 = vector.load %arg18[%c0_7, %c0_8] : memref<800x160xbf16, #tpu.memory_space<vmem>>, vector<800x160xbf16>
    %c0_9 = arith.constant 0 : index
    %c0_10 = arith.constant 0 : index
    %5 = vector.load %arg19[%c0_9, %c0_10] : memref<160x160xbf16, #tpu.memory_space<vmem>>, vector<160x160xbf16>
    %c0_11 = arith.constant 0 : index
    %c0_12 = arith.constant 0 : index
    %6 = vector.load %arg1[%c0_11, %c0_12] : memref<8x160xf32, #tpu.memory_space<vmem>>, vector<8x160xf32>
    %c0_13 = arith.constant 0 : index
    %c0_14 = arith.constant 0 : index
    %c0_15 = arith.constant 0 : index
    %7 = vector.load %arg2[%c0_13, %c0_14, %c0_15] : memref<2x160x480xbf16, #tpu.memory_space<vmem>>, vector<1x160x480xbf16>
    %8 = vector.shape_cast %7 : vector<1x160x480xbf16> to vector<160x480xbf16>
    %9 = arith.truncf %6 : vector<8x160xf32> to vector<8x160xbf16>
    %cst = arith.constant dense<0.000000e+00> : vector<8x480xf32>
    %10 = tpu.matmul %9, %8, %cst {dimension_numbers = #tpu.dot_dimension_numbers<[1], [0], [0], [1], [0, 0, 1, 1], [], []>} : vector<8x160xbf16>, vector<160x480xbf16>, vector<8x480xf32> -> vector<8x480xf32>
    %c0_16 = arith.constant 0 : index
    %c0_17 = arith.constant 0 : index
    %c0_18 = arith.constant 0 : index
    %11 = vector.load %arg3[%c0_16, %c0_17, %c0_18] : memref<2x1x480xf32, #tpu.memory_space<vmem>>, vector<1x1x480xf32>
    %12 = vector.shape_cast %11 : vector<1x1x480xf32> to vector<1x480xf32>
    %13 = vector.broadcast %12 : vector<1x480xf32> to vector<8x480xf32>
    %14 = arith.addf %10, %13 : vector<8x480xf32>
    %15 = vector.extract_strided_slice %14 {offsets = [0, 0], sizes = [8, 160], strides = [1, 1]} : vector<8x480xf32> to vector<8x160xf32>
    %16 = vector.extract_strided_slice %14 {offsets = [0, 160], sizes = [8, 160], strides = [1, 1]} : vector<8x480xf32> to vector<8x160xf32>
    %17 = vector.extract_strided_slice %14 {offsets = [0, 320], sizes = [8, 160], strides = [1, 1]} : vector<8x480xf32> to vector<8x160xf32>
    %18 = arith.truncf %15 : vector<8x160xf32> to vector<8x160xbf16>
    %cst_19 = arith.constant dense<0.000000e+00> : vector<8x800xf32>
    %19 = tpu.matmul %18, %0, %cst_19 {dimension_numbers = #tpu.dot_dimension_numbers<[1], [0], [0], [1], [0, 0, 1, 1], [], []>} : vector<8x160xbf16>, vector<160x800xbf16>, vector<8x800xf32> -> vector<8x800xf32>
    %20 = tpu.concatenate %16, %16, %16, %16, %16 in 1 : vector<8x160xf32>, vector<8x160xf32>, vector<8x160xf32>, vector<8x160xf32>, vector<8x160xf32> -> vector<8x800xf32>
    %21 = arith.mulf %19, %20 : vector<8x800xf32>
    %22 = arith.truncf %21 : vector<8x800xf32> to vector<8x800xbf16>
    %cst_20 = arith.constant dense<0.000000e+00> : vector<8x50xf32>
    %23 = tpu.matmul %22, %1, %cst_20 {dimension_numbers = #tpu.dot_dimension_numbers<[1], [0], [0], [1], [0, 0, 1, 1], [], []>} : vector<8x800xbf16>, vector<800x50xbf16>, vector<8x50xf32> -> vector<8x50xf32>
    %cst_21 = arith.constant dense<0xFF800000> : vector<8xf32>
    %24 = vector.multi_reduction <maximumf>, %23, %cst_21 [1] : vector<8x50xf32> to vector<8xf32>
    %25 = vector.shape_cast %24 : vector<8xf32> to vector<8x1xf32>
    %26 = vector.broadcast %25 : vector<8x1xf32> to vector<8x50xf32>
    %27 = arith.subf %23, %26 : vector<8x50xf32>
    %28 = math.exp %27 : vector<8x50xf32>
    %29 = arith.truncf %28 : vector<8x50xf32> to vector<8x50xbf16>
    %cst_22 = arith.constant dense<0.000000e+00> : vector<8x800xf32>
    %30 = tpu.matmul %29, %2, %cst_22 {dimension_numbers = #tpu.dot_dimension_numbers<[1], [0], [0], [1], [0, 0, 1, 1], [], []>} : vector<8x50xbf16>, vector<50x800xbf16>, vector<8x800xf32> -> vector<8x800xf32>
    %31 = tpu.concatenate %17, %17, %17, %17, %17 in 1 : vector<8x160xf32>, vector<8x160xf32>, vector<8x160xf32>, vector<8x160xf32>, vector<8x160xf32> -> vector<8x800xf32>
    %32 = arith.mulf %30, %31 : vector<8x800xf32>
    %33 = arith.truncf %32 : vector<8x800xf32> to vector<8x800xbf16>
    %cst_23 = arith.constant dense<0.000000e+00> : vector<8x160xf32>
    %34 = tpu.matmul %33, %4, %cst_23 {dimension_numbers = #tpu.dot_dimension_numbers<[1], [0], [0], [1], [0, 0, 1, 1], [], []>} : vector<8x800xbf16>, vector<800x160xbf16>, vector<8x160xf32> -> vector<8x160xf32>
    %35 = arith.truncf %28 : vector<8x50xf32> to vector<8x50xbf16>
    %cst_24 = arith.constant dense<0.000000e+00> : vector<8x160xf32>
    %36 = tpu.matmul %35, %3, %cst_24 {dimension_numbers = #tpu.dot_dimension_numbers<[1], [0], [0], [1], [0, 0, 1, 1], [], []>} : vector<8x50xbf16>, vector<50x160xbf16>, vector<8x160xf32> -> vector<8x160xf32>
    %37 = arith.divf %34, %36 : vector<8x160xf32>
    %c0_25 = arith.constant 0 : index
    %c0_26 = arith.constant 0 : index
    %c0_27 = arith.constant 0 : index
    %38 = vector.load %arg4[%c0_25, %c0_26, %c0_27] : memref<2x160x160xbf16, #tpu.memory_space<vmem>>, vector<1x160x160xbf16>
    %39 = vector.shape_cast %38 : vector<1x160x160xbf16> to vector<160x160xbf16>
    %40 = arith.truncf %37 : vector<8x160xf32> to vector<8x160xbf16>
    %cst_28 = arith.constant dense<0.000000e+00> : vector<8x160xf32>
    %41 = tpu.matmul %40, %39, %cst_28 {dimension_numbers = #tpu.dot_dimension_numbers<[1], [0], [0], [1], [0, 0, 1, 1], [], []>} : vector<8x160xbf16>, vector<160x160xbf16>, vector<8x160xf32> -> vector<8x160xf32>
    %c0_29 = arith.constant 0 : index
    %c0_30 = arith.constant 0 : index
    %c0_31 = arith.constant 0 : index
    %42 = vector.load %arg5[%c0_29, %c0_30, %c0_31] : memref<2x1x160xf32, #tpu.memory_space<vmem>>, vector<1x1x160xf32>
    %43 = vector.shape_cast %42 : vector<1x1x160xf32> to vector<1x160xf32>
    %44 = vector.broadcast %43 : vector<1x160xf32> to vector<8x160xf32>
    %45 = arith.addf %41, %44 : vector<8x160xf32>
    %46 = arith.addf %6, %45 : vector<8x160xf32>
    %c0_32 = arith.constant 0 : index
    %c0_33 = arith.constant 0 : index
    %c0_34 = arith.constant 0 : index
    %47 = vector.load %arg10[%c0_32, %c0_33, %c0_34] : memref<2x1x160xf32, #tpu.memory_space<vmem>>, vector<1x1x160xf32>
    %48 = vector.shape_cast %47 : vector<1x1x160xf32> to vector<1x160xf32>
    %c0_35 = arith.constant 0 : index
    %c0_36 = arith.constant 0 : index
    %c0_37 = arith.constant 0 : index
    %49 = vector.load %arg11[%c0_35, %c0_36, %c0_37] : memref<2x1x160xf32, #tpu.memory_space<vmem>>, vector<1x1x160xf32>
    %50 = vector.shape_cast %49 : vector<1x1x160xf32> to vector<1x160xf32>
    %51 = arith.truncf %46 : vector<8x160xf32> to vector<8x160xbf16>
    %cst_38 = arith.constant dense<0.000000e+00> : vector<8x160xf32>
    %52 = tpu.matmul %51, %5, %cst_38 {dimension_numbers = #tpu.dot_dimension_numbers<[1], [0], [0], [1], [0, 0, 1, 1], [], []>} : vector<8x160xbf16>, vector<160x160xbf16>, vector<8x160xf32> -> vector<8x160xf32>
    %53 = arith.subf %46, %52 : vector<8x160xf32>
    %54 = arith.mulf %53, %53 : vector<8x160xf32>
    %55 = arith.truncf %54 : vector<8x160xf32> to vector<8x160xbf16>
    %cst_39 = arith.constant dense<0.000000e+00> : vector<8x160xf32>
    %56 = tpu.matmul %55, %5, %cst_39 {dimension_numbers = #tpu.dot_dimension_numbers<[1], [0], [0], [1], [0, 0, 1, 1], [], []>} : vector<8x160xbf16>, vector<160x160xbf16>, vector<8x160xf32> -> vector<8x160xf32>
    %cst_40 = arith.constant 9.99999974E-6 : f32
    %57 = vector.broadcast %cst_40 : f32 to vector<8x160xf32>
    %58 = arith.addf %56, %57 : vector<8x160xf32>
    %59 = math.rsqrt %58 : vector<8x160xf32>
    %60 = arith.mulf %53, %59 : vector<8x160xf32>
    %61 = vector.broadcast %48 : vector<1x160xf32> to vector<8x160xf32>
    %62 = arith.mulf %60, %61 : vector<8x160xf32>
    %63 = vector.broadcast %50 : vector<1x160xf32> to vector<8x160xf32>
    %64 = arith.addf %62, %63 : vector<8x160xf32>
    %c0_41 = arith.constant 0 : index
    %c0_42 = arith.constant 0 : index
    %c0_43 = arith.constant 0 : index
    %65 = vector.load %arg6[%c0_41, %c0_42, %c0_43] : memref<2x160x1280xbf16, #tpu.memory_space<vmem>>, vector<1x160x1280xbf16>
    %66 = vector.shape_cast %65 : vector<1x160x1280xbf16> to vector<160x1280xbf16>
    %67 = arith.truncf %64 : vector<8x160xf32> to vector<8x160xbf16>
    %cst_44 = arith.constant dense<0.000000e+00> : vector<8x1280xf32>
    %68 = tpu.matmul %67, %66, %cst_44 {dimension_numbers = #tpu.dot_dimension_numbers<[1], [0], [0], [1], [0, 0, 1, 1], [], []>} : vector<8x160xbf16>, vector<160x1280xbf16>, vector<8x1280xf32> -> vector<8x1280xf32>
    %c0_45 = arith.constant 0 : index
    %c0_46 = arith.constant 0 : index
    %c0_47 = arith.constant 0 : index
    %69 = vector.load %arg7[%c0_45, %c0_46, %c0_47] : memref<2x1x1280xf32, #tpu.memory_space<vmem>>, vector<1x1x1280xf32>
    %70 = vector.shape_cast %69 : vector<1x1x1280xf32> to vector<1x1280xf32>
    %71 = vector.broadcast %70 : vector<1x1280xf32> to vector<8x1280xf32>
    %72 = arith.addf %68, %71 : vector<8x1280xf32>
    %cst_48 = arith.constant 0.000000e+00 : f32
    %73 = vector.broadcast %cst_48 : f32 to vector<8x1280xf32>
    %74 = arith.maximumf %72, %73 : vector<8x1280xf32>
    %c0_49 = arith.constant 0 : index
    %c0_50 = arith.constant 0 : index
    %c0_51 = arith.constant 0 : index
    %75 = vector.load %arg8[%c0_49, %c0_50, %c0_51] : memref<2x1280x160xbf16, #tpu.memory_space<vmem>>, vector<1x1280x160xbf16>
    %76 = vector.shape_cast %75 : vector<1x1280x160xbf16> to vector<1280x160xbf16>
    %77 = arith.truncf %74 : vector<8x1280xf32> to vector<8x1280xbf16>
    %cst_52 = arith.constant dense<0.000000e+00> : vector<8x160xf32>
    %78 = tpu.matmul %77, %76, %cst_52 {dimension_numbers = #tpu.dot_dimension_numbers<[1], [0], [0], [1], [0, 0, 1, 1], [], []>} : vector<8x1280xbf16>, vector<1280x160xbf16>, vector<8x160xf32> -> vector<8x160xf32>
    %c0_53 = arith.constant 0 : index
    %c0_54 = arith.constant 0 : index
    %c0_55 = arith.constant 0 : index
    %79 = vector.load %arg9[%c0_53, %c0_54, %c0_55] : memref<2x1x160xf32, #tpu.memory_space<vmem>>, vector<1x1x160xf32>
    %80 = vector.shape_cast %79 : vector<1x1x160xf32> to vector<1x160xf32>
    %81 = vector.broadcast %80 : vector<1x160xf32> to vector<8x160xf32>
    %82 = arith.addf %78, %81 : vector<8x160xf32>
    %83 = arith.addf %64, %82 : vector<8x160xf32>
    %c0_56 = arith.constant 0 : index
    %c0_57 = arith.constant 0 : index
    %c0_58 = arith.constant 0 : index
    %84 = vector.load %arg12[%c0_56, %c0_57, %c0_58] : memref<2x1x160xf32, #tpu.memory_space<vmem>>, vector<1x1x160xf32>
    %85 = vector.shape_cast %84 : vector<1x1x160xf32> to vector<1x160xf32>
    %c0_59 = arith.constant 0 : index
    %c0_60 = arith.constant 0 : index
    %c0_61 = arith.constant 0 : index
    %86 = vector.load %arg13[%c0_59, %c0_60, %c0_61] : memref<2x1x160xf32, #tpu.memory_space<vmem>>, vector<1x1x160xf32>
    %87 = vector.shape_cast %86 : vector<1x1x160xf32> to vector<1x160xf32>
    %88 = arith.truncf %83 : vector<8x160xf32> to vector<8x160xbf16>
    %cst_62 = arith.constant dense<0.000000e+00> : vector<8x160xf32>
    %89 = tpu.matmul %88, %5, %cst_62 {dimension_numbers = #tpu.dot_dimension_numbers<[1], [0], [0], [1], [0, 0, 1, 1], [], []>} : vector<8x160xbf16>, vector<160x160xbf16>, vector<8x160xf32> -> vector<8x160xf32>
    %90 = arith.subf %83, %89 : vector<8x160xf32>
    %91 = arith.mulf %90, %90 : vector<8x160xf32>
    %92 = arith.truncf %91 : vector<8x160xf32> to vector<8x160xbf16>
    %cst_63 = arith.constant dense<0.000000e+00> : vector<8x160xf32>
    %93 = tpu.matmul %92, %5, %cst_63 {dimension_numbers = #tpu.dot_dimension_numbers<[1], [0], [0], [1], [0, 0, 1, 1], [], []>} : vector<8x160xbf16>, vector<160x160xbf16>, vector<8x160xf32> -> vector<8x160xf32>
    %cst_64 = arith.constant 9.99999974E-6 : f32
    %94 = vector.broadcast %cst_64 : f32 to vector<8x160xf32>
    %95 = arith.addf %93, %94 : vector<8x160xf32>
    %96 = math.rsqrt %95 : vector<8x160xf32>
    %97 = arith.mulf %90, %96 : vector<8x160xf32>
    %98 = vector.broadcast %85 : vector<1x160xf32> to vector<8x160xf32>
    %99 = arith.mulf %97, %98 : vector<8x160xf32>
    %100 = vector.broadcast %87 : vector<1x160xf32> to vector<8x160xf32>
    %101 = arith.addf %99, %100 : vector<8x160xf32>
    %c1 = arith.constant 1 : index
    %c0_65 = arith.constant 0 : index
    %c0_66 = arith.constant 0 : index
    %102 = vector.load %arg2[%c1, %c0_65, %c0_66] : memref<2x160x480xbf16, #tpu.memory_space<vmem>>, vector<1x160x480xbf16>
    %103 = vector.shape_cast %102 : vector<1x160x480xbf16> to vector<160x480xbf16>
    %104 = arith.truncf %101 : vector<8x160xf32> to vector<8x160xbf16>
    %cst_67 = arith.constant dense<0.000000e+00> : vector<8x480xf32>
    %105 = tpu.matmul %104, %103, %cst_67 {dimension_numbers = #tpu.dot_dimension_numbers<[1], [0], [0], [1], [0, 0, 1, 1], [], []>} : vector<8x160xbf16>, vector<160x480xbf16>, vector<8x480xf32> -> vector<8x480xf32>
    %c1_68 = arith.constant 1 : index
    %c0_69 = arith.constant 0 : index
    %c0_70 = arith.constant 0 : index
    %106 = vector.load %arg3[%c1_68, %c0_69, %c0_70] : memref<2x1x480xf32, #tpu.memory_space<vmem>>, vector<1x1x480xf32>
    %107 = vector.shape_cast %106 : vector<1x1x480xf32> to vector<1x480xf32>
    %108 = vector.broadcast %107 : vector<1x480xf32> to vector<8x480xf32>
    %109 = arith.addf %105, %108 : vector<8x480xf32>
    %110 = vector.extract_strided_slice %109 {offsets = [0, 0], sizes = [8, 160], strides = [1, 1]} : vector<8x480xf32> to vector<8x160xf32>
    %111 = vector.extract_strided_slice %109 {offsets = [0, 160], sizes = [8, 160], strides = [1, 1]} : vector<8x480xf32> to vector<8x160xf32>
    %112 = vector.extract_strided_slice %109 {offsets = [0, 320], sizes = [8, 160], strides = [1, 1]} : vector<8x480xf32> to vector<8x160xf32>
    %113 = arith.truncf %110 : vector<8x160xf32> to vector<8x160xbf16>
    %cst_71 = arith.constant dense<0.000000e+00> : vector<8x800xf32>
    %114 = tpu.matmul %113, %0, %cst_71 {dimension_numbers = #tpu.dot_dimension_numbers<[1], [0], [0], [1], [0, 0, 1, 1], [], []>} : vector<8x160xbf16>, vector<160x800xbf16>, vector<8x800xf32> -> vector<8x800xf32>
    %115 = tpu.concatenate %111, %111, %111, %111, %111 in 1 : vector<8x160xf32>, vector<8x160xf32>, vector<8x160xf32>, vector<8x160xf32>, vector<8x160xf32> -> vector<8x800xf32>
    %116 = arith.mulf %114, %115 : vector<8x800xf32>
    %117 = arith.truncf %116 : vector<8x800xf32> to vector<8x800xbf16>
    %cst_72 = arith.constant dense<0.000000e+00> : vector<8x50xf32>
    %118 = tpu.matmul %117, %1, %cst_72 {dimension_numbers = #tpu.dot_dimension_numbers<[1], [0], [0], [1], [0, 0, 1, 1], [], []>} : vector<8x800xbf16>, vector<800x50xbf16>, vector<8x50xf32> -> vector<8x50xf32>
    %cst_73 = arith.constant dense<0xFF800000> : vector<8xf32>
    %119 = vector.multi_reduction <maximumf>, %118, %cst_73 [1] : vector<8x50xf32> to vector<8xf32>
    %120 = vector.shape_cast %119 : vector<8xf32> to vector<8x1xf32>
    %121 = vector.broadcast %120 : vector<8x1xf32> to vector<8x50xf32>
    %122 = arith.subf %118, %121 : vector<8x50xf32>
    %123 = math.exp %122 : vector<8x50xf32>
    %124 = arith.truncf %123 : vector<8x50xf32> to vector<8x50xbf16>
    %cst_74 = arith.constant dense<0.000000e+00> : vector<8x800xf32>
    %125 = tpu.matmul %124, %2, %cst_74 {dimension_numbers = #tpu.dot_dimension_numbers<[1], [0], [0], [1], [0, 0, 1, 1], [], []>} : vector<8x50xbf16>, vector<50x800xbf16>, vector<8x800xf32> -> vector<8x800xf32>
    %126 = tpu.concatenate %112, %112, %112, %112, %112 in 1 : vector<8x160xf32>, vector<8x160xf32>, vector<8x160xf32>, vector<8x160xf32>, vector<8x160xf32> -> vector<8x800xf32>
    %127 = arith.mulf %125, %126 : vector<8x800xf32>
    %128 = arith.truncf %127 : vector<8x800xf32> to vector<8x800xbf16>
    %cst_75 = arith.constant dense<0.000000e+00> : vector<8x160xf32>
    %129 = tpu.matmul %128, %4, %cst_75 {dimension_numbers = #tpu.dot_dimension_numbers<[1], [0], [0], [1], [0, 0, 1, 1], [], []>} : vector<8x800xbf16>, vector<800x160xbf16>, vector<8x160xf32> -> vector<8x160xf32>
    %130 = arith.truncf %123 : vector<8x50xf32> to vector<8x50xbf16>
    %cst_76 = arith.constant dense<0.000000e+00> : vector<8x160xf32>
    %131 = tpu.matmul %130, %3, %cst_76 {dimension_numbers = #tpu.dot_dimension_numbers<[1], [0], [0], [1], [0, 0, 1, 1], [], []>} : vector<8x50xbf16>, vector<50x160xbf16>, vector<8x160xf32> -> vector<8x160xf32>
    %132 = arith.divf %129, %131 : vector<8x160xf32>
    %c1_77 = arith.constant 1 : index
    %c0_78 = arith.constant 0 : index
    %c0_79 = arith.constant 0 : index
    %133 = vector.load %arg4[%c1_77, %c0_78, %c0_79] : memref<2x160x160xbf16, #tpu.memory_space<vmem>>, vector<1x160x160xbf16>
    %134 = vector.shape_cast %133 : vector<1x160x160xbf16> to vector<160x160xbf16>
    %135 = arith.truncf %132 : vector<8x160xf32> to vector<8x160xbf16>
    %cst_80 = arith.constant dense<0.000000e+00> : vector<8x160xf32>
    %136 = tpu.matmul %135, %134, %cst_80 {dimension_numbers = #tpu.dot_dimension_numbers<[1], [0], [0], [1], [0, 0, 1, 1], [], []>} : vector<8x160xbf16>, vector<160x160xbf16>, vector<8x160xf32> -> vector<8x160xf32>
    %c1_81 = arith.constant 1 : index
    %c0_82 = arith.constant 0 : index
    %c0_83 = arith.constant 0 : index
    %137 = vector.load %arg5[%c1_81, %c0_82, %c0_83] : memref<2x1x160xf32, #tpu.memory_space<vmem>>, vector<1x1x160xf32>
    %138 = vector.shape_cast %137 : vector<1x1x160xf32> to vector<1x160xf32>
    %139 = vector.broadcast %138 : vector<1x160xf32> to vector<8x160xf32>
    %140 = arith.addf %136, %139 : vector<8x160xf32>
    %141 = arith.addf %101, %140 : vector<8x160xf32>
    %c1_84 = arith.constant 1 : index
    %c0_85 = arith.constant 0 : index
    %c0_86 = arith.constant 0 : index
    %142 = vector.load %arg10[%c1_84, %c0_85, %c0_86] : memref<2x1x160xf32, #tpu.memory_space<vmem>>, vector<1x1x160xf32>
    %143 = vector.shape_cast %142 : vector<1x1x160xf32> to vector<1x160xf32>
    %c1_87 = arith.constant 1 : index
    %c0_88 = arith.constant 0 : index
    %c0_89 = arith.constant 0 : index
    %144 = vector.load %arg11[%c1_87, %c0_88, %c0_89] : memref<2x1x160xf32, #tpu.memory_space<vmem>>, vector<1x1x160xf32>
    %145 = vector.shape_cast %144 : vector<1x1x160xf32> to vector<1x160xf32>
    %146 = arith.truncf %141 : vector<8x160xf32> to vector<8x160xbf16>
    %cst_90 = arith.constant dense<0.000000e+00> : vector<8x160xf32>
    %147 = tpu.matmul %146, %5, %cst_90 {dimension_numbers = #tpu.dot_dimension_numbers<[1], [0], [0], [1], [0, 0, 1, 1], [], []>} : vector<8x160xbf16>, vector<160x160xbf16>, vector<8x160xf32> -> vector<8x160xf32>
    %148 = arith.subf %141, %147 : vector<8x160xf32>
    %149 = arith.mulf %148, %148 : vector<8x160xf32>
    %150 = arith.truncf %149 : vector<8x160xf32> to vector<8x160xbf16>
    %cst_91 = arith.constant dense<0.000000e+00> : vector<8x160xf32>
    %151 = tpu.matmul %150, %5, %cst_91 {dimension_numbers = #tpu.dot_dimension_numbers<[1], [0], [0], [1], [0, 0, 1, 1], [], []>} : vector<8x160xbf16>, vector<160x160xbf16>, vector<8x160xf32> -> vector<8x160xf32>
    %cst_92 = arith.constant 9.99999974E-6 : f32
    %152 = vector.broadcast %cst_92 : f32 to vector<8x160xf32>
    %153 = arith.addf %151, %152 : vector<8x160xf32>
    %154 = math.rsqrt %153 : vector<8x160xf32>
    %155 = arith.mulf %148, %154 : vector<8x160xf32>
    %156 = vector.broadcast %143 : vector<1x160xf32> to vector<8x160xf32>
    %157 = arith.mulf %155, %156 : vector<8x160xf32>
    %158 = vector.broadcast %145 : vector<1x160xf32> to vector<8x160xf32>
    %159 = arith.addf %157, %158 : vector<8x160xf32>
    %c1_93 = arith.constant 1 : index
    %c0_94 = arith.constant 0 : index
    %c0_95 = arith.constant 0 : index
    %160 = vector.load %arg6[%c1_93, %c0_94, %c0_95] : memref<2x160x1280xbf16, #tpu.memory_space<vmem>>, vector<1x160x1280xbf16>
    %161 = vector.shape_cast %160 : vector<1x160x1280xbf16> to vector<160x1280xbf16>
    %162 = arith.truncf %159 : vector<8x160xf32> to vector<8x160xbf16>
    %cst_96 = arith.constant dense<0.000000e+00> : vector<8x1280xf32>
    %163 = tpu.matmul %162, %161, %cst_96 {dimension_numbers = #tpu.dot_dimension_numbers<[1], [0], [0], [1], [0, 0, 1, 1], [], []>} : vector<8x160xbf16>, vector<160x1280xbf16>, vector<8x1280xf32> -> vector<8x1280xf32>
    %c1_97 = arith.constant 1 : index
    %c0_98 = arith.constant 0 : index
    %c0_99 = arith.constant 0 : index
    %164 = vector.load %arg7[%c1_97, %c0_98, %c0_99] : memref<2x1x1280xf32, #tpu.memory_space<vmem>>, vector<1x1x1280xf32>
    %165 = vector.shape_cast %164 : vector<1x1x1280xf32> to vector<1x1280xf32>
    %166 = vector.broadcast %165 : vector<1x1280xf32> to vector<8x1280xf32>
    %167 = arith.addf %163, %166 : vector<8x1280xf32>
    %cst_100 = arith.constant 0.000000e+00 : f32
    %168 = vector.broadcast %cst_100 : f32 to vector<8x1280xf32>
    %169 = arith.maximumf %167, %168 : vector<8x1280xf32>
    %c1_101 = arith.constant 1 : index
    %c0_102 = arith.constant 0 : index
    %c0_103 = arith.constant 0 : index
    %170 = vector.load %arg8[%c1_101, %c0_102, %c0_103] : memref<2x1280x160xbf16, #tpu.memory_space<vmem>>, vector<1x1280x160xbf16>
    %171 = vector.shape_cast %170 : vector<1x1280x160xbf16> to vector<1280x160xbf16>
    %172 = arith.truncf %169 : vector<8x1280xf32> to vector<8x1280xbf16>
    %cst_104 = arith.constant dense<0.000000e+00> : vector<8x160xf32>
    %173 = tpu.matmul %172, %171, %cst_104 {dimension_numbers = #tpu.dot_dimension_numbers<[1], [0], [0], [1], [0, 0, 1, 1], [], []>} : vector<8x1280xbf16>, vector<1280x160xbf16>, vector<8x160xf32> -> vector<8x160xf32>
    %c1_105 = arith.constant 1 : index
    %c0_106 = arith.constant 0 : index
    %c0_107 = arith.constant 0 : index
    %174 = vector.load %arg9[%c1_105, %c0_106, %c0_107] : memref<2x1x160xf32, #tpu.memory_space<vmem>>, vector<1x1x160xf32>
    %175 = vector.shape_cast %174 : vector<1x1x160xf32> to vector<1x160xf32>
    %176 = vector.broadcast %175 : vector<1x160xf32> to vector<8x160xf32>
    %177 = arith.addf %173, %176 : vector<8x160xf32>
    %178 = arith.addf %159, %177 : vector<8x160xf32>
    %c1_108 = arith.constant 1 : index
    %c0_109 = arith.constant 0 : index
    %c0_110 = arith.constant 0 : index
    %179 = vector.load %arg12[%c1_108, %c0_109, %c0_110] : memref<2x1x160xf32, #tpu.memory_space<vmem>>, vector<1x1x160xf32>
    %180 = vector.shape_cast %179 : vector<1x1x160xf32> to vector<1x160xf32>
    %c1_111 = arith.constant 1 : index
    %c0_112 = arith.constant 0 : index
    %c0_113 = arith.constant 0 : index
    %181 = vector.load %arg13[%c1_111, %c0_112, %c0_113] : memref<2x1x160xf32, #tpu.memory_space<vmem>>, vector<1x1x160xf32>
    %182 = vector.shape_cast %181 : vector<1x1x160xf32> to vector<1x160xf32>
    %183 = arith.truncf %178 : vector<8x160xf32> to vector<8x160xbf16>
    %cst_114 = arith.constant dense<0.000000e+00> : vector<8x160xf32>
    %184 = tpu.matmul %183, %5, %cst_114 {dimension_numbers = #tpu.dot_dimension_numbers<[1], [0], [0], [1], [0, 0, 1, 1], [], []>} : vector<8x160xbf16>, vector<160x160xbf16>, vector<8x160xf32> -> vector<8x160xf32>
    %185 = arith.subf %178, %184 : vector<8x160xf32>
    %186 = arith.mulf %185, %185 : vector<8x160xf32>
    %187 = arith.truncf %186 : vector<8x160xf32> to vector<8x160xbf16>
    %cst_115 = arith.constant dense<0.000000e+00> : vector<8x160xf32>
    %188 = tpu.matmul %187, %5, %cst_115 {dimension_numbers = #tpu.dot_dimension_numbers<[1], [0], [0], [1], [0, 0, 1, 1], [], []>} : vector<8x160xbf16>, vector<160x160xbf16>, vector<8x160xf32> -> vector<8x160xf32>
    %cst_116 = arith.constant 9.99999974E-6 : f32
    %189 = vector.broadcast %cst_116 : f32 to vector<8x160xf32>
    %190 = arith.addf %188, %189 : vector<8x160xf32>
    %191 = math.rsqrt %190 : vector<8x160xf32>
    %192 = arith.mulf %185, %191 : vector<8x160xf32>
    %193 = vector.broadcast %180 : vector<1x160xf32> to vector<8x160xf32>
    %194 = arith.mulf %192, %193 : vector<8x160xf32>
    %195 = vector.broadcast %182 : vector<1x160xf32> to vector<8x160xf32>
    %196 = arith.addf %194, %195 : vector<8x160xf32>
    %c0_117 = arith.constant 0 : index
    %c0_118 = arith.constant 0 : index
    %197 = vector.load %arg20[%c0_117, %c0_118] : memref<8x160xf32, #tpu.memory_space<vmem>>, vector<8x160xf32>
    tpu.vector_store %arg20[%c0_117, %c0_118], %196 {strides = array<i32>} : memref<8x160xf32, #tpu.memory_space<vmem>>, vector<8x160xf32>,
    return
  }
  func.func @transform_0(%arg0: i32) -> (i32, i32) {
    %c0_i32 = arith.constant 0 : i32
    %c0_i32_0 = arith.constant 0 : i32
    return %arg0, %c0_i32 : i32, i32
  }
  func.func @transform_1(%arg0: i32) -> (i32, i32, i32) {
    %c0_i32 = arith.constant 0 : i32
    %c0_i32_0 = arith.constant 0 : i32
    %c0_i32_1 = arith.constant 0 : i32
    %c0_i32_2 = arith.constant 0 : i32
    return %c0_i32, %c0_i32_0, %c0_i32_1 : i32, i32, i32
  }
  func.func @transform_2(%arg0: i32) -> (i32, i32, i32) {
    %c0_i32 = arith.constant 0 : i32
    %c0_i32_0 = arith.constant 0 : i32
    %c0_i32_1 = arith.constant 0 : i32
    %c0_i32_2 = arith.constant 0 : i32
    return %c0_i32, %c0_i32_0, %c0_i32_1 : i32, i32, i32
  }
  func.func @transform_3(%arg0: i32) -> (i32, i32, i32) {
    %c0_i32 = arith.constant 0 : i32
    %c0_i32_0 = arith.constant 0 : i32
    %c0_i32_1 = arith.constant 0 : i32
    %c0_i32_2 = arith.constant 0 : i32
    return %c0_i32, %c0_i32_0, %c0_i32_1 : i32, i32, i32
  }
  func.func @transform_4(%arg0: i32) -> (i32, i32, i32) {
    %c0_i32 = arith.constant 0 : i32
    %c0_i32_0 = arith.constant 0 : i32
    %c0_i32_1 = arith.constant 0 : i32
    %c0_i32_2 = arith.constant 0 : i32
    return %c0_i32, %c0_i32_0, %c0_i32_1 : i32, i32, i32
  }
  func.func @transform_5(%arg0: i32) -> (i32, i32, i32) {
    %c0_i32 = arith.constant 0 : i32
    %c0_i32_0 = arith.constant 0 : i32
    %c0_i32_1 = arith.constant 0 : i32
    %c0_i32_2 = arith.constant 0 : i32
    return %c0_i32, %c0_i32_0, %c0_i32_1 : i32, i32, i32
  }
  func.func @transform_6(%arg0: i32) -> (i32, i32, i32) {
    %c0_i32 = arith.constant 0 : i32
    %c0_i32_0 = arith.constant 0 : i32
    %c0_i32_1 = arith.constant 0 : i32
    %c0_i32_2 = arith.constant 0 : i32
    return %c0_i32, %c0_i32_0, %c0_i32_1 : i32, i32, i32
  }
  func.func @transform_7(%arg0: i32) -> (i32, i32, i32) {
    %c0_i32 = arith.constant 0 : i32
    %c0_i32_0 = arith.constant 0 : i32
    %c0_i32_1 = arith.constant 0 : i32
    %c0_i32_2 = arith.constant 0 : i32
    return %c0_i32, %c0_i32_0, %c0_i32_1 : i32, i32, i32
  }
  func.func @transform_8(%arg0: i32) -> (i32, i32, i32) {
    %c0_i32 = arith.constant 0 : i32
    %c0_i32_0 = arith.constant 0 : i32
    %c0_i32_1 = arith.constant 0 : i32
    %c0_i32_2 = arith.constant 0 : i32
    return %c0_i32, %c0_i32_0, %c0_i32_1 : i32, i32, i32
  }
  func.func @transform_9(%arg0: i32) -> (i32, i32, i32) {
    %c0_i32 = arith.constant 0 : i32
    %c0_i32_0 = arith.constant 0 : i32
    %c0_i32_1 = arith.constant 0 : i32
    %c0_i32_2 = arith.constant 0 : i32
    return %c0_i32, %c0_i32_0, %c0_i32_1 : i32, i32, i32
  }
  func.func @transform_10(%arg0: i32) -> (i32, i32, i32) {
    %c0_i32 = arith.constant 0 : i32
    %c0_i32_0 = arith.constant 0 : i32
    %c0_i32_1 = arith.constant 0 : i32
    %c0_i32_2 = arith.constant 0 : i32
    return %c0_i32, %c0_i32_0, %c0_i32_1 : i32, i32, i32
  }
  func.func @transform_11(%arg0: i32) -> (i32, i32, i32) {
    %c0_i32 = arith.constant 0 : i32
    %c0_i32_0 = arith.constant 0 : i32
    %c0_i32_1 = arith.constant 0 : i32
    %c0_i32_2 = arith.constant 0 : i32
    return %c0_i32, %c0_i32_0, %c0_i32_1 : i32, i32, i32
  }
  func.func @transform_12(%arg0: i32) -> (i32, i32, i32) {
    %c0_i32 = arith.constant 0 : i32
    %c0_i32_0 = arith.constant 0 : i32
    %c0_i32_1 = arith.constant 0 : i32
    %c0_i32_2 = arith.constant 0 : i32
    return %c0_i32, %c0_i32_0, %c0_i32_1 : i32, i32, i32
  }
  func.func @transform_13(%arg0: i32) -> (i32, i32) {
    %c0_i32 = arith.constant 0 : i32
    %c0_i32_0 = arith.constant 0 : i32
    %c0_i32_1 = arith.constant 0 : i32
    return %c0_i32, %c0_i32_0 : i32, i32
  }
  func.func @transform_14(%arg0: i32) -> (i32, i32) {
    %c0_i32 = arith.constant 0 : i32
    %c0_i32_0 = arith.constant 0 : i32
    %c0_i32_1 = arith.constant 0 : i32
    return %c0_i32, %c0_i32_0 : i32, i32
  }
  func.func @transform_15(%arg0: i32) -> (i32, i32) {
    %c0_i32 = arith.constant 0 : i32
    %c0_i32_0 = arith.constant 0 : i32
    %c0_i32_1 = arith.constant 0 : i32
    return %c0_i32, %c0_i32_0 : i32, i32
  }
  func.func @transform_16(%arg0: i32) -> (i32, i32) {
    %c0_i32 = arith.constant 0 : i32
    %c0_i32_0 = arith.constant 0 : i32
    %c0_i32_1 = arith.constant 0 : i32
    return %c0_i32, %c0_i32_0 : i32, i32
  }
  func.func @transform_17(%arg0: i32) -> (i32, i32) {
    %c0_i32 = arith.constant 0 : i32
    %c0_i32_0 = arith.constant 0 : i32
    %c0_i32_1 = arith.constant 0 : i32
    return %c0_i32, %c0_i32_0 : i32, i32
  }
  func.func @transform_18(%arg0: i32) -> (i32, i32) {
    %c0_i32 = arith.constant 0 : i32
    %c0_i32_0 = arith.constant 0 : i32
    %c0_i32_1 = arith.constant 0 : i32
    return %c0_i32, %c0_i32_0 : i32, i32
  }
  func.func @transform_19(%arg0: i32) -> (i32, i32) {
    %c0_i32 = arith.constant 0 : i32
    %c0_i32_0 = arith.constant 0 : i32
    return %arg0, %c0_i32 : i32, i32
  }
}

</mosaic_0001>

<bundles_post_ra>
// kernel: topology_optimizer_forward.1
= control target key start
LH: loop header
LB: loop body
LE: loop exit
PB: predicated region body
PF: predicated region fallthrough
CT: control target
= control target key end

     0   :  { %vm664_vm0 = vcmask 261120   ;;  %s12340_s26 = smov 64   ;;  %vm1284_vm1 = vcmask 785408   ;;  %vm1299_vm2 = vcmask 523264   ;;  %vm12342_vm3 = vmmov 0   ;;  %s16897_s28 = smov 32   ;;  %s16859_s1 = inlined_call_operand.vmem [shape: bf16[2,160,480], index: 1, kind: input, shape index: {}]   ;;  %s16860_s0 = inlined_call_operand.vmem [shape: f32[8,160], index: 0, kind: input, shape index: {}]   ;;  %s16861_s13 = inlined_call_operand.vmem [shape: bf16[160,800], index: 13, kind: input, shape index: {}]   ;;  %s16862_s2 = inlined_call_operand.vmem [shape: f32[2,1,480], index: 2, kind: input, shape index: {}]   ;;  %s16863_s14 = inlined_call_operand.vmem [shape: bf16[800,50], index: 14, kind: input, shape index: {}]   ;;  %s16864_s15 = inlined_call_operand.vmem [shape: bf16[50,800], index: 15, kind: input, shape index: {}]   ;;  %s16865_s16 = inlined_call_operand.vmem [shape: bf16[50,160], index: 16, kind: input, shape index: {}]   ;;  %s16866_s17 = inlined_call_operand.vmem [shape: bf16[800,160], index: 17, kind: input, shape index: {}]   ;;  %s16867_s3 = inlined_call_operand.vmem [shape: bf16[2,160,160], index: 3, kind: input, shape index: {}]   ;;  %s16868_s18 = inlined_call_operand.vmem [shape: bf16[160,160], index: 18, kind: input, shape index: {}]   ;;  %s16869_s4 = inlined_call_operand.vmem [shape: f32[2,1,160], index: 4, kind: input, shape index: {}]   ;;  %s16870_s5 = inlined_call_operand.vmem [shape: bf16[2,160,1280], index: 5, kind: input, shape index: {}]   ;;  %s16871_s7 = inlined_call_operand.vmem [shape: bf16[2,1280,160], index: 7, kind: input, shape index: {}]   ;;  %s16872_s9 = inlined_call_operand.vmem [shape: f32[2,1,160], index: 9, kind: input, shape index: {}]   ;;  %s16873_s10 = inlined_call_operand.vmem [shape: f32[2,1,160], index: 10, kind: input, shape index: {}]   ;;  %s16874_s6 = inlined_call_operand.vmem [shape: f32[2,1,1280], index: 6, kind: input, shape index: {}]   ;;  %s16875_s8 = inlined_call_operand.vmem [shape: f32[2,1,160], index: 8, kind: input, shape index: {}]   ;;  %s16876_s11 = inlined_call_operand.vmem [shape: f32[2,1,160], index: 11, kind: input, shape index: {}]   ;;  %s16877_s12 = inlined_call_operand.vmem [shape: f32[2,1,160], index: 12, kind: input, shape index: {}]   ;;  %s16878_s19 = inlined_call_operand.vmem [shape: f32[8,160], index: 19, kind: output, shape index: {}]  }
   0x1   :  { %16888 = sst [smem:[#allocation2_spill]] %s16859_s1  ;;  %vm1783_vm4 = vcmask 408576   ;;  %vm1920_vm5 = vcmask 1040384  }
   0x2   :  { %16889 = sst [smem:[#allocation3_spill]] %s16860_s0  ;;  %s16892_s20 = sld [smem:[#allocation2_spill]] }
   0x3   :  { %16890 = sst [smem:[#allocation4_spill]] %s16861_s13  ;;  %s16893_s23 = sld [smem:[#allocation3_spill]] }
   0x4   :  { %16891 = sst [smem:[#allocation5_spill]] %s16862_s2  ;;  %s16894_s22 = sld [smem:[#allocation4_spill]] }
   0x5   :  { %s16895_s21 = sld [smem:[#allocation5_spill]]  ;;  %s16885_s0 = smov 96  }
   0x6   :  { %s16883_s13 = smov 32  }
   0x8   :  { %v10662_v0 = vld [vmem:[%s16892_s20 + $0x4] ss:$16 sps:$4 sm:$0xff]   ;;  %v10664_v1 = vld [vmem:[%s16892_s20 + $0xc] ss:$16 sps:$4 sm:$0xff]   ;;  %v10666_v2 = vld [vmem:[%s16892_s20] ss:$16 sps:$4 sm:$0xff]  }
   0x9   :  { %668 = vmatprep.subr.bf16.mxu0 %v10662_v0  ;;  %v10667_v3 = vld [vmem:[%s16892_s20 + $0x8] ss:$16 sps:$4 sm:$0xff]   ;;  %709 = vmatprep.subr.bf16.mxu1 %v10664_v1  ;;  %v10668_v4 = vld [vmem:[%s16892_s20 + $0x24] ss:$16 sps:$4 sm:$0xff]   ;;  %v10670_v5 = vld [vmem:[%s16892_s20 + $0x2c] ss:$16 sps:$4 sm:$0xff]  }
   0xa   :  { %669 = vmatpush1.bf16.msra.mxu0 %v10666_v2  ;;  %710 = vmatpush1.bf16.msra.mxu1 %v10667_v3  ;;  %v10672_v6 = vld [vmem:[%s16892_s20 + $0x20] ss:$16 sps:$4 sm:$0xff]   ;;  %v10673_v7 = vld [vmem:[%s16892_s20 + $0x28] ss:$16 sps:$4 sm:$0xff]   ;;  %v10674_v8 = vld [vmem:[%s16892_s20 + $0x44] ss:$16 sps:$4 sm:$0xff]  }
   0xb   :  { %670 = vmatprep.subr.bf16.mxu0 %v10668_v4  ;;  %711 = vmatprep.subr.bf16.mxu1 %v10670_v5  ;;  %v10676_v9 = vld [vmem:[%s16892_s20 + $0x4c] ss:$16 sps:$4 sm:$0xff]   ;;  %v10678_v10 = vld [vmem:[%s16892_s20 + $0x40] ss:$16 sps:$4 sm:$0xff]   ;;  %v10679_v11 = vld [vmem:[%s16892_s20 + $0x48] ss:$16 sps:$4 sm:$0xff]  }
   0xc   :  { %v10680_v12 = vld [vmem:[%s16892_s20 + $0x64] ss:$16 sps:$4 sm:$0xff]   ;;  %v10682_v13 = vld [vmem:[%s16892_s20 + $0x6c] ss:$16 sps:$4 sm:$0xff]   ;;  %v10684_v14 = vld [vmem:[%s16892_s20 + $0x60] ss:$16 sps:$4 sm:$0xff]  }
   0xd   :  { %v10685_v15 = vld [vmem:[%s16892_s20 + $0x68] ss:$16 sps:$4 sm:$0xff]   ;;  %v10686_v16 = vld [vmem:[%s16892_s20 + $0x84] ss:$16 sps:$4 sm:$0xff]   ;;  %v10688_v17 = vld [vmem:[%s16892_s20 + $0x8c] ss:$16 sps:$4 sm:$0xff]  }
   0xe   :  { %671 = vmatpush1.bf16.msra.mxu0 %v10672_v6  ;;  %712 = vmatpush1.bf16.msra.mxu1 %v10673_v7  ;;  %v10690_v18 = vld [vmem:[%s16892_s20 + $0x80] ss:$16 sps:$4 sm:$0xff]   ;;  %v10691_v19 = vld [vmem:[%s16892_s20 + $0x88] ss:$16 sps:$4 sm:$0xff]   ;;  %v10692_v20 = vld [vmem:[%s16892_s20 + $0xa4] ss:$16 sps:$4 sm:$0xff]  }
   0xf   :  { %672 = vmatprep.subr.bf16.mxu0 %v10674_v8  ;;  %713 = vmatprep.subr.bf16.mxu1 %v10676_v9  ;;  %v10694_v21 = vld [vmem:[%s16892_s20 + $0xac] ss:$16 sps:$4 sm:$0xff]   ;;  %v10696_v22 = vld [vmem:[%s16892_s20 + $0xa0] ss:$16 sps:$4 sm:$0xff]   ;;  %v10697_v23 = vld [vmem:[%s16892_s20 + $0xa8] ss:$16 sps:$4 sm:$0xff]  }
  0x10   :  { %v10698_v24 = vld [vmem:[%s16892_s20 + $0xc4] ss:$16 sps:$4 sm:$0xff]   ;;  %v10700_v25 = vld [vmem:[%s16892_s20 + $0xcc] ss:$16 sps:$4 sm:$0xff]   ;;  %v10702_v26 = vld [vmem:[%s16892_s20 + $0xc0] ss:$16 sps:$4 sm:$0xff]  }
  0x11   :  { %v10703_v27 = vld [vmem:[%s16892_s20 + $0xc8] ss:$16 sps:$4 sm:$0xff]   ;;  %v10704_v28 = vld [vmem:[%s16892_s20 + $0xe4] ss:$16 sps:$4 sm:$0xff]   ;;  %v10706_v29 = vld [vmem:[%s16892_s20 + $0xec] ss:$16 sps:$4 sm:$0xff]  }
  0x12   :  { %673 = vmatpush1.bf16.msra.mxu0 %v10678_v10  ;;  %714 = vmatpush1.bf16.msra.mxu1 %v10679_v11  ;;  %v399_v30 = vld [vmem:[%s16893_s23 + $0x8] sm:$0xff]  ;;  %v10708_v31 = vld [vmem:[%s16892_s20 + $0xe0] ss:$16 sps:$4 sm:$0xff]   ;;  %v10710_v34 = vld [vmem:[%s16892_s20 + $0x104] ss:$16 sps:$4 sm:$0xff]  }
  0x13   :  { %674 = vmatprep.subr.bf16.mxu0 %v10680_v12  ;;  %715 = vmatprep.subr.bf16.mxu1 %v10682_v13  ;;  %v10709_v32 = vld [vmem:[%s16892_s20 + $0xe8] ss:$16 sps:$4 sm:$0xff]   ;;  %v441_v33 = vpack.c.bf16 %v399_v30, %v399_v30  ;;  %v10712_v35 = vld [vmem:[%s16892_s20 + $0x10c] ss:$16 sps:$4 sm:$0xff]   ;;  %v10714_v36 = vld [vmem:[%s16892_s20 + $0x100] ss:$16 sps:$4 sm:$0xff]  }
  0x14   :  { %v10715_v37 = vld [vmem:[%s16892_s20 + $0x108] ss:$16 sps:$4 sm:$0xff]   ;;  %v10716_v38 = vld [vmem:[%s16892_s20 + $0x124] ss:$16 sps:$4 sm:$0xff]   ;;  %v10718_v39 = vld [vmem:[%s16892_s20 + $0x12c] ss:$16 sps:$4 sm:$0xff]  }
  0x15   :  { %9185 = vmatprep.mubr.msk.bf16.mxu0 %vm664_vm0, %v441_v33  ;;  %9186 = vmatprep.mubr.msk.bf16.mxu1 %vm664_vm0, %v441_v33  ;;  %v10720_v40 = vld [vmem:[%s16892_s20 + $0x120] ss:$16 sps:$4 sm:$0xff]   ;;  %v10721_v41 = vld [vmem:[%s16892_s20 + $0x128] ss:$16 sps:$4 sm:$0xff]  }
  0x16   :  { %675 = vmatpush1.bf16.msra.mxu0 %v10684_v14  ;;  %716 = vmatpush1.bf16.msra.mxu1 %v10685_v15  ;;  %v398_v42 = vld [vmem:[%s16893_s23] sm:$0xff]  ;;  %v10727_v44 = vld [vmem:[%s16894_s22 + $0xc] ss:$28 sps:$4 sm:$0xff]   ;;  %v10730_v48 = vld [vmem:[%s16894_s22 + $0x3c] ss:$28 sps:$4 sm:$0xff]  }
  0x17   :  { %676 = vmatprep.subr.bf16.mxu0 %v10686_v16  ;;  %717 = vmatprep.subr.bf16.mxu1 %v10688_v17  ;;  %v10724_v43 = vld [vmem:[%s16894_s22 + $0x4] ss:$28 sps:$4 sm:$0xff]   ;;  %v440_v45 = vpack.c.bf16 %v398_v42, %v398_v42  ;;  %v10728_v50 = vld [vmem:[%s16894_s22 + $0x38] ss:$28 sps:$4 sm:$0xff]   ;;  %v10734_v54 = vld [vmem:[%s16894_s22 + $0x70] ss:$28 sps:$4 sm:$0xff]  }
  0x18   :  { %v10722_v46 = vld [vmem:[%s16894_s22] ss:$28 sps:$4 sm:$0xff]   ;;  %v10725_v47 = vld [vmem:[%s16894_s22 + $0x8] ss:$28 sps:$4 sm:$0xff]   ;;  %v10736_v52 = vld [vmem:[%s16894_s22 + $0x74] ss:$28 sps:$4 sm:$0xff]  }
  0x19   :  { %v10733_v49 = vld [vmem:[%s16894_s22 + $0x44] ss:$28 sps:$4 sm:$0xff]   ;;  %v10739_v53 = vld [vmem:[%s16894_s22 + $0x7c] ss:$28 sps:$4 sm:$0xff]   ;;  %v10742_v56 = vld [vmem:[%s16894_s22 + $0xac] ss:$28 sps:$4 sm:$0xff]  }
  0x1a   :  { %677 = vmatpush1.bf16.msra.mxu0 %v10690_v18  ;;  %718 = vmatpush1.bf16.msra.mxu1 %v10691_v19  ;;  %v10731_v51 = vld [vmem:[%s16894_s22 + $0x40] ss:$28 sps:$4 sm:$0xff]   ;;  %v10737_v55 = vld [vmem:[%s16894_s22 + $0x78] ss:$28 sps:$4 sm:$0xff]   ;;  %v10740_v58 = vld [vmem:[%s16894_s22 + $0xa8] ss:$28 sps:$4 sm:$0xff]  }
  0x1b   :  { %678 = vmatprep.subr.bf16.mxu0 %v10692_v20  ;;  %719 = vmatprep.subr.bf16.mxu1 %v10694_v21  ;;  %v10745_v57 = vld [vmem:[%s16894_s22 + $0xb4] ss:$28 sps:$4 sm:$0xff]   ;;  %v10748_v60 = vld [vmem:[%s16894_s22 + $0xe4] ss:$28 sps:$4 sm:$0xff]   ;;  %v10751_v61 = vld [vmem:[%s16894_s22 + $0xec] ss:$28 sps:$4 sm:$0xff]  }
  0x1c   :  { %v10743_v59 = vld [vmem:[%s16894_s22 + $0xb0] ss:$28 sps:$4 sm:$0xff]   ;;  %v10746_v62 = vld [vmem:[%s16894_s22 + $0xe0] ss:$28 sps:$4 sm:$0xff]   ;;  %v10749_v63 = vld [vmem:[%s16894_s22 + $0xe8] ss:$28 sps:$4 sm:$0xff]  }
  0x1d   :  { %v10754_v0 = vld [vmem:[%s16894_s22 + $0x11c] ss:$28 sps:$4 sm:$0xff]   ;;  %v10757_v1 = vld [vmem:[%s16894_s22 + $0x124] ss:$28 sps:$4 sm:$0xff]   ;;  %v10760_v4 = vld [vmem:[%s16894_s22 + $0x154] ss:$28 sps:$4 sm:$0xff]  }
  0x1e   :  { %679 = vmatpush1.bf16.msra.mxu0 %v10696_v22  ;;  %720 = vmatpush1.bf16.msra.mxu1 %v10697_v23  ;;  %v10752_v2 = vld [vmem:[%s16894_s22 + $0x118] ss:$28 sps:$4 sm:$0xff]   ;;  %v10755_v3 = vld [vmem:[%s16894_s22 + $0x120] ss:$28 sps:$4 sm:$0xff]   ;;  %v10758_v6 = vld [vmem:[%s16894_s22 + $0x150] ss:$28 sps:$4 sm:$0xff]   ;;  %v444_v22 = vlaneseq }
  0x1f   :  { %680 = vmatprep.subr.bf16.mxu0 %v10698_v24  ;;  %721 = vmatprep.subr.bf16.mxu1 %v10700_v25  ;;  %v10763_v5 = vld [vmem:[%s16894_s22 + $0x15c] ss:$28 sps:$4 sm:$0xff]   ;;  %v10766_v8 = vld [vmem:[%s16894_s22 + $0x18c] ss:$28 sps:$4 sm:$0xff]   ;;  %v10769_v9 = vld [vmem:[%s16894_s22 + $0x194] ss:$28 sps:$4 sm:$0xff]  }
  0x20   :  { %v10761_v7 = vld [vmem:[%s16894_s22 + $0x158] ss:$28 sps:$4 sm:$0xff]   ;;  %v10764_v10 = vld [vmem:[%s16894_s22 + $0x188] ss:$28 sps:$4 sm:$0xff]   ;;  %v10767_v11 = vld [vmem:[%s16894_s22 + $0x190] ss:$28 sps:$4 sm:$0xff]  }
  0x21   :  { %v10772_v12 = vld [vmem:[%s16894_s22 + $0x1c4] ss:$28 sps:$4 sm:$0xff]   ;;  %v10775_v13 = vld [vmem:[%s16894_s22 + $0x1cc] ss:$28 sps:$4 sm:$0xff]   ;;  %v10778_v16 = vld [vmem:[%s16894_s22 + $0x1fc] ss:$28 sps:$4 sm:$0xff]  }
  0x22   :  { %681 = vmatpush1.bf16.msra.mxu0 %v10702_v26  ;;  %722 = vmatpush1.bf16.msra.mxu1 %v10703_v27  ;;  %v10770_v14 = vld [vmem:[%s16894_s22 + $0x1c0] ss:$28 sps:$4 sm:$0xff]   ;;  %v10773_v15 = vld [vmem:[%s16894_s22 + $0x1c8] ss:$28 sps:$4 sm:$0xff]   ;;  %v10776_v18 = vld [vmem:[%s16894_s22 + $0x1f8] ss:$28 sps:$4 sm:$0xff]  }
  0x23   :  { %682 = vmatprep.subr.bf16.mxu0 %v10704_v28  ;;  %723 = vmatprep.subr.bf16.mxu1 %v10706_v29  ;;  %v10781_v17 = vld [vmem:[%s16894_s22 + $0x204] ss:$28 sps:$4 sm:$0xff]   ;;  %v10784_v20 = vld [vmem:[%s16894_s22 + $0x14] ss:$28 sps:$4 sm:$0xff]   ;;  %v12337_v21 = vmov 0   ;;  %v12695_v23 = vshrl.u32 %v444_v22, 7 }
  0x24   :  { %v10779_v19 = vld [vmem:[%s16894_s22 + $0x200] ss:$28 sps:$4 sm:$0xff]   ;;  %v10831_v22 = vld [vmem:[%s16863_s14 + $0xd0] sm:$0xff]  }
  0x25   :  { %v12698_v24 = vsub.s32 0, %v12695_v23  ;;  %v12701_v25 = vsub.s32 2, %v12695_v23  ;;  %v442_v26 = vld [vmem:[%s16895_s21] sm:$0xf]  ;;  %v12707_v27 = vsub.s32 1, %v12695_v23 }
  0x26   :  { %683 = vmatpush1.bf16.msra.mxu0 %v10708_v31  ;;  %724 = vmatpush1.bf16.msra.mxu1 %v10709_v32 }
  0x27   :  { %684 = vmatprep.subr.bf16.mxu0 %v10710_v34  ;;  %725 = vmatprep.subr.bf16.mxu1 %v10712_v35  ;;  %v447_v28 = vrot.slane %v442_v26, %v12698_v24  ;;  %v455_v29 = vrot.slane %v442_v26, %v12701_v25  ;;  %v451_v30 = vrot.slane %v442_v26, %v12707_v27 }
  0x2a   :  { %685 = vmatpush1.bf16.msra.mxu0 %v10714_v36  ;;  %726 = vmatpush1.bf16.msra.mxu1 %v10715_v37 }
  0x2b   :  { %686 = vmatprep.subr.bf16.mxu0 %v10716_v38  ;;  %727 = vmatprep.subr.bf16.mxu1 %v10718_v39 }
  0x2e   :  { %687 = vmatpush1.bf16.msra.mxu0 %v10720_v40  ;;  %728 = vmatpush1.bf16.msra.mxu1 %v10721_v41 }
  0x2f   :  { %1115 = vmatprep.subr.bf16.mxu0 %v10724_v43  ;;  %1156 = vmatprep.subr.bf16.mxu1 %v10727_v44  ;;  %v10782_v43 = vld [vmem:[%s16894_s22 + $0x10] ss:$28 sps:$4 sm:$0xff]   ;;  %v10785_v44 = vld [vmem:[%s16894_s22 + $0x18] ss:$28 sps:$4 sm:$0xff]  }
  0x31   :  { %701 = vmatmul.mubr.bf16.vlgmr.msra.gmra.mrb[0].mxu0 %v440_v45  ;;  %742 = vmatmul.mubr.bf16.vlgmr.msra.gmra.mrb[0].mxu1 %v440_v45 }
  0x32   :  { %1116 = vmatpush1.bf16.msra.mxu0 %v10722_v46  ;;  %1157 = vmatpush1.bf16.msra.mxu1 %v10725_v47  ;;  %v12731_v46 = vsub.s32 3, %v12695_v23  ;;  %v10786_v47 = vld [vmem:[%s16894_s22 + $0x48] ss:$28 sps:$4 sm:$0xff]  }
  0x33   :  { %1117 = vmatprep.subr.bf16.mxu0 %v10730_v48  ;;  %1158 = vmatprep.subr.bf16.mxu1 %v10733_v49  ;;  %v10788_v48 = vld [vmem:[%s16894_s22 + $0x4c] ss:$28 sps:$4 sm:$0xff]  }
  0x34   :  { %v10789_v49 = vld [vmem:[%s16894_s22 + $0x50] ss:$28 sps:$4 sm:$0xff]  }
  0x36   :  { %1118 = vmatpush1.bf16.msra.mxu0 %v10728_v50  ;;  %1159 = vmatpush1.bf16.msra.mxu1 %v10731_v51  ;;  %v459_v50 = vrot.slane %v442_v26, %v12731_v46  ;;  %v10792_v51 = vld [vmem:[%s16894_s22 + $0x84] ss:$28 sps:$4 sm:$0xff]   ;;  %v10832_v26 = vld [vmem:[%s16863_s14 + $0x10] sm:$0xff]  }
  0x37   :  { %1119 = vmatprep.subr.bf16.mxu0 %v10736_v52  ;;  %1160 = vmatprep.subr.bf16.mxu1 %v10739_v53  ;;  %v10790_v52 = vld [vmem:[%s16894_s22 + $0x80] ss:$28 sps:$4 sm:$0xff]  }
  0x3a   :  { %1120 = vmatpush1.bf16.msra.mxu0 %v10734_v54  ;;  %1161 = vmatpush1.bf16.msra.mxu1 %v10737_v55  ;;  %v10793_v54 = vld [vmem:[%s16894_s22 + $0x88] ss:$28 sps:$4 sm:$0xff]   ;;  %v10796_v55 = vld [vmem:[%s16894_s22 + $0xbc] ss:$28 sps:$4 sm:$0xff]  }
  0x3b   :  { %1121 = vmatprep.subr.bf16.mxu0 %v10742_v56  ;;  %1162 = vmatprep.subr.bf16.mxu1 %v10745_v57  ;;  %v10794_v56 = vld [vmem:[%s16894_s22 + $0xb8] ss:$28 sps:$4 sm:$0xff]   ;;  %v10797_v57 = vld [vmem:[%s16894_s22 + $0xc0] ss:$28 sps:$4 sm:$0xff]  }
  0x3e   :  { %1122 = vmatpush1.bf16.msra.mxu0 %v10740_v58  ;;  %1163 = vmatpush1.bf16.msra.mxu1 %v10743_v59  ;;  %v10800_v58 = vld [vmem:[%s16894_s22 + $0xf4] ss:$28 sps:$4 sm:$0xff]  }
  0x3f   :  { %1123 = vmatprep.subr.bf16.mxu0 %v10748_v60  ;;  %1164 = vmatprep.subr.bf16.mxu1 %v10751_v61  ;;  %v10798_v59 = vld [vmem:[%s16894_s22 + $0xf0] ss:$28 sps:$4 sm:$0xff]   ;;  %v10801_v60 = vld [vmem:[%s16894_s22 + $0xf8] ss:$28 sps:$4 sm:$0xff]  }
  0x40   :  { %v10804_v61 = vld [vmem:[%s16894_s22 + $0x12c] ss:$28 sps:$4 sm:$0xff]  }
  0x42   :  { %1124 = vmatpush1.bf16.msra.mxu0 %v10746_v62  ;;  %1165 = vmatpush1.bf16.msra.mxu1 %v10749_v63  ;;  %v10802_v62 = vld [vmem:[%s16894_s22 + $0x128] ss:$28 sps:$4 sm:$0xff]   ;;  %v10805_v63 = vld [vmem:[%s16894_s22 + $0x130] ss:$28 sps:$4 sm:$0xff]  }
  0x43   :  { %1125 = vmatprep.subr.bf16.mxu0 %v10754_v0  ;;  %1166 = vmatprep.subr.bf16.mxu1 %v10757_v1  ;;  %v10808_v0 = vld [vmem:[%s16894_s22 + $0x164] ss:$28 sps:$4 sm:$0xff]  }
  0x44   :  { %v10806_v1 = vld [vmem:[%s16894_s22 + $0x160] ss:$28 sps:$4 sm:$0xff]  }
  0x46   :  { %1126 = vmatpush1.bf16.msra.mxu0 %v10752_v2  ;;  %1167 = vmatpush1.bf16.msra.mxu1 %v10755_v3  ;;  %v10809_v2 = vld [vmem:[%s16894_s22 + $0x168] ss:$28 sps:$4 sm:$0xff]   ;;  %v10812_v3 = vld [vmem:[%s16894_s22 + $0x19c] ss:$28 sps:$4 sm:$0xff]  }
  0x47   :  { %1127 = vmatprep.subr.bf16.mxu0 %v10760_v4  ;;  %1168 = vmatprep.subr.bf16.mxu1 %v10763_v5  ;;  %v10810_v4 = vld [vmem:[%s16894_s22 + $0x198] ss:$28 sps:$4 sm:$0xff]   ;;  %v10813_v5 = vld [vmem:[%s16894_s22 + $0x1a0] ss:$28 sps:$4 sm:$0xff]  }
  0x4a   :  { %1128 = vmatpush1.bf16.msra.mxu0 %v10758_v6  ;;  %1169 = vmatpush1.bf16.msra.mxu1 %v10761_v7  ;;  %v10816_v6 = vld [vmem:[%s16894_s22 + $0x1d4] ss:$28 sps:$4 sm:$0xff]  }
  0x4b   :  { %1129 = vmatprep.subr.bf16.mxu0 %v10766_v8  ;;  %1170 = vmatprep.subr.bf16.mxu1 %v10769_v9  ;;  %v10814_v7 = vld [vmem:[%s16894_s22 + $0x1d0] ss:$28 sps:$4 sm:$0xff]   ;;  %v10817_v8 = vld [vmem:[%s16894_s22 + $0x1d8] ss:$28 sps:$4 sm:$0xff]  }
  0x4c   :  { %v10820_v9 = vld [vmem:[%s16894_s22 + $0x20c] ss:$28 sps:$4 sm:$0xff]  }
  0x4e   :  { %1130 = vmatpush1.bf16.msra.mxu0 %v10764_v10  ;;  %1171 = vmatpush1.bf16.msra.mxu1 %v10767_v11  ;;  %v10818_v10 = vld [vmem:[%s16894_s22 + $0x208] ss:$28 sps:$4 sm:$0xff]   ;;  %v10821_v11 = vld [vmem:[%s16894_s22 + $0x210] ss:$28 sps:$4 sm:$0xff]  }
  0x4f   :  { %1131 = vmatprep.subr.bf16.mxu0 %v10772_v12  ;;  %1172 = vmatprep.subr.bf16.mxu1 %v10775_v13  ;;  %v10822_v12 = vld [vmem:[%s16863_s14 + $0x40] sm:$0xff]  }
  0x50   :  { %v10823_v13 = vld [vmem:[%s16863_s14 + $0xc0] sm:$0xff]  }
  0x52   :  { %1132 = vmatpush1.bf16.msra.mxu0 %v10770_v14  ;;  %1173 = vmatpush1.bf16.msra.mxu1 %v10773_v15  ;;  %v10824_v14 = vld [vmem:[%s16863_s14] sm:$0xff]  }
  0x53   :  { %1133 = vmatprep.subr.bf16.mxu0 %v10778_v16  ;;  %1174 = vmatprep.subr.bf16.mxu1 %v10781_v17  ;;  %v10825_v15 = vld [vmem:[%s16863_s14 + $0x80] sm:$0xff]   ;;  %v10826_v16 = vld [vmem:[%s16863_s14 + $0x48] sm:$0xff]  }
  0x54   :  { %v10827_v17 = vld [vmem:[%s16863_s14 + $0xc8] sm:$0xff]  }
  0x56   :  { %1175 = vmatpush1.bf16.msra.mxu1 %v10779_v19  ;;  %1134 = vmatpush1.bf16.msra.mxu0 %v10776_v18  ;;  %v10828_v18 = vld [vmem:[%s16863_s14 + $0x8] sm:$0xff]  }
  0x57   :  { %1197 = vmatprep.subr.bf16.mxu0 %v10784_v20  ;;  %1238 = vmatprep.subr.bf16.mxu1 %v12337_v21  ;;  %v10829_v19 = vld [vmem:[%s16863_s14 + $0x88] sm:$0xff]   ;;  %v10830_v20 = vld [vmem:[%s16863_s14 + $0x50] sm:$0xff]  }
 0x104   :  { %v702_v31 = vpop.f32.mrb[0].mxu0  ;;  %v743_v32 = vpop.f32.mrb[0].mxu1 }
 0x105   :  { %v703_v33 = vadd.f32 %v702_v31, %v447_v28  ;;  %v12712_v34 = vadd.f32 %v743_v32, %v455_v29  ;;  %v704_v35 = vpop.f32.mrb[1].mxu0  ;;  %v745_v36 = vpop.f32.mrb[1].mxu1  ;;  %v10833_v28 = vld [vmem:[%s16863_s14 + $0x90] sm:$0xff]   ;;  %v10834_v29 = vld [vmem:[%s16863_s14 + $0x58] sm:$0xff]  }
 0x106   :  { %v12714_v37 = vadd.f32 %v704_v35, %v451_v30  ;;  %v706_v38 = vpop.f32.mrb[2].mxu0  ;;  %v747_v39 = vpop.f32.mrb[2].mxu1  ;;  %v12764_v53 = vadd.f32 %v745_v36, %v459_v50  ;;  %v10835_v30 = vld [vmem:[%s16863_s14 + $0xd8] sm:$0xff]   ;;  %v10839_v35 = vld [vmem:[%s16863_s14 + $0xe0] sm:$0xff]  }
 0x107   :  { %1282 = vrot.lane.b32.xlu0 %v12712_v34, %s16885_s0  ;;  %v707_v40 = vpop.f32.mrb[3].mxu0  ;;  %v748_v41 = vpop.f32.mrb[3].mxu1  ;;  %v12728_v45 = vpack.c.bf16 %v703_v33, %v703_v33  ;;  %v10836_v31 = vld [vmem:[%s16863_s14 + $0x18] sm:$0xff]   ;;  %v10838_v33 = vld [vmem:[%s16863_s14 + $0x60] sm:$0xff]   ;;  %v10842_v39 = vld [vmem:[%s16863_s14 + $0x68] sm:$0xff]  }
 0x108   :  { %1288 = vrot.lane.b32.xlu1 %v12714_v37, %s16883_s13  ;;  %v751_v42 = vpack.c.bf16 %v12714_v37, %v12714_v37  ;;  %v10837_v32 = vld [vmem:[%s16863_s14 + $0x98] sm:$0xff]   ;;  %v10840_v36 = vld [vmem:[%s16863_s14 + $0x20] sm:$0xff]   ;;  %v10843_v40 = vld [vmem:[%s16863_s14 + $0xe8] sm:$0xff]  }
 0x109   :  { %v10841_v38 = vld [vmem:[%s16863_s14 + $0xa0] sm:$0xff]   ;;  %v10844_v41 = vld [vmem:[%s16863_s14 + $0x28] sm:$0xff]   ;;  %v10852_v50 = vld [vmem:[%s16863_s14 + $0x38] sm:$0xff]  }
 0x10a   :  { %9257 = vmatprep.mubr.msk.bf16.mxu0 %vm664_vm0, %v751_v42  ;;  %9258 = vmatprep.mubr.msk.bf16.mxu1 %vm664_vm0, %v751_v42 }
 0x10b   :  { %1280 = vrot.lane.b32.xlu0 %v12714_v37, %s16885_s0  ;;  %1148 = vmatmul.mubr.bf16.vlgmr.msra.gmra.mrb[4].mxu0 %v12728_v45 }
 0x10c   :  { %1189 = vmatmul.mubr.bf16.vlgmr.msra.gmra.mrb[4].mxu1 %v12728_v45  ;;  %1198 = vmatpush1.bf16.msra.mxu0 %v10782_v43  ;;  %v10846_v43 = vld [vmem:[%s16863_s14 + $0x70] sm:$0xff]  }
 0x10d   :  { %1239 = vmatpush1.bf16.msra.mxu1 %v10785_v44  ;;  %1290 = vrot.lane.b32.xlu1 %v12712_v34, %s16883_s13  ;;  %v10847_v44 = vld [vmem:[%s16863_s14 + $0xf0] sm:$0xff]  }
 0x10e   :  { %9259 = vmatprep.mubr.msk.bf16.mxu0 %vm664_vm0, %v751_v42  ;;  %9260 = vmatprep.mubr.msk.bf16.mxu1 %vm664_vm0, %v751_v42  ;;  %v10845_v42 = vld [vmem:[%s16863_s14 + $0xa8] sm:$0xff]  }
 0x10f   :  { %1199 = vmatprep.subr.bf16.mxu0 %v10788_v48  ;;  %1240 = vmatprep.subr.bf16.mxu1 %v12337_v21  ;;  %v10850_v48 = vld [vmem:[%s16863_s14 + $0x78] sm:$0xff]  }
 0x110   :  { %1295 = vrot.lane.b32.xlu0 %v12714_v37, %s12340_s26  ;;  %1200 = vmatpush1.bf16.msra.mxu0 %v10786_v47  ;;  %v10849_v47 = vld [vmem:[%s16863_s14 + $0xb0] sm:$0xff]  }
 0x111   :  { %1241 = vmatpush1.bf16.msra.mxu1 %v10789_v49  ;;  %1297 = vrot.lane.b32.xlu1 %v12712_v34, %s12340_s26  ;;  %v10851_v49 = vld [vmem:[%s16863_s14 + $0xf8] sm:$0xff]  }
 0x112   :  { %1201 = vmatprep.subr.bf16.mxu0 %v10792_v51  ;;  %1242 = vmatprep.subr.bf16.mxu1 %v12337_v21  ;;  %v10853_v51 = vld [vmem:[%s16863_s14 + $0xb8] sm:$0xff]  }
 0x114   :  { %1202 = vmatpush1.bf16.msra.mxu0 %v10790_v52  ;;  %v10854_v52 = vld [vmem:[%s16863_s14 + $0x140] sm:$0xff]  }
 0x115   :  { %1243 = vmatpush1.bf16.msra.mxu1 %v10793_v54  ;;  %2111 = vrot.lane.b32.xlu1 %v12764_v53, %s16885_s0  ;;  %v12341_v54 = vmov 0.0  }
 0x116   :  { %1203 = vmatprep.subr.bf16.mxu0 %v10796_v55  ;;  %1244 = vmatprep.subr.bf16.mxu1 %v12337_v21 }
 0x118   :  { %1204 = vmatpush1.bf16.msra.mxu0 %v10794_v56 }
 0x119   :  { %1245 = vmatpush1.bf16.msra.mxu1 %v10797_v57  ;;  %1205 = vmatprep.subr.bf16.mxu0 %v10800_v58 }
 0x11a   :  { %1246 = vmatprep.subr.bf16.mxu1 %v12337_v21  ;;  %2106 = vrot.lane.b32.xlu1 %v12764_v53, %s12340_s26 }
 0x11c   :  { %1206 = vmatpush1.bf16.msra.mxu0 %v10798_v59 }
 0x11d   :  { %1247 = vmatpush1.bf16.msra.mxu1 %v10801_v60  ;;  %1207 = vmatprep.subr.bf16.mxu0 %v10804_v61 }
 0x11e   :  { %1248 = vmatprep.subr.bf16.mxu1 %v12337_v21  ;;  %2116 = vrot.lane.b32.xlu1 %v12764_v53, %s16883_s13 }
 0x120   :  { %1208 = vmatpush1.bf16.msra.mxu0 %v10802_v62 }
 0x121   :  { %1249 = vmatpush1.bf16.msra.mxu1 %v10805_v63  ;;  %1209 = vmatprep.subr.bf16.mxu0 %v10808_v0 }
 0x122   :  { %1250 = vmatprep.subr.bf16.mxu1 %v12337_v21 }
 0x124   :  { %1210 = vmatpush1.bf16.msra.mxu0 %v10806_v1 }
 0x125   :  { %1251 = vmatpush1.bf16.msra.mxu1 %v10809_v2  ;;  %1211 = vmatprep.subr.bf16.mxu0 %v10812_v3 }
 0x126   :  { %1252 = vmatprep.subr.bf16.mxu1 %v12337_v21 }
 0x128   :  { %1212 = vmatpush1.bf16.msra.mxu0 %v10810_v4 }
 0x129   :  { %1253 = vmatpush1.bf16.msra.mxu1 %v10813_v5  ;;  %1213 = vmatprep.subr.bf16.mxu0 %v10816_v6 }
 0x12a   :  { %1254 = vmatprep.subr.bf16.mxu1 %v12337_v21 }
 0x12c   :  { %1214 = vmatpush1.bf16.msra.mxu0 %v10814_v7 }
 0x12d   :  { %1255 = vmatpush1.bf16.msra.mxu1 %v10817_v8  ;;  %1215 = vmatprep.subr.bf16.mxu0 %v10820_v9 }
 0x12e   :  { %1256 = vmatprep.subr.bf16.mxu1 %v12337_v21 }
 0x130   :  { %1216 = vmatpush1.bf16.msra.mxu0 %v10818_v10 }
 0x131   :  { %1257 = vmatpush1.bf16.msra.mxu1 %v10821_v11  ;;  %10444 = vmatprep.subr.bf16.mxu0 %v10822_v12 }
 0x132   :  { %10466 = vmatprep.subr.bf16.mxu1 %v10823_v13 }
 0x133   :  { %1230 = vmatmul.mubr.bf16.vlgmr.msra.gmra.mrb[8].mxu0 %v12728_v45 }
 0x134   :  { %1271 = vmatmul.mubr.bf16.vlgmr.msra.gmra.mrb[8].mxu1 %v12728_v45  ;;  %10445 = vmatpush3.bf16.msra.mxu0 %v10824_v14  ;;  %v10848_v45 = vld [vmem:[%s16863_s14 + $0x30] sm:$0xff]   ;;  %v10855_v14 = vld [vmem:[%s16863_s14 + $0x100] sm:$0xff]  }
 0x135   :  { %10467 = vmatpush3.bf16.msra.mxu1 %v10825_v15  ;;  %10446 = vmatprep.subr.bf16.mxu0 %v10826_v16 }
 0x136   :  { %10468 = vmatprep.subr.bf16.mxu1 %v10827_v17  ;;  %v10866_v17 = vld [vmem:[%s16863_s14 + $0x180] sm:$0xff]  }
 0x138   :  { %10447 = vmatpush3.bf16.msra.mxu0 %v10828_v18 }
 0x139   :  { %10469 = vmatpush3.bf16.msra.mxu1 %v10829_v19  ;;  %10448 = vmatprep.subr.bf16.mxu0 %v10830_v20  ;;  %v10857_v19 = vld [vmem:[%s16863_s14 + $0x108] sm:$0xff]   ;;  %v10858_v20 = vld [vmem:[%s16863_s14 + $0x150] sm:$0xff]  }
 0x13a   :  { %10470 = vmatprep.subr.bf16.mxu1 %v10831_v22  ;;  %v10869_v22 = vld [vmem:[%s16863_s14 + $0x188] sm:$0xff]  }
 0x13c   :  { %10449 = vmatpush3.bf16.msra.mxu0 %v10832_v26  ;;  %v10859_v26 = vld [vmem:[%s16863_s14 + $0x110] sm:$0xff]  }
 0x13d   :  { %10471 = vmatpush3.bf16.msra.mxu1 %v10833_v28  ;;  %10450 = vmatprep.subr.bf16.mxu0 %v10834_v29  ;;  %v10860_v28 = vld [vmem:[%s16863_s14 + $0x158] sm:$0xff]  }
 0x13e   :  { %10472 = vmatprep.subr.bf16.mxu1 %v10835_v30  ;;  %v10861_v29 = vld [vmem:[%s16863_s14 + $0x118] sm:$0xff]   ;;  %v10862_v30 = vld [vmem:[%s16863_s14 + $0x160] sm:$0xff]  }
 0x140   :  { %10451 = vmatpush3.bf16.msra.mxu0 %v10836_v31  ;;  %v10863_v31 = vld [vmem:[%s16863_s14 + $0x120] sm:$0xff]  }
 0x141   :  { %10473 = vmatpush3.bf16.msra.mxu1 %v10837_v32  ;;  %10452 = vmatprep.subr.bf16.mxu0 %v10838_v33  ;;  %v10864_v32 = vld [vmem:[%s16863_s14 + $0x168] sm:$0xff]  }
 0x142   :  { %10474 = vmatprep.subr.bf16.mxu1 %v10839_v35  ;;  %v10865_v33 = vld [vmem:[%s16863_s14 + $0x128] sm:$0xff]   ;;  %v10867_v35 = vld [vmem:[%s16863_s14 + $0x170] sm:$0xff]  }
 0x144   :  { %10453 = vmatpush3.bf16.msra.mxu0 %v10840_v36  ;;  %v10868_v36 = vld [vmem:[%s16863_s14 + $0x130] sm:$0xff]  }
 0x145   :  { %10475 = vmatpush3.bf16.msra.mxu1 %v10841_v38  ;;  %10454 = vmatprep.subr.bf16.mxu0 %v10842_v39  ;;  %v10870_v38 = vld [vmem:[%s16863_s14 + $0x178] sm:$0xff]  }
 0x146   :  { %10476 = vmatprep.subr.bf16.mxu1 %v10843_v40  ;;  %v10871_v39 = vld [vmem:[%s16863_s14 + $0x138] sm:$0xff]  }
 0x148   :  { %10455 = vmatpush3.bf16.msra.mxu0 %v10844_v41 }
 0x149   :  { %10477 = vmatpush3.bf16.msra.mxu1 %v10845_v42  ;;  %10456 = vmatprep.subr.bf16.mxu0 %v10846_v43 }
 0x14a   :  { %10478 = vmatprep.subr.bf16.mxu1 %v10847_v44 }
 0x14c   :  { %10457 = vmatpush3.bf16.msra.mxu0 %v10848_v45 }
 0x14d   :  { %10479 = vmatpush3.bf16.msra.mxu1 %v10849_v47  ;;  %10458 = vmatprep.subr.bf16.mxu0 %v10850_v48 }
 0x14e   :  { %10480 = vmatprep.subr.bf16.mxu1 %v10851_v49 }
 0x150   :  { %10459 = vmatpush3.bf16.msra.mxu0 %v10852_v50 }
 0x151   :  { %10481 = vmatpush3.bf16.msra.mxu1 %v10853_v51  ;;  %10488 = vmatprep.subr.bf16.mxu0 %v10854_v52 }
 0x152   :  { %10592 = vmatprep.subr.bf16.mxu1 %v12341_v54 }
 0x179   :  { %v12948_v55 = vpop.permute.xlu0 %1282 }
 0x17a   :  { %v1289_v56 = vpop.permute.xlu1 %1288  ;;  %v1303_v3 = vsel %vm664_vm0, %v12948_v55, %v12714_v37  ;;  %v10856_v37 = vld [vmem:[%s16863_s14 + $0x148] sm:$0xff]  }
 0x17b   :  { %v1304_v1 = vsel %vm1299_vm2, %v12712_v34, %v1289_v56 }
 0x17d   :  { %v1281_v57 = vpop.permute.xlu0 %1280 }
 0x17e   :  { %v12956_v61 = vsel %vm1284_vm1, %v1281_v57, %v12948_v55 }
 0x17f   :  { %v12950_v58 = vpop.permute.xlu1 %1290 }
 0x180   :  { %v1292_v62 = vsel %vm664_vm0, %v1289_v56, %v12950_v58 }
 0x182   :  { %v12952_v59 = vpop.permute.xlu0 %1295 }
 0x183   :  { %v1305_v7 = vsel %vm1284_vm1, %v1292_v62, %v12952_v59  ;;  %v13022_v40 = vpop.permute.xlu1 %1297 }
 0x184   :  { %v1300_v42 = vsel %vm1299_vm2, %v12952_v59, %v13022_v40 }
 0x1de   :  { %v1149_v60 = vpop.f32.mrb[4].mxu0 }
 0x1df   :  { %v1306_v63 = vmul.f32 %v12956_v61, %v1149_v60  ;;  %v1190_v0 = vpop.f32.mrb[4].mxu1  ;;  %v1151_v2 = vpop.f32.mrb[5].mxu0 }
 0x1e0   :  { %v1308_v4 = vmul.f32 %v1304_v1, %v1190_v0  ;;  %v1307_v5 = vmul.f32 %v1303_v3, %v1151_v2  ;;  %v1192_v6 = vpop.f32.mrb[5].mxu1  ;;  %v1153_v8 = vpop.f32.mrb[6].mxu0 }
 0x1e1   :  { %v1309_v9 = vmul.f32 %v1305_v7, %v1192_v6  ;;  %v1194_v10 = vpop.f32.mrb[6].mxu1  ;;  %v1154_v11 = vpop.f32.mrb[7].mxu0  ;;  %v1313_v15 = vpack.c.bf16 %v1306_v63, %v1306_v63 }
 0x1e2   :  { %v1314_v12 = vpack.c.bf16 %v1307_v5, %v1307_v5  ;;  %v1195_v13 = vpop.f32.mrb[7].mxu1  ;;  %v1315_v18 = vpack.c.bf16 %v1308_v4, %v1308_v4 }
 0x1e3   :  { %v1316_v16 = vpack.c.bf16 %v1309_v9, %v1309_v9 }
 0x1e4   :  { %1655 = vmatprep.mubr.bf16.mxu0 %v1314_v12 }
 0x1e5   :  { %1695 = vmatprep.mubr.bf16.mxu1 %v1316_v16  ;;  %1656 = vmatmul.mubr.bf16.vlgmr.msra.gmra.mrb[12].mxu0 %v1313_v15 }
 0x1e6   :  { %1696 = vmatmul.mubr.bf16.vlgmr.msra.gmra.mrb[12].mxu1 %v1315_v18  ;;  %10489 = vmatpush3.bf16.msra.mxu0 %v10855_v14 }
 0x1e7   :  { %10490 = vmatprep.subr.bf16.mxu0 %v10856_v37  ;;  %10593 = vmatpush3.bf16.msra.mxu1 %v10866_v17 }
 0x1e8   :  { %10594 = vmatprep.subr.bf16.mxu1 %v12341_v54  ;;  %10596 = vmatprep.mubr.msk.bf16.mxu1 %vm12342_vm3, %v12341_v54 }
 0x1ea   :  { %10491 = vmatpush3.bf16.msra.mxu0 %v10857_v19  ;;  %v10874_v19 = vld [vmem:[%s16864_s15 + $0x4] ss:$28 sps:$4 sm:$0xff]  }
 0x1eb   :  { %10492 = vmatprep.subr.bf16.mxu0 %v10858_v20  ;;  %10595 = vmatpush3.bf16.msra.mxu1 %v10869_v22  ;;  %v10872_v20 = vld [vmem:[%s16864_s15] ss:$28 sps:$4 sm:$0xff]   ;;  %v10875_v22 = vld [vmem:[%s16864_s15 + $0x8] ss:$28 sps:$4 sm:$0xff]  }
 0x1ee   :  { %10493 = vmatpush3.bf16.msra.mxu0 %v10859_v26  ;;  %v10877_v26 = vld [vmem:[%s16864_s15 + $0xc] ss:$28 sps:$4 sm:$0xff]  }
 0x1ef   :  { %10494 = vmatprep.subr.bf16.mxu0 %v10860_v28  ;;  %1983 = vmatprep.subr.bf16.mxu1 %v10877_v26  ;;  %v10880_v28 = vld [vmem:[%s16864_s15 + $0x3c] ss:$28 sps:$4 sm:$0xff]  }
 0x1f0   :  { %v10931_v26 = vld [vmem:[%s16866_s17 + $0x34] ss:$8 sps:$4 sm:$0xff]  }
 0x1f2   :  { %10495 = vmatpush3.bf16.msra.mxu0 %v10861_v29  ;;  %v10883_v29 = vld [vmem:[%s16864_s15 + $0x44] ss:$28 sps:$4 sm:$0xff]  }
 0x1f3   :  { %10496 = vmatprep.subr.bf16.mxu0 %v10862_v30  ;;  %v10878_v30 = vld [vmem:[%s16864_s15 + $0x38] ss:$28 sps:$4 sm:$0xff]  }
 0x1f6   :  { %10497 = vmatpush3.bf16.msra.mxu0 %v10863_v31  ;;  %v10881_v31 = vld [vmem:[%s16864_s15 + $0x40] ss:$28 sps:$4 sm:$0xff]  }
 0x1f7   :  { %10498 = vmatprep.subr.bf16.mxu0 %v10864_v32  ;;  %v10886_v32 = vld [vmem:[%s16864_s15 + $0x74] ss:$28 sps:$4 sm:$0xff]  }
 0x1fa   :  { %10499 = vmatpush3.bf16.msra.mxu0 %v10865_v33  ;;  %v10889_v33 = vld [vmem:[%s16864_s15 + $0x7c] ss:$28 sps:$4 sm:$0xff]  }
 0x1fb   :  { %10500 = vmatprep.subr.bf16.mxu0 %v10867_v35  ;;  %v10884_v35 = vld [vmem:[%s16864_s15 + $0x70] ss:$28 sps:$4 sm:$0xff]  }
 0x1fe   :  { %10501 = vmatpush3.bf16.msra.mxu0 %v10868_v36  ;;  %v10887_v36 = vld [vmem:[%s16864_s15 + $0x78] ss:$28 sps:$4 sm:$0xff]  }
 0x1ff   :  { %10502 = vmatprep.subr.bf16.mxu0 %v10870_v38  ;;  %v267_v38 = vld [vmem:[%s16864_s15 + $0xa8] sm:$0x11] }
 0x202   :  { %10503 = vmatpush3.bf16.msra.mxu0 %v10871_v39  ;;  %v268_v39 = vld [vmem:[%s16864_s15 + $0xb0] sm:$0x11] }
 0x203   :  { %1942 = vmatprep.subr.bf16.mxu0 %v10874_v19 }
 0x206   :  { %v1231_v41 = vpop.f32.mrb[8].mxu0 }
 0x207   :  { %v1310_v43 = vmul.f32 %v1300_v42, %v1231_v41  ;;  %v1272_v44 = vpop.f32.mrb[8].mxu1  ;;  %v1233_v45 = vpop.f32.mrb[9].mxu0  ;;  %v13075_v41 = vcombine.high %v267_v38, %v267_v38  ;;  %v13077_v42 = vcombine.high %v268_v39, %v268_v39 }
 0x208   :  { %v1312_v47 = vmul.f32 %v12948_v55, %v1272_v44  ;;  %v1311_v48 = vmul.f32 %v12956_v61, %v1233_v45  ;;  %v1274_v49 = vpop.f32.mrb[9].mxu1  ;;  %v1235_v50 = vpop.f32.mrb[10].mxu0  ;;  %v9335_v44 = vcombine.low %v268_v39, %v268_v39  ;;  %v10941_v39 = vld [vmem:[%s16866_s17 + $0x70] ss:$8 sps:$4 sm:$0xff]  }
 0x209   :  { %v1275_v51 = vpop.f32.mrb[10].mxu1  ;;  %v1236_v52 = vpop.f32.mrb[11].mxu0  ;;  %v1317_v62 = vpack.c.bf16 %v1310_v43, %v1310_v43  ;;  %v9333_v43 = vcombine.low %v267_v38, %v267_v38  ;;  %v10943_v38 = vld [vmem:[%s16866_s17 + $0x74] ss:$8 sps:$4 sm:$0xff]  }
 0x20a   :  { %v1319_v56 = vpack.c.bf16 %v1312_v47, %v1312_v47  ;;  %v1318_v57 = vpack.c.bf16 %v1311_v48, %v1311_v48  ;;  %v1276_v60 = vpop.f32.mrb[11].mxu1  ;;  %v13087_v47 = vsel %vm1920_vm5, %v9335_v44, 0  ;;  %v10896_v48 = vld [vmem:[%s16864_s15 + $0x14] ss:$28 sps:$4 sm:$0xff]   ;;  %v10944_v44 = vld [vmem:[%s16866_s17 + $0x80] ss:$8 sps:$4 sm:$0xff]  }
 0x20b   :  { %v13084_v45 = vsel %vm1920_vm5, %v9333_v43, 0  ;;  %v10946_v43 = vld [vmem:[%s16866_s17 + $0x84] ss:$8 sps:$4 sm:$0xff]  }
 0x20c   :  { %10597 = vmatmul.mubr.msk.bf16.vlgmr.msra.gmra.mrb[16].mxu1 %vm664_vm0, %v1319_v56  ;;  %1735 = vmatprep.mubr.bf16.mxu0 %v1318_v57  ;;  %v10894_v56 = vld [vmem:[%s16864_s15 + $0x10] ss:$28 sps:$4 sm:$0xff]   ;;  %v10897_v57 = vld [vmem:[%s16864_s15 + $0x18] ss:$28 sps:$4 sm:$0xff]  }
 0x20d   :  { %1736 = vmatmul.mubr.bf16.vlgmr.msra.gmra.mrb[16].mxu0 %v1317_v62  ;;  %2015 = vmatprep.mubr.bf16.mxu1 %v12337_v21  ;;  %v10900_v62 = vld [vmem:[%s16864_s15 + $0x4c] ss:$28 sps:$4 sm:$0xff]  }
 0x20e   :  { %1974 = vmatprep.mubr.bf16.mxu0 %v12337_v21  ;;  %1943 = vmatpush1.bf16.msra.mxu0 %v10872_v20 }
 0x20f   :  { %1984 = vmatpush1.bf16.msra.mxu1 %v10875_v22  ;;  %1944 = vmatprep.subr.bf16.mxu0 %v10880_v28  ;;  %v10926_v22 = vld [vmem:[%s16866_s17 + $0x20] ss:$8 sps:$4 sm:$0xff]  }
 0x210   :  { %1985 = vmatprep.subr.bf16.mxu1 %v10883_v29  ;;  %v10929_v29 = vld [vmem:[%s16866_s17 + $0x30] ss:$8 sps:$4 sm:$0xff]  }
 0x212   :  { %1945 = vmatpush1.bf16.msra.mxu0 %v10878_v30  ;;  %v10934_v30 = vld [vmem:[%s16866_s17 + $0x44] ss:$8 sps:$4 sm:$0xff]  }
 0x213   :  { %1986 = vmatpush1.bf16.msra.mxu1 %v10881_v31  ;;  %1946 = vmatprep.subr.bf16.mxu0 %v10886_v32  ;;  %v10932_v31 = vld [vmem:[%s16866_s17 + $0x40] ss:$8 sps:$4 sm:$0xff]   ;;  %v10937_v32 = vld [vmem:[%s16866_s17 + $0x54] ss:$8 sps:$4 sm:$0xff]  }
 0x214   :  { %1987 = vmatprep.subr.bf16.mxu1 %v10889_v33  ;;  %v10935_v33 = vld [vmem:[%s16866_s17 + $0x50] ss:$8 sps:$4 sm:$0xff]  }
 0x216   :  { %1947 = vmatpush1.bf16.msra.mxu0 %v10884_v35  ;;  %v10940_v35 = vld [vmem:[%s16866_s17 + $0x64] ss:$8 sps:$4 sm:$0xff]  }
 0x217   :  { %1988 = vmatpush1.bf16.msra.mxu1 %v10887_v36  ;;  %9340 = vmatprep.subr.msk.bf16.mxu0 %vm1920_vm5, %v13075_v41  ;;  %v10938_v36 = vld [vmem:[%s16866_s17 + $0x60] ss:$8 sps:$4 sm:$0xff]  }
 0x218   :  { %9342 = vmatprep.subr.msk.bf16.mxu1 %vm1920_vm5, %v13077_v42 }
 0x21a   :  { %1949 = vmatpush1.bf16.msra.mxu0 %v13084_v45 }
 0x21b   :  { %1990 = vmatpush1.bf16.msra.mxu1 %v13087_v47  ;;  %2024 = vmatprep.subr.bf16.mxu0 %v10896_v48  ;;  %v10949_v48 = vld [vmem:[%s16866_s17 + $0x94] ss:$8 sps:$4 sm:$0xff]  }
 0x21c   :  { %10600 = vmatprep.subr.bf16.mxu1 %v12341_v54 }
 0x2b8   :  { %v10460_v59 = vpop.f32.mrb[12].mxu0 }
 0x2b9   :  { %v10482_v63 = vpop.f32.mrb[12].mxu1  ;;  %v10461_v0 = vpop.f32.mrb[13].mxu0 }
 0x2ba   :  { %v10462_v61 = vadd.f32 %v10461_v0, %v10460_v59  ;;  %v10483_v1 = vpop.f32.mrb[13].mxu1  ;;  %v10463_v2 = vpop.f32.mrb[14].mxu0  ;;  %v10898_v59 = vld [vmem:[%s16864_s15 + $0x48] ss:$28 sps:$4 sm:$0xff]  }
 0x2bb   :  { %v10484_v3 = vadd.f32 %v10483_v1, %v10482_v63  ;;  %v10485_v4 = vpop.f32.mrb[14].mxu1  ;;  %v10464_v5 = vpop.f32.mrb[15].mxu0  ;;  %v10901_v63 = vld [vmem:[%s16864_s15 + $0x50] ss:$28 sps:$4 sm:$0xff]   ;;  %v10904_v0 = vld [vmem:[%s16864_s15 + $0x84] ss:$28 sps:$4 sm:$0xff]  }
 0x2bc   :  { %v10486_v6 = vpop.f32.mrb[15].mxu1  ;;  %v10902_v1 = vld [vmem:[%s16864_s15 + $0x80] ss:$28 sps:$4 sm:$0xff]   ;;  %v10905_v2 = vld [vmem:[%s16864_s15 + $0x88] ss:$28 sps:$4 sm:$0xff]  }
 0x2bd   :  { %v1698_v7 = vadd.f32 %v10484_v3, %v10462_v61  ;;  %v269_v61 = vld [vmem:[%s16864_s15 + $0xb8] sm:$0x11]  ;;  %v10908_v5 = vld [vmem:[%s16864_s15 + $0xc0] ss:$0 sps:$4 sm:$0x11]  }
 0x2be   :  { %v13133_v3 = vcombine.high %v269_v61, %v269_v61  ;;  %v9337_v4 = vcombine.low %v269_v61, %v269_v61  ;;  %v10967_v61 = vld [vmem:[%s16866_s17 + $0xf4] ss:$8 sps:$4 sm:$0xff]  }
 0x2c0   :  { %v13142_v6 = vsel %vm1920_vm5, %v9337_v4, 0  ;;  %v2112_v4 = vpop.permute.xlu1 %2111 }
 0x2df   :  { %v1777_v8 = vpop.f32.mrb[16].mxu1 }
 0x2e0   :  { %v10598_v9 = vpop.f32.mrb[17].mxu1  ;;  %v10504_v10 = vpop.f32.mrb[16].mxu0 }
 0x2e1   :  { %v1780_v11 = vpop.f32.mrb[18].mxu1  ;;  %v10505_v12 = vpop.f32.mrb[17].mxu0  ;;  %v10922_v9 = vld [vmem:[%s16866_s17 + $0x4] ss:$8 sps:$4 sm:$0xff]  }
 0x2e2   :  { %v10506_v13 = vadd.f32 %v10505_v12, %v10504_v10  ;;  %v10599_v14 = vpop.f32.mrb[19].mxu1  ;;  %v10507_v15 = vpop.f32.mrb[18].mxu0  ;;  %v10909_v10 = vld [vmem:[%s16865_s16] ss:$8 sps:$4 sm:$0xff]   ;;  %v10914_v11 = vld [vmem:[%s16865_s16 + $0x14] ss:$8 sps:$4 sm:$0xff]  }
 0x2e3   :  { %v10508_v16 = vpop.f32.mrb[19].mxu0  ;;  %v10920_v12 = vld [vmem:[%s16866_s17] ss:$8 sps:$4 sm:$0xff]   ;;  %v10912_v14 = vld [vmem:[%s16865_s16 + $0x10] ss:$8 sps:$4 sm:$0xff]  }
 0x2e4   :  { %v1738_v37 = vadd.f32 %v10506_v13, %v1698_v7  ;;  %v13145_v7 = vsel %vm1920_vm5, %v10908_v5, 0  ;;  %v10925_v13 = vld [vmem:[%s16866_s17 + $0x14] ss:$8 sps:$4 sm:$0xff]   ;;  %v10917_v15 = vld [vmem:[%s16865_s16 + $0x24] ss:$8 sps:$4 sm:$0xff]   ;;  %v2113_v5 = vsel %vm1284_vm1, %v12948_v55, %v2112_v4  ;;  %v2123_v55 = vsel %vm1284_vm1, %v12764_v53, %v12950_v58 }
 0x2e5   :  { %v10923_v16 = vld [vmem:[%s16866_s17 + $0x10] ss:$8 sps:$4 sm:$0xff]  }
 0x2e6   :  { %v1778_v17 = vadd.f32 %v1777_v8, %v1738_v37  ;;  %v10911_v8 = vld [vmem:[%s16865_s16 + $0x4] ss:$8 sps:$4 sm:$0xff]   ;;  %v277_v37 = vld [vmem:[%s16865_s16 + $0x30] sm:$0x11] }
 0x2e7   :  { %v13190_v19 = vcombine.high %v277_v37, %v277_v37  ;;  %v9454_v20 = vcombine.low %v277_v37, %v277_v37  ;;  %v10971_v53 = vld [vmem:[%s16866_s17 + $0x110] ss:$8 sps:$4 sm:$0xff]  }
 0x2e8   :  { %v1784_v18 = vsel %vm1783_vm4, %v1778_v17, -inf }
 0x2e9   :  { %1785 = vmax.xlane.f32.xlu0 %v1784_v18  ;;  %v10915_v18 = vld [vmem:[%s16865_s16 + $0x20] ss:$8 sps:$4 sm:$0xff]   ;;  %v13201_v28 = vsel %vm1920_vm5, %v9454_v20, 0 }
 0x376   :  { %v1786_v49 = vpop.xlane.xlu0 %1785 }
 0x377   :  { %v1787_v50 = vsub.f32 %v1778_v17, %v1786_v49  ;;  %v10928_v17 = vld [vmem:[%s16866_s17 + $0x24] ss:$8 sps:$4 sm:$0xff]   ;;  %v10947_v49 = vld [vmem:[%s16866_s17 + $0x90] ss:$8 sps:$4 sm:$0xff]  }
 0x379   :  { %v1788_v51 = vmul.f32 1.442695, %v1787_v50  ;;  %v10952_v50 = vld [vmem:[%s16866_s17 + $0xa4] ss:$8 sps:$4 sm:$0xff]  }
 0x37b   :  { %12000 = vpow2.f32 %v1788_v51  ;;  %v10950_v51 = vld [vmem:[%s16866_s17 + $0xa0] ss:$8 sps:$4 sm:$0xff]  }
 0x385   :  { %v12001_v52 = vpop.eup %12000 }
 0x386   :  { %v13101_v60 = vpack.c.bf16 %v12001_v52, %v12001_v52  ;;  %v10955_v52 = vld [vmem:[%s16866_s17 + $0xb4] ss:$8 sps:$4 sm:$0xff]  }
 0x388   :  { %9341 = vmatmul.mubr.msk.bf16.vlgmr.msra.gmra.mrb[20].mxu0 %vm1783_vm4, %v13101_v60  ;;  %9343 = vmatmul.mubr.msk.bf16.vlgmr.msra.gmra.mrb[20].mxu1 %vm1783_vm4, %v13101_v60 }
 0x389   :  { %2025 = vmatpush1.bf16.msra.mxu0 %v10894_v56  ;;  %10601 = vmatpush3.bf16.msra.mxu1 %v10897_v57  ;;  %v10953_v56 = vld [vmem:[%s16866_s17 + $0xb0] ss:$8 sps:$4 sm:$0xff]   ;;  %v10958_v57 = vld [vmem:[%s16866_s17 + $0xc4] ss:$8 sps:$4 sm:$0xff]  }
 0x38a   :  { %2026 = vmatprep.subr.bf16.mxu0 %v10900_v62  ;;  %10602 = vmatprep.subr.bf16.mxu1 %v12341_v54  ;;  %v10961_v62 = vld [vmem:[%s16866_s17 + $0xd4] ss:$8 sps:$4 sm:$0xff]  }
 0x38b   :  { %2056 = vmatprep.mubr.bf16.mxu0 %v12337_v21  ;;  %10608 = vmatprep.mubr.msk.bf16.mxu1 %vm12342_vm3, %v12341_v54 }
 0x38d   :  { %2027 = vmatpush1.bf16.msra.mxu0 %v10898_v59  ;;  %10603 = vmatpush3.bf16.msra.mxu1 %v10901_v63  ;;  %v10959_v59 = vld [vmem:[%s16866_s17 + $0xd0] ss:$8 sps:$4 sm:$0xff]   ;;  %v10964_v63 = vld [vmem:[%s16866_s17 + $0xe4] ss:$8 sps:$4 sm:$0xff]  }
 0x38e   :  { %2028 = vmatprep.subr.bf16.mxu0 %v10904_v0  ;;  %10604 = vmatprep.subr.bf16.mxu1 %v12341_v54  ;;  %v10962_v0 = vld [vmem:[%s16866_s17 + $0xe0] ss:$8 sps:$4 sm:$0xff]  }
 0x391   :  { %2029 = vmatpush1.bf16.msra.mxu0 %v10902_v1  ;;  %10605 = vmatpush3.bf16.msra.mxu1 %v10905_v2  ;;  %v10965_v1 = vld [vmem:[%s16866_s17 + $0xf0] ss:$8 sps:$4 sm:$0xff]   ;;  %v10970_v2 = vld [vmem:[%s16866_s17 + $0x104] ss:$8 sps:$4 sm:$0xff]  }
 0x392   :  { %9344 = vmatprep.subr.msk.bf16.mxu0 %vm1920_vm5, %v13133_v3  ;;  %10606 = vmatprep.subr.bf16.mxu1 %v12341_v54 }
 0x395   :  { %2031 = vmatpush1.bf16.msra.mxu0 %v13142_v6  ;;  %10607 = vmatpush3.bf16.msra.mxu1 %v13145_v7 }
 0x396   :  { %2846 = vmatprep.subr.bf16.mxu1 %v10911_v8  ;;  %2641 = vmatprep.subr.bf16.mxu0 %v10922_v9  ;;  %v13286_v8 = vpop.permute.xlu1 %2106 }
 0x398   :  { %9345 = vmatmul.mubr.msk.bf16.vlgmr.msra.gmra.mrb[24].mxu0 %vm1783_vm4, %v13101_v60  ;;  %10609 = vmatmul.mubr.msk.bf16.vlgmr.msra.gmra.mrb[24].mxu1 %vm1783_vm4, %v13101_v60 }
 0x399   :  { %2847 = vmatpush1.bf16.msra.mxu1 %v10909_v10  ;;  %2878 = vmatprep.mubr.bf16.mxu1 %v12337_v21  ;;  %v2108_v10 = vsel %vm1299_vm2, %v13022_v40, %v13286_v8 }
 0x39a   :  { %2848 = vmatprep.subr.bf16.mxu1 %v10914_v11  ;;  %2642 = vmatpush1.bf16.msra.mxu0 %v10920_v12  ;;  %v2122_v12 = vsel %vm1299_vm2, %v2112_v4, %v12712_v34  ;;  %v10968_v34 = vld [vmem:[%s16866_s17 + $0x100] ss:$8 sps:$4 sm:$0xff]   ;;  %v10988_v4 = vld [vmem:[%s16866_s17 + $0x164] ss:$8 sps:$4 sm:$0xff]  }
 0x39b   :  { %2643 = vmatprep.subr.bf16.mxu0 %v10925_v13 }
 0x39d   :  { %2849 = vmatpush1.bf16.msra.mxu1 %v10912_v14 }
 0x39e   :  { %2850 = vmatprep.subr.bf16.mxu1 %v10917_v15  ;;  %2644 = vmatpush1.bf16.msra.mxu0 %v10923_v16  ;;  %v2121_v16 = vsel %vm664_vm0, %v13286_v8, %v2113_v5  ;;  %v11073_v5 = vld [vmem:[%s16867_s3 + $0x10] ss:$8 sps:$4 sm:$0xff]  }
 0x39f   :  { %2645 = vmatprep.subr.bf16.mxu0 %v10928_v17 }
 0x3a1   :  { %2851 = vmatpush1.bf16.msra.mxu1 %v10915_v18 }
 0x3a2   :  { %9456 = vmatprep.subr.msk.bf16.mxu1 %vm1920_vm5, %v13190_v19  ;;  %2646 = vmatpush1.bf16.msra.mxu0 %v10926_v22 }
 0x3a3   :  { %2647 = vmatprep.subr.bf16.mxu0 %v10931_v26 }
 0x3a5   :  { %2853 = vmatpush1.bf16.msra.mxu1 %v13201_v28 }
 0x3a6   :  { %2648 = vmatpush1.bf16.msra.mxu0 %v10929_v29 }
 0x3a7   :  { %2649 = vmatprep.subr.bf16.mxu0 %v10934_v30 }
 0x3a8   :  { %9457 = vmatmul.mubr.msk.bf16.vlgmr.msra.gmra.mrb[28].mxu1 %vm1783_vm4, %v13101_v60  ;;  %v10956_v60 = vld [vmem:[%s16866_s17 + $0xc0] ss:$8 sps:$4 sm:$0xff]  }
 0x3aa   :  { %2650 = vmatpush1.bf16.msra.mxu0 %v10932_v31  ;;  %v10973_v31 = vld [vmem:[%s16866_s17 + $0x114] ss:$8 sps:$4 sm:$0xff]  }
 0x3ab   :  { %2651 = vmatprep.subr.bf16.mxu0 %v10937_v32 }
 0x3ae   :  { %2652 = vmatpush1.bf16.msra.mxu0 %v10935_v33  ;;  %v10976_v33 = vld [vmem:[%s16866_s17 + $0x124] ss:$8 sps:$4 sm:$0xff]  }
 0x3af   :  { %2653 = vmatprep.subr.bf16.mxu0 %v10940_v35  ;;  %v10974_v35 = vld [vmem:[%s16866_s17 + $0x120] ss:$8 sps:$4 sm:$0xff]  }
 0x3b2   :  { %2654 = vmatpush1.bf16.msra.mxu0 %v10938_v36  ;;  %v2117_v36 = vpop.permute.xlu1 %2116 }
 0x3b3   :  { %2655 = vmatprep.subr.bf16.mxu0 %v10943_v38  ;;  %v10979_v38 = vld [vmem:[%s16866_s17 + $0x134] ss:$8 sps:$4 sm:$0xff]  }
 0x3b6   :  { %2656 = vmatpush1.bf16.msra.mxu0 %v10941_v39 }
 0x3b7   :  { %2657 = vmatprep.subr.bf16.mxu0 %v10946_v43  ;;  %v2118_v43 = vsel %vm664_vm0, %v12950_v58, %v2117_v36  ;;  %v11003_v36 = vld [vmem:[%s16866_s17 + $0x1b4] ss:$8 sps:$4 sm:$0xff]  }
 0x3ba   :  { %2658 = vmatpush1.bf16.msra.mxu0 %v10944_v44 }
 0x3bb   :  { %2659 = vmatprep.subr.bf16.mxu0 %v10949_v48  ;;  %v10977_v48 = vld [vmem:[%s16866_s17 + $0x130] ss:$8 sps:$4 sm:$0xff]  }
 0x3be   :  { %2660 = vmatpush1.bf16.msra.mxu0 %v10947_v49 }
 0x3bf   :  { %2661 = vmatprep.subr.bf16.mxu0 %v10952_v50 }
 0x3c2   :  { %2662 = vmatpush1.bf16.msra.mxu0 %v10950_v51 }
 0x3c3   :  { %2663 = vmatprep.subr.bf16.mxu0 %v10955_v52  ;;  %v10982_v52 = vld [vmem:[%s16866_s17 + $0x144] ss:$8 sps:$4 sm:$0xff]  }
 0x3c6   :  { %2664 = vmatpush1.bf16.msra.mxu0 %v10953_v56 }
 0x3c7   :  { %2665 = vmatprep.subr.bf16.mxu0 %v10958_v57 }
 0x3ca   :  { %2666 = vmatpush1.bf16.msra.mxu0 %v10956_v60 }
 0x3cb   :  { %2667 = vmatprep.subr.bf16.mxu0 %v10961_v62 }
 0x3ce   :  { %2668 = vmatpush1.bf16.msra.mxu0 %v10959_v59  ;;  %v10980_v59 = vld [vmem:[%s16866_s17 + $0x140] ss:$8 sps:$4 sm:$0xff]  }
 0x3cf   :  { %2669 = vmatprep.subr.bf16.mxu0 %v10964_v63  ;;  %v10985_v63 = vld [vmem:[%s16866_s17 + $0x154] ss:$8 sps:$4 sm:$0xff]  }
 0x3d2   :  { %2670 = vmatpush1.bf16.msra.mxu0 %v10962_v0  ;;  %v11070_v0 = vld [vmem:[%s16867_s3] ss:$8 sps:$4 sm:$0xff]  }
 0x3d3   :  { %2671 = vmatprep.subr.bf16.mxu0 %v10967_v61  ;;  %v11072_v61 = vld [vmem:[%s16867_s3 + $0x4] ss:$8 sps:$4 sm:$0xff]  }
 0x3d4   :  { %3028 = vmatprep.subr.bf16.mxu1 %v11072_v61  ;;  %v11016_v61 = vld [vmem:[%s16866_s17 + $0x200] ss:$8 sps:$4 sm:$0xff]  }
 0x3d5   :  { %3029 = vmatpush1.bf16.msra.mxu1 %v11070_v0  ;;  %v11018_v0 = vld [vmem:[%s16866_s17 + $0x204] ss:$8 sps:$4 sm:$0xff]  }
 0x3d6   :  { %2672 = vmatpush1.bf16.msra.mxu0 %v10965_v1  ;;  %v11075_v1 = vld [vmem:[%s16867_s3 + $0x14] ss:$8 sps:$4 sm:$0xff]  }
 0x3d7   :  { %2682 = vmatprep.subr.bf16.mxu0 %v10970_v2  ;;  %v10983_v2 = vld [vmem:[%s16866_s17 + $0x150] ss:$8 sps:$4 sm:$0xff]   ;;  %3030 = vmatprep.subr.bf16.mxu1 %v11075_v1 }
 0x3d9   :  { %3031 = vmatpush1.bf16.msra.mxu1 %v11073_v5  ;;  %v11019_v5 = vld [vmem:[%s16866_s17 + $0x210] ss:$8 sps:$4 sm:$0xff]  }
 0x45b   :  { %v1976_v9 = vpop.f32.mrb[20].mxu0  ;;  %v2017_v11 = vpop.f32.mrb[20].mxu1 }
 0x45c   :  { %v2124_v13 = vmul.f32 %v2108_v10, %v1976_v9  ;;  %v13293_v14 = vmul.f32 %v2122_v12, %v2017_v11  ;;  %v1978_v15 = vpop.f32.mrb[21].mxu0  ;;  %v2019_v37 = vpop.f32.mrb[21].mxu1  ;;  %v11078_v9 = vld [vmem:[%s16867_s3 + $0x24] ss:$8 sps:$4 sm:$0xff]   ;;  %v10991_v11 = vld [vmem:[%s16866_s17 + $0x174] ss:$8 sps:$4 sm:$0xff]  }
 0x45d   :  { %v2125_v17 = vmul.f32 %v2121_v16, %v1978_v15  ;;  %v2127_v18 = vmul.f32 %v2123_v55, %v2019_v37  ;;  %v1980_v20 = vpop.f32.mrb[22].mxu0  ;;  %v2021_v40 = vpop.f32.mrb[22].mxu1  ;;  %v11076_v12 = vld [vmem:[%s16867_s3 + $0x20] ss:$8 sps:$4 sm:$0xff]   ;;  %3032 = vmatprep.subr.bf16.mxu1 %v11078_v9  ;;  %v10989_v15 = vld [vmem:[%s16866_s17 + $0x170] ss:$8 sps:$4 sm:$0xff]  }
 0x45e   :  { %v1981_v22 = vpop.f32.mrb[23].mxu0  ;;  %v2022_v26 = vpop.f32.mrb[23].mxu1  ;;  %v2131_v30 = vpack.c.bf16 %v2124_v13, %v2124_v13  ;;  %v11081_v13 = vld [vmem:[%s16867_s3 + $0x34] ss:$8 sps:$4 sm:$0xff]   ;;  %v10994_v16 = vld [vmem:[%s16866_s17 + $0x184] ss:$8 sps:$4 sm:$0xff]   ;;  %3033 = vmatpush1.bf16.msra.mxu1 %v11076_v12  ;;  %v2133_v1 = vpack.c.bf16 %v13293_v14, %v13293_v14 }
 0x45f   :  { %v2132_v29 = vpack.c.bf16 %v2125_v17, %v2125_v17  ;;  %v2134_v32 = vpack.c.bf16 %v2127_v18, %v2127_v18  ;;  %v11079_v37 = vld [vmem:[%s16867_s3 + $0x30] ss:$8 sps:$4 sm:$0xff]   ;;  %v11084_v55 = vld [vmem:[%s16867_s3 + $0x44] ss:$8 sps:$4 sm:$0xff]   ;;  %3034 = vmatprep.subr.bf16.mxu1 %v11081_v13  ;;  %v10992_v40 = vld [vmem:[%s16866_s17 + $0x180] ss:$8 sps:$4 sm:$0xff]  }
 0x460   :  { %v11082_v22 = vld [vmem:[%s16867_s3 + $0x40] ss:$8 sps:$4 sm:$0xff]   ;;  %v11024_v14 = vld [vmem:[%s16866_s17 + $0x224] ss:$8 sps:$4 sm:$0xff]   ;;  %v11033_v13 = vld [vmem:[%s16866_s17 + $0x254] ss:$8 sps:$4 sm:$0xff]  }
 0x461   :  { %2673 = vmatprep.mubr.bf16.mxu0 %v2132_v29  ;;  %v10997_v29 = vld [vmem:[%s16866_s17 + $0x194] ss:$8 sps:$4 sm:$0xff]   ;;  %v11022_v9 = vld [vmem:[%s16866_s17 + $0x220] ss:$8 sps:$4 sm:$0xff]  }
 0x462   :  { %2674 = vmatmul.mubr.bf16.vlgmr.msra.gmra.mrb[28].mxu0 %v2131_v30  ;;  %3035 = vmatpush1.bf16.msra.mxu1 %v11079_v37  ;;  %v10995_v30 = vld [vmem:[%s16866_s17 + $0x190] ss:$8 sps:$4 sm:$0xff]   ;;  %v11028_v12 = vld [vmem:[%s16866_s17 + $0x240] ss:$8 sps:$4 sm:$0xff]  }
 0x463   :  { %2683 = vmatpush1.bf16.msra.mxu0 %v10968_v34  ;;  %2714 = vmatprep.mubr.bf16.mxu0 %v2134_v32  ;;  %v11087_v34 = vld [vmem:[%s16867_s3 + $0x54] ss:$8 sps:$4 sm:$0xff]   ;;  %v11000_v32 = vld [vmem:[%s16866_s17 + $0x1a4] ss:$8 sps:$4 sm:$0xff]   ;;  %v11034_v37 = vld [vmem:[%s16866_s17 + $0x260] ss:$8 sps:$4 sm:$0xff]  }
 0x464   :  { %2684 = vmatprep.subr.bf16.mxu0 %v10973_v31  ;;  %3036 = vmatprep.subr.bf16.mxu1 %v11084_v55  ;;  %v11085_v31 = vld [vmem:[%s16867_s3 + $0x50] ss:$8 sps:$4 sm:$0xff]   ;;  %v11039_v55 = vld [vmem:[%s16866_s17 + $0x274] ss:$8 sps:$4 sm:$0xff]  }
 0x466   :  { %3037 = vmatpush1.bf16.msra.mxu1 %v11082_v22  ;;  %v11040_v22 = vld [vmem:[%s16866_s17 + $0x280] ss:$8 sps:$4 sm:$0xff]  }
 0x467   :  { %2685 = vmatpush1.bf16.msra.mxu0 %v10971_v53  ;;  %3038 = vmatprep.subr.bf16.mxu1 %v11087_v34  ;;  %v11090_v53 = vld [vmem:[%s16867_s3 + $0x64] ss:$8 sps:$4 sm:$0xff]  }
 0x468   :  { %2686 = vmatprep.subr.bf16.mxu0 %v10976_v33  ;;  %v10998_v33 = vld [vmem:[%s16866_s17 + $0x1a0] ss:$8 sps:$4 sm:$0xff]   ;;  %v11048_v34 = vld [vmem:[%s16866_s17 + $0x2a4] ss:$8 sps:$4 sm:$0xff]  }
 0x46a   :  { %3039 = vmatpush1.bf16.msra.mxu1 %v11085_v31  ;;  %v11051_v31 = vld [vmem:[%s16866_s17 + $0x2b4] ss:$8 sps:$4 sm:$0xff]  }
 0x46b   :  { %v2058_v39 = vpop.f32.mrb[24].mxu0  ;;  %v13320_v44 = vpop.f32.mrb[24].mxu1  ;;  %2687 = vmatpush1.bf16.msra.mxu0 %v10974_v35  ;;  %v11088_v35 = vld [vmem:[%s16867_s3 + $0x60] ss:$8 sps:$4 sm:$0xff]   ;;  %3040 = vmatprep.subr.bf16.mxu1 %v11090_v53  ;;  %v11054_v53 = vld [vmem:[%s16866_s17 + $0x2c4] ss:$8 sps:$4 sm:$0xff]  }
 0x46c   :  { %v13325_v49 = vmul.f32 %v2118_v43, %v2058_v39  ;;  %v2060_v50 = vpop.f32.mrb[25].mxu0  ;;  %v10610_v51 = vpop.f32.mrb[25].mxu1  ;;  %2688 = vmatprep.subr.bf16.mxu0 %v10979_v38  ;;  %v11093_v38 = vld [vmem:[%s16867_s3 + $0x74] ss:$8 sps:$4 sm:$0xff]   ;;  %v11001_v39 = vld [vmem:[%s16866_s17 + $0x1b0] ss:$8 sps:$4 sm:$0xff]  }
 0x46d   :  { %v13330_v56 = vmul.f32 %v2108_v10, %v2060_v50  ;;  %v2062_v57 = vpop.f32.mrb[26].mxu0  ;;  %v2102_v58 = vpop.f32.mrb[26].mxu1  ;;  %v10986_v10 = vld [vmem:[%s16866_s17 + $0x160] ss:$8 sps:$4 sm:$0xff]   ;;  %v11091_v43 = vld [vmem:[%s16867_s3 + $0x70] ss:$8 sps:$4 sm:$0xff]  }
 0x46e   :  { %v2063_v60 = vpop.f32.mrb[27].mxu0  ;;  %v10611_v62 = vpop.f32.mrb[27].mxu1  ;;  %3041 = vmatpush1.bf16.msra.mxu1 %v11088_v35  ;;  %v11096_v50 = vld [vmem:[%s16867_s3 + $0x84] ss:$8 sps:$4 sm:$0xff]   ;;  %v11004_v51 = vld [vmem:[%s16866_s17 + $0x1c0] ss:$8 sps:$4 sm:$0xff]  }
 0x46f   :  { %2689 = vmatpush1.bf16.msra.mxu0 %v10977_v48  ;;  %v11006_v48 = vld [vmem:[%s16866_s17 + $0x1c4] ss:$8 sps:$4 sm:$0xff]   ;;  %3042 = vmatprep.subr.bf16.mxu1 %v11093_v38  ;;  %v11009_v57 = vld [vmem:[%s16866_s17 + $0x1d4] ss:$8 sps:$4 sm:$0xff]   ;;  %v11007_v58 = vld [vmem:[%s16866_s17 + $0x1d0] ss:$8 sps:$4 sm:$0xff]  }
 0x470   :  { %2690 = vmatprep.subr.bf16.mxu0 %v10982_v52  ;;  %v11094_v52 = vld [vmem:[%s16867_s3 + $0x80] ss:$8 sps:$4 sm:$0xff]   ;;  %v11012_v60 = vld [vmem:[%s16866_s17 + $0x1e4] ss:$8 sps:$4 sm:$0xff]   ;;  %v11057_v35 = vld [vmem:[%s16866_s17 + $0x2d4] ss:$8 sps:$4 sm:$0xff]  }
 0x471   :  { %v11010_v62 = vld [vmem:[%s16866_s17 + $0x1e0] ss:$8 sps:$4 sm:$0xff]   ;;  %v11060_v38 = vld [vmem:[%s16866_s17 + $0x2e4] ss:$8 sps:$4 sm:$0xff]  }
 0x472   :  { %3043 = vmatpush1.bf16.msra.mxu1 %v11091_v43  ;;  %v11063_v43 = vld [vmem:[%s16866_s17 + $0x2f4] ss:$8 sps:$4 sm:$0xff]  }
 0x473   :  { %2691 = vmatpush1.bf16.msra.mxu0 %v10980_v59  ;;  %3044 = vmatprep.subr.bf16.mxu1 %v11096_v50  ;;  %v11015_v59 = vld [vmem:[%s16866_s17 + $0x1f4] ss:$8 sps:$4 sm:$0xff]   ;;  %v11066_v50 = vld [vmem:[%s16866_s17 + $0x304] ss:$8 sps:$4 sm:$0xff]  }
 0x474   :  { %2692 = vmatprep.subr.bf16.mxu0 %v10985_v63  ;;  %v11013_v63 = vld [vmem:[%s16866_s17 + $0x1f0] ss:$8 sps:$4 sm:$0xff]  }
 0x476   :  { %3045 = vmatpush1.bf16.msra.mxu1 %v11094_v52  ;;  %v2135_v52 = vpack.c.bf16 %v13325_v49, %v13325_v49  ;;  %v11099_v49 = vld [vmem:[%s16867_s3 + $0x94] ss:$8 sps:$4 sm:$0xff]  }
 0x477   :  { %2693 = vmatpush1.bf16.msra.mxu0 %v10983_v2  ;;  %v11021_v2 = vld [vmem:[%s16866_s17 + $0x214] ss:$8 sps:$4 sm:$0xff]   ;;  %3046 = vmatprep.subr.bf16.mxu1 %v11099_v49  ;;  %v11133_v49 = vld [vmem:[%s16870_s5 + $0x10] ss:$40 sps:$4 sm:$0xff]  }
 0x478   :  { %2694 = vmatprep.subr.bf16.mxu0 %v10988_v4  ;;  %v2136_v4 = vpack.c.bf16 %v13330_v56, %v13330_v56  ;;  %v11027_v56 = vld [vmem:[%s16866_s17 + $0x234] ss:$8 sps:$4 sm:$0xff]  }
 0x47b   :  { %2695 = vmatpush1.bf16.msra.mxu0 %v10986_v10  ;;  %v13383_v17 = vpop.f32.mrb[28].mxu1  ;;  %v11025_v10 = vld [vmem:[%s16866_s17 + $0x230] ss:$8 sps:$4 sm:$0xff]  }
 0x47c   :  { %v13385_v18 = vpop.f32.mrb[29].mxu1  ;;  %2696 = vmatprep.subr.bf16.mxu0 %v10991_v11  ;;  %v11030_v11 = vld [vmem:[%s16866_s17 + $0x244] ss:$8 sps:$4 sm:$0xff]   ;;  %12002 = vrcp.f32 %v13383_v17  ;;  %v11103_v17 = vld [vmem:[%s16868_s18 + $0x14] ss:$8 sps:$4 sm:$0xff]  }
 0x47d   :  { %v2884_v20 = vpop.f32.mrb[30].mxu1  ;;  %12004 = vrcp.f32 %v13385_v18  ;;  %v11105_v18 = vld [vmem:[%s16868_s18 + $0x10] ss:$8 sps:$4 sm:$0xff]  }
 0x47e   :  { %v2885_v26 = vpop.f32.mrb[31].mxu1  ;;  %v11037_v20 = vld [vmem:[%s16866_s17 + $0x270] ss:$8 sps:$4 sm:$0xff]  }
 0x47f   :  { %2697 = vmatpush1.bf16.msra.mxu0 %v10989_v15  ;;  %v11031_v15 = vld [vmem:[%s16866_s17 + $0x250] ss:$8 sps:$4 sm:$0xff]   ;;  %v11045_v26 = vld [vmem:[%s16866_s17 + $0x294] ss:$8 sps:$4 sm:$0xff]  }
 0x480   :  { %2698 = vmatprep.subr.bf16.mxu0 %v10994_v16  ;;  %v11036_v16 = vld [vmem:[%s16866_s17 + $0x264] ss:$8 sps:$4 sm:$0xff]  }
 0x483   :  { %2699 = vmatpush1.bf16.msra.mxu0 %v10992_v40  ;;  %v11042_v40 = vld [vmem:[%s16866_s17 + $0x284] ss:$8 sps:$4 sm:$0xff]  }
 0x484   :  { %2700 = vmatprep.subr.bf16.mxu0 %v10997_v29  ;;  %v11043_v29 = vld [vmem:[%s16866_s17 + $0x290] ss:$8 sps:$4 sm:$0xff]  }
 0x487   :  { %2701 = vmatpush1.bf16.msra.mxu0 %v10995_v30  ;;  %v11046_v30 = vld [vmem:[%s16866_s17 + $0x2a0] ss:$8 sps:$4 sm:$0xff]  }
 0x488   :  { %2702 = vmatprep.subr.bf16.mxu0 %v11000_v32  ;;  %v11049_v32 = vld [vmem:[%s16866_s17 + $0x2b0] ss:$8 sps:$4 sm:$0xff]  }
 0x48b   :  { %2703 = vmatpush1.bf16.msra.mxu0 %v10998_v33  ;;  %v11052_v33 = vld [vmem:[%s16866_s17 + $0x2c0] ss:$8 sps:$4 sm:$0xff]  }
 0x48c   :  { %2704 = vmatprep.subr.bf16.mxu0 %v11003_v36  ;;  %v11055_v36 = vld [vmem:[%s16866_s17 + $0x2d0] ss:$8 sps:$4 sm:$0xff]  }
 0x48f   :  { %2705 = vmatpush1.bf16.msra.mxu0 %v11001_v39  ;;  %v11058_v39 = vld [vmem:[%s16866_s17 + $0x2e0] ss:$8 sps:$4 sm:$0xff]  }
 0x490   :  { %2706 = vmatprep.subr.bf16.mxu0 %v11006_v48  ;;  %v11061_v48 = vld [vmem:[%s16866_s17 + $0x2f0] ss:$8 sps:$4 sm:$0xff]  }
 0x493   :  { %2707 = vmatpush1.bf16.msra.mxu0 %v11004_v51  ;;  %v11064_v51 = vld [vmem:[%s16866_s17 + $0x300] ss:$8 sps:$4 sm:$0xff]  }
 0x494   :  { %2708 = vmatprep.subr.bf16.mxu0 %v11009_v57  ;;  %v11069_v57 = vld [vmem:[%s16866_s17 + $0x314] ss:$8 sps:$4 sm:$0xff]  }
 0x497   :  { %2709 = vmatpush1.bf16.msra.mxu0 %v11007_v58  ;;  %v11067_v58 = vld [vmem:[%s16866_s17 + $0x310] ss:$8 sps:$4 sm:$0xff]  }
 0x498   :  { %2710 = vmatprep.subr.bf16.mxu0 %v11012_v60  ;;  %v2130_v60 = vmul.f32 %v13286_v8, %v13320_v44  ;;  %v12003_v8 = vpop.eup %12002 }
 0x49b   :  { %2711 = vmatpush1.bf16.msra.mxu0 %v11010_v62  ;;  %v2137_v62 = vpack.c.bf16 %v2130_v60, %v2130_v60 }
 0x49c   :  { %2712 = vmatprep.subr.bf16.mxu0 %v11015_v59  ;;  %v11097_v59 = vld [vmem:[%s16867_s3 + $0x90] ss:$8 sps:$4 sm:$0xff]  }
 0x49d   :  { %3047 = vmatpush1.bf16.msra.mxu1 %v11097_v59  ;;  %v11135_v59 = vld [vmem:[%s16870_s5 + $0x14] ss:$40 sps:$4 sm:$0xff]  }
 0x49f   :  { %2713 = vmatpush1.bf16.msra.mxu0 %v11013_v63  ;;  %v11100_v63 = vld [vmem:[%s16868_s18 + $0x4] ss:$8 sps:$4 sm:$0xff]  }
 0x4a0   :  { %2723 = vmatprep.subr.bf16.mxu0 %v11018_v0  ;;  %3178 = vmatprep.subr.bf16.mxu1 %v11100_v63  ;;  %v12005_v0 = vpop.eup %12004 }
 0x4a2   :  { %2715 = vmatmul.mubr.bf16.vlgmr.msra.gmra.mrb[28].mxu0 %v2133_v1 }
 0x4a3   :  { %2724 = vmatpush1.bf16.msra.mxu0 %v11016_v61  ;;  %2755 = vmatprep.mubr.bf16.mxu0 %v2136_v4 }
 0x4a4   :  { %2725 = vmatprep.subr.bf16.mxu0 %v11021_v2 }
 0x4a7   :  { %2726 = vmatpush1.bf16.msra.mxu0 %v11019_v5 }
 0x4a8   :  { %2727 = vmatprep.subr.bf16.mxu0 %v11024_v14 }
 0x4ab   :  { %2728 = vmatpush1.bf16.msra.mxu0 %v11022_v9  ;;  %v11102_v9 = vld [vmem:[%s16868_s18] ss:$8 sps:$4 sm:$0xff]  }
 0x4ac   :  { %2729 = vmatprep.subr.bf16.mxu0 %v11027_v56 }
 0x4af   :  { %2730 = vmatpush1.bf16.msra.mxu0 %v11025_v10  ;;  %v11106_v10 = vld [vmem:[%s16868_s18 + $0x24] ss:$8 sps:$4 sm:$0xff]  }
 0x4b0   :  { %2731 = vmatprep.subr.bf16.mxu0 %v11030_v11  ;;  %v11108_v11 = vld [vmem:[%s16868_s18 + $0x20] ss:$8 sps:$4 sm:$0xff]  }
 0x4b3   :  { %2732 = vmatpush1.bf16.msra.mxu0 %v11028_v12  ;;  %v11109_v12 = vld [vmem:[%s16868_s18 + $0x34] ss:$8 sps:$4 sm:$0xff]  }
 0x4b4   :  { %2733 = vmatprep.subr.bf16.mxu0 %v11033_v13  ;;  %v11111_v13 = vld [vmem:[%s16868_s18 + $0x30] ss:$8 sps:$4 sm:$0xff]  }
 0x4b7   :  { %2734 = vmatpush1.bf16.msra.mxu0 %v11031_v15  ;;  %v11112_v15 = vld [vmem:[%s16868_s18 + $0x44] ss:$8 sps:$4 sm:$0xff]  }
 0x4b8   :  { %2735 = vmatprep.subr.bf16.mxu0 %v11036_v16  ;;  %v11114_v16 = vld [vmem:[%s16868_s18 + $0x40] ss:$8 sps:$4 sm:$0xff]  }
 0x4bb   :  { %2736 = vmatpush1.bf16.msra.mxu0 %v11034_v37  ;;  %v11115_v37 = vld [vmem:[%s16868_s18 + $0x54] ss:$8 sps:$4 sm:$0xff]  }
 0x4bc   :  { %2737 = vmatprep.subr.bf16.mxu0 %v11039_v55  ;;  %v11117_v55 = vld [vmem:[%s16868_s18 + $0x50] ss:$8 sps:$4 sm:$0xff]  }
 0x4bf   :  { %2738 = vmatpush1.bf16.msra.mxu0 %v11037_v20  ;;  %v11118_v20 = vld [vmem:[%s16868_s18 + $0x64] ss:$8 sps:$4 sm:$0xff]  }
 0x4c0   :  { %2739 = vmatprep.subr.bf16.mxu0 %v11042_v40  ;;  %v11120_v40 = vld [vmem:[%s16868_s18 + $0x60] ss:$8 sps:$4 sm:$0xff]  }
 0x4c3   :  { %2740 = vmatpush1.bf16.msra.mxu0 %v11040_v22  ;;  %v11121_v22 = vld [vmem:[%s16868_s18 + $0x74] ss:$8 sps:$4 sm:$0xff]  }
 0x4c4   :  { %2741 = vmatprep.subr.bf16.mxu0 %v11045_v26  ;;  %v11123_v26 = vld [vmem:[%s16868_s18 + $0x70] ss:$8 sps:$4 sm:$0xff]  }
 0x4c7   :  { %2742 = vmatpush1.bf16.msra.mxu0 %v11043_v29  ;;  %v11124_v29 = vld [vmem:[%s16868_s18 + $0x84] ss:$8 sps:$4 sm:$0xff]  }
 0x4c8   :  { %2743 = vmatprep.subr.bf16.mxu0 %v11048_v34  ;;  %v11126_v34 = vld [vmem:[%s16868_s18 + $0x80] ss:$8 sps:$4 sm:$0xff]  }
 0x4cb   :  { %2744 = vmatpush1.bf16.msra.mxu0 %v11046_v30  ;;  %v11127_v30 = vld [vmem:[%s16868_s18 + $0x94] ss:$8 sps:$4 sm:$0xff]  }
 0x4cc   :  { %2745 = vmatprep.subr.bf16.mxu0 %v11051_v31  ;;  %v11129_v31 = vld [vmem:[%s16868_s18 + $0x90] ss:$8 sps:$4 sm:$0xff]  }
 0x4cf   :  { %2746 = vmatpush1.bf16.msra.mxu0 %v11049_v32  ;;  %v2913_v32 = vld [vmem:[%s16869_s4] sm:$0x3] }
 0x4d0   :  { %2747 = vmatprep.subr.bf16.mxu0 %v11054_v53  ;;  %v2918_v53 = vrot.slane %v2913_v32, %v12698_v24 }
 0x4d3   :  { %2748 = vmatpush1.bf16.msra.mxu0 %v11052_v33  ;;  %v2922_v33 = vrot.slane %v2913_v32, %v12707_v27  ;;  %v11163_v32 = vld [vmem:[%s16870_s5 + $0x1a0] ss:$40 sps:$4 sm:$0xff]  }
 0x4d4   :  { %2749 = vmatprep.subr.bf16.mxu0 %v11057_v35 }
 0x4d7   :  { %2750 = vmatpush1.bf16.msra.mxu0 %v11055_v36 }
 0x4d8   :  { %2751 = vmatprep.subr.bf16.mxu0 %v11060_v38 }
 0x4db   :  { %2752 = vmatpush1.bf16.msra.mxu0 %v11058_v39 }
 0x4dc   :  { %2753 = vmatprep.subr.bf16.mxu0 %v11063_v43 }
 0x4df   :  { %2754 = vmatpush1.bf16.msra.mxu0 %v11061_v48  ;;  %v12028_v48 = vld [vmem:[%s16893_s23] sm:$0xff] }
 0x4e0   :  { %2764 = vmatprep.subr.bf16.mxu0 %v11066_v50 }
 0x4e2   :  { %2756 = vmatmul.mubr.bf16.vlgmr.msra.gmra.mrb[28].mxu0 %v2135_v52  ;;  %v12029_v52 = vld [vmem:[%s16893_s23 + $0x8] sm:$0xff] }
 0x4e3   :  { %2765 = vmatpush1.bf16.msra.mxu0 %v11064_v51  ;;  %2796 = vmatprep.mubr.bf16.mxu0 %v12337_v21 }
 0x4e4   :  { %2766 = vmatprep.subr.bf16.mxu0 %v11069_v57 }
 0x4e7   :  { %2767 = vmatpush1.bf16.msra.mxu0 %v11067_v58 }
 0x4e8   :  { %4040 = vmatprep.subr.bf16.mxu0 %v11135_v59  ;;  %v11192_v59 = vld [vmem:[%s16870_s5 + $0xc] ss:$40 sps:$4 sm:$0xff]  }
 0x4ee   :  { %9447 = vmatmul.mubr.msk.bf16.vlgmr.msra.gmra.mrb[28].mxu0 %vm664_vm0, %v2137_v62  ;;  %v11132_v62 = vld [vmem:[%s16870_s5 + $0x4] ss:$40 sps:$4 sm:$0xff]  }
 0x4ef   :  { %4041 = vmatpush1.bf16.msra.mxu0 %v11133_v49  ;;  %v11189_v49 = vld [vmem:[%s16870_s5 + $0x2e4] ss:$40 sps:$4 sm:$0xff]  }
 0x5c1   :  { %v2798_v44 = vpop.f32.mrb[28].mxu0 }
 0x5c2   :  { %v2888_v61 = vmul.f32 %v12003_v8, %v2798_v44  ;;  %v2800_v1 = vpop.f32.mrb[29].mxu0  ;;  %v11141_v8 = vld [vmem:[%s16870_s5 + $0x64] ss:$40 sps:$4 sm:$0xff]   ;;  %v11147_v44 = vld [vmem:[%s16870_s5 + $0xb4] ss:$40 sps:$4 sm:$0xff]  }
 0x5c3   :  { %v2890_v2 = vmul.f32 %v12005_v0, %v2800_v1  ;;  %v2802_v4 = vpop.f32.mrb[30].mxu0  ;;  %4042 = vmatprep.subr.bf16.mxu0 %v11141_v8  ;;  %v11145_v0 = vld [vmem:[%s16870_s5 + $0xb0] ss:$40 sps:$4 sm:$0xff]   ;;  %v11151_v1 = vld [vmem:[%s16870_s5 + $0x100] ss:$40 sps:$4 sm:$0xff]  }
 0x5c4   :  { %v2803_v5 = vpop.f32.mrb[31].mxu0  ;;  %v2911_v56 = vpack.c.bf16 %v2888_v61, %v2888_v61  ;;  %v11153_v61 = vld [vmem:[%s16870_s5 + $0x104] ss:$40 sps:$4 sm:$0xff]   ;;  %v11157_v4 = vld [vmem:[%s16870_s5 + $0x150] ss:$40 sps:$4 sm:$0xff]  }
 0x5c5   :  { %v2912_v14 = vpack.c.bf16 %v2890_v2, %v2890_v2  ;;  %v11159_v2 = vld [vmem:[%s16870_s5 + $0x154] ss:$40 sps:$4 sm:$0xff]  }
 0x5c7   :  { %9478 = vmatprep.mubr.msk.bf16.mxu1 %vm664_vm0, %v2912_v14 }
 0x5c8   :  { %3061 = vmatmul.mubr.bf16.vlgmr.msra.gmra.mrb[32].mxu1 %v2911_v56 }
 0x5c9   :  { %3179 = vmatpush1.bf16.msra.mxu1 %v11102_v9 }
 0x5ca   :  { %3180 = vmatprep.subr.bf16.mxu1 %v11103_v17 }
 0x5cd   :  { %3181 = vmatpush1.bf16.msra.mxu1 %v11105_v18 }
 0x5ce   :  { %3182 = vmatprep.subr.bf16.mxu1 %v11106_v10 }
 0x5d1   :  { %3183 = vmatpush1.bf16.msra.mxu1 %v11108_v11 }
 0x5d2   :  { %3184 = vmatprep.subr.bf16.mxu1 %v11109_v12 }
 0x5d5   :  { %3185 = vmatpush1.bf16.msra.mxu1 %v11111_v13 }
 0x5d6   :  { %3186 = vmatprep.subr.bf16.mxu1 %v11112_v15 }
 0x5d9   :  { %3187 = vmatpush1.bf16.msra.mxu1 %v11114_v16 }
 0x5da   :  { %3188 = vmatprep.subr.bf16.mxu1 %v11115_v37 }
 0x5dd   :  { %3189 = vmatpush1.bf16.msra.mxu1 %v11117_v55 }
 0x5de   :  { %3190 = vmatprep.subr.bf16.mxu1 %v11118_v20 }
 0x5e1   :  { %3191 = vmatpush1.bf16.msra.mxu1 %v11120_v40 }
 0x5e2   :  { %3192 = vmatprep.subr.bf16.mxu1 %v11121_v22 }
 0x5e5   :  { %3193 = vmatpush1.bf16.msra.mxu1 %v11123_v26 }
 0x5e6   :  { %3194 = vmatprep.subr.bf16.mxu1 %v11124_v29 }
 0x5e9   :  { %3195 = vmatpush1.bf16.msra.mxu1 %v11126_v34 }
 0x5ea   :  { %3196 = vmatprep.subr.bf16.mxu1 %v11127_v30 }
 0x5ed   :  { %3197 = vmatpush1.bf16.msra.mxu1 %v11129_v31 }
 0x5ee   :  { %3228 = vmatprep.subr.bf16.mxu1 %v11100_v63  ;;  %v11139_v63 = vld [vmem:[%s16870_s5 + $0x60] ss:$40 sps:$4 sm:$0xff]  }
 0x5ef   :  { %4043 = vmatpush1.bf16.msra.mxu0 %v11139_v63  ;;  %v11195_v63 = vld [vmem:[%s16870_s5 + $0x24] ss:$40 sps:$4 sm:$0xff]  }
 0x5f0   :  { %4044 = vmatprep.subr.bf16.mxu0 %v11147_v44 }
 0x5f3   :  { %4045 = vmatpush1.bf16.msra.mxu0 %v11145_v0 }
 0x5f4   :  { %4046 = vmatprep.subr.bf16.mxu0 %v11153_v61 }
 0x5f7   :  { %4047 = vmatpush1.bf16.msra.mxu0 %v11151_v1 }
 0x5f8   :  { %4048 = vmatprep.subr.bf16.mxu0 %v11159_v2 }
 0x5fb   :  { %4049 = vmatpush1.bf16.msra.mxu0 %v11157_v4  ;;  %v3071_v4 = vld [vmem:[%s16872_s9] sm:$0x3] }
 0x69b   :  { %v3062_v35 = vpop.f32.mrb[32].mxu1 }
 0x69c   :  { %v3063_v36 = vadd.f32 %v3062_v35, %v2918_v53  ;;  %v3064_v38 = vpop.f32.mrb[33].mxu1  ;;  %v11168_v53 = vld [vmem:[%s16870_s5 + $0x1e4] ss:$40 sps:$4 sm:$0xff]   ;;  %v11166_v35 = vld [vmem:[%s16870_s5 + $0x1e0] ss:$40 sps:$4 sm:$0xff]  }
 0x69d   :  { %v3065_v39 = vadd.f32 %v3064_v38, %v2922_v33  ;;  %v3066_v43 = vpop.f32.mrb[34].mxu1  ;;  %v11171_v33 = vld [vmem:[%s16870_s5 + $0x1f4] ss:$40 sps:$4 sm:$0xff]  }
 0x69e   :  { %v3069_v50 = vadd.f32 %v12028_v48, %v3063_v36  ;;  %v3067_v51 = vpop.f32.mrb[35].mxu1  ;;  %v11169_v36 = vld [vmem:[%s16870_s5 + $0x1f0] ss:$40 sps:$4 sm:$0xff]   ;;  %v11174_v38 = vld [vmem:[%s16870_s5 + $0x234] ss:$40 sps:$4 sm:$0xff]  }
 0x69f   :  { %v3070_v57 = vadd.f32 %v12029_v52, %v3065_v39  ;;  %v11177_v39 = vld [vmem:[%s16870_s5 + $0x244] ss:$40 sps:$4 sm:$0xff]   ;;  %v11172_v43 = vld [vmem:[%s16870_s5 + $0x230] ss:$40 sps:$4 sm:$0xff]   ;;  %v11175_v48 = vld [vmem:[%s16870_s5 + $0x240] ss:$40 sps:$4 sm:$0xff]  }
 0x6a0   :  { %v3073_v60 = vpack.c.bf16 %v3069_v50, %v3069_v50  ;;  %v11183_v51 = vld [vmem:[%s16870_s5 + $0x294] ss:$40 sps:$4 sm:$0xff]   ;;  %v11178_v52 = vld [vmem:[%s16870_s5 + $0x280] ss:$40 sps:$4 sm:$0xff]  }
 0x6a1   :  { %v3074_v58 = vpack.c.bf16 %v3070_v57, %v3070_v57 }
 0x6a3   :  { %9499 = vmatprep.mubr.msk.bf16.mxu1 %vm664_vm0, %v3074_v58  ;;  %v11184_v58 = vld [vmem:[%s16870_s5 + $0x2d0] ss:$40 sps:$4 sm:$0xff]  }
 0x6a4   :  { %3211 = vmatmul.mubr.bf16.vlgmr.msra.gmra.mrb[36].mxu1 %v3073_v60  ;;  %v11186_v60 = vld [vmem:[%s16870_s5 + $0x2d4] ss:$40 sps:$4 sm:$0xff]  }
 0x6a5   :  { %3229 = vmatpush1.bf16.msra.mxu1 %v11102_v9 }
 0x6a6   :  { %3230 = vmatprep.subr.bf16.mxu1 %v11103_v17 }
 0x6a9   :  { %3231 = vmatpush1.bf16.msra.mxu1 %v11105_v18 }
 0x6aa   :  { %3232 = vmatprep.subr.bf16.mxu1 %v11106_v10 }
 0x6ad   :  { %3233 = vmatpush1.bf16.msra.mxu1 %v11108_v11 }
 0x6ae   :  { %3234 = vmatprep.subr.bf16.mxu1 %v11109_v12 }
 0x6b1   :  { %3235 = vmatpush1.bf16.msra.mxu1 %v11111_v13  ;;  %v11130_v13 = vld [vmem:[%s16870_s5] ss:$40 sps:$4 sm:$0xff]  }
 0x6b2   :  { %3236 = vmatprep.subr.bf16.mxu1 %v11112_v15 }
 0x6b5   :  { %3237 = vmatpush1.bf16.msra.mxu1 %v11114_v16  ;;  %v11138_v16 = vld [vmem:[%s16870_s5 + $0x54] ss:$40 sps:$4 sm:$0xff]  }
 0x6b6   :  { %3238 = vmatprep.subr.bf16.mxu1 %v11115_v37  ;;  %v11136_v37 = vld [vmem:[%s16870_s5 + $0x50] ss:$40 sps:$4 sm:$0xff]  }
 0x6b9   :  { %3239 = vmatpush1.bf16.msra.mxu1 %v11117_v55  ;;  %v11144_v55 = vld [vmem:[%s16870_s5 + $0xa4] ss:$40 sps:$4 sm:$0xff]  }
 0x6ba   :  { %3240 = vmatprep.subr.bf16.mxu1 %v11118_v20  ;;  %v11142_v20 = vld [vmem:[%s16870_s5 + $0xa0] ss:$40 sps:$4 sm:$0xff]  }
 0x6bd   :  { %3241 = vmatpush1.bf16.msra.mxu1 %v11120_v40  ;;  %v11150_v40 = vld [vmem:[%s16870_s5 + $0xf4] ss:$40 sps:$4 sm:$0xff]  }
 0x6be   :  { %3242 = vmatprep.subr.bf16.mxu1 %v11121_v22  ;;  %v11148_v22 = vld [vmem:[%s16870_s5 + $0xf0] ss:$40 sps:$4 sm:$0xff]  }
 0x6c1   :  { %3243 = vmatpush1.bf16.msra.mxu1 %v11123_v26  ;;  %v11156_v26 = vld [vmem:[%s16870_s5 + $0x144] ss:$40 sps:$4 sm:$0xff]  }
 0x6c2   :  { %3244 = vmatprep.subr.bf16.mxu1 %v11124_v29  ;;  %v11154_v29 = vld [vmem:[%s16870_s5 + $0x140] ss:$40 sps:$4 sm:$0xff]  }
 0x6c5   :  { %3245 = vmatpush1.bf16.msra.mxu1 %v11126_v34  ;;  %v11162_v34 = vld [vmem:[%s16870_s5 + $0x194] ss:$40 sps:$4 sm:$0xff]  }
 0x6c6   :  { %3246 = vmatprep.subr.bf16.mxu1 %v11127_v30  ;;  %v11165_v30 = vld [vmem:[%s16870_s5 + $0x1a4] ss:$40 sps:$4 sm:$0xff]  }
 0x6c7   :  { %4050 = vmatprep.subr.bf16.mxu0 %v11165_v30  ;;  %v11199_v30 = vld [vmem:[%s16870_s5 + $0x70] ss:$40 sps:$4 sm:$0xff]  }
 0x6c8   :  { %4051 = vmatpush1.bf16.msra.mxu0 %v11163_v32  ;;  %v11207_v32 = vld [vmem:[%s16870_s5 + $0xc4] ss:$40 sps:$4 sm:$0xff]  }
 0x6c9   :  { %3247 = vmatpush1.bf16.msra.mxu1 %v11129_v31  ;;  %v11160_v31 = vld [vmem:[%s16870_s5 + $0x190] ss:$40 sps:$4 sm:$0xff]   ;;  %4052 = vmatprep.subr.bf16.mxu0 %v11171_v33  ;;  %v11205_v33 = vld [vmem:[%s16870_s5 + $0xc0] ss:$40 sps:$4 sm:$0xff]  }
 0x6ca   :  { %3958 = vmatprep.subr.bf16.mxu1 %v11132_v62  ;;  %v11187_v62 = vld [vmem:[%s16870_s5 + $0x2e0] ss:$40 sps:$4 sm:$0xff]  }
 0x6cc   :  { %4053 = vmatpush1.bf16.msra.mxu0 %v11169_v36  ;;  %v11213_v36 = vld [vmem:[%s16870_s5 + $0x114] ss:$40 sps:$4 sm:$0xff]  }
 0x6cd   :  { %4054 = vmatprep.subr.bf16.mxu0 %v11177_v39  ;;  %v11211_v39 = vld [vmem:[%s16870_s5 + $0x110] ss:$40 sps:$4 sm:$0xff]  }
 0x6d0   :  { %4055 = vmatpush1.bf16.msra.mxu0 %v11175_v48  ;;  %v11219_v48 = vld [vmem:[%s16870_s5 + $0x164] ss:$40 sps:$4 sm:$0xff]  }
 0x6d1   :  { %4056 = vmatprep.subr.bf16.mxu0 %v11183_v51  ;;  %v11217_v51 = vld [vmem:[%s16870_s5 + $0x160] ss:$40 sps:$4 sm:$0xff]  }
 0x777   :  { %v3212_v5 = vpop.f32.mrb[36].mxu1 }
 0x778   :  { %v13691_v14 = vsub.f32 %v3069_v50, %v3212_v5  ;;  %v3214_v9 = vpop.f32.mrb[37].mxu1  ;;  %v11180_v50 = vld [vmem:[%s16870_s5 + $0x284] ss:$40 sps:$4 sm:$0xff]   ;;  %v3072_v5 = vld [vmem:[%s16873_s10] sm:$0x3] }
 0x779   :  { %v13693_v56 = vsub.f32 %v3070_v57, %v3214_v9  ;;  %v3216_v17 = vpop.f32.mrb[38].mxu1  ;;  %v11181_v57 = vld [vmem:[%s16870_s5 + $0x290] ss:$40 sps:$4 sm:$0xff]   ;;  %v3277_v9 = vrot.slane %v3071_v4, %v12698_v24 }
 0x77a   :  { %v3221_v18 = vmul.f32 %v13691_v14, %v13691_v14  ;;  %v3217_v10 = vpop.f32.mrb[39].mxu1  ;;  %4057 = vmatpush1.bf16.msra.mxu0 %v11181_v57  ;;  %v11225_v57 = vld [vmem:[%s16870_s5 + $0x1b4] ss:$40 sps:$4 sm:$0xff]  }
 0x77b   :  { %v3222_v11 = vmul.f32 %v13693_v56, %v13693_v56  ;;  %4058 = vmatprep.subr.bf16.mxu0 %v11189_v49  ;;  %v11231_v49 = vld [vmem:[%s16870_s5 + $0x204] ss:$40 sps:$4 sm:$0xff]  }
 0x77c   :  { %v3223_v15 = vpack.c.bf16 %v3221_v18, %v3221_v18  ;;  %v3281_v18 = vrot.slane %v3071_v4, %v12707_v27  ;;  %v11238_v4 = vld [vmem:[%s16870_s5 + $0x288] ss:$40 sps:$4 sm:$0xff]  }
 0x77d   :  { %v3224_v12 = vpack.c.bf16 %v3222_v11, %v3222_v11 }
 0x77e   :  { %4059 = vmatpush1.bf16.msra.mxu0 %v11187_v62  ;;  %v11228_v62 = vld [vmem:[%s16870_s5 + $0x1ec] ss:$40 sps:$4 sm:$0xff]  }
 0x77f   :  { %9500 = vmatprep.mubr.msk.bf16.mxu1 %vm664_vm0, %v3224_v12  ;;  %4122 = vmatprep.subr.bf16.mxu0 %v11195_v63  ;;  %v3290_v12 = vrot.slane %v3072_v5, %v12698_v24  ;;  %v11229_v63 = vld [vmem:[%s16870_s5 + $0x200] ss:$40 sps:$4 sm:$0xff]  }
 0x780   :  { %3261 = vmatmul.mubr.bf16.vlgmr.msra.gmra.mrb[40].mxu1 %v3223_v15  ;;  %v3294_v15 = vrot.slane %v3072_v5, %v12707_v27  ;;  %v11241_v5 = vld [vmem:[%s16870_s5 + $0x2a0] ss:$40 sps:$4 sm:$0xff]  }
 0x781   :  { %3959 = vmatpush1.bf16.msra.mxu1 %v11130_v13 }
 0x782   :  { %3960 = vmatprep.subr.bf16.mxu1 %v11138_v16 }
 0x785   :  { %3961 = vmatpush1.bf16.msra.mxu1 %v11136_v37 }
 0x786   :  { %3962 = vmatprep.subr.bf16.mxu1 %v11144_v55 }
 0x789   :  { %3963 = vmatpush1.bf16.msra.mxu1 %v11142_v20 }
 0x78a   :  { %3964 = vmatprep.subr.bf16.mxu1 %v11150_v40 }
 0x78d   :  { %3965 = vmatpush1.bf16.msra.mxu1 %v11148_v22  ;;  %v11198_v22 = vld [vmem:[%s16870_s5 + $0x5c] ss:$40 sps:$4 sm:$0xff]  }
 0x78e   :  { %3966 = vmatprep.subr.bf16.mxu1 %v11156_v26 }
 0x791   :  { %3967 = vmatpush1.bf16.msra.mxu1 %v11154_v29  ;;  %v11201_v29 = vld [vmem:[%s16870_s5 + $0x74] ss:$40 sps:$4 sm:$0xff]  }
 0x792   :  { %3968 = vmatprep.subr.bf16.mxu1 %v11162_v34  ;;  %v11196_v34 = vld [vmem:[%s16870_s5 + $0x58] ss:$40 sps:$4 sm:$0xff]  }
 0x795   :  { %3969 = vmatpush1.bf16.msra.mxu1 %v11160_v31  ;;  %v11204_v31 = vld [vmem:[%s16870_s5 + $0xac] ss:$40 sps:$4 sm:$0xff]  }
 0x796   :  { %3970 = vmatprep.subr.bf16.mxu1 %v11168_v53  ;;  %v11202_v53 = vld [vmem:[%s16870_s5 + $0xa8] ss:$40 sps:$4 sm:$0xff]  }
 0x799   :  { %3971 = vmatpush1.bf16.msra.mxu1 %v11166_v35  ;;  %v11210_v35 = vld [vmem:[%s16870_s5 + $0xfc] ss:$40 sps:$4 sm:$0xff]  }
 0x79a   :  { %3972 = vmatprep.subr.bf16.mxu1 %v11174_v38  ;;  %v11208_v38 = vld [vmem:[%s16870_s5 + $0xf8] ss:$40 sps:$4 sm:$0xff]  }
 0x79d   :  { %3973 = vmatpush1.bf16.msra.mxu1 %v11172_v43  ;;  %v11216_v43 = vld [vmem:[%s16870_s5 + $0x14c] ss:$40 sps:$4 sm:$0xff]  }
 0x79e   :  { %3974 = vmatprep.subr.bf16.mxu1 %v11180_v50  ;;  %v11214_v50 = vld [vmem:[%s16870_s5 + $0x148] ss:$40 sps:$4 sm:$0xff]  }
 0x7a1   :  { %3975 = vmatpush1.bf16.msra.mxu1 %v11178_v52  ;;  %v11222_v52 = vld [vmem:[%s16870_s5 + $0x19c] ss:$40 sps:$4 sm:$0xff]  }
 0x7a2   :  { %3976 = vmatprep.subr.bf16.mxu1 %v11186_v60  ;;  %v11223_v60 = vld [vmem:[%s16870_s5 + $0x1b0] ss:$40 sps:$4 sm:$0xff]  }
 0x7a5   :  { %3977 = vmatpush1.bf16.msra.mxu1 %v11184_v58  ;;  %v11220_v58 = vld [vmem:[%s16870_s5 + $0x198] ss:$40 sps:$4 sm:$0xff]  }
 0x7a6   :  { %3999 = vmatprep.subr.bf16.mxu1 %v11192_v59  ;;  %v11226_v59 = vld [vmem:[%s16870_s5 + $0x1e8] ss:$40 sps:$4 sm:$0xff]  }
 0x853   :  { %v3262_v8 = vpop.f32.mrb[40].mxu1 }
 0x854   :  { %v3263_v44 = vadd.f32 1e-05, %v3262_v8  ;;  %v3264_v0 = vpop.f32.mrb[41].mxu1  ;;  %v11234_v8 = vld [vmem:[%s16870_s5 + $0x23c] ss:$40 sps:$4 sm:$0xff]  }
 0x855   :  { %v3265_v61 = vadd.f32 1e-05, %v3264_v0  ;;  %v3266_v1 = vpop.f32.mrb[42].mxu1  ;;  %v11232_v0 = vld [vmem:[%s16870_s5 + $0x238] ss:$40 sps:$4 sm:$0xff]  }
 0x856   :  { %12006 = vrsqrt.f32 %v3263_v44  ;;  %v3267_v2 = vpop.f32.mrb[43].mxu1  ;;  %v11237_v44 = vld [vmem:[%s16870_s5 + $0x254] ss:$40 sps:$4 sm:$0xff]  }
 0x857   :  { %12008 = vrsqrt.f32 %v3265_v61  ;;  %v11235_v61 = vld [vmem:[%s16870_s5 + $0x250] ss:$40 sps:$4 sm:$0xff]   ;;  %v11240_v1 = vld [vmem:[%s16870_s5 + $0x28c] ss:$40 sps:$4 sm:$0xff]  }
 0x858   :  { %v11243_v2 = vld [vmem:[%s16870_s5 + $0x2a4] ss:$40 sps:$4 sm:$0xff]  }
 0x860   :  { %v12007_v17 = vpop.eup %12006 }
 0x861   :  { %v12009_v10 = vpop.eup %12008  ;;  %v3271_v11 = vmul.f32 %v12007_v17, %v13691_v14  ;;  %v11190_v14 = vld [vmem:[%s16870_s5 + $0x8] ss:$40 sps:$4 sm:$0xff]   ;;  %v11249_v17 = vld [vmem:[%s16870_s5 + $0x2f4] ss:$40 sps:$4 sm:$0xff]  }
 0x862   :  { %v3272_v13 = vmul.f32 %v12009_v10, %v13693_v56  ;;  %v11193_v56 = vld [vmem:[%s16870_s5 + $0x20] ss:$40 sps:$4 sm:$0xff]   ;;  %v11247_v10 = vld [vmem:[%s16870_s5 + $0x2f0] ss:$40 sps:$4 sm:$0xff]  }
 0x863   :  { %v3284_v16 = vmul.f32 %v3277_v9, %v3271_v11  ;;  %v11246_v9 = vld [vmem:[%s16870_s5 + $0x2dc] ss:$40 sps:$4 sm:$0xff]  }
 0x864   :  { %v3285_v37 = vmul.f32 %v3281_v18, %v3272_v13  ;;  %v11244_v18 = vld [vmem:[%s16870_s5 + $0x2d8] ss:$40 sps:$4 sm:$0xff]   ;;  %v11252_v11 = vld [vmem:[%s16870_s5 + $0x1c] ss:$40 sps:$4 sm:$0xff]  }
 0x865   :  { %v13805_v55 = vadd.f32 %v3290_v12, %v3284_v16  ;;  %v11312_v12 = vld [vmem:[%s16871_s7 + $0x104] ss:$8 sps:$4 sm:$0xff]   ;;  %v11250_v13 = vld [vmem:[%s16870_s5 + $0x18] ss:$40 sps:$4 sm:$0xff]  }
 0x866   :  { %v13807_v20 = vadd.f32 %v3294_v15, %v3285_v37  ;;  %v11255_v15 = vld [vmem:[%s16870_s5 + $0x6c] ss:$40 sps:$4 sm:$0xff]   ;;  %v11310_v16 = vld [vmem:[%s16871_s7 + $0x100] ss:$8 sps:$4 sm:$0xff]  }
 0x867   :  { %v13824_v26 = vpack.c.bf16 %v13805_v55, %v13805_v55  ;;  %v11318_v37 = vld [vmem:[%s16871_s7 + $0x114] ss:$8 sps:$4 sm:$0xff]  }
 0x868   :  { %v13811_v40 = vpack.c.bf16 %v13807_v20, %v13807_v20 }
 0x86a   :  { %9601 = vmatprep.mubr.msk.bf16.mxu1 %vm664_vm0, %v13811_v40  ;;  %9603 = vmatprep.mubr.msk.bf16.mxu0 %vm664_vm0, %v13811_v40 }
 0x86b   :  { %3991 = vmatmul.mubr.bf16.vlgmr.msra.gmra.mrb[44].mxu1 %v13824_v26  ;;  %4073 = vmatmul.mubr.bf16.vlgmr.msra.gmra.mrb[32].mxu0 %v13824_v26 }
 0x86c   :  { %4000 = vmatpush1.bf16.msra.mxu1 %v11190_v14  ;;  %4123 = vmatpush1.bf16.msra.mxu0 %v11193_v56  ;;  %v11253_v14 = vld [vmem:[%s16870_s5 + $0x68] ss:$40 sps:$4 sm:$0xff]   ;;  %v11258_v56 = vld [vmem:[%s16870_s5 + $0xbc] ss:$40 sps:$4 sm:$0xff]  }
 0x86d   :  { %9602 = vmatprep.mubr.msk.bf16.mxu1 %vm664_vm0, %v13811_v40  ;;  %9605 = vmatprep.mubr.msk.bf16.mxu0 %vm664_vm0, %v13811_v40 }
 0x86e   :  { %4001 = vmatprep.subr.bf16.mxu1 %v11198_v22  ;;  %4124 = vmatprep.subr.bf16.mxu0 %v11201_v29  ;;  %v11316_v22 = vld [vmem:[%s16871_s7 + $0x110] ss:$8 sps:$4 sm:$0xff]   ;;  %v11324_v29 = vld [vmem:[%s16871_s7 + $0x124] ss:$8 sps:$4 sm:$0xff]  }
 0x870   :  { %4002 = vmatpush1.bf16.msra.mxu1 %v11196_v34  ;;  %4125 = vmatpush1.bf16.msra.mxu0 %v11199_v30  ;;  %v11256_v34 = vld [vmem:[%s16870_s5 + $0xb8] ss:$40 sps:$4 sm:$0xff]   ;;  %v11261_v30 = vld [vmem:[%s16870_s5 + $0x10c] ss:$40 sps:$4 sm:$0xff]  }
 0x871   :  { %4003 = vmatprep.subr.bf16.mxu1 %v11204_v31  ;;  %4126 = vmatprep.subr.bf16.mxu0 %v11207_v32  ;;  %v11322_v31 = vld [vmem:[%s16871_s7 + $0x120] ss:$8 sps:$4 sm:$0xff]  }
 0x872   :  { %v11259_v32 = vld [vmem:[%s16870_s5 + $0x108] ss:$40 sps:$4 sm:$0xff]  }
 0x874   :  { %4004 = vmatpush1.bf16.msra.mxu1 %v11202_v53  ;;  %4127 = vmatpush1.bf16.msra.mxu0 %v11205_v33  ;;  %v11264_v53 = vld [vmem:[%s16870_s5 + $0x15c] ss:$40 sps:$4 sm:$0xff]   ;;  %v11328_v33 = vld [vmem:[%s16871_s7 + $0x130] ss:$8 sps:$4 sm:$0xff]  }
 0x875   :  { %4005 = vmatprep.subr.bf16.mxu1 %v11210_v35  ;;  %4128 = vmatprep.subr.bf16.mxu0 %v11213_v36  ;;  %v11336_v35 = vld [vmem:[%s16871_s7 + $0x144] ss:$8 sps:$4 sm:$0xff]   ;;  %v11262_v36 = vld [vmem:[%s16870_s5 + $0x158] ss:$40 sps:$4 sm:$0xff]  }
 0x878   :  { %4006 = vmatpush1.bf16.msra.mxu1 %v11208_v38  ;;  %4129 = vmatpush1.bf16.msra.mxu0 %v11211_v39  ;;  %v11267_v38 = vld [vmem:[%s16870_s5 + $0x1ac] ss:$40 sps:$4 sm:$0xff]   ;;  %v11334_v39 = vld [vmem:[%s16871_s7 + $0x140] ss:$8 sps:$4 sm:$0xff]  }
 0x879   :  { %4007 = vmatprep.subr.bf16.mxu1 %v11216_v43  ;;  %4130 = vmatprep.subr.bf16.mxu0 %v11219_v48  ;;  %v11265_v43 = vld [vmem:[%s16870_s5 + $0x1a8] ss:$40 sps:$4 sm:$0xff]   ;;  %v11270_v48 = vld [vmem:[%s16870_s5 + $0x1fc] ss:$40 sps:$4 sm:$0xff]  }
 0x87c   :  { %4008 = vmatpush1.bf16.msra.mxu1 %v11214_v50  ;;  %4131 = vmatpush1.bf16.msra.mxu0 %v11217_v51  ;;  %v11268_v50 = vld [vmem:[%s16870_s5 + $0x1f8] ss:$40 sps:$4 sm:$0xff]   ;;  %v11273_v51 = vld [vmem:[%s16870_s5 + $0x24c] ss:$40 sps:$4 sm:$0xff]  }
 0x87d   :  { %4009 = vmatprep.subr.bf16.mxu1 %v11222_v52  ;;  %4132 = vmatprep.subr.bf16.mxu0 %v11225_v57  ;;  %v11271_v52 = vld [vmem:[%s16870_s5 + $0x248] ss:$40 sps:$4 sm:$0xff]   ;;  %v11276_v57 = vld [vmem:[%s16870_s5 + $0x29c] ss:$40 sps:$4 sm:$0xff]  }
 0x880   :  { %4010 = vmatpush1.bf16.msra.mxu1 %v11220_v58  ;;  %4133 = vmatpush1.bf16.msra.mxu0 %v11223_v60  ;;  %v11274_v58 = vld [vmem:[%s16870_s5 + $0x298] ss:$40 sps:$4 sm:$0xff]   ;;  %v11279_v60 = vld [vmem:[%s16870_s5 + $0x2ec] ss:$40 sps:$4 sm:$0xff]  }
 0x881   :  { %4011 = vmatprep.subr.bf16.mxu1 %v11228_v62  ;;  %4134 = vmatprep.subr.bf16.mxu0 %v11231_v49  ;;  %v11277_v62 = vld [vmem:[%s16870_s5 + $0x2e8] ss:$40 sps:$4 sm:$0xff]   ;;  %v11282_v49 = vld [vmem:[%s16871_s7 + $0x4] ss:$8 sps:$4 sm:$0xff]  }
 0x884   :  { %4012 = vmatpush1.bf16.msra.mxu1 %v11226_v59  ;;  %4135 = vmatpush1.bf16.msra.mxu0 %v11229_v63  ;;  %v11280_v59 = vld [vmem:[%s16871_s7] ss:$8 sps:$4 sm:$0xff]   ;;  %v11285_v63 = vld [vmem:[%s16871_s7 + $0x14] ss:$8 sps:$4 sm:$0xff]  }
 0x885   :  { %4013 = vmatprep.subr.bf16.mxu1 %v11234_v8  ;;  %4136 = vmatprep.subr.bf16.mxu0 %v11237_v44  ;;  %v11283_v8 = vld [vmem:[%s16871_s7 + $0x10] ss:$8 sps:$4 sm:$0xff]   ;;  %v11288_v44 = vld [vmem:[%s16871_s7 + $0x24] ss:$8 sps:$4 sm:$0xff]  }
 0x888   :  { %4014 = vmatpush1.bf16.msra.mxu1 %v11232_v0  ;;  %4137 = vmatpush1.bf16.msra.mxu0 %v11235_v61  ;;  %v11286_v0 = vld [vmem:[%s16871_s7 + $0x20] ss:$8 sps:$4 sm:$0xff]   ;;  %v11342_v61 = vld [vmem:[%s16871_s7 + $0x154] ss:$8 sps:$4 sm:$0xff]  }
 0x889   :  { %4015 = vmatprep.subr.bf16.mxu1 %v11240_v1  ;;  %4138 = vmatprep.subr.bf16.mxu0 %v11243_v2  ;;  %v11340_v1 = vld [vmem:[%s16871_s7 + $0x150] ss:$8 sps:$4 sm:$0xff]  }
 0x88a   :  { %v11289_v2 = vld [vmem:[%s16871_s7 + $0x30] ss:$8 sps:$4 sm:$0xff]  }
 0x88c   :  { %4016 = vmatpush1.bf16.msra.mxu1 %v11238_v4  ;;  %4139 = vmatpush1.bf16.msra.mxu0 %v11241_v5  ;;  %v11346_v4 = vld [vmem:[%s16871_s7 + $0x160] ss:$8 sps:$4 sm:$0xff]   ;;  %v11348_v5 = vld [vmem:[%s16871_s7 + $0x164] ss:$8 sps:$4 sm:$0xff]  }
 0x88d   :  { %4017 = vmatprep.subr.bf16.mxu1 %v11246_v9  ;;  %4140 = vmatprep.subr.bf16.mxu0 %v11249_v17  ;;  %v11294_v9 = vld [vmem:[%s16871_s7 + $0x44] ss:$8 sps:$4 sm:$0xff]   ;;  %v11292_v17 = vld [vmem:[%s16871_s7 + $0x40] ss:$8 sps:$4 sm:$0xff]  }
 0x890   :  { %4018 = vmatpush1.bf16.msra.mxu1 %v11244_v18  ;;  %4141 = vmatpush1.bf16.msra.mxu0 %v11247_v10  ;;  %v11352_v18 = vld [vmem:[%s16871_s7 + $0x170] ss:$8 sps:$4 sm:$0xff]   ;;  %v11354_v10 = vld [vmem:[%s16871_s7 + $0x174] ss:$8 sps:$4 sm:$0xff]  }
 0x891   :  { %4081 = vmatprep.subr.bf16.mxu1 %v11252_v11  ;;  %5196 = vmatprep.subr.bf16.mxu0 %v11312_v12  ;;  %v11297_v11 = vld [vmem:[%s16871_s7 + $0x54] ss:$8 sps:$4 sm:$0xff]   ;;  %v11295_v12 = vld [vmem:[%s16871_s7 + $0x50] ss:$8 sps:$4 sm:$0xff]  }
 0x893   :  { %4032 = vmatmul.mubr.bf16.vlgmr.msra.gmra.mrb[48].mxu1 %v13824_v26  ;;  %4155 = vmatmul.mubr.bf16.vlgmr.msra.gmra.mrb[36].mxu0 %v13824_v26 }
 0x894   :  { %4082 = vmatpush1.bf16.msra.mxu1 %v11250_v13  ;;  %9604 = vmatprep.mubr.msk.bf16.mxu1 %vm664_vm0, %v13811_v40  ;;  %v11330_v40 = vld [vmem:[%s16871_s7 + $0x134] ss:$8 sps:$4 sm:$0xff]   ;;  %v11358_v13 = vld [vmem:[%s16871_s7 + $0x180] ss:$8 sps:$4 sm:$0xff]  }
 0x895   :  { %4083 = vmatprep.subr.bf16.mxu1 %v11255_v15  ;;  %5197 = vmatpush1.bf16.msra.mxu0 %v11310_v16  ;;  %v11360_v15 = vld [vmem:[%s16871_s7 + $0x184] ss:$8 sps:$4 sm:$0xff]  }
 0x896   :  { %5198 = vmatprep.subr.bf16.mxu0 %v11318_v37  ;;  %v11300_v16 = vld [vmem:[%s16871_s7 + $0x64] ss:$8 sps:$4 sm:$0xff]   ;;  %v11298_v37 = vld [vmem:[%s16871_s7 + $0x60] ss:$8 sps:$4 sm:$0xff]  }
 0x898   :  { %4084 = vmatpush1.bf16.msra.mxu1 %v11253_v14  ;;  %v11364_v14 = vld [vmem:[%s16871_s7 + $0x190] ss:$8 sps:$4 sm:$0xff]  }
 0x899   :  { %4085 = vmatprep.subr.bf16.mxu1 %v11258_v56  ;;  %5199 = vmatpush1.bf16.msra.mxu0 %v11316_v22  ;;  %v11366_v56 = vld [vmem:[%s16871_s7 + $0x194] ss:$8 sps:$4 sm:$0xff]  }
 0x89a   :  { %5200 = vmatprep.subr.bf16.mxu0 %v11324_v29  ;;  %v11303_v22 = vld [vmem:[%s16871_s7 + $0x74] ss:$8 sps:$4 sm:$0xff]   ;;  %v11301_v29 = vld [vmem:[%s16871_s7 + $0x70] ss:$8 sps:$4 sm:$0xff]  }
 0x89c   :  { %4086 = vmatpush1.bf16.msra.mxu1 %v11256_v34  ;;  %v11370_v34 = vld [vmem:[%s16871_s7 + $0x1a0] ss:$8 sps:$4 sm:$0xff]  }
 0x89d   :  { %4087 = vmatprep.subr.bf16.mxu1 %v11261_v30  ;;  %5201 = vmatpush1.bf16.msra.mxu0 %v11322_v31  ;;  %v11372_v30 = vld [vmem:[%s16871_s7 + $0x1a4] ss:$8 sps:$4 sm:$0xff]  }
 0x89e   :  { %5202 = vmatprep.subr.bf16.mxu0 %v11330_v40  ;;  %v11306_v31 = vld [vmem:[%s16871_s7 + $0x84] ss:$8 sps:$4 sm:$0xff]   ;;  %v11304_v40 = vld [vmem:[%s16871_s7 + $0x80] ss:$8 sps:$4 sm:$0xff]  }
 0x8a0   :  { %4088 = vmatpush1.bf16.msra.mxu1 %v11259_v32  ;;  %v11376_v32 = vld [vmem:[%s16871_s7 + $0x1b0] ss:$8 sps:$4 sm:$0xff]  }
 0x8a1   :  { %4089 = vmatprep.subr.bf16.mxu1 %v11264_v53  ;;  %5203 = vmatpush1.bf16.msra.mxu0 %v11328_v33  ;;  %v11378_v53 = vld [vmem:[%s16871_s7 + $0x1b4] ss:$8 sps:$4 sm:$0xff]  }
 0x8a2   :  { %5204 = vmatprep.subr.bf16.mxu0 %v11336_v35  ;;  %v11309_v33 = vld [vmem:[%s16871_s7 + $0x94] ss:$8 sps:$4 sm:$0xff]   ;;  %v11307_v35 = vld [vmem:[%s16871_s7 + $0x90] ss:$8 sps:$4 sm:$0xff]  }
 0x8a4   :  { %4090 = vmatpush1.bf16.msra.mxu1 %v11262_v36  ;;  %v11382_v36 = vld [vmem:[%s16871_s7 + $0x1c0] ss:$8 sps:$4 sm:$0xff]  }
 0x8a5   :  { %4091 = vmatprep.subr.bf16.mxu1 %v11267_v38  ;;  %5205 = vmatpush1.bf16.msra.mxu0 %v11334_v39  ;;  %v11384_v38 = vld [vmem:[%s16871_s7 + $0x1c4] ss:$8 sps:$4 sm:$0xff]  }
 0x8a6   :  { %5206 = vmatprep.subr.bf16.mxu0 %v11342_v61  ;;  %v11315_v39 = vld [vmem:[%s16871_s7 + $0xa4] ss:$8 sps:$4 sm:$0xff]   ;;  %v11337_v61 = vld [vmem:[%s16871_s7 + $0xe0] ss:$8 sps:$4 sm:$0xff]  }
 0x8a8   :  { %4092 = vmatpush1.bf16.msra.mxu1 %v11265_v43  ;;  %v11313_v43 = vld [vmem:[%s16871_s7 + $0xa0] ss:$8 sps:$4 sm:$0xff]  }
 0x8a9   :  { %4093 = vmatprep.subr.bf16.mxu1 %v11270_v48  ;;  %5207 = vmatpush1.bf16.msra.mxu0 %v11340_v1  ;;  %v11388_v48 = vld [vmem:[%s16871_s7 + $0x1d0] ss:$8 sps:$4 sm:$0xff]  }
 0x8aa   :  { %5208 = vmatprep.subr.bf16.mxu0 %v11348_v5  ;;  %v11343_v1 = vld [vmem:[%s16871_s7 + $0xf0] ss:$8 sps:$4 sm:$0xff]   ;;  %v3427_v5 = vsub.s32 5, %v12695_v23 }
 0x8ac   :  { %4094 = vmatpush1.bf16.msra.mxu1 %v11268_v50  ;;  %v11390_v50 = vld [vmem:[%s16871_s7 + $0x1d4] ss:$8 sps:$4 sm:$0xff]  }
 0x8ad   :  { %4095 = vmatprep.subr.bf16.mxu1 %v11273_v51  ;;  %5209 = vmatpush1.bf16.msra.mxu0 %v11346_v4  ;;  %v11321_v51 = vld [vmem:[%s16871_s7 + $0xb4] ss:$8 sps:$4 sm:$0xff]   ;;  %v14207_v4 = vld [vmem:[%s16874_s6] sm:$0xff] }
 0x8ae   :  { %5210 = vmatprep.subr.bf16.mxu0 %v11354_v10 }
 0x8b0   :  { %4096 = vmatpush1.bf16.msra.mxu1 %v11271_v52  ;;  %v11319_v52 = vld [vmem:[%s16871_s7 + $0xb0] ss:$8 sps:$4 sm:$0xff]  }
 0x8b1   :  { %4097 = vmatprep.subr.bf16.mxu1 %v11276_v57  ;;  %5211 = vmatpush1.bf16.msra.mxu0 %v11352_v18  ;;  %v11396_v57 = vld [vmem:[%s16871_s7 + $0x1e4] ss:$8 sps:$4 sm:$0xff]   ;;  %v3428_v18 = vrot.slane %v14207_v4, %v3427_v5 }
 0x8b2   :  { %5212 = vmatprep.subr.bf16.mxu0 %v11360_v15 }
 0x8b4   :  { %4098 = vmatpush1.bf16.msra.mxu1 %v11274_v58  ;;  %v11327_v58 = vld [vmem:[%s16871_s7 + $0xc4] ss:$8 sps:$4 sm:$0xff]  }
 0x8b5   :  { %4099 = vmatprep.subr.bf16.mxu1 %v11279_v60  ;;  %5213 = vmatpush1.bf16.msra.mxu0 %v11358_v13  ;;  %v11394_v60 = vld [vmem:[%s16871_s7 + $0x1e0] ss:$8 sps:$4 sm:$0xff]  }
 0x8b6   :  { %5214 = vmatprep.subr.bf16.mxu0 %v11366_v56 }
 0x8b8   :  { %4100 = vmatpush1.bf16.msra.mxu1 %v11277_v62  ;;  %v11325_v62 = vld [vmem:[%s16871_s7 + $0xc0] ss:$8 sps:$4 sm:$0xff]  }
 0x8b9   :  { %5155 = vmatprep.subr.bf16.mxu1 %v11282_v49  ;;  %5215 = vmatpush1.bf16.msra.mxu0 %v11364_v14  ;;  %v11402_v49 = vld [vmem:[%s16871_s7 + $0x1f4] ss:$8 sps:$4 sm:$0xff]  }
 0x8ba   :  { %5216 = vmatprep.subr.bf16.mxu0 %v11372_v30 }
 0x8bb   :  { %4114 = vmatmul.mubr.bf16.vlgmr.msra.gmra.mrb[52].mxu1 %v13824_v26  ;;  %v11291_v26 = vld [vmem:[%s16871_s7 + $0x34] ss:$8 sps:$4 sm:$0xff]  }
 0x8bc   :  { %5156 = vmatpush1.bf16.msra.mxu1 %v11280_v59  ;;  %v11333_v59 = vld [vmem:[%s16871_s7 + $0xd4] ss:$8 sps:$4 sm:$0xff]  }
 0x8bd   :  { %5157 = vmatprep.subr.bf16.mxu1 %v11285_v63  ;;  %5217 = vmatpush1.bf16.msra.mxu0 %v11370_v34  ;;  %v11400_v63 = vld [vmem:[%s16871_s7 + $0x1f0] ss:$8 sps:$4 sm:$0xff]  }
 0x8be   :  { %5218 = vmatprep.subr.bf16.mxu0 %v11378_v53 }
 0x8c0   :  { %5158 = vmatpush1.bf16.msra.mxu1 %v11283_v8  ;;  %v11331_v8 = vld [vmem:[%s16871_s7 + $0xd0] ss:$8 sps:$4 sm:$0xff]  }
 0x8c1   :  { %5159 = vmatprep.subr.bf16.mxu1 %v11288_v44  ;;  %5219 = vmatpush1.bf16.msra.mxu0 %v11376_v32  ;;  %v11408_v44 = vld [vmem:[%s16871_s7 + $0x304] ss:$8 sps:$4 sm:$0xff]   ;;  %v11349_v32 = vld [vmem:[%s16871_s7 + $0x200] ss:$8 sps:$4 sm:$0xff]  }
 0x8c2   :  { %5220 = vmatprep.subr.bf16.mxu0 %v11384_v38  ;;  %v11363_v38 = vld [vmem:[%s16871_s7 + $0x224] ss:$8 sps:$4 sm:$0xff]  }
 0x8c4   :  { %5160 = vmatpush1.bf16.msra.mxu1 %v11286_v0  ;;  %v11339_v0 = vld [vmem:[%s16871_s7 + $0xe4] ss:$8 sps:$4 sm:$0xff]  }
 0x8c5   :  { %5161 = vmatprep.subr.bf16.mxu1 %v11291_v26  ;;  %5221 = vmatpush1.bf16.msra.mxu0 %v11382_v36  ;;  %v11345_v26 = vld [vmem:[%s16871_s7 + $0xf4] ss:$8 sps:$4 sm:$0xff]   ;;  %v11355_v36 = vld [vmem:[%s16871_s7 + $0x210] ss:$8 sps:$4 sm:$0xff]  }
 0x8c6   :  { %5222 = vmatprep.subr.bf16.mxu0 %v11390_v50  ;;  %v11375_v50 = vld [vmem:[%s16871_s7 + $0x244] ss:$8 sps:$4 sm:$0xff]  }
 0x8c8   :  { %5162 = vmatpush1.bf16.msra.mxu1 %v11289_v2  ;;  %v11351_v2 = vld [vmem:[%s16871_s7 + $0x204] ss:$8 sps:$4 sm:$0xff]  }
 0x8c9   :  { %5163 = vmatprep.subr.bf16.mxu1 %v11294_v9  ;;  %5223 = vmatpush1.bf16.msra.mxu0 %v11388_v48  ;;  %v3408_v9 = vrot.slane %v14207_v4, %v12698_v24  ;;  %v11367_v48 = vld [vmem:[%s16871_s7 + $0x230] ss:$8 sps:$4 sm:$0xff]  }
 0x8ca   :  { %5224 = vmatprep.subr.bf16.mxu0 %v11396_v57  ;;  %v11379_v57 = vld [vmem:[%s16871_s7 + $0x250] ss:$8 sps:$4 sm:$0xff]  }
 0x8cc   :  { %5164 = vmatpush1.bf16.msra.mxu1 %v11292_v17  ;;  %v3412_v17 = vrot.slane %v14207_v4, %v12707_v27 }
 0x8cd   :  { %5165 = vmatprep.subr.bf16.mxu1 %v11297_v11  ;;  %5225 = vmatpush1.bf16.msra.mxu0 %v11394_v60  ;;  %v11385_v60 = vld [vmem:[%s16871_s7 + $0x260] ss:$8 sps:$4 sm:$0xff]  }
 0x8ce   :  { %5226 = vmatprep.subr.bf16.mxu0 %v11402_v49  ;;  %v11391_v49 = vld [vmem:[%s16871_s7 + $0x270] ss:$8 sps:$4 sm:$0xff]  }
 0x8d0   :  { %5166 = vmatpush1.bf16.msra.mxu1 %v11295_v12 }
 0x8d1   :  { %5167 = vmatprep.subr.bf16.mxu1 %v11300_v16  ;;  %5227 = vmatpush1.bf16.msra.mxu0 %v11400_v63  ;;  %v3416_v63 = vrot.slane %v14207_v4, %v12701_v25 }
 0x8d2   :  { %5278 = vmatprep.subr.bf16.mxu0 %v11408_v44  ;;  %v11397_v44 = vld [vmem:[%s16871_s7 + $0x280] ss:$8 sps:$4 sm:$0xff]  }
 0x8d4   :  { %5168 = vmatpush1.bf16.msra.mxu1 %v11298_v37 }
 0x8d5   :  { %5169 = vmatprep.subr.bf16.mxu1 %v11303_v22 }
 0x8d8   :  { %5170 = vmatpush1.bf16.msra.mxu1 %v11301_v29 }
 0x8d9   :  { %5171 = vmatprep.subr.bf16.mxu1 %v11306_v31 }
 0x8dc   :  { %5172 = vmatpush1.bf16.msra.mxu1 %v11304_v40 }
 0x8dd   :  { %5173 = vmatprep.subr.bf16.mxu1 %v11309_v33  ;;  %v11357_v33 = vld [vmem:[%s16871_s7 + $0x214] ss:$8 sps:$4 sm:$0xff]  }
 0x8e0   :  { %5174 = vmatpush1.bf16.msra.mxu1 %v11307_v35 }
 0x8e1   :  { %5175 = vmatprep.subr.bf16.mxu1 %v11315_v39  ;;  %v11361_v39 = vld [vmem:[%s16871_s7 + $0x220] ss:$8 sps:$4 sm:$0xff]  }
 0x8e4   :  { %5176 = vmatpush1.bf16.msra.mxu1 %v11313_v43  ;;  %v11369_v43 = vld [vmem:[%s16871_s7 + $0x234] ss:$8 sps:$4 sm:$0xff]  }
 0x8e5   :  { %5177 = vmatprep.subr.bf16.mxu1 %v11321_v51  ;;  %v11373_v51 = vld [vmem:[%s16871_s7 + $0x240] ss:$8 sps:$4 sm:$0xff]  }
 0x8e8   :  { %5178 = vmatpush1.bf16.msra.mxu1 %v11319_v52  ;;  %v11381_v52 = vld [vmem:[%s16871_s7 + $0x254] ss:$8 sps:$4 sm:$0xff]  }
 0x8e9   :  { %5179 = vmatprep.subr.bf16.mxu1 %v11327_v58  ;;  %v11387_v58 = vld [vmem:[%s16871_s7 + $0x264] ss:$8 sps:$4 sm:$0xff]  }
 0x8ec   :  { %5180 = vmatpush1.bf16.msra.mxu1 %v11325_v62  ;;  %v11393_v62 = vld [vmem:[%s16871_s7 + $0x274] ss:$8 sps:$4 sm:$0xff]  }
 0x8ed   :  { %5181 = vmatprep.subr.bf16.mxu1 %v11333_v59  ;;  %v11399_v59 = vld [vmem:[%s16871_s7 + $0x284] ss:$8 sps:$4 sm:$0xff]  }
 0x8f0   :  { %5182 = vmatpush1.bf16.msra.mxu1 %v11331_v8  ;;  %v3420_v8 = vrot.slane %v14207_v4, %v12731_v46 }
 0x8f1   :  { %5183 = vmatprep.subr.bf16.mxu1 %v11339_v0  ;;  %v11405_v0 = vld [vmem:[%s16871_s7 + $0x294] ss:$8 sps:$4 sm:$0xff]  }
 0x8f4   :  { %5184 = vmatpush1.bf16.msra.mxu1 %v11337_v61 }
 0x8f5   :  { %5185 = vmatprep.subr.bf16.mxu1 %v11345_v26 }
 0x8f8   :  { %5186 = vmatpush1.bf16.msra.mxu1 %v11343_v1 }
 0x8f9   :  { %5237 = vmatprep.subr.bf16.mxu1 %v11351_v2 }
 0x93e   :  { %v3992_v10 = vpop.f32.mrb[44].mxu1  ;;  %v14217_v11 = vpop.f32.mrb[32].mxu0 }
 0x93f   :  { %v3993_v12 = vadd.f32 %v3992_v10, %v3408_v9  ;;  %v3994_v13 = vpop.f32.mrb[45].mxu1  ;;  %v4076_v15 = vpop.f32.mrb[33].mxu0 }
 0x940   :  { %v3995_v16 = vadd.f32 %v3994_v13, %v3412_v17  ;;  %v4077_v37 = vadd.f32 %v4076_v15, %v3428_v18  ;;  %v3996_v14 = vpop.f32.mrb[46].mxu1  ;;  %v4078_v56 = vpop.f32.mrb[34].mxu0 }
 0x941   :  { %v4163_v22 = vmax.f32 %v3993_v12, 0.0  ;;  %v3997_v29 = vpop.f32.mrb[47].mxu1  ;;  %v4079_v34 = vpop.f32.mrb[35].mxu0  ;;  %v11403_v12 = vld [vmem:[%s16871_s7 + $0x290] ss:$8 sps:$4 sm:$0xff]  }
 0x942   :  { %v4164_v30 = vmax.f32 %v3995_v16, 0.0  ;;  %v4168_v31 = vmax.f32 %v4077_v37, 0.0  ;;  %v11411_v37 = vld [vmem:[%s16871_s7 + $0x2a4] ss:$8 sps:$4 sm:$0xff]   ;;  %v11409_v29 = vld [vmem:[%s16871_s7 + $0x2a0] ss:$8 sps:$4 sm:$0xff]  }
 0x943   :  { %v4333_v53 = vpack.c.bf16 %v4163_v22, %v4163_v22  ;;  %v11406_v22 = vld [vmem:[%s16871_s7 + $0x300] ss:$8 sps:$4 sm:$0xff]  }
 0x944   :  { %v4334_v40 = vpack.c.bf16 %v4164_v30, %v4164_v30  ;;  %v4338_v35 = vpack.c.bf16 %v4168_v31, %v4168_v31  ;;  %v11414_v30 = vld [vmem:[%s16871_s7 + $0x314] ss:$8 sps:$4 sm:$0xff]  }
 0x945   :  { %v11417_v31 = vld [vmem:[%s16871_s7 + $0x2b4] ss:$8 sps:$4 sm:$0xff]  }
 0x946   :  { %5187 = vmatprep.mubr.bf16.mxu1 %v4334_v40  ;;  %v11412_v40 = vld [vmem:[%s16871_s7 + $0x310] ss:$8 sps:$4 sm:$0xff]  }
 0x947   :  { %5188 = vmatmul.mubr.bf16.vlgmr.msra.gmra.mrb[56].mxu1 %v4333_v53  ;;  %v11420_v53 = vld [vmem:[%s16871_s7 + $0x324] ss:$8 sps:$4 sm:$0xff]  }
 0x948   :  { %5238 = vmatpush1.bf16.msra.mxu1 %v11349_v32  ;;  %5269 = vmatprep.mubr.bf16.mxu1 %v4338_v35  ;;  %v11415_v32 = vld [vmem:[%s16871_s7 + $0x2b0] ss:$8 sps:$4 sm:$0xff]   ;;  %v11418_v35 = vld [vmem:[%s16871_s7 + $0x320] ss:$8 sps:$4 sm:$0xff]  }
 0x949   :  { %5239 = vmatprep.subr.bf16.mxu1 %v11357_v33  ;;  %v11423_v33 = vld [vmem:[%s16871_s7 + $0x2c4] ss:$8 sps:$4 sm:$0xff]  }
 0x94c   :  { %5240 = vmatpush1.bf16.msra.mxu1 %v11355_v36  ;;  %v11421_v36 = vld [vmem:[%s16871_s7 + $0x2c0] ss:$8 sps:$4 sm:$0xff]  }
 0x94d   :  { %5241 = vmatprep.subr.bf16.mxu1 %v11363_v38  ;;  %v3423_v38 = vsub.s32 4, %v12695_v23 }
 0x950   :  { %5242 = vmatpush1.bf16.msra.mxu1 %v11361_v39  ;;  %v11426_v39 = vld [vmem:[%s16871_s7 + $0x334] ss:$8 sps:$4 sm:$0xff]  }
 0x951   :  { %5243 = vmatprep.subr.bf16.mxu1 %v11369_v43  ;;  %v11429_v43 = vld [vmem:[%s16871_s7 + $0x2d4] ss:$8 sps:$4 sm:$0xff]  }
 0x954   :  { %5244 = vmatpush1.bf16.msra.mxu1 %v11367_v48  ;;  %v14325_v48 = vld [vmem:[%s16874_s6 + $0x8] sm:$0x3] }
 0x955   :  { %5245 = vmatprep.subr.bf16.mxu1 %v11375_v50  ;;  %v11424_v50 = vld [vmem:[%s16871_s7 + $0x330] ss:$8 sps:$4 sm:$0xff]  }
 0x958   :  { %5246 = vmatpush1.bf16.msra.mxu1 %v11373_v51  ;;  %v11427_v51 = vld [vmem:[%s16871_s7 + $0x2d0] ss:$8 sps:$4 sm:$0xff]  }
 0x959   :  { %5247 = vmatprep.subr.bf16.mxu1 %v11381_v52  ;;  %v3424_v52 = vrot.slane %v14207_v4, %v3423_v38 }
 0x95c   :  { %5248 = vmatpush1.bf16.msra.mxu1 %v11379_v57  ;;  %v11432_v57 = vld [vmem:[%s16871_s7 + $0x344] ss:$8 sps:$4 sm:$0xff]  }
 0x95d   :  { %5249 = vmatprep.subr.bf16.mxu1 %v11387_v58  ;;  %v11435_v58 = vld [vmem:[%s16871_s7 + $0x2e4] ss:$8 sps:$4 sm:$0xff]  }
 0x960   :  { %5250 = vmatpush1.bf16.msra.mxu1 %v11385_v60  ;;  %v3444_v60 = vrot.slane %v14325_v48, %v12707_v27 }
 0x961   :  { %5251 = vmatprep.subr.bf16.mxu1 %v11393_v62  ;;  %v11430_v62 = vld [vmem:[%s16871_s7 + $0x340] ss:$8 sps:$4 sm:$0xff]  }
 0x964   :  { %5252 = vmatpush1.bf16.msra.mxu1 %v11391_v49  ;;  %v11433_v49 = vld [vmem:[%s16871_s7 + $0x2e0] ss:$8 sps:$4 sm:$0xff]  }
 0x965   :  { %5253 = vmatprep.subr.bf16.mxu1 %v11399_v59  ;;  %v4075_v59 = vadd.f32 %v14217_v11, %v3424_v52  ;;  %v11439_v11 = vld [vmem:[%s16871_s7 + $0x2f0] ss:$8 sps:$4 sm:$0xff]  }
 0x966   :  { %v4033_v61 = vpop.f32.mrb[48].mxu1  ;;  %v14277_v26 = vpop.f32.mrb[36].mxu0 }
 0x967   :  { %v4034_v1 = vadd.f32 %v4033_v61, %v3416_v63  ;;  %v4035_v2 = vpop.f32.mrb[49].mxu1  ;;  %v4158_v9 = vpop.f32.mrb[37].mxu0  ;;  %v11438_v63 = vld [vmem:[%s16871_s7 + $0x354] ss:$8 sps:$4 sm:$0xff]   ;;  %v4167_v61 = vmax.f32 %v4075_v59, 0.0 }
 0x968   :  { %v4036_v17 = vadd.f32 %v4035_v2, %v3420_v8  ;;  %v4037_v18 = vpop.f32.mrb[50].mxu1  ;;  %v4160_v10 = vpop.f32.mrb[38].mxu0  ;;  %5254 = vmatpush1.bf16.msra.mxu1 %v11397_v44  ;;  %v11441_v8 = vld [vmem:[%s16871_s7 + $0x2f4] ss:$8 sps:$4 sm:$0xff]   ;;  %v4159_v44 = vadd.f32 %v4158_v9, %v3444_v60  ;;  %v11447_v2 = vld [vmem:[%s16871_s7 + $0x404] ss:$8 sps:$4 sm:$0xff]  }
 0x969   :  { %v4165_v13 = vmax.f32 %v4034_v1, 0.0  ;;  %v4038_v15 = vpop.f32.mrb[51].mxu1  ;;  %v4161_v16 = vpop.f32.mrb[39].mxu0  ;;  %5255 = vmatprep.subr.bf16.mxu1 %v11405_v0  ;;  %v11436_v0 = vld [vmem:[%s16871_s7 + $0x350] ss:$8 sps:$4 sm:$0xff]   ;;  %v4337_v10 = vpack.c.bf16 %v4167_v61, %v4167_v61  ;;  %v16887_v61 = vsub.s32 6, %v12695_v23 }
 0x96a   :  { %v4166_v14 = vmax.f32 %v4036_v17, 0.0  ;;  %v11444_v1 = vld [vmem:[%s16871_s7 + $0x364] ss:$8 sps:$4 sm:$0xff]   ;;  %v4172_v9 = vmax.f32 %v4159_v44, 0.0  ;;  %v11442_v17 = vld [vmem:[%s16871_s7 + $0x360] ss:$8 sps:$4 sm:$0xff]  }
 0x96b   :  { %v4335_v34 = vpack.c.bf16 %v4165_v13, %v4165_v13  ;;  %v11445_v18 = vld [vmem:[%s16871_s7 + $0x400] ss:$8 sps:$4 sm:$0xff]   ;;  %v11453_v13 = vld [vmem:[%s16871_s7 + $0x414] ss:$8 sps:$4 sm:$0xff]   ;;  %v11448_v16 = vld [vmem:[%s16871_s7 + $0x370] ss:$8 sps:$4 sm:$0xff]  }
 0x96c   :  { %v4336_v56 = vpack.c.bf16 %v4166_v14, %v4166_v14  ;;  %5256 = vmatpush1.bf16.msra.mxu1 %v11403_v12  ;;  %v11450_v12 = vld [vmem:[%s16871_s7 + $0x374] ss:$8 sps:$4 sm:$0xff]   ;;  %v4342_v15 = vpack.c.bf16 %v4172_v9, %v4172_v9  ;;  %v3435_v14 = vsub.s32 7, %v12695_v23  ;;  %v11469_v60 = vld [vmem:[%s16871_s7 + $0x440] ss:$8 sps:$4 sm:$0xff]  }
 0x96d   :  { %5257 = vmatprep.subr.bf16.mxu1 %v11411_v37  ;;  %v11451_v37 = vld [vmem:[%s16871_s7 + $0x410] ss:$8 sps:$4 sm:$0xff]   ;;  %v11483_v44 = vld [vmem:[%s16871_s7 + $0x464] ss:$8 sps:$4 sm:$0xff]  }
 0x96e   :  { %5228 = vmatprep.mubr.bf16.mxu0 %v4336_v56  ;;  %v11456_v56 = vld [vmem:[%s16871_s7 + $0x384] ss:$8 sps:$4 sm:$0xff]   ;;  %v11472_v59 = vld [vmem:[%s16871_s7 + $0x3b0] ss:$8 sps:$4 sm:$0xff]  }
 0x96f   :  { %5229 = vmatmul.mubr.bf16.vlgmr.msra.gmra.mrb[40].mxu0 %v4335_v34  ;;  %v3436_v34 = vrot.slane %v14207_v4, %v3435_v14  ;;  %v11484_v9 = vld [vmem:[%s16871_s7 + $0x3d0] ss:$8 sps:$4 sm:$0xff]  }
 0x970   :  { %5279 = vmatpush1.bf16.msra.mxu0 %v11406_v22  ;;  %5258 = vmatpush1.bf16.msra.mxu1 %v11409_v29  ;;  %v11459_v22 = vld [vmem:[%s16871_s7 + $0x424] ss:$8 sps:$4 sm:$0xff]   ;;  %v11454_v29 = vld [vmem:[%s16871_s7 + $0x380] ss:$8 sps:$4 sm:$0xff]  }
 0x971   :  { %5280 = vmatprep.subr.bf16.mxu0 %v11414_v30  ;;  %5259 = vmatprep.subr.bf16.mxu1 %v11417_v31  ;;  %v11457_v30 = vld [vmem:[%s16871_s7 + $0x420] ss:$8 sps:$4 sm:$0xff]   ;;  %v11462_v31 = vld [vmem:[%s16871_s7 + $0x394] ss:$8 sps:$4 sm:$0xff]  }
 0x974   :  { %5281 = vmatpush1.bf16.msra.mxu0 %v11412_v40  ;;  %5260 = vmatpush1.bf16.msra.mxu1 %v11415_v32  ;;  %v11465_v40 = vld [vmem:[%s16871_s7 + $0x434] ss:$8 sps:$4 sm:$0xff]  }
 0x975   :  { %5282 = vmatprep.subr.bf16.mxu0 %v11420_v53  ;;  %5261 = vmatprep.subr.bf16.mxu1 %v11423_v33 }
 0x978   :  { %5283 = vmatpush1.bf16.msra.mxu0 %v11418_v35  ;;  %5262 = vmatpush1.bf16.msra.mxu1 %v11421_v36  ;;  %v11460_v36 = vld [vmem:[%s16871_s7 + $0x390] ss:$8 sps:$4 sm:$0xff]  }
 0x979   :  { %5284 = vmatprep.subr.bf16.mxu0 %v11426_v39  ;;  %5263 = vmatprep.subr.bf16.mxu1 %v11429_v43  ;;  %v11463_v39 = vld [vmem:[%s16871_s7 + $0x430] ss:$8 sps:$4 sm:$0xff]  }
 0x97c   :  { %5285 = vmatpush1.bf16.msra.mxu0 %v11424_v50  ;;  %5264 = vmatpush1.bf16.msra.mxu1 %v11427_v51  ;;  %v11468_v50 = vld [vmem:[%s16871_s7 + $0x3a4] ss:$8 sps:$4 sm:$0xff]  }
 0x97d   :  { %5286 = vmatprep.subr.bf16.mxu0 %v11432_v57  ;;  %5265 = vmatprep.subr.bf16.mxu1 %v11435_v58  ;;  %v11471_v51 = vld [vmem:[%s16871_s7 + $0x444] ss:$8 sps:$4 sm:$0xff]   ;;  %v11466_v58 = vld [vmem:[%s16871_s7 + $0x3a0] ss:$8 sps:$4 sm:$0xff]  }
 0x980   :  { %5287 = vmatpush1.bf16.msra.mxu0 %v11430_v62  ;;  %5266 = vmatpush1.bf16.msra.mxu1 %v11433_v49  ;;  %v11474_v62 = vld [vmem:[%s16871_s7 + $0x3b4] ss:$8 sps:$4 sm:$0xff]  }
 0x981   :  { %5288 = vmatprep.subr.bf16.mxu0 %v11438_v63  ;;  %5267 = vmatprep.subr.bf16.mxu1 %v11441_v8  ;;  %v11477_v49 = vld [vmem:[%s16871_s7 + $0x454] ss:$8 sps:$4 sm:$0xff]   ;;  %v11475_v63 = vld [vmem:[%s16871_s7 + $0x450] ss:$8 sps:$4 sm:$0xff]   ;;  %v11480_v8 = vld [vmem:[%s16871_s7 + $0x3c4] ss:$8 sps:$4 sm:$0xff]  }
 0x984   :  { %5289 = vmatpush1.bf16.msra.mxu0 %v11436_v0  ;;  %5268 = vmatpush1.bf16.msra.mxu1 %v11439_v11  ;;  %v11478_v0 = vld [vmem:[%s16871_s7 + $0x3c0] ss:$8 sps:$4 sm:$0xff]  }
 0x985   :  { %5290 = vmatprep.subr.bf16.mxu0 %v11444_v1  ;;  %5319 = vmatprep.subr.bf16.mxu1 %v11447_v2  ;;  %v11481_v11 = vld [vmem:[%s16871_s7 + $0x460] ss:$8 sps:$4 sm:$0xff]   ;;  %v11486_v1 = vld [vmem:[%s16871_s7 + $0x3d4] ss:$8 sps:$4 sm:$0xff]  }
 0x986   :  { %v11489_v2 = vld [vmem:[%s16871_s7 + $0x474] ss:$8 sps:$4 sm:$0xff]  }
 0x987   :  { %5270 = vmatmul.mubr.bf16.vlgmr.msra.gmra.mrb[60].mxu1 %v4337_v10  ;;  %v11492_v10 = vld [vmem:[%s16871_s7 + $0x3e4] ss:$8 sps:$4 sm:$0xff]  }
 0x988   :  { %5291 = vmatpush1.bf16.msra.mxu0 %v11442_v17  ;;  %5320 = vmatpush1.bf16.msra.mxu1 %v11445_v18  ;;  %v11487_v17 = vld [vmem:[%s16871_s7 + $0x470] ss:$8 sps:$4 sm:$0xff]   ;;  %v3432_v18 = vrot.slane %v14207_v4, %v16887_v61  ;;  %v11493_v4 = vld [vmem:[%s16871_s7 + $0x480] ss:$8 sps:$4 sm:$0xff]  }
 0x989   :  { %5351 = vmatprep.mubr.bf16.mxu1 %v4342_v15  ;;  %5292 = vmatprep.subr.bf16.mxu0 %v11450_v12  ;;  %v11495_v12 = vld [vmem:[%s16871_s7 + $0x484] ss:$8 sps:$4 sm:$0xff]  }
 0x98a   :  { %5321 = vmatprep.subr.bf16.mxu1 %v11453_v13  ;;  %v11490_v13 = vld [vmem:[%s16871_s7 + $0x3e0] ss:$8 sps:$4 sm:$0xff]  }
 0x98c   :  { %5293 = vmatpush1.bf16.msra.mxu0 %v11448_v16  ;;  %5322 = vmatpush1.bf16.msra.mxu1 %v11451_v37  ;;  %v11498_v16 = vld [vmem:[%s16871_s7 + $0x3f4] ss:$8 sps:$4 sm:$0xff]  }
 0x98d   :  { %5294 = vmatprep.subr.bf16.mxu0 %v11456_v56  ;;  %5323 = vmatprep.subr.bf16.mxu1 %v11459_v22  ;;  %v11501_v37 = vld [vmem:[%s16871_s7 + $0x494] ss:$8 sps:$4 sm:$0xff]   ;;  %v11496_v56 = vld [vmem:[%s16871_s7 + $0x3f0] ss:$8 sps:$4 sm:$0xff]  }
 0x98e   :  { %v4115_v32 = vpop.f32.mrb[52].mxu1  ;;  %v11499_v22 = vld [vmem:[%s16871_s7 + $0x490] ss:$8 sps:$4 sm:$0xff]  }
 0x98f   :  { %v4117_v53 = vpop.f32.mrb[53].mxu1  ;;  %v4116_v15 = vadd.f32 %v4115_v32, %v3432_v18  ;;  %v14503_v32 = vld [vmem:[%s16868_s18 + $0x4] ss:$8 sps:$4 sm:$0xff]   ;;  %v14617_v18 = vld [vmem:[%s16868_s18 + $0x74] ss:$8 sps:$4 sm:$0xff]  }
 0x990   :  { %v4118_v33 = vadd.f32 %v4117_v53, %v3436_v34  ;;  %5295 = vmatpush1.bf16.msra.mxu0 %v11454_v29  ;;  %v4119_v35 = vpop.f32.mrb[54].mxu1  ;;  %5324 = vmatpush1.bf16.msra.mxu1 %v11457_v30  ;;  %v11504_v34 = vld [vmem:[%s16871_s7 + $0x4a4] ss:$8 sps:$4 sm:$0xff]   ;;  %v11502_v30 = vld [vmem:[%s16871_s7 + $0x4a0] ss:$8 sps:$4 sm:$0xff]  }
 0x991   :  { %v4120_v43 = vpop.f32.mrb[55].mxu1  ;;  %5296 = vmatprep.subr.bf16.mxu0 %v11462_v31  ;;  %5325 = vmatprep.subr.bf16.mxu1 %v11465_v40  ;;  %v4169_v29 = vmax.f32 %v4116_v15, 0.0  ;;  %v11507_v40 = vld [vmem:[%s16871_s7 + $0x4b4] ss:$8 sps:$4 sm:$0xff]   ;;  %v11505_v53 = vld [vmem:[%s16871_s7 + $0x4b0] ss:$8 sps:$4 sm:$0xff]  }
 0x992   :  { %v4170_v52 = vmax.f32 %v4118_v33, 0.0  ;;  %v14512_v33 = vld [vmem:[%s16868_s18] ss:$8 sps:$4 sm:$0xff]   ;;  %v11510_v35 = vld [vmem:[%s16871_s7 + $0x4c4] ss:$8 sps:$4 sm:$0xff]  }
 0x993   :  { %v4339_v31 = vpack.c.bf16 %v4169_v29, %v4169_v29  ;;  %v14530_v43 = vld [vmem:[%s16868_s18 + $0x10] ss:$8 sps:$4 sm:$0xff]   ;;  %v4343_v29 = vld [vmem:[%s16875_s8] sm:$0x3] }
 0x994   :  { %v4340_v57 = vpack.c.bf16 %v4170_v52, %v4170_v52  ;;  %5297 = vmatpush1.bf16.msra.mxu0 %v11460_v36  ;;  %5326 = vmatpush1.bf16.msra.mxu1 %v11463_v39  ;;  %v14521_v36 = vld [vmem:[%s16868_s18 + $0x14] ss:$8 sps:$4 sm:$0xff]   ;;  %v11508_v39 = vld [vmem:[%s16871_s7 + $0x4c0] ss:$8 sps:$4 sm:$0xff]   ;;  %v11511_v52 = vld [vmem:[%s16871_s7 + $0x4d0] ss:$8 sps:$4 sm:$0xff]  }
 0x995   :  { %5298 = vmatprep.subr.bf16.mxu0 %v11468_v50  ;;  %5327 = vmatprep.subr.bf16.mxu1 %v11471_v51  ;;  %v11513_v50 = vld [vmem:[%s16871_s7 + $0x4d4] ss:$8 sps:$4 sm:$0xff]   ;;  %v14539_v51 = vld [vmem:[%s16868_s18 + $0x24] ss:$8 sps:$4 sm:$0xff]   ;;  %v12049_v15 = vld [vmem:[%s16868_s18 + $0x90] ss:$8 sps:$4 sm:$0xff]  }
 0x996   :  { %5310 = vmatprep.mubr.bf16.mxu0 %v4340_v57  ;;  %v14548_v57 = vld [vmem:[%s16868_s18 + $0x20] ss:$8 sps:$4 sm:$0xff]  }
 0x998   :  { %5299 = vmatpush1.bf16.msra.mxu0 %v11466_v58  ;;  %5328 = vmatpush1.bf16.msra.mxu1 %v11469_v60  ;;  %v3440_v58 = vrot.slane %v14325_v48, %v12698_v24  ;;  %v11516_v60 = vld [vmem:[%s16871_s7 + $0x4e4] ss:$8 sps:$4 sm:$0xff]   ;;  %v14568_v48 = vld [vmem:[%s16868_s18 + $0x30] ss:$8 sps:$4 sm:$0xff]  }
 0x999   :  { %5300 = vmatprep.subr.bf16.mxu0 %v11474_v62  ;;  %5329 = vmatprep.subr.bf16.mxu1 %v11477_v49  ;;  %v14559_v62 = vld [vmem:[%s16868_s18 + $0x34] ss:$8 sps:$4 sm:$0xff]   ;;  %v11514_v49 = vld [vmem:[%s16871_s7 + $0x4e0] ss:$8 sps:$4 sm:$0xff]  }
 0x99c   :  { %5301 = vmatpush1.bf16.msra.mxu0 %v11472_v59  ;;  %5330 = vmatpush1.bf16.msra.mxu1 %v11475_v63  ;;  %v4157_v59 = vadd.f32 %v14277_v26, %v3440_v58  ;;  %v11519_v63 = vld [vmem:[%s16871_s7 + $0x4f4] ss:$8 sps:$4 sm:$0xff]   ;;  %v14587_v26 = vld [vmem:[%s16868_s18 + $0x40] ss:$8 sps:$4 sm:$0xff]  }
 0x99d   :  { %5302 = vmatprep.subr.bf16.mxu0 %v11480_v8  ;;  %5331 = vmatprep.subr.bf16.mxu1 %v11483_v44  ;;  %v14578_v8 = vld [vmem:[%s16868_s18 + $0x44] ss:$8 sps:$4 sm:$0xff]   ;;  %v11517_v44 = vld [vmem:[%s16871_s7 + $0x4f0] ss:$8 sps:$4 sm:$0xff]  }
 0x9a0   :  { %5303 = vmatpush1.bf16.msra.mxu0 %v11478_v0  ;;  %5332 = vmatpush1.bf16.msra.mxu1 %v11481_v11  ;;  %v4171_v0 = vmax.f32 %v4157_v59, 0.0  ;;  %v14593_v11 = vld [vmem:[%s16868_s18 + $0x54] ss:$8 sps:$4 sm:$0xff]  }
 0x9a1   :  { %5304 = vmatprep.subr.bf16.mxu0 %v11486_v1  ;;  %5333 = vmatprep.subr.bf16.mxu1 %v11489_v2  ;;  %v14599_v1 = vld [vmem:[%s16868_s18 + $0x50] ss:$8 sps:$4 sm:$0xff]  }
 0x9a2   :  { %v4341_v2 = vpack.c.bf16 %v4171_v0, %v4171_v0 }
 0x9a4   :  { %5305 = vmatpush1.bf16.msra.mxu0 %v11484_v9  ;;  %5334 = vmatpush1.bf16.msra.mxu1 %v11487_v17  ;;  %v14605_v9 = vld [vmem:[%s16868_s18 + $0x64] ss:$8 sps:$4 sm:$0xff]   ;;  %v14611_v17 = vld [vmem:[%s16868_s18 + $0x60] ss:$8 sps:$4 sm:$0xff]  }
 0x9a5   :  { %5306 = vmatprep.subr.bf16.mxu0 %v11492_v10  ;;  %5335 = vmatprep.subr.bf16.mxu1 %v11495_v12  ;;  %v14623_v10 = vld [vmem:[%s16868_s18 + $0x70] ss:$8 sps:$4 sm:$0xff]   ;;  %v14629_v12 = vld [vmem:[%s16868_s18 + $0x84] ss:$8 sps:$4 sm:$0xff]  }
 0x9a8   :  { %5307 = vmatpush1.bf16.msra.mxu0 %v11490_v13  ;;  %5336 = vmatpush1.bf16.msra.mxu1 %v11493_v4  ;;  %v12047_v13 = vld [vmem:[%s16868_s18 + $0x80] ss:$8 sps:$4 sm:$0xff]   ;;  %v12048_v4 = vld [vmem:[%s16868_s18 + $0x94] ss:$8 sps:$4 sm:$0xff]  }
 0x9a9   :  { %5308 = vmatprep.subr.bf16.mxu0 %v11498_v16  ;;  %5337 = vmatprep.subr.bf16.mxu1 %v11501_v37 }
 0x9ac   :  { %5309 = vmatpush1.bf16.msra.mxu0 %v11496_v56  ;;  %5338 = vmatpush1.bf16.msra.mxu1 %v11499_v22 }
 0x9ad   :  { %5339 = vmatprep.subr.bf16.mxu1 %v11504_v34  ;;  %5369 = vmatprep.subr.bf16.mxu0 %v14503_v32  ;;  %v4348_v34 = vrot.slane %v4343_v29, %v12698_v24 }
 0x9af   :  { %5311 = vmatmul.mubr.bf16.vlgmr.msra.gmra.mrb[44].mxu0 %v4339_v31 }
 0x9b0   :  { %5340 = vmatpush1.bf16.msra.mxu1 %v11502_v30  ;;  %5370 = vmatpush1.bf16.msra.mxu0 %v14512_v33  ;;  %v4352_v30 = vrot.slane %v4343_v29, %v12707_v27 }
 0x9b1   :  { %5341 = vmatprep.subr.bf16.mxu1 %v11507_v40  ;;  %5371 = vmatprep.subr.bf16.mxu0 %v14521_v36 }
 0x9b4   :  { %5342 = vmatpush1.bf16.msra.mxu1 %v11505_v53  ;;  %5372 = vmatpush1.bf16.msra.mxu0 %v14530_v43 }
 0x9b5   :  { %5343 = vmatprep.subr.bf16.mxu1 %v11510_v35  ;;  %5373 = vmatprep.subr.bf16.mxu0 %v14539_v51 }
 0x9b8   :  { %5344 = vmatpush1.bf16.msra.mxu1 %v11508_v39  ;;  %5374 = vmatpush1.bf16.msra.mxu0 %v14548_v57 }
 0x9b9   :  { %5345 = vmatprep.subr.bf16.mxu1 %v11513_v50  ;;  %5375 = vmatprep.subr.bf16.mxu0 %v14559_v62 }
 0x9bc   :  { %5346 = vmatpush1.bf16.msra.mxu1 %v11511_v52  ;;  %5376 = vmatpush1.bf16.msra.mxu0 %v14568_v48 }
 0x9bd   :  { %5347 = vmatprep.subr.bf16.mxu1 %v11516_v60  ;;  %5377 = vmatprep.subr.bf16.mxu0 %v14578_v8 }
 0x9c0   :  { %5348 = vmatpush1.bf16.msra.mxu1 %v11514_v49  ;;  %5378 = vmatpush1.bf16.msra.mxu0 %v14587_v26 }
 0x9c1   :  { %5349 = vmatprep.subr.bf16.mxu1 %v11519_v63  ;;  %5379 = vmatprep.subr.bf16.mxu0 %v14593_v11 }
 0x9c4   :  { %5350 = vmatpush1.bf16.msra.mxu1 %v11517_v44  ;;  %5380 = vmatpush1.bf16.msra.mxu0 %v14599_v1 }
 0x9c5   :  { %5381 = vmatprep.subr.bf16.mxu0 %v14605_v9 }
 0x9c7   :  { %5352 = vmatmul.mubr.bf16.vlgmr.msra.gmra.mrb[64].mxu1 %v4341_v2 }
 0x9c8   :  { %5382 = vmatpush1.bf16.msra.mxu0 %v14611_v17 }
 0x9c9   :  { %5383 = vmatprep.subr.bf16.mxu0 %v14617_v18 }
 0x9cc   :  { %5384 = vmatpush1.bf16.msra.mxu0 %v14623_v10 }
 0x9cd   :  { %5385 = vmatprep.subr.bf16.mxu0 %v14629_v12 }
 0x9d0   :  { %5386 = vmatpush1.bf16.msra.mxu0 %v12047_v13 }
 0x9d1   :  { %5387 = vmatprep.subr.bf16.mxu0 %v12048_v4 }
 0x9d4   :  { %5388 = vmatpush1.bf16.msra.mxu0 %v12049_v15 }
 0x9d5   :  { %5419 = vmatprep.subr.bf16.mxu0 %v14503_v32 }
 0xa1a   :  { %v5189_v16 = vpop.f32.mrb[56].mxu1 }
 0xa1b   :  { %v5191_v37 = vpop.f32.mrb[57].mxu1  ;;  %v5190_v31 = vadd.f32 %v5189_v16, %v4348_v34 }
 0xa1c   :  { %v5193_v56 = vpop.f32.mrb[58].mxu1  ;;  %v5192_v40 = vadd.f32 %v5191_v37, %v4352_v30 }
 0xa1d   :  { %v5194_v22 = vpop.f32.mrb[59].mxu1 }
 0xa42   :  { %v5230_v53 = vpop.f32.mrb[40].mxu0 }
 0xa43   :  { %v5231_v35 = vadd.f32 %v5230_v53, %v5190_v31  ;;  %v5232_v39 = vpop.f32.mrb[41].mxu0 }
 0xa44   :  { %v5233_v50 = vadd.f32 %v5232_v39, %v5192_v40  ;;  %v5234_v52 = vpop.f32.mrb[42].mxu0 }
 0xa45   :  { %v5235_v32 = vpop.f32.mrb[43].mxu0  ;;  %v11537_v52 = vld [vmem:[%s16892_s20 + $0x18c] ss:$16 sps:$4 sm:$0xff]  }
 0xa46   :  { %v11535_v32 = vld [vmem:[%s16892_s20 + $0x188] ss:$16 sps:$4 sm:$0xff]  }
 0xa5a   :  { %v5271_v58 = vpop.f32.mrb[60].mxu1 }
 0xa5b   :  { %v5272_v60 = vadd.f32 %v5271_v58, %v5231_v35  ;;  %v5273_v49 = vpop.f32.mrb[61].mxu1  ;;  %v11543_v58 = vld [vmem:[%s16892_s20 + $0x1ac] ss:$16 sps:$4 sm:$0xff]  }
 0xa5c   :  { %v5274_v59 = vadd.f32 %v5273_v49, %v5233_v50  ;;  %v5275_v63 = vpop.f32.mrb[62].mxu1  ;;  %v11546_v49 = vld [vmem:[%s16892_s20 + $0x1c4] ss:$16 sps:$4 sm:$0xff]  }
 0xa5d   :  { %v5276_v44 = vpop.f32.mrb[63].mxu1  ;;  %v11544_v63 = vld [vmem:[%s16892_s20 + $0x1c0] ss:$16 sps:$4 sm:$0xff]  }
 0xa5e   :  { %v11547_v44 = vld [vmem:[%s16892_s20 + $0x1c8] ss:$16 sps:$4 sm:$0xff]  }
 0xa82   :  { %v5312_v0 = vpop.f32.mrb[44].mxu0 }
 0xa83   :  { %v5313_v2 = vadd.f32 %v5312_v0, %v5272_v60  ;;  %v5314_v56 = vpop.f32.mrb[45].mxu0  ;;  %v11541_v60 = vld [vmem:[%s16892_s20 + $0x1a8] ss:$16 sps:$4 sm:$0xff]   ;;  %v11552_v0 = vld [vmem:[%s16892_s20 + $0x1e4] ss:$16 sps:$4 sm:$0xff]  }
 0xa84   :  { %v5315_v22 = vadd.f32 %v5314_v56, %v5274_v59  ;;  %v5316_v61 = vpop.f32.mrb[46].mxu0  ;;  %v11549_v59 = vld [vmem:[%s16892_s20 + $0x1cc] ss:$16 sps:$4 sm:$0xff]   ;;  %v11550_v56 = vld [vmem:[%s16892_s20 + $0x1e0] ss:$16 sps:$4 sm:$0xff]  }
 0xa85   :  { %v5317_v29 = vpop.f32.mrb[47].mxu0  ;;  %v11525_v61 = vld [vmem:[%s16892_s20 + $0x14c] ss:$16 sps:$4 sm:$0xff]  }
 0xa86   :  { %v11558_v29 = vld [vmem:[%s16892_s20 + $0x204] ss:$16 sps:$4 sm:$0xff]  }
 0xa9a   :  { %v5353_v16 = vpop.f32.mrb[64].mxu1 }
 0xa9b   :  { %v5354_v37 = vadd.f32 %v5353_v16, %v5313_v2  ;;  %v5355_v34 = vpop.f32.mrb[65].mxu1  ;;  %v11555_v2 = vld [vmem:[%s16892_s20 + $0x1ec] ss:$16 sps:$4 sm:$0xff]  }
 0xa9c   :  { %v5356_v30 = vadd.f32 %v5355_v34, %v5315_v22  ;;  %v5357_v31 = vpop.f32.mrb[66].mxu1  ;;  %v11553_v22 = vld [vmem:[%s16892_s20 + $0x1e8] ss:$16 sps:$4 sm:$0xff]   ;;  %v11561_v16 = vld [vmem:[%s16892_s20 + $0x20c] ss:$16 sps:$4 sm:$0xff]  }
 0xa9d   :  { %v5360_v40 = vadd.f32 %v5354_v37, %v13805_v55  ;;  %v5358_v53 = vpop.f32.mrb[67].mxu1  ;;  %v11520_v55 = vld [vmem:[%s16892_s20 + $0x140] ss:$16 sps:$4 sm:$0xff]   ;;  %v11559_v34 = vld [vmem:[%s16892_s20 + $0x208] ss:$16 sps:$4 sm:$0xff]  }
 0xa9e   :  { %v5361_v35 = vadd.f32 %v5356_v30, %v13807_v20  ;;  %v11522_v20 = vld [vmem:[%s16892_s20 + $0x144] ss:$16 sps:$4 sm:$0xff]   ;;  %v11556_v37 = vld [vmem:[%s16892_s20 + $0x200] ss:$16 sps:$4 sm:$0xff]   ;;  %v11567_v31 = vld [vmem:[%s16892_s20 + $0x22c] ss:$16 sps:$4 sm:$0xff]  }
 0xa9f   :  { %v5364_v50 = vpack.c.bf16 %v5360_v40, %v5360_v40  ;;  %5759 = vmatprep.subr.bf16.mxu1 %v11522_v20  ;;  %v11564_v30 = vld [vmem:[%s16892_s20 + $0x224] ss:$16 sps:$4 sm:$0xff]   ;;  %v11565_v53 = vld [vmem:[%s16892_s20 + $0x228] ss:$16 sps:$4 sm:$0xff]  }
 0xaa0   :  { %v5365_v39 = vpack.c.bf16 %v5361_v35, %v5361_v35  ;;  %5760 = vmatpush1.bf16.msra.mxu1 %v11520_v55  ;;  %v11573_v55 = vld [vmem:[%s16892_s20 + $0x24c] ss:$16 sps:$4 sm:$0xff]   ;;  %v11576_v20 = vld [vmem:[%s16892_s20 + $0x264] ss:$16 sps:$4 sm:$0xff]  }
 0xaa2   :  { %9766 = vmatprep.mubr.msk.bf16.mxu0 %vm664_vm0, %v5365_v39  ;;  %v11570_v39 = vld [vmem:[%s16892_s20 + $0x244] ss:$16 sps:$4 sm:$0xff]  }
 0xaa3   :  { %5402 = vmatmul.mubr.bf16.vlgmr.msra.gmra.mrb[48].mxu0 %v5364_v50  ;;  %v11571_v50 = vld [vmem:[%s16892_s20 + $0x248] ss:$16 sps:$4 sm:$0xff]  }
 0xaa4   :  { %5420 = vmatpush1.bf16.msra.mxu0 %v14512_v33  ;;  %v11528_v33 = vld [vmem:[%s16892_s20 + $0x164] ss:$16 sps:$4 sm:$0xff]  }
 0xaa5   :  { %5421 = vmatprep.subr.bf16.mxu0 %v14521_v36  ;;  %v11526_v36 = vld [vmem:[%s16892_s20 + $0x160] ss:$16 sps:$4 sm:$0xff]   ;;  %5761 = vmatprep.subr.bf16.mxu1 %v11528_v33 }
 0xaa6   :  { %5762 = vmatpush1.bf16.msra.mxu1 %v11526_v36  ;;  %v11574_v33 = vld [vmem:[%s16892_s20 + $0x260] ss:$16 sps:$4 sm:$0xff]   ;;  %v11577_v36 = vld [vmem:[%s16892_s20 + $0x268] ss:$16 sps:$4 sm:$0xff]  }
 0xaa8   :  { %5422 = vmatpush1.bf16.msra.mxu0 %v14530_v43  ;;  %v11534_v43 = vld [vmem:[%s16892_s20 + $0x184] ss:$16 sps:$4 sm:$0xff]  }
 0xaa9   :  { %5423 = vmatprep.subr.bf16.mxu0 %v14539_v51  ;;  %v11532_v51 = vld [vmem:[%s16892_s20 + $0x180] ss:$16 sps:$4 sm:$0xff]   ;;  %5763 = vmatprep.subr.bf16.mxu1 %v11534_v43 }
 0xaaa   :  { %5764 = vmatpush1.bf16.msra.mxu1 %v11532_v51  ;;  %v12050_v43 = vld [vmem:[%s16894_s22 + $0x4] ss:$28 sps:$4 sm:$0xff]   ;;  %v12051_v51 = vld [vmem:[%s16894_s22 + $0xc] ss:$28 sps:$4 sm:$0xff]  }
 0xaac   :  { %5424 = vmatpush1.bf16.msra.mxu0 %v14548_v57  ;;  %v11540_v57 = vld [vmem:[%s16892_s20 + $0x1a4] ss:$16 sps:$4 sm:$0xff]  }
 0xaad   :  { %5425 = vmatprep.subr.bf16.mxu0 %v14559_v62  ;;  %v11538_v62 = vld [vmem:[%s16892_s20 + $0x1a0] ss:$16 sps:$4 sm:$0xff]   ;;  %5765 = vmatprep.subr.bf16.mxu1 %v11540_v57 }
 0xaae   :  { %5766 = vmatpush1.bf16.msra.mxu1 %v11538_v62 }
 0xaaf   :  { %5767 = vmatprep.subr.bf16.mxu1 %v11546_v49 }
 0xab0   :  { %5426 = vmatpush1.bf16.msra.mxu0 %v14568_v48 }
 0xab1   :  { %5427 = vmatprep.subr.bf16.mxu0 %v14578_v8 }
 0xab2   :  { %5768 = vmatpush1.bf16.msra.mxu1 %v11544_v63 }
 0xab3   :  { %5769 = vmatprep.subr.bf16.mxu1 %v11552_v0 }
 0xab4   :  { %5428 = vmatpush1.bf16.msra.mxu0 %v14587_v26 }
 0xab5   :  { %5429 = vmatprep.subr.bf16.mxu0 %v14593_v11 }
 0xab6   :  { %5770 = vmatpush1.bf16.msra.mxu1 %v11550_v56  ;;  %v12055_v56 = vld [vmem:[%s16894_s22 + $0x44] ss:$28 sps:$4 sm:$0xff]  }
 0xab7   :  { %5771 = vmatprep.subr.bf16.mxu1 %v11558_v29  ;;  %v12057_v29 = vld [vmem:[%s16894_s22 + $0x40] ss:$28 sps:$4 sm:$0xff]  }
 0xab8   :  { %5430 = vmatpush1.bf16.msra.mxu0 %v14599_v1 }
 0xab9   :  { %5431 = vmatprep.subr.bf16.mxu0 %v14605_v9 }
 0xaba   :  { %5772 = vmatpush1.bf16.msra.mxu1 %v11556_v37  ;;  %v12059_v37 = vld [vmem:[%s16894_s22 + $0x7c] ss:$28 sps:$4 sm:$0xff]  }
 0xabb   :  { %5773 = vmatprep.subr.bf16.mxu1 %v11564_v30  ;;  %v12061_v30 = vld [vmem:[%s16894_s22 + $0x78] ss:$28 sps:$4 sm:$0xff]  }
 0xabc   :  { %5432 = vmatpush1.bf16.msra.mxu0 %v14611_v17 }
 0xabd   :  { %5433 = vmatprep.subr.bf16.mxu0 %v14617_v18 }
 0xac0   :  { %5434 = vmatpush1.bf16.msra.mxu0 %v14623_v10 }
 0xac1   :  { %5435 = vmatprep.subr.bf16.mxu0 %v14629_v12  ;;  %v11523_v12 = vld [vmem:[%s16892_s20 + $0x148] ss:$16 sps:$4 sm:$0xff]  }
 0xac4   :  { %5436 = vmatpush1.bf16.msra.mxu0 %v12047_v13 }
 0xac5   :  { %5437 = vmatprep.subr.bf16.mxu0 %v12048_v4  ;;  %v11531_v4 = vld [vmem:[%s16892_s20 + $0x16c] ss:$16 sps:$4 sm:$0xff]  }
 0xac8   :  { %5438 = vmatpush1.bf16.msra.mxu0 %v12049_v15  ;;  %v11529_v15 = vld [vmem:[%s16892_s20 + $0x168] ss:$16 sps:$4 sm:$0xff]  }
 0xac9   :  { %5800 = vmatprep.subr.bf16.mxu0 %v11525_v61  ;;  %v11579_v61 = vld [vmem:[%s16892_s20 + $0x26c] ss:$16 sps:$4 sm:$0xff]  }
 0xb76   :  { %v5403_v48 = vpop.f32.mrb[48].mxu0 }
 0xb77   :  { %v14693_v8 = vsub.f32 %v5360_v40, %v5403_v48  ;;  %v5405_v26 = vpop.f32.mrb[49].mxu0  ;;  %v11562_v40 = vld [vmem:[%s16892_s20 + $0x220] ss:$16 sps:$4 sm:$0xff]  }
 0xb78   :  { %v14695_v11 = vsub.f32 %v5361_v35, %v5405_v26  ;;  %v5407_v1 = vpop.f32.mrb[50].mxu0  ;;  %5774 = vmatpush1.bf16.msra.mxu1 %v11562_v40  ;;  %v11568_v35 = vld [vmem:[%s16892_s20 + $0x240] ss:$16 sps:$4 sm:$0xff]  }
 0xb79   :  { %v5412_v9 = vmul.f32 %v14693_v8, %v14693_v8  ;;  %v5408_v17 = vpop.f32.mrb[51].mxu0  ;;  %5775 = vmatprep.subr.bf16.mxu1 %v11570_v39  ;;  %v12063_v40 = vld [vmem:[%s16894_s22 + $0xb4] ss:$28 sps:$4 sm:$0xff]   ;;  %v12066_v39 = vld [vmem:[%s16894_s22 + $0xe4] ss:$28 sps:$4 sm:$0xff]  }
 0xb7a   :  { %v5413_v18 = vmul.f32 %v14695_v11, %v14695_v11  ;;  %v5362_v17 = vld [vmem:[%s16876_s11] sm:$0x3] }
 0xb7b   :  { %v5414_v13 = vpack.c.bf16 %v5412_v9, %v5412_v9 }
 0xb7c   :  { %v5415_v10 = vpack.c.bf16 %v5413_v18, %v5413_v18  ;;  %5776 = vmatpush1.bf16.msra.mxu1 %v11568_v35  ;;  %v5363_v18 = vld [vmem:[%s16877_s12] sm:$0x3]  ;;  %v12065_v35 = vld [vmem:[%s16894_s22 + $0xb0] ss:$28 sps:$4 sm:$0xff]  }
 0xb7d   :  { %5777 = vmatprep.subr.bf16.mxu1 %v11576_v20  ;;  %v12069_v20 = vld [vmem:[%s16894_s22 + $0xe8] ss:$28 sps:$4 sm:$0xff]  }
 0xb7e   :  { %9767 = vmatprep.mubr.msk.bf16.mxu0 %vm664_vm0, %v5415_v10  ;;  %v5468_v10 = vrot.slane %v5362_v17, %v12698_v24 }
 0xb7f   :  { %5452 = vmatmul.mubr.bf16.vlgmr.msra.gmra.mrb[52].mxu0 %v5414_v13  ;;  %v5472_v13 = vrot.slane %v5362_v17, %v12707_v27  ;;  %v12081_v17 = vld [vmem:[%s16894_s22 + $0x190] ss:$28 sps:$4 sm:$0xff]  }
 0xb80   :  { %5801 = vmatpush1.bf16.msra.mxu0 %v11523_v12  ;;  %5778 = vmatpush1.bf16.msra.mxu1 %v11574_v33  ;;  %v12071_v33 = vld [vmem:[%s16894_s22 + $0x124] ss:$28 sps:$4 sm:$0xff]  }
 0xb81   :  { %5802 = vmatprep.subr.bf16.mxu0 %v11531_v4  ;;  %5846 = vmatprep.subr.bf16.mxu1 %v12050_v43  ;;  %v12073_v43 = vld [vmem:[%s16894_s22 + $0x120] ss:$28 sps:$4 sm:$0xff]  }
 0xb84   :  { %5803 = vmatpush1.bf16.msra.mxu0 %v11529_v15 }
 0xb85   :  { %5804 = vmatprep.subr.bf16.mxu0 %v11537_v52  ;;  %v5481_v52 = vrot.slane %v5363_v18, %v12698_v24 }
 0xb88   :  { %5805 = vmatpush1.bf16.msra.mxu0 %v11535_v32 }
 0xb89   :  { %5806 = vmatprep.subr.bf16.mxu0 %v11543_v58  ;;  %v5485_v58 = vrot.slane %v5363_v18, %v12707_v27  ;;  %v12082_v18 = vld [vmem:[%s16894_s22 + $0x1c4] ss:$28 sps:$4 sm:$0xff]  }
 0xb8c   :  { %5807 = vmatpush1.bf16.msra.mxu0 %v11541_v60 }
 0xb8d   :  { %5808 = vmatprep.subr.bf16.mxu0 %v11549_v59 }
 0xb90   :  { %5809 = vmatpush1.bf16.msra.mxu0 %v11547_v44 }
 0xb91   :  { %5810 = vmatprep.subr.bf16.mxu0 %v11555_v2  ;;  %v12054_v2 = vld [vmem:[%s16894_s22 + $0x3c] ss:$28 sps:$4 sm:$0xff]  }
 0xb94   :  { %5811 = vmatpush1.bf16.msra.mxu0 %v11553_v22  ;;  %v12056_v22 = vld [vmem:[%s16894_s22 + $0x38] ss:$28 sps:$4 sm:$0xff]  }
 0xb95   :  { %5812 = vmatprep.subr.bf16.mxu0 %v11561_v16  ;;  %v12058_v16 = vld [vmem:[%s16894_s22 + $0x74] ss:$28 sps:$4 sm:$0xff]  }
 0xb98   :  { %5813 = vmatpush1.bf16.msra.mxu0 %v11559_v34  ;;  %v12060_v34 = vld [vmem:[%s16894_s22 + $0x70] ss:$28 sps:$4 sm:$0xff]  }
 0xb99   :  { %5814 = vmatprep.subr.bf16.mxu0 %v11567_v31  ;;  %v12062_v31 = vld [vmem:[%s16894_s22 + $0xac] ss:$28 sps:$4 sm:$0xff]  }
 0xb9c   :  { %5815 = vmatpush1.bf16.msra.mxu0 %v11565_v53  ;;  %v12064_v53 = vld [vmem:[%s16894_s22 + $0xa8] ss:$28 sps:$4 sm:$0xff]  }
 0xb9d   :  { %5816 = vmatprep.subr.bf16.mxu0 %v11573_v55  ;;  %v12068_v55 = vld [vmem:[%s16894_s22 + $0xe0] ss:$28 sps:$4 sm:$0xff]  }
 0xba0   :  { %5817 = vmatpush1.bf16.msra.mxu0 %v11571_v50  ;;  %v12067_v50 = vld [vmem:[%s16894_s22 + $0xec] ss:$28 sps:$4 sm:$0xff]  }
 0xba1   :  { %5818 = vmatprep.subr.bf16.mxu0 %v11579_v61  ;;  %v12070_v61 = vld [vmem:[%s16894_s22 + $0x11c] ss:$28 sps:$4 sm:$0xff]  }
 0xba4   :  { %5819 = vmatpush1.bf16.msra.mxu0 %v11577_v36  ;;  %v12072_v36 = vld [vmem:[%s16894_s22 + $0x118] ss:$28 sps:$4 sm:$0xff]  }
 0xba5   :  { %5887 = vmatprep.subr.bf16.mxu0 %v12051_v51  ;;  %v12074_v51 = vld [vmem:[%s16894_s22 + $0x154] ss:$28 sps:$4 sm:$0xff]  }
 0xc52   :  { %v5453_v57 = vpop.f32.mrb[52].mxu0 }
 0xc53   :  { %v5454_v62 = vadd.f32 1e-05, %v5453_v57  ;;  %v5455_v48 = vpop.f32.mrb[53].mxu0  ;;  %v12075_v57 = vld [vmem:[%s16894_s22 + $0x15c] ss:$28 sps:$4 sm:$0xff]  }
 0xc54   :  { %v5456_v26 = vadd.f32 1e-05, %v5455_v48  ;;  %v5457_v1 = vpop.f32.mrb[54].mxu0  ;;  %v12077_v48 = vld [vmem:[%s16894_s22 + $0x158] ss:$28 sps:$4 sm:$0xff]  }
 0xc55   :  { %12010 = vrsqrt.f32 %v5454_v62  ;;  %v5458_v9 = vpop.f32.mrb[55].mxu0  ;;  %v12076_v62 = vld [vmem:[%s16894_s22 + $0x150] ss:$28 sps:$4 sm:$0xff]  }
 0xc56   :  { %12012 = vrsqrt.f32 %v5456_v26  ;;  %v12078_v26 = vld [vmem:[%s16894_s22 + $0x18c] ss:$28 sps:$4 sm:$0xff]   ;;  %v12079_v1 = vld [vmem:[%s16894_s22 + $0x194] ss:$28 sps:$4 sm:$0xff]  }
 0xc57   :  { %v12080_v9 = vld [vmem:[%s16894_s22 + $0x188] ss:$28 sps:$4 sm:$0xff]  }
 0xc5f   :  { %v12011_v12 = vpop.eup %12010 }
 0xc60   :  { %v12013_v4 = vpop.eup %12012  ;;  %v5462_v15 = vmul.f32 %v12011_v12, %v14693_v8  ;;  %v12052_v8 = vld [vmem:[%s16894_s22] ss:$28 sps:$4 sm:$0xff]  }
 0xc61   :  { %v5463_v32 = vmul.f32 %v12013_v4, %v14695_v11  ;;  %v12053_v11 = vld [vmem:[%s16894_s22 + $0x8] ss:$28 sps:$4 sm:$0xff]   ;;  %v12084_v12 = vld [vmem:[%s16894_s22 + $0x1c0] ss:$28 sps:$4 sm:$0xff]  }
 0xc62   :  { %v5475_v60 = vmul.f32 %v5468_v10, %v5462_v15  ;;  %v12083_v10 = vld [vmem:[%s16894_s22 + $0x1cc] ss:$28 sps:$4 sm:$0xff]   ;;  %v12086_v4 = vld [vmem:[%s16894_s22 + $0x1fc] ss:$28 sps:$4 sm:$0xff]   ;;  %v12087_v15 = vld [vmem:[%s16894_s22 + $0x204] ss:$28 sps:$4 sm:$0xff]  }
 0xc63   :  { %v5476_v49 = vmul.f32 %v5472_v13, %v5463_v32  ;;  %v12085_v13 = vld [vmem:[%s16894_s22 + $0x1c8] ss:$28 sps:$4 sm:$0xff]   ;;  %v12089_v32 = vld [vmem:[%s16894_s22 + $0x1f8] ss:$28 sps:$4 sm:$0xff]  }
 0xc64   :  { %v14813_v59 = vadd.f32 %v5481_v52, %v5475_v60  ;;  %v12088_v52 = vld [vmem:[%s16894_s22 + $0x200] ss:$28 sps:$4 sm:$0xff]   ;;  %v9808_v60 = vld [vmem:[%s16895_s21 + $0x4] sm:$0xf]  ;;  %s16896_s21 = smov 96  }
 0xc65   :  { %v14815_v63 = vadd.f32 %v5485_v58, %v5476_v49  ;;  %v12090_v58 = vld [vmem:[%s16894_s22 + $0x14] ss:$28 sps:$4 sm:$0xff]   ;;  %v5547_v49 = vrot.slane %v9808_v60, %v12701_v25 }
 0xc66   :  { %v5531_v0 = vpack.c.bf16 %v14813_v59, %v14813_v59 }
 0xc67   :  { %v5532_v44 = vpack.c.bf16 %v14815_v63, %v14815_v63 }
 0xc69   :  { %9849 = vmatprep.mubr.msk.bf16.mxu1 %vm664_vm0, %v5532_v44  ;;  %9850 = vmatprep.mubr.msk.bf16.mxu0 %vm664_vm0, %v5532_v44  ;;  %v5539_v44 = vrot.slane %v9808_v60, %v12698_v24 }
 0xc6a   :  { %5792 = vmatmul.mubr.bf16.vlgmr.msra.gmra.mrb[68].mxu1 %v5531_v0  ;;  %5833 = vmatmul.mubr.bf16.vlgmr.msra.gmra.mrb[56].mxu0 %v5531_v0  ;;  %v5543_v0 = vrot.slane %v9808_v60, %v12707_v27 }
 0xc6b   :  { %5847 = vmatpush1.bf16.msra.mxu1 %v12052_v8  ;;  %5888 = vmatpush1.bf16.msra.mxu0 %v12053_v11 }
 0xc6c   :  { %5848 = vmatprep.subr.bf16.mxu1 %v12054_v2  ;;  %5889 = vmatprep.subr.bf16.mxu0 %v12055_v56 }
 0xc6f   :  { %5849 = vmatpush1.bf16.msra.mxu1 %v12056_v22  ;;  %5890 = vmatpush1.bf16.msra.mxu0 %v12057_v29  ;;  %v5551_v22 = vrot.slane %v9808_v60, %v12731_v46  ;;  %v12115_v60 = vld [vmem:[%s16894_s22 + $0x1d0] ss:$28 sps:$4 sm:$0xff]  }
 0xc70   :  { %5850 = vmatprep.subr.bf16.mxu1 %v12058_v16  ;;  %5891 = vmatprep.subr.bf16.mxu0 %v12059_v37 }
 0xc73   :  { %5851 = vmatpush1.bf16.msra.mxu1 %v12060_v34  ;;  %5892 = vmatpush1.bf16.msra.mxu0 %v12061_v30 }
 0xc74   :  { %5852 = vmatprep.subr.bf16.mxu1 %v12062_v31  ;;  %5893 = vmatprep.subr.bf16.mxu0 %v12063_v40 }
 0xc77   :  { %5853 = vmatpush1.bf16.msra.mxu1 %v12064_v53  ;;  %5894 = vmatpush1.bf16.msra.mxu0 %v12065_v35 }
 0xc78   :  { %5854 = vmatprep.subr.bf16.mxu1 %v12066_v39  ;;  %5895 = vmatprep.subr.bf16.mxu0 %v12067_v50  ;;  %v12091_v50 = vld [vmem:[%s16894_s22 + $0x10] ss:$28 sps:$4 sm:$0xff]  }
 0xc7b   :  { %5855 = vmatpush1.bf16.msra.mxu1 %v12068_v55  ;;  %5896 = vmatpush1.bf16.msra.mxu0 %v12069_v20  ;;  %v12092_v55 = vld [vmem:[%s16894_s22 + $0x18] ss:$28 sps:$4 sm:$0xff]   ;;  %v12093_v20 = vld [vmem:[%s16894_s22 + $0x4c] ss:$28 sps:$4 sm:$0xff]  }
 0xc7c   :  { %5856 = vmatprep.subr.bf16.mxu1 %v12070_v61  ;;  %5897 = vmatprep.subr.bf16.mxu0 %v12071_v33  ;;  %v12094_v61 = vld [vmem:[%s16894_s22 + $0x48] ss:$28 sps:$4 sm:$0xff]   ;;  %v12095_v33 = vld [vmem:[%s16894_s22 + $0x50] ss:$28 sps:$4 sm:$0xff]  }
 0xc7f   :  { %5857 = vmatpush1.bf16.msra.mxu1 %v12072_v36  ;;  %5898 = vmatpush1.bf16.msra.mxu0 %v12073_v43  ;;  %v12096_v36 = vld [vmem:[%s16894_s22 + $0x84] ss:$28 sps:$4 sm:$0xff]  }
 0xc80   :  { %5858 = vmatprep.subr.bf16.mxu1 %v12074_v51  ;;  %5899 = vmatprep.subr.bf16.mxu0 %v12075_v57  ;;  %v12097_v43 = vld [vmem:[%s16894_s22 + $0x80] ss:$28 sps:$4 sm:$0xff]   ;;  %v12098_v51 = vld [vmem:[%s16894_s22 + $0x88] ss:$28 sps:$4 sm:$0xff]  }
 0xc81   :  { %v12099_v57 = vld [vmem:[%s16894_s22 + $0xbc] ss:$28 sps:$4 sm:$0xff]  }
 0xc83   :  { %5859 = vmatpush1.bf16.msra.mxu1 %v12076_v62  ;;  %5900 = vmatpush1.bf16.msra.mxu0 %v12077_v48  ;;  %v12100_v62 = vld [vmem:[%s16894_s22 + $0xb8] ss:$28 sps:$4 sm:$0xff]   ;;  %v12101_v48 = vld [vmem:[%s16894_s22 + $0xc0] ss:$28 sps:$4 sm:$0xff]  }
 0xc84   :  { %5860 = vmatprep.subr.bf16.mxu1 %v12078_v26  ;;  %5901 = vmatprep.subr.bf16.mxu0 %v12079_v1  ;;  %v12102_v26 = vld [vmem:[%s16894_s22 + $0xf4] ss:$28 sps:$4 sm:$0xff]  }
 0xc85   :  { %v12103_v1 = vld [vmem:[%s16894_s22 + $0xf0] ss:$28 sps:$4 sm:$0xff]  }
 0xc87   :  { %5861 = vmatpush1.bf16.msra.mxu1 %v12080_v9  ;;  %5902 = vmatpush1.bf16.msra.mxu0 %v12081_v17  ;;  %v12104_v9 = vld [vmem:[%s16894_s22 + $0xf8] ss:$28 sps:$4 sm:$0xff]   ;;  %v12105_v17 = vld [vmem:[%s16894_s22 + $0x12c] ss:$28 sps:$4 sm:$0xff]  }
 0xc88   :  { %5862 = vmatprep.subr.bf16.mxu1 %v12082_v18  ;;  %5903 = vmatprep.subr.bf16.mxu0 %v12083_v10  ;;  %v12106_v18 = vld [vmem:[%s16894_s22 + $0x128] ss:$28 sps:$4 sm:$0xff]   ;;  %v12107_v10 = vld [vmem:[%s16894_s22 + $0x130] ss:$28 sps:$4 sm:$0xff]  }
 0xc8b   :  { %5863 = vmatpush1.bf16.msra.mxu1 %v12084_v12  ;;  %5904 = vmatpush1.bf16.msra.mxu0 %v12085_v13  ;;  %v12108_v12 = vld [vmem:[%s16894_s22 + $0x164] ss:$28 sps:$4 sm:$0xff]  }
 0xc8c   :  { %5864 = vmatprep.subr.bf16.mxu1 %v12086_v4  ;;  %5905 = vmatprep.subr.bf16.mxu0 %v12087_v15  ;;  %v12109_v13 = vld [vmem:[%s16894_s22 + $0x160] ss:$28 sps:$4 sm:$0xff]   ;;  %v12110_v4 = vld [vmem:[%s16894_s22 + $0x168] ss:$28 sps:$4 sm:$0xff]  }
 0xc8d   :  { %v12111_v15 = vld [vmem:[%s16894_s22 + $0x19c] ss:$28 sps:$4 sm:$0xff]  }
 0xc8f   :  { %5906 = vmatpush1.bf16.msra.mxu0 %v12088_v52  ;;  %5865 = vmatpush1.bf16.msra.mxu1 %v12089_v32  ;;  %v12112_v52 = vld [vmem:[%s16894_s22 + $0x198] ss:$28 sps:$4 sm:$0xff]   ;;  %v12113_v32 = vld [vmem:[%s16894_s22 + $0x1a0] ss:$28 sps:$4 sm:$0xff]  }
 0xc90   :  { %5928 = vmatprep.subr.bf16.mxu1 %v12090_v58  ;;  %5969 = vmatprep.subr.bf16.mxu0 %v12337_v21  ;;  %v12114_v58 = vld [vmem:[%s16894_s22 + $0x1d4] ss:$28 sps:$4 sm:$0xff]  }
 0xd3d   :  { %v5793_v8 = vpop.f32.mrb[68].mxu1  ;;  %v5834_v11 = vpop.f32.mrb[56].mxu0 }
 0xd3e   :  { %v14947_v2 = vadd.f32 %v5834_v11, %v5547_v49  ;;  %v5795_v56 = vpop.f32.mrb[69].mxu1  ;;  %v5836_v29 = vpop.f32.mrb[57].mxu0  ;;  %v5794_v16 = vadd.f32 %v5793_v8, %v5539_v44  ;;  %v12116_v49 = vld [vmem:[%s16894_s22 + $0x1d8] ss:$28 sps:$4 sm:$0xff]   ;;  %v12117_v44 = vld [vmem:[%s16894_s22 + $0x20c] ss:$28 sps:$4 sm:$0xff]  }
 0xd3f   :  { %v14950_v37 = vadd.f32 %v5795_v56, %v5543_v0  ;;  %v5797_v34 = vpop.f32.mrb[70].mxu1  ;;  %v5838_v30 = vpop.f32.mrb[58].mxu0  ;;  %v14958_v35 = vadd.f32 %v5836_v29, %v5551_v22  ;;  %v12118_v0 = vld [vmem:[%s16894_s22 + $0x208] ss:$28 sps:$4 sm:$0xff]   ;;  %v12119_v8 = vld [vmem:[%s16894_s22 + $0x210] ss:$28 sps:$4 sm:$0xff]  }
 0xd40   :  { %v5839_v31 = vpop.f32.mrb[59].mxu0  ;;  %6027 = vrot.lane.b32.xlu0 %v14947_v2, %s12340_s26  ;;  %6013 = vrot.lane.b32.xlu1 %v14947_v2, %s16896_s21  ;;  %v5798_v40 = vpop.f32.mrb[71].mxu1  ;;  %v14960_v39 = vpack.c.bf16 %v5794_v16, %v5794_v16  ;;  %v12120_v11 = vld [vmem:[%s16863_s14 + $0x40] sm:$0xff]   ;;  %v12124_v16 = vld [vmem:[%s16863_s14 + $0x48] sm:$0xff]  }
 0xd41   :  { %v5842_v53 = vpack.c.bf16 %v14950_v37, %v14950_v37  ;;  %v12121_v56 = vld [vmem:[%s16863_s14 + $0xc0] sm:$0xff]   ;;  %v12125_v34 = vld [vmem:[%s16863_s14 + $0xc8] sm:$0xff]   ;;  %v12128_v40 = vld [vmem:[%s16863_s14 + $0x50] sm:$0xff]  }
 0xd42   :  { %v12122_v22 = vld [vmem:[%s16863_s14] sm:$0xff]   ;;  %v12126_v30 = vld [vmem:[%s16863_s14 + $0x8] sm:$0xff]  }
 0xd43   :  { %9851 = vmatprep.mubr.msk.bf16.mxu1 %vm664_vm0, %v5842_v53  ;;  %9852 = vmatprep.mubr.msk.bf16.mxu0 %vm664_vm0, %v5842_v53  ;;  %v12123_v29 = vld [vmem:[%s16863_s14 + $0x80] sm:$0xff]   ;;  %v12127_v31 = vld [vmem:[%s16863_s14 + $0x88] sm:$0xff]  }
 0xd44   :  { %6391 = vrot.lane.b32.xlu0 %v14958_v35, %s16896_s21  ;;  %6011 = vrot.lane.b32.xlu1 %v14950_v37, %s16896_s21 }
 0xd45   :  { %5879 = vmatmul.mubr.bf16.vlgmr.msra.gmra.mrb[72].mxu1 %v14960_v39  ;;  %5920 = vmatmul.mubr.bf16.vlgmr.msra.gmra.mrb[60].mxu0 %v14960_v39 }
 0xd46   :  { %5929 = vmatpush1.bf16.msra.mxu1 %v12091_v50  ;;  %5970 = vmatpush1.bf16.msra.mxu0 %v12092_v55  ;;  %v12131_v50 = vld [vmem:[%s16863_s14 + $0x90] sm:$0xff]   ;;  %v12132_v55 = vld [vmem:[%s16863_s14 + $0x58] sm:$0xff]  }
 0xd47   :  { %9853 = vmatprep.mubr.msk.bf16.mxu1 %vm664_vm0, %v5842_v53  ;;  %9854 = vmatprep.mubr.msk.bf16.mxu0 %vm664_vm0, %v5842_v53  ;;  %v12129_v53 = vld [vmem:[%s16863_s14 + $0xd0] sm:$0xff]  }
 0xd48   :  { %5930 = vmatprep.subr.bf16.mxu1 %v12093_v20  ;;  %5971 = vmatprep.subr.bf16.mxu0 %v12337_v21  ;;  %v12133_v20 = vld [vmem:[%s16863_s14 + $0xd8] sm:$0xff]  }
 0xd49   :  { %6386 = vrot.lane.b32.xlu0 %v14958_v35, %s12340_s26  ;;  %6020 = vrot.lane.b32.xlu1 %v14947_v2, %s16897_s28 }
 0xd4a   :  { %5931 = vmatpush1.bf16.msra.mxu1 %v12094_v61  ;;  %5972 = vmatpush1.bf16.msra.mxu0 %v12095_v33  ;;  %v12134_v61 = vld [vmem:[%s16863_s14 + $0x18] sm:$0xff]  }
 0xd4b   :  { %5932 = vmatprep.subr.bf16.mxu1 %v12096_v36  ;;  %5973 = vmatprep.subr.bf16.mxu0 %v12337_v21  ;;  %v12135_v33 = vld [vmem:[%s16863_s14 + $0x98] sm:$0xff]   ;;  %v12136_v36 = vld [vmem:[%s16863_s14 + $0x60] sm:$0xff]  }
 0xd4d   :  { %6396 = vrot.lane.b32.xlu0 %v14958_v35, %s16897_s28  ;;  %6018 = vrot.lane.b32.xlu1 %v14950_v37, %s16897_s28 }
 0xd4e   :  { %5933 = vmatpush1.bf16.msra.mxu1 %v12097_v43  ;;  %5974 = vmatpush1.bf16.msra.mxu0 %v12098_v51  ;;  %v12137_v43 = vld [vmem:[%s16863_s14 + $0xe0] sm:$0xff]  }
 0xd4f   :  { %5934 = vmatprep.subr.bf16.mxu1 %v12099_v57  ;;  %5975 = vmatprep.subr.bf16.mxu0 %v12337_v21  ;;  %v12138_v51 = vld [vmem:[%s16863_s14 + $0x20] sm:$0xff]  }
 0xd50   :  { %v12139_v57 = vld [vmem:[%s16863_s14 + $0xa0] sm:$0xff]  }
 0xd51   :  { %6025 = vrot.lane.b32.xlu1 %v14950_v37, %s12340_s26 }
 0xd52   :  { %5935 = vmatpush1.bf16.msra.mxu1 %v12100_v62  ;;  %5976 = vmatpush1.bf16.msra.mxu0 %v12101_v48  ;;  %v12140_v62 = vld [vmem:[%s16863_s14 + $0x68] sm:$0xff]  }
 0xd53   :  { %5936 = vmatprep.subr.bf16.mxu1 %v12102_v26  ;;  %5977 = vmatprep.subr.bf16.mxu0 %v12337_v21  ;;  %v12141_v48 = vld [vmem:[%s16863_s14 + $0xe8] sm:$0xff]  }
 0xd54   :  { %v12142_v26 = vld [vmem:[%s16863_s14 + $0x28] sm:$0xff]  }
 0xd56   :  { %5937 = vmatpush1.bf16.msra.mxu1 %v12103_v1  ;;  %5978 = vmatpush1.bf16.msra.mxu0 %v12104_v9  ;;  %v12143_v1 = vld [vmem:[%s16863_s14 + $0xa8] sm:$0xff]   ;;  %v12144_v9 = vld [vmem:[%s16863_s14 + $0x70] sm:$0xff]  }
 0xd57   :  { %5938 = vmatprep.subr.bf16.mxu1 %v12105_v17  ;;  %5979 = vmatprep.subr.bf16.mxu0 %v12337_v21  ;;  %v12145_v17 = vld [vmem:[%s16863_s14 + $0xf0] sm:$0xff]  }
 0xd5a   :  { %5939 = vmatpush1.bf16.msra.mxu1 %v12106_v18  ;;  %5980 = vmatpush1.bf16.msra.mxu0 %v12107_v10  ;;  %v12146_v18 = vld [vmem:[%s16863_s14 + $0x30] sm:$0xff]  }
 0xd5b   :  { %5940 = vmatprep.subr.bf16.mxu1 %v12108_v12  ;;  %5981 = vmatprep.subr.bf16.mxu0 %v12337_v21  ;;  %v12147_v10 = vld [vmem:[%s16863_s14 + $0xb0] sm:$0xff]   ;;  %v12148_v12 = vld [vmem:[%s16863_s14 + $0x78] sm:$0xff]  }
 0xd5e   :  { %5941 = vmatpush1.bf16.msra.mxu1 %v12109_v13  ;;  %5982 = vmatpush1.bf16.msra.mxu0 %v12110_v4  ;;  %v12149_v13 = vld [vmem:[%s16863_s14 + $0xf8] sm:$0xff]  }
 0xd5f   :  { %5942 = vmatprep.subr.bf16.mxu1 %v12111_v15  ;;  %5983 = vmatprep.subr.bf16.mxu0 %v12337_v21  ;;  %v12150_v4 = vld [vmem:[%s16863_s14 + $0x38] sm:$0xff]  }
 0xd60   :  { %v12151_v15 = vld [vmem:[%s16863_s14 + $0xb8] sm:$0xff]  }
 0xd62   :  { %5943 = vmatpush1.bf16.msra.mxu1 %v12112_v52  ;;  %5984 = vmatpush1.bf16.msra.mxu0 %v12113_v32  ;;  %v12152_v52 = vld [vmem:[%s16863_s14 + $0x140] sm:$0xff]  }
 0xd63   :  { %5944 = vmatprep.subr.bf16.mxu1 %v12114_v58  ;;  %5985 = vmatprep.subr.bf16.mxu0 %v12337_v21 }
 0xd66   :  { %5945 = vmatpush1.bf16.msra.mxu1 %v12115_v60  ;;  %5986 = vmatpush1.bf16.msra.mxu0 %v12116_v49 }
 0xd67   :  { %5946 = vmatprep.subr.bf16.mxu1 %v12117_v44  ;;  %5987 = vmatprep.subr.bf16.mxu0 %v12337_v21 }
 0xd6a   :  { %5947 = vmatpush1.bf16.msra.mxu1 %v12118_v0  ;;  %5988 = vmatpush1.bf16.msra.mxu0 %v12119_v8 }
 0xd6b   :  { %10518 = vmatprep.subr.bf16.mxu1 %v12120_v11  ;;  %10540 = vmatprep.subr.bf16.mxu0 %v12121_v56 }
 0xd6d   :  { %5961 = vmatmul.mubr.bf16.vlgmr.msra.gmra.mrb[76].mxu1 %v14960_v39  ;;  %6002 = vmatmul.mubr.bf16.vlgmr.msra.gmra.mrb[64].mxu0 %v14960_v39  ;;  %v12130_v39 = vld [vmem:[%s16863_s14 + $0x10] sm:$0xff]  }
 0xd6e   :  { %10519 = vmatpush3.bf16.msra.mxu1 %v12122_v22  ;;  %10541 = vmatpush3.bf16.msra.mxu0 %v12123_v29 }
 0xd6f   :  { %10520 = vmatprep.subr.bf16.mxu1 %v12124_v16  ;;  %10542 = vmatprep.subr.bf16.mxu0 %v12125_v34 }
 0xd72   :  { %10521 = vmatpush3.bf16.msra.mxu1 %v12126_v30  ;;  %10543 = vmatpush3.bf16.msra.mxu0 %v12127_v31 }
 0xd73   :  { %10522 = vmatprep.subr.bf16.mxu1 %v12128_v40  ;;  %10544 = vmatprep.subr.bf16.mxu0 %v12129_v53 }
 0xd76   :  { %10523 = vmatpush3.bf16.msra.mxu1 %v12130_v39  ;;  %10545 = vmatpush3.bf16.msra.mxu0 %v12131_v50 }
 0xd77   :  { %10524 = vmatprep.subr.bf16.mxu1 %v12132_v55  ;;  %10546 = vmatprep.subr.bf16.mxu0 %v12133_v20 }
 0xd7a   :  { %10525 = vmatpush3.bf16.msra.mxu1 %v12134_v61  ;;  %10547 = vmatpush3.bf16.msra.mxu0 %v12135_v33 }
 0xd7b   :  { %10526 = vmatprep.subr.bf16.mxu1 %v12136_v36  ;;  %10548 = vmatprep.subr.bf16.mxu0 %v12137_v43 }
 0xd7e   :  { %10527 = vmatpush3.bf16.msra.mxu1 %v12138_v51  ;;  %10549 = vmatpush3.bf16.msra.mxu0 %v12139_v57  ;;  %v12154_v57 = vld [vmem:[%s16863_s14 + $0x180] sm:$0xff]  }
 0xd7f   :  { %10528 = vmatprep.subr.bf16.mxu1 %v12140_v62  ;;  %10550 = vmatprep.subr.bf16.mxu0 %v12141_v48  ;;  %v12155_v62 = vld [vmem:[%s16863_s14 + $0x148] sm:$0xff]  }
 0xd80   :  { %v12156_v48 = vld [vmem:[%s16863_s14 + $0x108] sm:$0xff]  }
 0xd82   :  { %10529 = vmatpush3.bf16.msra.mxu1 %v12142_v26  ;;  %10551 = vmatpush3.bf16.msra.mxu0 %v12143_v1  ;;  %v12157_v26 = vld [vmem:[%s16863_s14 + $0x188] sm:$0xff]   ;;  %v12158_v1 = vld [vmem:[%s16863_s14 + $0x150] sm:$0xff]  }
 0xd83   :  { %10530 = vmatprep.subr.bf16.mxu1 %v12144_v9  ;;  %10552 = vmatprep.subr.bf16.mxu0 %v12145_v17  ;;  %v12159_v9 = vld [vmem:[%s16864_s15 + $0xc] ss:$28 sps:$4 sm:$0xff]   ;;  %v12160_v17 = vld [vmem:[%s16863_s14 + $0x110] sm:$0xff]  }
 0xd86   :  { %10531 = vmatpush3.bf16.msra.mxu1 %v12146_v18  ;;  %10553 = vmatpush3.bf16.msra.mxu0 %v12147_v10  ;;  %v12161_v18 = vld [vmem:[%s16863_s14 + $0x158] sm:$0xff]  }
 0xd87   :  { %10532 = vmatprep.subr.bf16.mxu1 %v12148_v12  ;;  %10554 = vmatprep.subr.bf16.mxu0 %v12149_v13  ;;  %v12162_v10 = vld [vmem:[%s16863_s14 + $0x118] sm:$0xff]   ;;  %v12163_v12 = vld [vmem:[%s16863_s14 + $0x160] sm:$0xff]  }
 0xd88   :  { %v12164_v13 = vld [vmem:[%s16863_s14 + $0x120] sm:$0xff]  }
 0xd8a   :  { %10533 = vmatpush3.bf16.msra.mxu1 %v12150_v4  ;;  %10555 = vmatpush3.bf16.msra.mxu0 %v12151_v15  ;;  %v12165_v4 = vld [vmem:[%s16863_s14 + $0x168] sm:$0xff]  }
 0xd8b   :  { %10562 = vmatprep.subr.bf16.mxu1 %v12152_v52  ;;  %10612 = vmatprep.subr.bf16.mxu0 %v12341_v54  ;;  %v12166_v15 = vld [vmem:[%s16863_s14 + $0x128] sm:$0xff]   ;;  %v12167_v52 = vld [vmem:[%s16863_s14 + $0x170] sm:$0xff]  }
 0xdb2   :  { %v15180_v32 = vpop.permute.xlu1 %6013 }
 0xdb3   :  { %v6032_v30 = vsel %vm664_vm0, %v15180_v32, %v14950_v37  ;;  %v12153_v37 = vld [vmem:[%s16863_s14 + $0x100] sm:$0xff]  }
 0xdb6   :  { %v6012_v58 = vpop.permute.xlu1 %6011 }
 0xdb7   :  { %v15190_v11 = vsel %vm1284_vm1, %v6012_v58, %v15180_v32  ;;  %v12168_v58 = vld [vmem:[%s16863_s14 + $0x130] sm:$0xff]  }
 0xdbb   :  { %v15182_v60 = vpop.permute.xlu1 %6020 }
 0xdbf   :  { %v6019_v49 = vpop.permute.xlu1 %6018 }
 0xdc0   :  { %v6022_v0 = vsel %vm664_vm0, %v6019_v49, %v15182_v60  ;;  %v6033_v22 = vsel %vm1299_vm2, %v14947_v2, %v6019_v49  ;;  %v12169_v49 = vld [vmem:[%s16863_s14 + $0x178] sm:$0xff]  }
 0xdc3   :  { %v15184_v44 = vpop.permute.xlu1 %6025 }
 0xdc4   :  { %v6034_v40 = vsel %vm1284_vm1, %v6022_v0, %v15184_v44  ;;  %v12170_v0 = vld [vmem:[%s16863_s14 + $0x138] sm:$0xff]  }
 0xe18   :  { %v5880_v8 = vpop.f32.mrb[72].mxu1  ;;  %v5921_v56 = vpop.f32.mrb[60].mxu0 }
 0xe19   :  { %v6035_v29 = vmul.f32 %v15190_v11, %v5880_v8  ;;  %v6037_v16 = vmul.f32 %v6033_v22, %v5921_v56  ;;  %v5882_v34 = vpop.f32.mrb[73].mxu1  ;;  %v5923_v31 = vpop.f32.mrb[61].mxu0  ;;  %v12171_v8 = vld [vmem:[%s16864_s15 + $0x4] ss:$28 sps:$4 sm:$0xff]  }
 0xe1a   :  { %v6036_v53 = vmul.f32 %v6032_v30, %v5882_v34  ;;  %v6038_v39 = vmul.f32 %v6034_v40, %v5923_v31  ;;  %v5884_v50 = vpop.f32.mrb[74].mxu1  ;;  %v5925_v55 = vpop.f32.mrb[62].mxu0 }
 0xe1b   :  { %v5885_v20 = vpop.f32.mrb[75].mxu1  ;;  %v5926_v61 = vpop.f32.mrb[63].mxu0  ;;  %v6042_v43 = vpack.c.bf16 %v6035_v29, %v6035_v29  ;;  %v6044_v51 = vpack.c.bf16 %v6037_v16, %v6037_v16 }
 0xe1c   :  { %v6043_v33 = vpack.c.bf16 %v6036_v53, %v6036_v53  ;;  %v6045_v36 = vpack.c.bf16 %v6038_v39, %v6038_v39  ;;  %v15260_v56 = vpop.permute.xlu0 %6027 }
 0xe1d   :  { %v6029_v29 = vsel %vm1299_vm2, %v15184_v44, %v15260_v56  ;;  %v12172_v44 = vld [vmem:[%s16864_s15 + $0x8] ss:$28 sps:$4 sm:$0xff]  }
 0xe1e   :  { %6084 = vmatprep.mubr.bf16.mxu1 %v6043_v33  ;;  %6124 = vmatprep.mubr.bf16.mxu0 %v6045_v36 }
 0xe1f   :  { %6085 = vmatmul.mubr.bf16.vlgmr.msra.gmra.mrb[80].mxu1 %v6042_v43  ;;  %6125 = vmatmul.mubr.bf16.vlgmr.msra.gmra.mrb[68].mxu0 %v6044_v51  ;;  %v12174_v43 = vld [vmem:[%s16864_s15] ss:$28 sps:$4 sm:$0xff]  }
 0xe20   :  { %10563 = vmatpush3.bf16.msra.mxu1 %v12153_v37  ;;  %10613 = vmatpush3.bf16.msra.mxu0 %v12154_v57  ;;  %v12175_v51 = vld [vmem:[%s16864_s15 + $0x3c] ss:$28 sps:$4 sm:$0xff]  }
 0xe21   :  { %10564 = vmatprep.subr.bf16.mxu1 %v12155_v62  ;;  %10614 = vmatprep.subr.bf16.mxu0 %v12341_v54  ;;  %v12176_v37 = vld [vmem:[%s16864_s15 + $0x40] ss:$28 sps:$4 sm:$0xff]   ;;  %v12178_v62 = vld [vmem:[%s16864_s15 + $0x38] ss:$28 sps:$4 sm:$0xff]  }
 0xe22   :  { %10616 = vmatprep.mubr.msk.bf16.mxu0 %vm12342_vm3, %v12341_v54  ;;  %v12177_v57 = vld [vmem:[%s16864_s15 + $0x7c] ss:$28 sps:$4 sm:$0xff]  }
 0xe24   :  { %10565 = vmatpush3.bf16.msra.mxu1 %v12156_v48  ;;  %10615 = vmatpush3.bf16.msra.mxu0 %v12157_v26  ;;  %v12179_v48 = vld [vmem:[%s16864_s15 + $0x74] ss:$28 sps:$4 sm:$0xff]  }
 0xe25   :  { %10566 = vmatprep.subr.bf16.mxu1 %v12158_v1  ;;  %6263 = vmatprep.subr.bf16.mxu0 %v12159_v9  ;;  %v12180_v26 = vld [vmem:[%s16864_s15 + $0x78] ss:$28 sps:$4 sm:$0xff]   ;;  %v12181_v1 = vld [vmem:[%s16864_s15 + $0x70] ss:$28 sps:$4 sm:$0xff]  }
 0xe26   :  { %v12182_v9 = vld [vmem:[%s16864_s15 + $0x14] ss:$28 sps:$4 sm:$0xff]  }
 0xe28   :  { %10567 = vmatpush3.bf16.msra.mxu1 %v12160_v17 }
 0xe29   :  { %10568 = vmatprep.subr.bf16.mxu1 %v12161_v18 }
 0xe2c   :  { %10569 = vmatpush3.bf16.msra.mxu1 %v12162_v10 }
 0xe2d   :  { %10570 = vmatprep.subr.bf16.mxu1 %v12163_v12 }
 0xe30   :  { %10571 = vmatpush3.bf16.msra.mxu1 %v12164_v13 }
 0xe31   :  { %10572 = vmatprep.subr.bf16.mxu1 %v12165_v4 }
 0xe34   :  { %10573 = vmatpush3.bf16.msra.mxu1 %v12166_v15 }
 0xe35   :  { %10574 = vmatprep.subr.bf16.mxu1 %v12167_v52 }
 0xe38   :  { %10575 = vmatpush3.bf16.msra.mxu1 %v12168_v58 }
 0xe39   :  { %10576 = vmatprep.subr.bf16.mxu1 %v12169_v49 }
 0xe3c   :  { %10577 = vmatpush3.bf16.msra.mxu1 %v12170_v0 }
 0xe3d   :  { %6222 = vmatprep.subr.bf16.mxu1 %v12171_v8 }
 0xe40   :  { %v5962_v22 = vpop.f32.mrb[76].mxu1  ;;  %v6003_v16 = vpop.f32.mrb[64].mxu0 }
 0xe41   :  { %v6039_v34 = vmul.f32 %v6029_v29, %v5962_v22  ;;  %v6041_v30 = vmul.f32 %v15180_v32, %v6003_v16  ;;  %v5964_v31 = vpop.f32.mrb[77].mxu1  ;;  %v6005_v40 = vpop.f32.mrb[65].mxu0 }
 0xe42   :  { %v6040_v53 = vmul.f32 %v15190_v11, %v5964_v31  ;;  %v5966_v39 = vpop.f32.mrb[78].mxu1  ;;  %v6006_v50 = vpop.f32.mrb[66].mxu0  ;;  %v12173_v11 = vld [vmem:[%s16864_s15 + $0x44] ss:$28 sps:$4 sm:$0xff]  }
 0xe43   :  { %v6048_v55 = vpack.c.bf16 %v6041_v30, %v6041_v30  ;;  %v5967_v20 = vpop.f32.mrb[79].mxu1  ;;  %v6007_v61 = vpop.f32.mrb[67].mxu0  ;;  %v6046_v36 = vpack.c.bf16 %v6039_v34, %v6039_v34 }
 0xe44   :  { %v6047_v33 = vpack.c.bf16 %v6040_v53, %v6040_v53  ;;  %v12183_v61 = vld [vmem:[%s16864_s15 + $0x10] ss:$28 sps:$4 sm:$0xff]  }
 0xe45   :  { %10617 = vmatmul.mubr.msk.bf16.vlgmr.msra.gmra.mrb[72].mxu0 %vm664_vm0, %v6048_v55 }
 0xe46   :  { %6164 = vmatprep.mubr.bf16.mxu1 %v6047_v33  ;;  %6264 = vmatpush1.bf16.msra.mxu0 %v12172_v44  ;;  %v12184_v33 = vld [vmem:[%s16864_s15 + $0x18] ss:$28 sps:$4 sm:$0xff]   ;;  %v12186_v44 = vld [vmem:[%s16864_s15 + $0x48] ss:$28 sps:$4 sm:$0xff]  }
 0xe47   :  { %6165 = vmatmul.mubr.bf16.vlgmr.msra.gmra.mrb[84].mxu1 %v6046_v36  ;;  %6265 = vmatprep.subr.bf16.mxu0 %v12173_v11  ;;  %v12185_v36 = vld [vmem:[%s16864_s15 + $0x4c] ss:$28 sps:$4 sm:$0xff]  }
 0xe48   :  { %6223 = vmatpush1.bf16.msra.mxu1 %v12174_v43  ;;  %6254 = vmatprep.mubr.bf16.mxu1 %v12337_v21  ;;  %v12187_v11 = vld [vmem:[%s16864_s15 + $0x50] ss:$28 sps:$4 sm:$0xff]   ;;  %v12188_v43 = vld [vmem:[%s16864_s15 + $0x84] ss:$28 sps:$4 sm:$0xff]  }
 0xe49   :  { %6224 = vmatprep.subr.bf16.mxu1 %v12175_v51  ;;  %6295 = vmatprep.mubr.bf16.mxu0 %v12337_v21  ;;  %v12189_v51 = vld [vmem:[%s16864_s15 + $0x80] ss:$28 sps:$4 sm:$0xff]  }
 0xe4a   :  { %6266 = vmatpush1.bf16.msra.mxu0 %v12176_v37  ;;  %v12190_v37 = vld [vmem:[%s16864_s15 + $0x88] ss:$28 sps:$4 sm:$0xff]  }
 0xe4b   :  { %6267 = vmatprep.subr.bf16.mxu0 %v12177_v57  ;;  %v12191_v57 = vld [vmem:[%s16865_s16 + $0x4] ss:$8 sps:$4 sm:$0xff]  }
 0xe4c   :  { %6225 = vmatpush1.bf16.msra.mxu1 %v12178_v62  ;;  %v12192_v62 = vld [vmem:[%s16866_s17 + $0x4] ss:$8 sps:$4 sm:$0xff]  }
 0xe4d   :  { %6226 = vmatprep.subr.bf16.mxu1 %v12179_v48  ;;  %v12197_v48 = vld [vmem:[%s16865_s16 + $0x10] ss:$8 sps:$4 sm:$0xff]  }
 0xe4e   :  { %6268 = vmatpush1.bf16.msra.mxu0 %v12180_v26  ;;  %v12198_v26 = vld [vmem:[%s16865_s16 + $0x24] ss:$8 sps:$4 sm:$0xff]  }
 0xe4f   :  { %9858 = vmatprep.subr.msk.bf16.mxu0 %vm1920_vm5, %v13077_v42 }
 0xe50   :  { %6227 = vmatpush1.bf16.msra.mxu1 %v12181_v1  ;;  %v12199_v1 = vld [vmem:[%s16866_s17 + $0x10] ss:$8 sps:$4 sm:$0xff]  }
 0xe51   :  { %9856 = vmatprep.subr.msk.bf16.mxu1 %vm1920_vm5, %v13075_v41 }
 0xe52   :  { %6270 = vmatpush1.bf16.msra.mxu0 %v13087_v47 }
 0xe53   :  { %10620 = vmatprep.subr.bf16.mxu0 %v12341_v54 }
 0xe54   :  { %6229 = vmatpush1.bf16.msra.mxu1 %v13084_v45 }
 0xe55   :  { %6304 = vmatprep.subr.bf16.mxu1 %v12182_v9  ;;  %v12200_v9 = vld [vmem:[%s16866_s17 + $0x24] ss:$8 sps:$4 sm:$0xff]  }
 0xef2   :  { %v10534_v42 = vpop.f32.mrb[80].mxu1  ;;  %v10556_v17 = vpop.f32.mrb[68].mxu0 }
 0xef3   :  { %v10535_v18 = vpop.f32.mrb[81].mxu1  ;;  %v10557_v10 = vpop.f32.mrb[69].mxu0 }
 0xef4   :  { %v10536_v12 = vadd.f32 %v10535_v18, %v10534_v42  ;;  %v10558_v13 = vadd.f32 %v10557_v10, %v10556_v17  ;;  %v10537_v4 = vpop.f32.mrb[82].mxu1  ;;  %v10559_v15 = vpop.f32.mrb[70].mxu0  ;;  %v12201_v42 = vld [vmem:[%s16865_s16 + $0x20] ss:$8 sps:$4 sm:$0xff]   ;;  %v12203_v18 = vld [vmem:[%s16866_s17 + $0x34] ss:$8 sps:$4 sm:$0xff]  }
 0xef5   :  { %v10538_v41 = vpop.f32.mrb[83].mxu1  ;;  %v10560_v52 = vpop.f32.mrb[71].mxu0  ;;  %v12202_v17 = vld [vmem:[%s16866_s17 + $0x20] ss:$8 sps:$4 sm:$0xff]   ;;  %v12204_v10 = vld [vmem:[%s16866_s17 + $0x30] ss:$8 sps:$4 sm:$0xff]  }
 0xef6   :  { %v6127_v47 = vadd.f32 %v10558_v13, %v10536_v12  ;;  %v12206_v12 = vld [vmem:[%s16866_s17 + $0x40] ss:$8 sps:$4 sm:$0xff]   ;;  %v12208_v13 = vld [vmem:[%s16866_s17 + $0x50] ss:$8 sps:$4 sm:$0xff]   ;;  %v12209_v4 = vld [vmem:[%s16866_s17 + $0x64] ss:$8 sps:$4 sm:$0xff]  }
 0xef7   :  { %v12210_v15 = vld [vmem:[%s16866_s17 + $0x60] ss:$8 sps:$4 sm:$0xff]   ;;  %v12211_v41 = vld [vmem:[%s16866_s17 + $0x74] ss:$8 sps:$4 sm:$0xff]   ;;  %v12212_v52 = vld [vmem:[%s16866_s17 + $0x70] ss:$8 sps:$4 sm:$0xff]  }
 0xf18   :  { %v6206_v58 = vpop.f32.mrb[72].mxu0 }
 0xf19   :  { %v10618_v49 = vpop.f32.mrb[73].mxu0 }
 0xf1a   :  { %v10578_v0 = vpop.f32.mrb[84].mxu1  ;;  %v6209_v45 = vpop.f32.mrb[74].mxu0  ;;  %v12215_v49 = vld [vmem:[%s16866_s17 + $0x94] ss:$8 sps:$4 sm:$0xff]  }
 0xf1b   :  { %v10579_v8 = vpop.f32.mrb[85].mxu1  ;;  %v10619_v22 = vpop.f32.mrb[75].mxu0  ;;  %v12217_v45 = vld [vmem:[%s16866_s17 + $0xa4] ss:$8 sps:$4 sm:$0xff]  }
 0xf1c   :  { %v10580_v29 = vadd.f32 %v10579_v8, %v10578_v0  ;;  %v10581_v16 = vpop.f32.mrb[86].mxu1  ;;  %v12216_v0 = vld [vmem:[%s16866_s17 + $0x90] ss:$8 sps:$4 sm:$0xff]   ;;  %v12218_v8 = vld [vmem:[%s16866_s17 + $0xa0] ss:$8 sps:$4 sm:$0xff]  }
 0xf1d   :  { %v10582_v34 = vpop.f32.mrb[87].mxu1  ;;  %v12219_v22 = vld [vmem:[%s16866_s17 + $0xb4] ss:$8 sps:$4 sm:$0xff]   ;;  %v12221_v16 = vld [vmem:[%s16866_s17 + $0xc4] ss:$8 sps:$4 sm:$0xff]  }
 0xf1e   :  { %v6167_v30 = vadd.f32 %v10580_v29, %v6127_v47  ;;  %v12213_v47 = vld [vmem:[%s16866_s17 + $0x84] ss:$8 sps:$4 sm:$0xff]   ;;  %v12220_v29 = vld [vmem:[%s16866_s17 + $0xb0] ss:$8 sps:$4 sm:$0xff]   ;;  %v12222_v34 = vld [vmem:[%s16866_s17 + $0xc0] ss:$8 sps:$4 sm:$0xff]  }
 0xf20   :  { %v6207_v31 = vadd.f32 %v6206_v58, %v6167_v30  ;;  %v12214_v58 = vld [vmem:[%s16866_s17 + $0x80] ss:$8 sps:$4 sm:$0xff]   ;;  %v12223_v30 = vld [vmem:[%s16866_s17 + $0xd4] ss:$8 sps:$4 sm:$0xff]  }
 0xf22   :  { %v6212_v40 = vsel %vm1783_vm4, %v6207_v31, -inf }
 0xf23   :  { %6213 = vmax.xlane.f32.xlu1 %v6212_v40  ;;  %v12225_v40 = vld [vmem:[%s16866_s17 + $0xe4] ss:$8 sps:$4 sm:$0xff]  }
 0xfb0   :  { %v6214_v53 = vpop.xlane.xlu1 %6213 }
 0xfb1   :  { %v6215_v39 = vsub.f32 %v6207_v31, %v6214_v53  ;;  %v12224_v31 = vld [vmem:[%s16866_s17 + $0xd0] ss:$8 sps:$4 sm:$0xff]   ;;  %v12226_v53 = vld [vmem:[%s16866_s17 + $0xe0] ss:$8 sps:$4 sm:$0xff]  }
 0xfb3   :  { %v6216_v50 = vmul.f32 1.442695, %v6215_v39  ;;  %v12227_v39 = vld [vmem:[%s16866_s17 + $0xf4] ss:$8 sps:$4 sm:$0xff]  }
 0xfb5   :  { %12014 = vpow2.f32 %v6216_v50  ;;  %v12228_v50 = vld [vmem:[%s16866_s17 + $0xf0] ss:$8 sps:$4 sm:$0xff]  }
 0xfbf   :  { %v12015_v55 = vpop.eup %12014 }
 0xfc0   :  { %v6218_v20 = vpack.c.bf16 %v12015_v55, %v12015_v55  ;;  %v12229_v55 = vld [vmem:[%s16866_s17 + $0x104] ss:$8 sps:$4 sm:$0xff]  }
 0xfc2   :  { %9857 = vmatmul.mubr.msk.bf16.vlgmr.msra.gmra.mrb[88].mxu1 %vm1783_vm4, %v6218_v20  ;;  %9859 = vmatmul.mubr.msk.bf16.vlgmr.msra.gmra.mrb[76].mxu0 %vm1783_vm4, %v6218_v20 }
 0xfc3   :  { %6305 = vmatpush1.bf16.msra.mxu1 %v12183_v61  ;;  %10621 = vmatpush3.bf16.msra.mxu0 %v12184_v33 }
 0xfc4   :  { %6306 = vmatprep.subr.bf16.mxu1 %v12185_v36  ;;  %10622 = vmatprep.subr.bf16.mxu0 %v12341_v54 }
 0xfc5   :  { %6336 = vmatprep.mubr.bf16.mxu1 %v12337_v21  ;;  %10628 = vmatprep.mubr.msk.bf16.mxu0 %vm12342_vm3, %v12341_v54 }
 0xfc7   :  { %6307 = vmatpush1.bf16.msra.mxu1 %v12186_v44  ;;  %10623 = vmatpush3.bf16.msra.mxu0 %v12187_v11 }
 0xfc8   :  { %6308 = vmatprep.subr.bf16.mxu1 %v12188_v43  ;;  %10624 = vmatprep.subr.bf16.mxu0 %v12341_v54 }
 0xfcb   :  { %6309 = vmatpush1.bf16.msra.mxu1 %v12189_v51  ;;  %10625 = vmatpush3.bf16.msra.mxu0 %v12190_v37 }
 0xfcc   :  { %9860 = vmatprep.subr.msk.bf16.mxu1 %vm1920_vm5, %v13133_v3  ;;  %10626 = vmatprep.subr.bf16.mxu0 %v12341_v54  ;;  %v12193_v54 = vld [vmem:[%s16865_s16] ss:$8 sps:$4 sm:$0xff]   ;;  %v12194_v3 = vld [vmem:[%s16865_s16 + $0x14] ss:$8 sps:$4 sm:$0xff]  }
 0xfcf   :  { %6311 = vmatpush1.bf16.msra.mxu1 %v13142_v6  ;;  %10627 = vmatpush3.bf16.msra.mxu0 %v13145_v7  ;;  %v12195_v6 = vld [vmem:[%s16866_s17] ss:$8 sps:$4 sm:$0xff]   ;;  %v12196_v7 = vld [vmem:[%s16866_s17 + $0x14] ss:$8 sps:$4 sm:$0xff]  }
 0xfd0   :  { %6585 = vmatprep.subr.bf16.mxu0 %v12191_v57  ;;  %6421 = vmatprep.subr.bf16.mxu1 %v12192_v62 }
 0xfd2   :  { %9861 = vmatmul.mubr.msk.bf16.vlgmr.msra.gmra.mrb[92].mxu1 %vm1783_vm4, %v6218_v20  ;;  %10629 = vmatmul.mubr.msk.bf16.vlgmr.msra.gmra.mrb[80].mxu0 %vm1783_vm4, %v6218_v20 }
 0xfd3   :  { %6586 = vmatpush1.bf16.msra.mxu0 %v12193_v54  ;;  %6617 = vmatprep.mubr.bf16.mxu0 %v12337_v21 }
 0xfd4   :  { %6587 = vmatprep.subr.bf16.mxu0 %v12194_v3  ;;  %6422 = vmatpush1.bf16.msra.mxu1 %v12195_v6 }
 0xfd5   :  { %6423 = vmatprep.subr.bf16.mxu1 %v12196_v7 }
 0xfd7   :  { %6588 = vmatpush1.bf16.msra.mxu0 %v12197_v48 }
 0xfd8   :  { %6589 = vmatprep.subr.bf16.mxu0 %v12198_v26  ;;  %6424 = vmatpush1.bf16.msra.mxu1 %v12199_v1 }
 0xfd9   :  { %6425 = vmatprep.subr.bf16.mxu1 %v12200_v9 }
 0xfdb   :  { %6590 = vmatpush1.bf16.msra.mxu0 %v12201_v42  ;;  %v12230_v42 = vld [vmem:[%s16866_s17 + $0x100] ss:$8 sps:$4 sm:$0xff]  }
 0xfdc   :  { %9864 = vmatprep.subr.msk.bf16.mxu0 %vm1920_vm5, %v13190_v19  ;;  %6426 = vmatpush1.bf16.msra.mxu1 %v12202_v17  ;;  %v12205_v19 = vld [vmem:[%s16866_s17 + $0x44] ss:$8 sps:$4 sm:$0xff]   ;;  %v12232_v17 = vld [vmem:[%s16866_s17 + $0x110] ss:$8 sps:$4 sm:$0xff]  }
 0xfdd   :  { %6427 = vmatprep.subr.bf16.mxu1 %v12203_v18 }
 0xfdf   :  { %6592 = vmatpush1.bf16.msra.mxu0 %v13201_v28  ;;  %v12207_v28 = vld [vmem:[%s16866_s17 + $0x54] ss:$8 sps:$4 sm:$0xff]  }
 0xfe0   :  { %6428 = vmatpush1.bf16.msra.mxu1 %v12204_v10  ;;  %v12233_v10 = vld [vmem:[%s16866_s17 + $0x124] ss:$8 sps:$4 sm:$0xff]  }
 0xfe1   :  { %6429 = vmatprep.subr.bf16.mxu1 %v12205_v19 }
 0xfe2   :  { %9865 = vmatmul.mubr.msk.bf16.vlgmr.msra.gmra.mrb[84].mxu0 %vm1783_vm4, %v6218_v20  ;;  %v6392_v20 = vpop.permute.xlu0 %6391 }
 0xfe3   :  { %v6393_v33 = vsel %vm1284_vm1, %v15180_v32, %v6392_v20  ;;  %v6402_v43 = vsel %vm1299_vm2, %v6392_v20, %v14947_v2  ;;  %v6403_v32 = vsel %vm1284_vm1, %v14958_v35, %v15182_v60  ;;  %v12231_v35 = vld [vmem:[%s16866_s17 + $0x114] ss:$8 sps:$4 sm:$0xff]   ;;  %v11589_v20 = vld [vmem:[%s16867_s3 + $0xd0] ss:$8 sps:$4 sm:$0xff]  }
 0xfe4   :  { %6430 = vmatpush1.bf16.msra.mxu1 %v12206_v12 }
 0xfe5   :  { %6431 = vmatprep.subr.bf16.mxu1 %v12207_v28 }
 0xfe6   :  { %v15471_v61 = vpop.permute.xlu0 %6386 }
 0xfe7   :  { %v6388_v44 = vsel %vm1299_vm2, %v15260_v56, %v15471_v61  ;;  %v6401_v62 = vsel %vm664_vm0, %v15471_v61, %v6393_v33  ;;  %v11594_v33 = vld [vmem:[%s16867_s3 + $0xe4] ss:$8 sps:$4 sm:$0xff]  }
 0xfe8   :  { %6432 = vmatpush1.bf16.msra.mxu1 %v12208_v13  ;;  %v12234_v13 = vld [vmem:[%s16866_s17 + $0x120] ss:$8 sps:$4 sm:$0xff]  }
 0xfe9   :  { %6433 = vmatprep.subr.bf16.mxu1 %v12209_v4 }
 0xfea   :  { %v6397_v18 = vpop.permute.xlu0 %6396 }
 0xfeb   :  { %v6398_v12 = vsel %vm664_vm0, %v15182_v60, %v6397_v18  ;;  %v12251_v18 = vld [vmem:[%s16866_s17 + $0x1b4] ss:$8 sps:$4 sm:$0xff]  }
 0xfec   :  { %6434 = vmatpush1.bf16.msra.mxu1 %v12210_v15 }
 0xfed   :  { %6435 = vmatprep.subr.bf16.mxu1 %v12211_v41 }
 0xff0   :  { %6436 = vmatpush1.bf16.msra.mxu1 %v12212_v52  ;;  %v12235_v52 = vld [vmem:[%s16866_s17 + $0x134] ss:$8 sps:$4 sm:$0xff]  }
 0xff1   :  { %6437 = vmatprep.subr.bf16.mxu1 %v12213_v47 }
 0xff4   :  { %6438 = vmatpush1.bf16.msra.mxu1 %v12214_v58 }
 0xff5   :  { %6439 = vmatprep.subr.bf16.mxu1 %v12215_v49 }
 0xff8   :  { %6440 = vmatpush1.bf16.msra.mxu1 %v12216_v0 }
 0xff9   :  { %6441 = vmatprep.subr.bf16.mxu1 %v12217_v45  ;;  %v11580_v45 = vld [vmem:[%s16867_s3 + $0xa0] ss:$8 sps:$4 sm:$0xff]  }
 0xffc   :  { %6442 = vmatpush1.bf16.msra.mxu1 %v12218_v8  ;;  %v11582_v8 = vld [vmem:[%s16867_s3 + $0xa4] ss:$8 sps:$4 sm:$0xff]  }
 0xffd   :  { %6443 = vmatprep.subr.bf16.mxu1 %v12219_v22  ;;  %v12236_v22 = vld [vmem:[%s16866_s17 + $0x130] ss:$8 sps:$4 sm:$0xff]   ;;  %6769 = vmatprep.subr.bf16.mxu0 %v11582_v8 }
 0xffe   :  { %6770 = vmatpush1.bf16.msra.mxu0 %v11580_v45  ;;  %v12261_v45 = vld [vmem:[%s16866_s17 + $0x204] ss:$8 sps:$4 sm:$0xff]  }
0x1000   :  { %6444 = vmatpush1.bf16.msra.mxu1 %v12220_v29  ;;  %v11585_v29 = vld [vmem:[%s16867_s3 + $0xb4] ss:$8 sps:$4 sm:$0xff]  }
0x1001   :  { %6445 = vmatprep.subr.bf16.mxu1 %v12221_v16  ;;  %v12237_v16 = vld [vmem:[%s16866_s17 + $0x144] ss:$8 sps:$4 sm:$0xff]   ;;  %6771 = vmatprep.subr.bf16.mxu0 %v11585_v29  ;;  %v12263_v29 = vld [vmem:[%s16866_s17 + $0x214] ss:$8 sps:$4 sm:$0xff]  }
0x1004   :  { %6446 = vmatpush1.bf16.msra.mxu1 %v12222_v34  ;;  %v11583_v34 = vld [vmem:[%s16867_s3 + $0xb0] ss:$8 sps:$4 sm:$0xff]  }
0x1005   :  { %6447 = vmatprep.subr.bf16.mxu1 %v12223_v30  ;;  %v11588_v30 = vld [vmem:[%s16867_s3 + $0xc4] ss:$8 sps:$4 sm:$0xff]   ;;  %6772 = vmatpush1.bf16.msra.mxu0 %v11583_v34  ;;  %v12267_v34 = vld [vmem:[%s16866_s17 + $0x234] ss:$8 sps:$4 sm:$0xff]  }
0x1006   :  { %6773 = vmatprep.subr.bf16.mxu0 %v11588_v30  ;;  %v12268_v30 = vld [vmem:[%s16866_s17 + $0x230] ss:$8 sps:$4 sm:$0xff]  }
0x1008   :  { %6448 = vmatpush1.bf16.msra.mxu1 %v12224_v31  ;;  %v12238_v31 = vld [vmem:[%s16866_s17 + $0x140] ss:$8 sps:$4 sm:$0xff]  }
0x1009   :  { %6449 = vmatprep.subr.bf16.mxu1 %v12225_v40  ;;  %v12239_v40 = vld [vmem:[%s16866_s17 + $0x154] ss:$8 sps:$4 sm:$0xff]  }
0x100c   :  { %6450 = vmatpush1.bf16.msra.mxu1 %v12226_v53  ;;  %v11586_v53 = vld [vmem:[%s16867_s3 + $0xc0] ss:$8 sps:$4 sm:$0xff]  }
0x100d   :  { %6451 = vmatprep.subr.bf16.mxu1 %v12227_v39  ;;  %v11591_v39 = vld [vmem:[%s16867_s3 + $0xd4] ss:$8 sps:$4 sm:$0xff]   ;;  %6774 = vmatpush1.bf16.msra.mxu0 %v11586_v53 }
0x100e   :  { %6775 = vmatprep.subr.bf16.mxu0 %v11591_v39  ;;  %v12271_v53 = vld [vmem:[%s16866_s17 + $0x254] ss:$8 sps:$4 sm:$0xff]   ;;  %v12272_v39 = vld [vmem:[%s16866_s17 + $0x250] ss:$8 sps:$4 sm:$0xff]  }
0x1010   :  { %6452 = vmatpush1.bf16.msra.mxu1 %v12228_v50  ;;  %v12240_v50 = vld [vmem:[%s16866_s17 + $0x150] ss:$8 sps:$4 sm:$0xff]  }
0x1011   :  { %6462 = vmatprep.subr.bf16.mxu1 %v12229_v55  ;;  %v12241_v55 = vld [vmem:[%s16866_s17 + $0x164] ss:$8 sps:$4 sm:$0xff]   ;;  %6776 = vmatpush1.bf16.msra.mxu0 %v11589_v20  ;;  %v12275_v20 = vld [vmem:[%s16866_s17 + $0x274] ss:$8 sps:$4 sm:$0xff]  }
0x1012   :  { %6777 = vmatprep.subr.bf16.mxu0 %v11594_v33  ;;  %v12276_v33 = vld [vmem:[%s16866_s17 + $0x270] ss:$8 sps:$4 sm:$0xff]  }
0x1095   :  { %v6256_v36 = vpop.f32.mrb[88].mxu1  ;;  %v6297_v11 = vpop.f32.mrb[76].mxu0 }
0x1096   :  { %v6404_v51 = vmul.f32 %v6388_v44, %v6256_v36  ;;  %v15480_v37 = vmul.f32 %v6402_v43, %v6297_v11  ;;  %v6258_v57 = vpop.f32.mrb[89].mxu1  ;;  %v6299_v54 = vpop.f32.mrb[77].mxu0  ;;  %v12242_v36 = vld [vmem:[%s16866_s17 + $0x160] ss:$8 sps:$4 sm:$0xff]   ;;  %v12243_v43 = vld [vmem:[%s16866_s17 + $0x174] ss:$8 sps:$4 sm:$0xff]  }
0x1097   :  { %v6405_v3 = vmul.f32 %v6401_v62, %v6258_v57  ;;  %v6407_v6 = vmul.f32 %v6403_v32, %v6299_v54  ;;  %v6260_v7 = vpop.f32.mrb[90].mxu1  ;;  %v6301_v56 = vpop.f32.mrb[78].mxu0  ;;  %v11592_v57 = vld [vmem:[%s16867_s3 + $0xe0] ss:$8 sps:$4 sm:$0xff]   ;;  %v11597_v54 = vld [vmem:[%s16867_s3 + $0xf4] ss:$8 sps:$4 sm:$0xff]  }
0x1098   :  { %v6261_v48 = vpop.f32.mrb[91].mxu1  ;;  %v6302_v26 = vpop.f32.mrb[79].mxu0  ;;  %v6411_v2 = vpack.c.bf16 %v6404_v51, %v6404_v51  ;;  %v12244_v32 = vld [vmem:[%s16866_s17 + $0x170] ss:$8 sps:$4 sm:$0xff]   ;;  %6778 = vmatpush1.bf16.msra.mxu0 %v11592_v57  ;;  %v11600_v7 = vld [vmem:[%s16867_s3 + $0x104] ss:$8 sps:$4 sm:$0xff]  }
0x1099   :  { %v6412_v1 = vpack.c.bf16 %v6405_v3, %v6405_v3  ;;  %v6414_v9 = vpack.c.bf16 %v6407_v6, %v6407_v6  ;;  %v12245_v3 = vld [vmem:[%s16866_s17 + $0x184] ss:$8 sps:$4 sm:$0xff]   ;;  %v11595_v6 = vld [vmem:[%s16867_s3 + $0xf0] ss:$8 sps:$4 sm:$0xff]   ;;  %6779 = vmatprep.subr.bf16.mxu0 %v11597_v54  ;;  %v12246_v56 = vld [vmem:[%s16866_s17 + $0x180] ss:$8 sps:$4 sm:$0xff]  }
0x109a   :  { %v12247_v48 = vld [vmem:[%s16866_s17 + $0x194] ss:$8 sps:$4 sm:$0xff]   ;;  %v11598_v26 = vld [vmem:[%s16867_s3 + $0x100] ss:$8 sps:$4 sm:$0xff]   ;;  %v12280_v57 = vld [vmem:[%s16866_s17 + $0x290] ss:$8 sps:$4 sm:$0xff]  }
0x109b   :  { %6453 = vmatprep.mubr.bf16.mxu1 %v6412_v1  ;;  %v11603_v1 = vld [vmem:[%s16867_s3 + $0x114] ss:$8 sps:$4 sm:$0xff]   ;;  %v12282_v54 = vld [vmem:[%s16866_s17 + $0x2a0] ss:$8 sps:$4 sm:$0xff]  }
0x109c   :  { %6454 = vmatmul.mubr.bf16.vlgmr.msra.gmra.mrb[96].mxu1 %v6411_v2  ;;  %6780 = vmatpush1.bf16.msra.mxu0 %v11595_v6  ;;  %v12248_v2 = vld [vmem:[%s16866_s17 + $0x190] ss:$8 sps:$4 sm:$0xff]   ;;  %v12285_v6 = vld [vmem:[%s16866_s17 + $0x2c4] ss:$8 sps:$4 sm:$0xff]  }
0x109d   :  { %6463 = vmatpush1.bf16.msra.mxu1 %v12230_v42  ;;  %6494 = vmatprep.mubr.bf16.mxu1 %v6414_v9  ;;  %v12249_v9 = vld [vmem:[%s16866_s17 + $0x1a4] ss:$8 sps:$4 sm:$0xff]   ;;  %v11601_v42 = vld [vmem:[%s16867_s3 + $0x110] ss:$8 sps:$4 sm:$0xff]  }
0x109e   :  { %6464 = vmatprep.subr.bf16.mxu1 %v12231_v35  ;;  %6781 = vmatprep.subr.bf16.mxu0 %v11600_v7  ;;  %v11606_v35 = vld [vmem:[%s16867_s3 + $0x124] ss:$8 sps:$4 sm:$0xff]   ;;  %v12286_v7 = vld [vmem:[%s16866_s17 + $0x2c0] ss:$8 sps:$4 sm:$0xff]  }
0x10a0   :  { %6782 = vmatpush1.bf16.msra.mxu0 %v11598_v26  ;;  %v12289_v26 = vld [vmem:[%s16866_s17 + $0x2e4] ss:$8 sps:$4 sm:$0xff]  }
0x10a1   :  { %6465 = vmatpush1.bf16.msra.mxu1 %v12232_v17  ;;  %6783 = vmatprep.subr.bf16.mxu0 %v11603_v1  ;;  %v12250_v17 = vld [vmem:[%s16866_s17 + $0x1a0] ss:$8 sps:$4 sm:$0xff]  }
0x10a2   :  { %6466 = vmatprep.subr.bf16.mxu1 %v12233_v10  ;;  %v11604_v10 = vld [vmem:[%s16867_s3 + $0x120] ss:$8 sps:$4 sm:$0xff]  }
0x10a3   :  { %v12290_v1 = vld [vmem:[%s16866_s17 + $0x2e0] ss:$8 sps:$4 sm:$0xff]  }
0x10a4   :  { %6784 = vmatpush1.bf16.msra.mxu0 %v11601_v42 }
0x10a5   :  { %v6338_v19 = vpop.f32.mrb[92].mxu1  ;;  %v15501_v28 = vpop.f32.mrb[80].mxu0  ;;  %6467 = vmatpush1.bf16.msra.mxu1 %v12234_v13  ;;  %6785 = vmatprep.subr.bf16.mxu0 %v11606_v35  ;;  %v12254_v13 = vld [vmem:[%s16866_s17 + $0x1c0] ss:$8 sps:$4 sm:$0xff]   ;;  %v12293_v35 = vld [vmem:[%s16866_s17 + $0x304] ss:$8 sps:$4 sm:$0xff]  }
0x10a6   :  { %v15506_v4 = vmul.f32 %v6398_v12, %v6338_v19  ;;  %v6340_v15 = vpop.f32.mrb[93].mxu1  ;;  %v10630_v41 = vpop.f32.mrb[81].mxu0  ;;  %6468 = vmatprep.subr.bf16.mxu1 %v12235_v52  ;;  %v12252_v19 = vld [vmem:[%s16866_s17 + $0x1b0] ss:$8 sps:$4 sm:$0xff]   ;;  %v12253_v12 = vld [vmem:[%s16866_s17 + $0x1c4] ss:$8 sps:$4 sm:$0xff]  }
0x10a7   :  { %v15511_v47 = vmul.f32 %v6388_v44, %v6340_v15  ;;  %v6342_v58 = vpop.f32.mrb[94].mxu1  ;;  %v6382_v60 = vpop.f32.mrb[82].mxu0  ;;  %v12255_v15 = vld [vmem:[%s16866_s17 + $0x1d4] ss:$8 sps:$4 sm:$0xff]   ;;  %v12256_v41 = vld [vmem:[%s16866_s17 + $0x1d0] ss:$8 sps:$4 sm:$0xff]  }
0x10a8   :  { %v6343_v49 = vpop.f32.mrb[95].mxu1  ;;  %v10631_v0 = vpop.f32.mrb[83].mxu0  ;;  %6786 = vmatpush1.bf16.msra.mxu0 %v11604_v10  ;;  %v12257_v52 = vld [vmem:[%s16866_s17 + $0x1e4] ss:$8 sps:$4 sm:$0xff]   ;;  %v12258_v58 = vld [vmem:[%s16866_s17 + $0x1e0] ss:$8 sps:$4 sm:$0xff]   ;;  %v6415_v42 = vpack.c.bf16 %v15506_v4, %v15506_v4  ;;  %v6410_v10 = vmul.f32 %v15471_v61, %v15501_v28 }
0x10a9   :  { %6469 = vmatpush1.bf16.msra.mxu1 %v12236_v22  ;;  %v12259_v60 = vld [vmem:[%s16866_s17 + $0x1f4] ss:$8 sps:$4 sm:$0xff]   ;;  %v12260_v49 = vld [vmem:[%s16866_s17 + $0x1f0] ss:$8 sps:$4 sm:$0xff]   ;;  %v6413_v0 = vpack.c.bf16 %v15480_v37, %v15480_v37  ;;  %v6416_v8 = vpack.c.bf16 %v15511_v47, %v15511_v47  ;;  %v12262_v22 = vld [vmem:[%s16866_s17 + $0x200] ss:$8 sps:$4 sm:$0xff]  }
0x10aa   :  { %6470 = vmatprep.subr.bf16.mxu1 %v12237_v16  ;;  %v12264_v37 = vld [vmem:[%s16866_s17 + $0x210] ss:$8 sps:$4 sm:$0xff]   ;;  %v12265_v47 = vld [vmem:[%s16866_s17 + $0x224] ss:$8 sps:$4 sm:$0xff]   ;;  %v12266_v16 = vld [vmem:[%s16866_s17 + $0x220] ss:$8 sps:$4 sm:$0xff]  }
0x10ab   :  { %v12296_v4 = vld [vmem:[%s16866_s17 + $0x310] ss:$8 sps:$4 sm:$0xff]  }
0x10ad   :  { %6471 = vmatpush1.bf16.msra.mxu1 %v12238_v31  ;;  %v12269_v31 = vld [vmem:[%s16866_s17 + $0x244] ss:$8 sps:$4 sm:$0xff]  }
0x10ae   :  { %6472 = vmatprep.subr.bf16.mxu1 %v12239_v40  ;;  %v12270_v40 = vld [vmem:[%s16866_s17 + $0x240] ss:$8 sps:$4 sm:$0xff]  }
0x10b1   :  { %6473 = vmatpush1.bf16.msra.mxu1 %v12240_v50  ;;  %v12273_v50 = vld [vmem:[%s16866_s17 + $0x264] ss:$8 sps:$4 sm:$0xff]  }
0x10b2   :  { %6474 = vmatprep.subr.bf16.mxu1 %v12241_v55  ;;  %v12274_v55 = vld [vmem:[%s16866_s17 + $0x260] ss:$8 sps:$4 sm:$0xff]  }
0x10b5   :  { %6475 = vmatpush1.bf16.msra.mxu1 %v12242_v36  ;;  %v15561_v44 = vpop.f32.mrb[84].mxu0  ;;  %v12277_v36 = vld [vmem:[%s16866_s17 + $0x284] ss:$8 sps:$4 sm:$0xff]  }
0x10b6   :  { %v15563_v11 = vpop.f32.mrb[85].mxu0  ;;  %6476 = vmatprep.subr.bf16.mxu1 %v12243_v43  ;;  %v12278_v43 = vld [vmem:[%s16866_s17 + $0x280] ss:$8 sps:$4 sm:$0xff]   ;;  %12016 = vrcp.f32 %v15561_v44  ;;  %v12299_v44 = vld [vmem:[%s16868_s18 + $0x14] ss:$8 sps:$4 sm:$0xff]  }
0x10b7   :  { %v6623_v51 = vpop.f32.mrb[86].mxu0  ;;  %12018 = vrcp.f32 %v15563_v11  ;;  %v12300_v11 = vld [vmem:[%s16868_s18 + $0x10] ss:$8 sps:$4 sm:$0xff]  }
0x10b8   :  { %v6624_v62 = vpop.f32.mrb[87].mxu0  ;;  %v12279_v51 = vld [vmem:[%s16866_s17 + $0x294] ss:$8 sps:$4 sm:$0xff]  }
0x10b9   :  { %6477 = vmatpush1.bf16.msra.mxu1 %v12244_v32  ;;  %v12281_v62 = vld [vmem:[%s16866_s17 + $0x2a4] ss:$8 sps:$4 sm:$0xff]   ;;  %v12283_v32 = vld [vmem:[%s16866_s17 + $0x2b4] ss:$8 sps:$4 sm:$0xff]  }
0x10ba   :  { %6478 = vmatprep.subr.bf16.mxu1 %v12245_v3  ;;  %v12284_v3 = vld [vmem:[%s16866_s17 + $0x2b0] ss:$8 sps:$4 sm:$0xff]  }
0x10bd   :  { %6479 = vmatpush1.bf16.msra.mxu1 %v12246_v56  ;;  %v12287_v56 = vld [vmem:[%s16866_s17 + $0x2d4] ss:$8 sps:$4 sm:$0xff]  }
0x10be   :  { %6480 = vmatprep.subr.bf16.mxu1 %v12247_v48  ;;  %v12288_v48 = vld [vmem:[%s16866_s17 + $0x2d0] ss:$8 sps:$4 sm:$0xff]  }
0x10c0   :  { %v12017_v61 = vpop.eup %12016 }
0x10c1   :  { %6481 = vmatpush1.bf16.msra.mxu1 %v12248_v2  ;;  %v12291_v2 = vld [vmem:[%s16866_s17 + $0x2f4] ss:$8 sps:$4 sm:$0xff]  }
0x10c2   :  { %6482 = vmatprep.subr.bf16.mxu1 %v12249_v9  ;;  %v12292_v9 = vld [vmem:[%s16866_s17 + $0x2f0] ss:$8 sps:$4 sm:$0xff]  }
0x10c5   :  { %6483 = vmatpush1.bf16.msra.mxu1 %v12250_v17  ;;  %v12294_v17 = vld [vmem:[%s16866_s17 + $0x300] ss:$8 sps:$4 sm:$0xff]  }
0x10c6   :  { %6484 = vmatprep.subr.bf16.mxu1 %v12251_v18  ;;  %v12295_v18 = vld [vmem:[%s16866_s17 + $0x314] ss:$8 sps:$4 sm:$0xff]  }
0x10c9   :  { %6485 = vmatpush1.bf16.msra.mxu1 %v12252_v19  ;;  %v6417_v19 = vpack.c.bf16 %v6410_v10, %v6410_v10  ;;  %v11639_v10 = vld [vmem:[%s16870_s5 + $0x474] ss:$40 sps:$4 sm:$0xff]  }
0x10ca   :  { %6486 = vmatprep.subr.bf16.mxu1 %v12253_v12  ;;  %v11607_v12 = vld [vmem:[%s16867_s3 + $0x130] ss:$8 sps:$4 sm:$0xff]  }
0x10cd   :  { %6487 = vmatpush1.bf16.msra.mxu1 %v12254_v13  ;;  %v12297_v13 = vld [vmem:[%s16868_s18 + $0x4] ss:$8 sps:$4 sm:$0xff]  }
0x10ce   :  { %6488 = vmatprep.subr.bf16.mxu1 %v12255_v15  ;;  %v12019_v15 = vpop.eup %12018 }
0x10d1   :  { %6489 = vmatpush1.bf16.msra.mxu1 %v12256_v41 }
0x10d2   :  { %6490 = vmatprep.subr.bf16.mxu1 %v12257_v52 }
0x10d5   :  { %6491 = vmatpush1.bf16.msra.mxu1 %v12258_v58 }
0x10d6   :  { %6492 = vmatprep.subr.bf16.mxu1 %v12259_v60 }
0x10d9   :  { %6493 = vmatpush1.bf16.msra.mxu1 %v12260_v49 }
0x10da   :  { %6503 = vmatprep.subr.bf16.mxu1 %v12261_v45 }
0x10dc   :  { %6495 = vmatmul.mubr.bf16.vlgmr.msra.gmra.mrb[96].mxu1 %v6413_v0 }
0x10dd   :  { %6504 = vmatpush1.bf16.msra.mxu1 %v12262_v22  ;;  %6535 = vmatprep.mubr.bf16.mxu1 %v6416_v8  ;;  %v12298_v8 = vld [vmem:[%s16868_s18] ss:$8 sps:$4 sm:$0xff]   ;;  %v12301_v22 = vld [vmem:[%s16868_s18 + $0x24] ss:$8 sps:$4 sm:$0xff]  }
0x10de   :  { %6505 = vmatprep.subr.bf16.mxu1 %v12263_v29  ;;  %v12302_v29 = vld [vmem:[%s16868_s18 + $0x20] ss:$8 sps:$4 sm:$0xff]  }
0x10e1   :  { %6506 = vmatpush1.bf16.msra.mxu1 %v12264_v37  ;;  %v12303_v37 = vld [vmem:[%s16868_s18 + $0x34] ss:$8 sps:$4 sm:$0xff]  }
0x10e2   :  { %6507 = vmatprep.subr.bf16.mxu1 %v12265_v47  ;;  %v12304_v47 = vld [vmem:[%s16868_s18 + $0x30] ss:$8 sps:$4 sm:$0xff]  }
0x10e5   :  { %6508 = vmatpush1.bf16.msra.mxu1 %v12266_v16  ;;  %v12305_v16 = vld [vmem:[%s16868_s18 + $0x44] ss:$8 sps:$4 sm:$0xff]  }
0x10e6   :  { %6509 = vmatprep.subr.bf16.mxu1 %v12267_v34  ;;  %v12306_v34 = vld [vmem:[%s16868_s18 + $0x40] ss:$8 sps:$4 sm:$0xff]  }
0x10e9   :  { %6510 = vmatpush1.bf16.msra.mxu1 %v12268_v30  ;;  %v12307_v30 = vld [vmem:[%s16868_s18 + $0x54] ss:$8 sps:$4 sm:$0xff]  }
0x10ea   :  { %6511 = vmatprep.subr.bf16.mxu1 %v12269_v31  ;;  %v12308_v31 = vld [vmem:[%s16868_s18 + $0x50] ss:$8 sps:$4 sm:$0xff]  }
0x10ed   :  { %6512 = vmatpush1.bf16.msra.mxu1 %v12270_v40  ;;  %v12309_v40 = vld [vmem:[%s16868_s18 + $0x64] ss:$8 sps:$4 sm:$0xff]  }
0x10ee   :  { %6513 = vmatprep.subr.bf16.mxu1 %v12271_v53  ;;  %v12310_v53 = vld [vmem:[%s16868_s18 + $0x60] ss:$8 sps:$4 sm:$0xff]  }
0x10f1   :  { %6514 = vmatpush1.bf16.msra.mxu1 %v12272_v39  ;;  %v12311_v39 = vld [vmem:[%s16868_s18 + $0x74] ss:$8 sps:$4 sm:$0xff]  }
0x10f2   :  { %6515 = vmatprep.subr.bf16.mxu1 %v12273_v50  ;;  %v12312_v50 = vld [vmem:[%s16868_s18 + $0x70] ss:$8 sps:$4 sm:$0xff]  }
0x10f5   :  { %6516 = vmatpush1.bf16.msra.mxu1 %v12274_v55  ;;  %v12313_v55 = vld [vmem:[%s16868_s18 + $0x84] ss:$8 sps:$4 sm:$0xff]  }
0x10f6   :  { %6517 = vmatprep.subr.bf16.mxu1 %v12275_v20  ;;  %v12314_v20 = vld [vmem:[%s16868_s18 + $0x80] ss:$8 sps:$4 sm:$0xff]  }
0x10f9   :  { %6518 = vmatpush1.bf16.msra.mxu1 %v12276_v33  ;;  %v12315_v33 = vld [vmem:[%s16868_s18 + $0x94] ss:$8 sps:$4 sm:$0xff]  }
0x10fa   :  { %6519 = vmatprep.subr.bf16.mxu1 %v12277_v36  ;;  %v12316_v36 = vld [vmem:[%s16868_s18 + $0x90] ss:$8 sps:$4 sm:$0xff]  }
0x10fd   :  { %6520 = vmatpush1.bf16.msra.mxu1 %v12278_v43  ;;  %v9886_v43 = vld [vmem:[%s16869_s4 + $0x2] sm:$0x3] }
0x10fe   :  { %6521 = vmatprep.subr.bf16.mxu1 %v12279_v51  ;;  %v6659_v51 = vrot.slane %v9886_v43, %v12698_v24 }
0x1101   :  { %6522 = vmatpush1.bf16.msra.mxu1 %v12280_v57  ;;  %v6663_v57 = vrot.slane %v9886_v43, %v12707_v27  ;;  %v11663_v43 = vld [vmem:[%s16870_s5 + $0x5b4] ss:$40 sps:$4 sm:$0xff]  }
0x1102   :  { %6523 = vmatprep.subr.bf16.mxu1 %v12281_v62 }
0x1105   :  { %6524 = vmatpush1.bf16.msra.mxu1 %v12282_v54 }
0x1106   :  { %6525 = vmatprep.subr.bf16.mxu1 %v12283_v32 }
0x1109   :  { %6526 = vmatpush1.bf16.msra.mxu1 %v12284_v3 }
0x110a   :  { %6527 = vmatprep.subr.bf16.mxu1 %v12285_v6 }
0x110d   :  { %6528 = vmatpush1.bf16.msra.mxu1 %v12286_v7 }
0x110e   :  { %6529 = vmatprep.subr.bf16.mxu1 %v12287_v56 }
0x1111   :  { %6530 = vmatpush1.bf16.msra.mxu1 %v12288_v48 }
0x1112   :  { %6531 = vmatprep.subr.bf16.mxu1 %v12289_v26 }
0x1115   :  { %6532 = vmatpush1.bf16.msra.mxu1 %v12290_v1 }
0x1116   :  { %6533 = vmatprep.subr.bf16.mxu1 %v12291_v2  ;;  %v11615_v2 = vld [vmem:[%s16870_s5 + $0x334] ss:$40 sps:$4 sm:$0xff]  }
0x1119   :  { %6534 = vmatpush1.bf16.msra.mxu1 %v12292_v9  ;;  %v11621_v9 = vld [vmem:[%s16870_s5 + $0x384] ss:$40 sps:$4 sm:$0xff]  }
0x111a   :  { %6544 = vmatprep.subr.bf16.mxu1 %v12293_v35  ;;  %v11627_v35 = vld [vmem:[%s16870_s5 + $0x3d4] ss:$40 sps:$4 sm:$0xff]  }
0x111c   :  { %6536 = vmatmul.mubr.bf16.vlgmr.msra.gmra.mrb[96].mxu1 %v6415_v42  ;;  %v11619_v42 = vld [vmem:[%s16870_s5 + $0x380] ss:$40 sps:$4 sm:$0xff]  }
0x111d   :  { %6545 = vmatpush1.bf16.msra.mxu1 %v12294_v17  ;;  %6576 = vmatprep.mubr.bf16.mxu1 %v12337_v21  ;;  %v11609_v21 = vld [vmem:[%s16867_s3 + $0x134] ss:$8 sps:$4 sm:$0xff]   ;;  %v11625_v17 = vld [vmem:[%s16870_s5 + $0x3d0] ss:$40 sps:$4 sm:$0xff]  }
0x111e   :  { %6546 = vmatprep.subr.bf16.mxu1 %v12295_v18  ;;  %6787 = vmatprep.subr.bf16.mxu0 %v11609_v21  ;;  %v11633_v18 = vld [vmem:[%s16870_s5 + $0x424] ss:$40 sps:$4 sm:$0xff]  }
0x111f   :  { %6788 = vmatpush1.bf16.msra.mxu0 %v11607_v12 }
0x1120   :  { %6821 = vmatprep.subr.bf16.mxu0 %v12297_v13 }
0x1121   :  { %6547 = vmatpush1.bf16.msra.mxu1 %v12296_v4  ;;  %v11631_v4 = vld [vmem:[%s16870_s5 + $0x420] ss:$40 sps:$4 sm:$0xff]  }
0x1122   :  { %7685 = vmatprep.subr.bf16.mxu1 %v11615_v2  ;;  %v9908_v2 = vld [vmem:[%s16872_s9 + $0x2] sm:$0x3] }
0x1128   :  { %9863 = vmatmul.mubr.msk.bf16.vlgmr.msra.gmra.mrb[96].mxu1 %vm664_vm0, %v6417_v19  ;;  %v11637_v19 = vld [vmem:[%s16870_s5 + $0x470] ss:$40 sps:$4 sm:$0xff]  }
0x11fb   :  { %v6578_v28 = vpop.f32.mrb[96].mxu1 }
0x11fc   :  { %v6627_v41 = vmul.f32 %v12017_v61, %v6578_v28  ;;  %v6580_v52 = vpop.f32.mrb[97].mxu1 }
0x11fd   :  { %v6629_v58 = vmul.f32 %v12019_v15, %v6580_v52  ;;  %v6582_v60 = vpop.f32.mrb[98].mxu1 }
0x11fe   :  { %v6583_v49 = vpop.f32.mrb[99].mxu1  ;;  %v6651_v45 = vpack.c.bf16 %v6627_v41, %v6627_v41  ;;  %v11610_v60 = vld [vmem:[%s16870_s5 + $0x320] ss:$40 sps:$4 sm:$0xff]  }
0x11ff   :  { %v6652_v0 = vpack.c.bf16 %v6629_v58, %v6629_v58 }
0x1201   :  { %9907 = vmatprep.mubr.msk.bf16.mxu0 %vm664_vm0, %v6652_v0  ;;  %v11618_v0 = vld [vmem:[%s16870_s5 + $0x374] ss:$40 sps:$4 sm:$0xff]  }
0x1202   :  { %6802 = vmatmul.mubr.bf16.vlgmr.msra.gmra.mrb[88].mxu0 %v6651_v45  ;;  %v11616_v45 = vld [vmem:[%s16870_s5 + $0x370] ss:$40 sps:$4 sm:$0xff]  }
0x1203   :  { %6822 = vmatpush1.bf16.msra.mxu0 %v12298_v8 }
0x1204   :  { %6823 = vmatprep.subr.bf16.mxu0 %v12299_v44 }
0x1207   :  { %6824 = vmatpush1.bf16.msra.mxu0 %v12300_v11 }
0x1208   :  { %6825 = vmatprep.subr.bf16.mxu0 %v12301_v22 }
0x120b   :  { %6826 = vmatpush1.bf16.msra.mxu0 %v12302_v29 }
0x120c   :  { %6827 = vmatprep.subr.bf16.mxu0 %v12303_v37 }
0x120f   :  { %6828 = vmatpush1.bf16.msra.mxu0 %v12304_v47 }
0x1210   :  { %6829 = vmatprep.subr.bf16.mxu0 %v12305_v16 }
0x1213   :  { %6830 = vmatpush1.bf16.msra.mxu0 %v12306_v34 }
0x1214   :  { %6831 = vmatprep.subr.bf16.mxu0 %v12307_v30 }
0x1217   :  { %6832 = vmatpush1.bf16.msra.mxu0 %v12308_v31 }
0x1218   :  { %6833 = vmatprep.subr.bf16.mxu0 %v12309_v40 }
0x121b   :  { %6834 = vmatpush1.bf16.msra.mxu0 %v12310_v53 }
0x121c   :  { %6835 = vmatprep.subr.bf16.mxu0 %v12311_v39 }
0x121f   :  { %6836 = vmatpush1.bf16.msra.mxu0 %v12312_v50 }
0x1220   :  { %6837 = vmatprep.subr.bf16.mxu0 %v12313_v55 }
0x1223   :  { %6838 = vmatpush1.bf16.msra.mxu0 %v12314_v20 }
0x1224   :  { %6839 = vmatprep.subr.bf16.mxu0 %v12315_v33 }
0x1227   :  { %6840 = vmatpush1.bf16.msra.mxu0 %v12316_v36 }
0x1228   :  { %6871 = vmatprep.subr.bf16.mxu0 %v12297_v13 }
0x12d5   :  { %v6803_v62 = vpop.f32.mrb[88].mxu0 }
0x12d6   :  { %v6804_v54 = vadd.f32 %v6803_v62, %v6659_v51  ;;  %v6805_v32 = vpop.f32.mrb[89].mxu0  ;;  %v11658_v51 = vld [vmem:[%s16870_s5 + $0x5a0] ss:$40 sps:$4 sm:$0xff]   ;;  %v11664_v62 = vld [vmem:[%s16870_s5 + $0x5f0] ss:$40 sps:$4 sm:$0xff]  }
0x12d7   :  { %v6806_v3 = vadd.f32 %v6805_v32, %v6663_v57  ;;  %v6807_v6 = vpop.f32.mrb[90].mxu0  ;;  %v11661_v57 = vld [vmem:[%s16870_s5 + $0x5b0] ss:$40 sps:$4 sm:$0xff]   ;;  %v11667_v32 = vld [vmem:[%s16870_s5 + $0x600] ss:$40 sps:$4 sm:$0xff]  }
0x12d8   :  { %v6810_v7 = vadd.f32 %v6804_v54, %v14813_v59  ;;  %v6808_v56 = vpop.f32.mrb[91].mxu0  ;;  %v11612_v59 = vld [vmem:[%s16870_s5 + $0x324] ss:$40 sps:$4 sm:$0xff]   ;;  %v11666_v54 = vld [vmem:[%s16870_s5 + $0x5f4] ss:$40 sps:$4 sm:$0xff]  }
0x12d9   :  { %v6811_v48 = vadd.f32 %v6806_v3, %v14815_v63  ;;  %v11613_v63 = vld [vmem:[%s16870_s5 + $0x330] ss:$40 sps:$4 sm:$0xff]   ;;  %v11669_v3 = vld [vmem:[%s16870_s5 + $0x604] ss:$40 sps:$4 sm:$0xff]  }
0x12da   :  { %v6816_v1 = vpack.c.bf16 %v6810_v7, %v6810_v7  ;;  %7686 = vmatpush1.bf16.msra.mxu1 %v11613_v63  ;;  %v11672_v6 = vld [vmem:[%s16870_s5 + $0x32c] ss:$40 sps:$4 sm:$0xff]  }
0x12db   :  { %v6817_v26 = vpack.c.bf16 %v6811_v48, %v6811_v48  ;;  %7687 = vmatprep.subr.bf16.mxu1 %v11621_v9  ;;  %v9909_v9 = vld [vmem:[%s16873_s10 + $0x2] sm:$0x3] }
0x12dd   :  { %9910 = vmatprep.mubr.msk.bf16.mxu0 %vm664_vm0, %v6817_v26 }
0x12de   :  { %6854 = vmatmul.mubr.bf16.vlgmr.msra.gmra.mrb[92].mxu0 %v6816_v1  ;;  %7688 = vmatpush1.bf16.msra.mxu1 %v11619_v42  ;;  %v6920_v42 = vrot.slane %v9908_v2, %v12698_v24 }
0x12df   :  { %6872 = vmatpush1.bf16.msra.mxu0 %v12298_v8  ;;  %7689 = vmatprep.subr.bf16.mxu1 %v11627_v35  ;;  %v11624_v8 = vld [vmem:[%s16870_s5 + $0x3c4] ss:$40 sps:$4 sm:$0xff]  }
0x12e0   :  { %6873 = vmatprep.subr.bf16.mxu0 %v12299_v44  ;;  %v11622_v44 = vld [vmem:[%s16870_s5 + $0x3c0] ss:$40 sps:$4 sm:$0xff]  }
0x12e2   :  { %7690 = vmatpush1.bf16.msra.mxu1 %v11625_v17  ;;  %v6924_v17 = vrot.slane %v9908_v2, %v12707_v27  ;;  %v11730_v2 = vld [vmem:[%s16870_s5 + $0x338] ss:$40 sps:$4 sm:$0xff]  }
0x12e3   :  { %6874 = vmatpush1.bf16.msra.mxu0 %v12300_v11  ;;  %7691 = vmatprep.subr.bf16.mxu1 %v11633_v18  ;;  %v11630_v11 = vld [vmem:[%s16870_s5 + $0x414] ss:$40 sps:$4 sm:$0xff]  }
0x12e4   :  { %6875 = vmatprep.subr.bf16.mxu0 %v12301_v22  ;;  %v11628_v22 = vld [vmem:[%s16870_s5 + $0x410] ss:$40 sps:$4 sm:$0xff]  }
0x12e6   :  { %7692 = vmatpush1.bf16.msra.mxu1 %v11631_v4 }
0x12e7   :  { %6876 = vmatpush1.bf16.msra.mxu0 %v12302_v29  ;;  %7693 = vmatprep.subr.bf16.mxu1 %v11639_v10  ;;  %v11636_v29 = vld [vmem:[%s16870_s5 + $0x464] ss:$40 sps:$4 sm:$0xff]   ;;  %v6933_v10 = vrot.slane %v9909_v9, %v12698_v24 }
0x12e8   :  { %6877 = vmatprep.subr.bf16.mxu0 %v12303_v37  ;;  %v11634_v37 = vld [vmem:[%s16870_s5 + $0x460] ss:$40 sps:$4 sm:$0xff]  }
0x12ea   :  { %7694 = vmatpush1.bf16.msra.mxu1 %v11637_v19 }
0x12eb   :  { %6878 = vmatpush1.bf16.msra.mxu0 %v12304_v47  ;;  %v11642_v47 = vld [vmem:[%s16870_s5 + $0x4b4] ss:$40 sps:$4 sm:$0xff]  }
0x12ec   :  { %6879 = vmatprep.subr.bf16.mxu0 %v12305_v16  ;;  %v11645_v16 = vld [vmem:[%s16870_s5 + $0x4c4] ss:$40 sps:$4 sm:$0xff]  }
0x12ed   :  { %7695 = vmatprep.subr.bf16.mxu1 %v11645_v16  ;;  %v11691_v16 = vld [vmem:[%s16870_s5 + $0x430] ss:$40 sps:$4 sm:$0xff]  }
0x12ef   :  { %6880 = vmatpush1.bf16.msra.mxu0 %v12306_v34  ;;  %v11640_v34 = vld [vmem:[%s16870_s5 + $0x4b0] ss:$40 sps:$4 sm:$0xff]  }
0x12f0   :  { %6881 = vmatprep.subr.bf16.mxu0 %v12307_v30  ;;  %v11643_v30 = vld [vmem:[%s16870_s5 + $0x4c0] ss:$40 sps:$4 sm:$0xff]  }
0x12f1   :  { %7696 = vmatpush1.bf16.msra.mxu1 %v11643_v30  ;;  %v11699_v30 = vld [vmem:[%s16870_s5 + $0x484] ss:$40 sps:$4 sm:$0xff]  }
0x12f3   :  { %6882 = vmatpush1.bf16.msra.mxu0 %v12308_v31  ;;  %v11648_v31 = vld [vmem:[%s16870_s5 + $0x504] ss:$40 sps:$4 sm:$0xff]  }
0x12f4   :  { %6883 = vmatprep.subr.bf16.mxu0 %v12309_v40  ;;  %v11651_v40 = vld [vmem:[%s16870_s5 + $0x514] ss:$40 sps:$4 sm:$0xff]  }
0x12f5   :  { %7697 = vmatprep.subr.bf16.mxu1 %v11651_v40  ;;  %v11697_v40 = vld [vmem:[%s16870_s5 + $0x480] ss:$40 sps:$4 sm:$0xff]  }
0x12f7   :  { %6884 = vmatpush1.bf16.msra.mxu0 %v12310_v53  ;;  %v11646_v53 = vld [vmem:[%s16870_s5 + $0x500] ss:$40 sps:$4 sm:$0xff]  }
0x12f8   :  { %6885 = vmatprep.subr.bf16.mxu0 %v12311_v39  ;;  %v11649_v39 = vld [vmem:[%s16870_s5 + $0x510] ss:$40 sps:$4 sm:$0xff]  }
0x12f9   :  { %7698 = vmatpush1.bf16.msra.mxu1 %v11649_v39  ;;  %v11705_v39 = vld [vmem:[%s16870_s5 + $0x4d4] ss:$40 sps:$4 sm:$0xff]  }
0x12fb   :  { %6886 = vmatpush1.bf16.msra.mxu0 %v12312_v50  ;;  %v11654_v50 = vld [vmem:[%s16870_s5 + $0x554] ss:$40 sps:$4 sm:$0xff]  }
0x12fc   :  { %6887 = vmatprep.subr.bf16.mxu0 %v12313_v55  ;;  %v11657_v55 = vld [vmem:[%s16870_s5 + $0x564] ss:$40 sps:$4 sm:$0xff]  }
0x12fd   :  { %7699 = vmatprep.subr.bf16.mxu1 %v11657_v55  ;;  %v11703_v55 = vld [vmem:[%s16870_s5 + $0x4d0] ss:$40 sps:$4 sm:$0xff]  }
0x12ff   :  { %6888 = vmatpush1.bf16.msra.mxu0 %v12314_v20  ;;  %v11652_v20 = vld [vmem:[%s16870_s5 + $0x550] ss:$40 sps:$4 sm:$0xff]  }
0x1300   :  { %6889 = vmatprep.subr.bf16.mxu0 %v12315_v33  ;;  %v11655_v33 = vld [vmem:[%s16870_s5 + $0x560] ss:$40 sps:$4 sm:$0xff]  }
0x1301   :  { %7700 = vmatpush1.bf16.msra.mxu1 %v11655_v33  ;;  %v11711_v33 = vld [vmem:[%s16870_s5 + $0x524] ss:$40 sps:$4 sm:$0xff]  }
0x1302   :  { %7701 = vmatprep.subr.bf16.mxu1 %v11663_v43  ;;  %v11709_v43 = vld [vmem:[%s16870_s5 + $0x520] ss:$40 sps:$4 sm:$0xff]  }
0x1303   :  { %6890 = vmatpush1.bf16.msra.mxu0 %v12316_v36  ;;  %v11660_v36 = vld [vmem:[%s16870_s5 + $0x5a4] ss:$40 sps:$4 sm:$0xff]  }
0x1304   :  { %7603 = vmatprep.subr.bf16.mxu0 %v11612_v59 }
0x1305   :  { %7702 = vmatpush1.bf16.msra.mxu1 %v11661_v57  ;;  %v11717_v57 = vld [vmem:[%s16870_s5 + $0x574] ss:$40 sps:$4 sm:$0xff]  }
0x1306   :  { %7703 = vmatprep.subr.bf16.mxu1 %v11669_v3  ;;  %v11723_v3 = vld [vmem:[%s16870_s5 + $0x5c4] ss:$40 sps:$4 sm:$0xff]  }
0x1309   :  { %7704 = vmatpush1.bf16.msra.mxu1 %v11667_v32  ;;  %v11720_v32 = vld [vmem:[%s16870_s5 + $0x5ac] ss:$40 sps:$4 sm:$0xff]  }
0x13b1   :  { %v6855_v21 = vpop.f32.mrb[92].mxu0 }
0x13b2   :  { %v15874_v12 = vsub.f32 %v6810_v7, %v6855_v21  ;;  %v6857_v13 = vpop.f32.mrb[93].mxu0  ;;  %v11675_v7 = vld [vmem:[%s16870_s5 + $0x344] ss:$40 sps:$4 sm:$0xff]   ;;  %v6937_v21 = vrot.slane %v9909_v9, %v12707_v27 }
0x13b3   :  { %v15876_v61 = vsub.f32 %v6811_v48, %v6857_v13  ;;  %v6859_v28 = vpop.f32.mrb[94].mxu0  ;;  %7767 = vmatprep.subr.bf16.mxu1 %v11675_v7  ;;  %v11721_v7 = vld [vmem:[%s16870_s5 + $0x5c0] ss:$40 sps:$4 sm:$0xff]   ;;  %v11735_v9 = vld [vmem:[%s16870_s5 + $0x38c] ss:$40 sps:$4 sm:$0xff]  }
0x13b4   :  { %v6864_v15 = vmul.f32 %v15874_v12, %v15874_v12  ;;  %v6860_v41 = vpop.f32.mrb[95].mxu0 }
0x13b5   :  { %v6865_v52 = vmul.f32 %v15876_v61, %v15876_v61 }
0x13b6   :  { %v6866_v49 = vpack.c.bf16 %v6864_v15, %v6864_v15 }
0x13b7   :  { %v6867_v58 = vpack.c.bf16 %v6865_v52, %v6865_v52 }
0x13b9   :  { %9911 = vmatprep.mubr.msk.bf16.mxu0 %vm664_vm0, %v6867_v58 }
0x13ba   :  { %6904 = vmatmul.mubr.bf16.vlgmr.msra.gmra.mrb[96].mxu0 %v6866_v49  ;;  %v11681_v49 = vld [vmem:[%s16870_s5 + $0x394] ss:$40 sps:$4 sm:$0xff]  }
0x13bb   :  { %7604 = vmatpush1.bf16.msra.mxu0 %v11610_v60  ;;  %v11678_v60 = vld [vmem:[%s16870_s5 + $0x37c] ss:$40 sps:$4 sm:$0xff]  }
0x13bc   :  { %7605 = vmatprep.subr.bf16.mxu0 %v11618_v0  ;;  %v11676_v0 = vld [vmem:[%s16870_s5 + $0x378] ss:$40 sps:$4 sm:$0xff]  }
0x13bf   :  { %7606 = vmatpush1.bf16.msra.mxu0 %v11616_v45  ;;  %v11679_v45 = vld [vmem:[%s16870_s5 + $0x390] ss:$40 sps:$4 sm:$0xff]  }
0x13c0   :  { %7607 = vmatprep.subr.bf16.mxu0 %v11624_v8  ;;  %v11684_v8 = vld [vmem:[%s16870_s5 + $0x3cc] ss:$40 sps:$4 sm:$0xff]  }
0x13c3   :  { %7608 = vmatpush1.bf16.msra.mxu0 %v11622_v44  ;;  %v11687_v44 = vld [vmem:[%s16870_s5 + $0x3e4] ss:$40 sps:$4 sm:$0xff]  }
0x13c4   :  { %7609 = vmatprep.subr.bf16.mxu0 %v11630_v11  ;;  %v11682_v11 = vld [vmem:[%s16870_s5 + $0x3c8] ss:$40 sps:$4 sm:$0xff]  }
0x13c7   :  { %7610 = vmatpush1.bf16.msra.mxu0 %v11628_v22  ;;  %v11685_v22 = vld [vmem:[%s16870_s5 + $0x3e0] ss:$40 sps:$4 sm:$0xff]  }
0x13c8   :  { %7611 = vmatprep.subr.bf16.mxu0 %v11636_v29  ;;  %v11690_v29 = vld [vmem:[%s16870_s5 + $0x41c] ss:$40 sps:$4 sm:$0xff]  }
0x13cb   :  { %7612 = vmatpush1.bf16.msra.mxu0 %v11634_v37  ;;  %v11693_v37 = vld [vmem:[%s16870_s5 + $0x434] ss:$40 sps:$4 sm:$0xff]  }
0x13cc   :  { %7613 = vmatprep.subr.bf16.mxu0 %v11642_v47  ;;  %v11688_v47 = vld [vmem:[%s16870_s5 + $0x418] ss:$40 sps:$4 sm:$0xff]  }
0x13cf   :  { %7614 = vmatpush1.bf16.msra.mxu0 %v11640_v34  ;;  %v11696_v34 = vld [vmem:[%s16870_s5 + $0x46c] ss:$40 sps:$4 sm:$0xff]  }
0x13d0   :  { %7615 = vmatprep.subr.bf16.mxu0 %v11648_v31  ;;  %v11694_v31 = vld [vmem:[%s16870_s5 + $0x468] ss:$40 sps:$4 sm:$0xff]  }
0x13d3   :  { %7616 = vmatpush1.bf16.msra.mxu0 %v11646_v53  ;;  %v11702_v53 = vld [vmem:[%s16870_s5 + $0x4bc] ss:$40 sps:$4 sm:$0xff]  }
0x13d4   :  { %7617 = vmatprep.subr.bf16.mxu0 %v11654_v50  ;;  %v11700_v50 = vld [vmem:[%s16870_s5 + $0x4b8] ss:$40 sps:$4 sm:$0xff]  }
0x13d7   :  { %7618 = vmatpush1.bf16.msra.mxu0 %v11652_v20  ;;  %v11708_v20 = vld [vmem:[%s16870_s5 + $0x50c] ss:$40 sps:$4 sm:$0xff]  }
0x13d8   :  { %7619 = vmatprep.subr.bf16.mxu0 %v11660_v36  ;;  %v11706_v36 = vld [vmem:[%s16870_s5 + $0x508] ss:$40 sps:$4 sm:$0xff]  }
0x13db   :  { %7620 = vmatpush1.bf16.msra.mxu0 %v11658_v51  ;;  %v11714_v51 = vld [vmem:[%s16870_s5 + $0x55c] ss:$40 sps:$4 sm:$0xff]  }
0x13dc   :  { %7621 = vmatprep.subr.bf16.mxu0 %v11666_v54  ;;  %v11715_v54 = vld [vmem:[%s16870_s5 + $0x570] ss:$40 sps:$4 sm:$0xff]  }
0x13df   :  { %7622 = vmatpush1.bf16.msra.mxu0 %v11664_v62  ;;  %v11712_v62 = vld [vmem:[%s16870_s5 + $0x558] ss:$40 sps:$4 sm:$0xff]  }
0x13e0   :  { %7644 = vmatprep.subr.bf16.mxu0 %v11672_v6  ;;  %v11718_v6 = vld [vmem:[%s16870_s5 + $0x5a8] ss:$40 sps:$4 sm:$0xff]  }
0x148d   :  { %v6905_v56 = vpop.f32.mrb[96].mxu0 }
0x148e   :  { %v6906_v48 = vadd.f32 1e-05, %v6905_v56  ;;  %v6907_v26 = vpop.f32.mrb[97].mxu0  ;;  %v11726_v56 = vld [vmem:[%s16870_s5 + $0x5fc] ss:$40 sps:$4 sm:$0xff]  }
0x148f   :  { %v6908_v1 = vadd.f32 1e-05, %v6907_v26  ;;  %v6909_v59 = vpop.f32.mrb[98].mxu0  ;;  %v11724_v26 = vld [vmem:[%s16870_s5 + $0x5f8] ss:$40 sps:$4 sm:$0xff]  }
0x1490   :  { %12020 = vrsqrt.f32 %v6906_v48  ;;  %v6910_v63 = vpop.f32.mrb[99].mxu0  ;;  %v11729_v48 = vld [vmem:[%s16870_s5 + $0x614] ss:$40 sps:$4 sm:$0xff]  }
0x1491   :  { %12022 = vrsqrt.f32 %v6908_v1  ;;  %v11727_v1 = vld [vmem:[%s16870_s5 + $0x610] ss:$40 sps:$4 sm:$0xff]   ;;  %v11732_v59 = vld [vmem:[%s16870_s5 + $0x33c] ss:$40 sps:$4 sm:$0xff]  }
0x1492   :  { %v11792_v63 = vld [vmem:[%s16871_s7 + $0x604] ss:$8 sps:$4 sm:$0xff]  }
0x149a   :  { %v12021_v35 = vpop.eup %12020 }
0x149b   :  { %v12023_v18 = vpop.eup %12022  ;;  %v6914_v4 = vmul.f32 %v12021_v35, %v15874_v12  ;;  %v11670_v12 = vld [vmem:[%s16870_s5 + $0x328] ss:$40 sps:$4 sm:$0xff]   ;;  %v11798_v35 = vld [vmem:[%s16871_s7 + $0x614] ss:$8 sps:$4 sm:$0xff]  }
0x149c   :  { %v6915_v19 = vmul.f32 %v12023_v18, %v15876_v61  ;;  %v11673_v61 = vld [vmem:[%s16870_s5 + $0x340] ss:$40 sps:$4 sm:$0xff]   ;;  %v11738_v18 = vld [vmem:[%s16870_s5 + $0x3dc] ss:$40 sps:$4 sm:$0xff]  }
0x149d   :  { %v6927_v13 = vmul.f32 %v6920_v42, %v6914_v4  ;;  %v11790_v42 = vld [vmem:[%s16871_s7 + $0x600] ss:$8 sps:$4 sm:$0xff]   ;;  %v11796_v4 = vld [vmem:[%s16871_s7 + $0x610] ss:$8 sps:$4 sm:$0xff]  }
0x149e   :  { %v6928_v28 = vmul.f32 %v6924_v17, %v6915_v19  ;;  %v11733_v17 = vld [vmem:[%s16870_s5 + $0x388] ss:$40 sps:$4 sm:$0xff]   ;;  %v11736_v19 = vld [vmem:[%s16870_s5 + $0x3d8] ss:$40 sps:$4 sm:$0xff]  }
0x149f   :  { %v15988_v15 = vadd.f32 %v6933_v10, %v6927_v13  ;;  %v11804_v10 = vld [vmem:[%s16871_s7 + $0x624] ss:$8 sps:$4 sm:$0xff]   ;;  %v11802_v13 = vld [vmem:[%s16871_s7 + $0x620] ss:$8 sps:$4 sm:$0xff]  }
0x14a0   :  { %v15990_v41 = vadd.f32 %v6937_v21, %v6928_v28  ;;  %v11741_v21 = vld [vmem:[%s16870_s5 + $0x42c] ss:$40 sps:$4 sm:$0xff]  }
0x14a1   :  { %v16004_v58 = vpack.c.bf16 %v15988_v15, %v15988_v15  ;;  %v11810_v28 = vld [vmem:[%s16871_s7 + $0x634] ss:$8 sps:$4 sm:$0xff]  }
0x14a2   :  { %v15994_v52 = vpack.c.bf16 %v15990_v41, %v15990_v41 }
0x14a4   :  { %10114 = vmatprep.mubr.msk.bf16.mxu0 %vm664_vm0, %v15994_v52  ;;  %10116 = vmatprep.mubr.msk.bf16.mxu1 %vm664_vm0, %v15994_v52 }
0x14a5   :  { %7636 = vmatmul.mubr.bf16.vlgmr.msra.gmra.mrb[100].mxu0 %v16004_v58  ;;  %7718 = vmatmul.mubr.bf16.vlgmr.msra.gmra.mrb[100].mxu1 %v16004_v58 }
0x14a6   :  { %7645 = vmatpush1.bf16.msra.mxu0 %v11670_v12  ;;  %7768 = vmatpush1.bf16.msra.mxu1 %v11673_v61  ;;  %v11744_v12 = vld [vmem:[%s16870_s5 + $0x47c] ss:$40 sps:$4 sm:$0xff]   ;;  %v11808_v61 = vld [vmem:[%s16871_s7 + $0x630] ss:$8 sps:$4 sm:$0xff]  }
0x14a7   :  { %10115 = vmatprep.mubr.msk.bf16.mxu0 %vm664_vm0, %v15994_v52  ;;  %10118 = vmatprep.mubr.msk.bf16.mxu1 %vm664_vm0, %v15994_v52 }
0x14a8   :  { %7646 = vmatprep.subr.bf16.mxu0 %v11678_v60  ;;  %7769 = vmatprep.subr.bf16.mxu1 %v11681_v49  ;;  %v11816_v60 = vld [vmem:[%s16871_s7 + $0x644] ss:$8 sps:$4 sm:$0xff]   ;;  %v11742_v49 = vld [vmem:[%s16870_s5 + $0x478] ss:$40 sps:$4 sm:$0xff]  }
0x14aa   :  { %7647 = vmatpush1.bf16.msra.mxu0 %v11676_v0  ;;  %7770 = vmatpush1.bf16.msra.mxu1 %v11679_v45  ;;  %v11747_v0 = vld [vmem:[%s16870_s5 + $0x4cc] ss:$40 sps:$4 sm:$0xff]   ;;  %v11814_v45 = vld [vmem:[%s16871_s7 + $0x640] ss:$8 sps:$4 sm:$0xff]  }
0x14ab   :  { %7648 = vmatprep.subr.bf16.mxu0 %v11684_v8  ;;  %7771 = vmatprep.subr.bf16.mxu1 %v11687_v44  ;;  %v11745_v8 = vld [vmem:[%s16870_s5 + $0x4c8] ss:$40 sps:$4 sm:$0xff]   ;;  %v11750_v44 = vld [vmem:[%s16870_s5 + $0x51c] ss:$40 sps:$4 sm:$0xff]  }
0x14ae   :  { %7649 = vmatpush1.bf16.msra.mxu0 %v11682_v11  ;;  %7772 = vmatpush1.bf16.msra.mxu1 %v11685_v22  ;;  %v11748_v11 = vld [vmem:[%s16870_s5 + $0x518] ss:$40 sps:$4 sm:$0xff]   ;;  %v11753_v22 = vld [vmem:[%s16870_s5 + $0x56c] ss:$40 sps:$4 sm:$0xff]  }
0x14af   :  { %7650 = vmatprep.subr.bf16.mxu0 %v11690_v29  ;;  %7773 = vmatprep.subr.bf16.mxu1 %v11693_v37  ;;  %v11751_v29 = vld [vmem:[%s16870_s5 + $0x568] ss:$40 sps:$4 sm:$0xff]   ;;  %v11756_v37 = vld [vmem:[%s16870_s5 + $0x5bc] ss:$40 sps:$4 sm:$0xff]  }
0x14b2   :  { %7651 = vmatpush1.bf16.msra.mxu0 %v11688_v47  ;;  %7774 = vmatpush1.bf16.msra.mxu1 %v11691_v16  ;;  %v11754_v47 = vld [vmem:[%s16870_s5 + $0x5b8] ss:$40 sps:$4 sm:$0xff]   ;;  %v11759_v16 = vld [vmem:[%s16870_s5 + $0x60c] ss:$40 sps:$4 sm:$0xff]  }
0x14b3   :  { %7652 = vmatprep.subr.bf16.mxu0 %v11696_v34  ;;  %7775 = vmatprep.subr.bf16.mxu1 %v11699_v30  ;;  %v11757_v34 = vld [vmem:[%s16870_s5 + $0x608] ss:$40 sps:$4 sm:$0xff]   ;;  %v11762_v30 = vld [vmem:[%s16871_s7 + $0x504] ss:$8 sps:$4 sm:$0xff]  }
0x14b6   :  { %7653 = vmatpush1.bf16.msra.mxu0 %v11694_v31  ;;  %7776 = vmatpush1.bf16.msra.mxu1 %v11697_v40  ;;  %v11760_v31 = vld [vmem:[%s16871_s7 + $0x500] ss:$8 sps:$4 sm:$0xff]   ;;  %v11765_v40 = vld [vmem:[%s16871_s7 + $0x514] ss:$8 sps:$4 sm:$0xff]  }
0x14b7   :  { %7654 = vmatprep.subr.bf16.mxu0 %v11702_v53  ;;  %7777 = vmatprep.subr.bf16.mxu1 %v11705_v39  ;;  %v11763_v53 = vld [vmem:[%s16871_s7 + $0x510] ss:$8 sps:$4 sm:$0xff]   ;;  %v11768_v39 = vld [vmem:[%s16871_s7 + $0x524] ss:$8 sps:$4 sm:$0xff]  }
0x14ba   :  { %7655 = vmatpush1.bf16.msra.mxu0 %v11700_v50  ;;  %7778 = vmatpush1.bf16.msra.mxu1 %v11703_v55  ;;  %v11766_v50 = vld [vmem:[%s16871_s7 + $0x520] ss:$8 sps:$4 sm:$0xff]   ;;  %v11822_v55 = vld [vmem:[%s16871_s7 + $0x654] ss:$8 sps:$4 sm:$0xff]  }
0x14bb   :  { %7656 = vmatprep.subr.bf16.mxu0 %v11708_v20  ;;  %7779 = vmatprep.subr.bf16.mxu1 %v11711_v33  ;;  %v11820_v20 = vld [vmem:[%s16871_s7 + $0x650] ss:$8 sps:$4 sm:$0xff]  }
0x14bc   :  { %v11769_v33 = vld [vmem:[%s16871_s7 + $0x530] ss:$8 sps:$4 sm:$0xff]  }
0x14be   :  { %7657 = vmatpush1.bf16.msra.mxu0 %v11706_v36  ;;  %7780 = vmatpush1.bf16.msra.mxu1 %v11709_v43  ;;  %v11826_v36 = vld [vmem:[%s16871_s7 + $0x660] ss:$8 sps:$4 sm:$0xff]   ;;  %v11828_v43 = vld [vmem:[%s16871_s7 + $0x664] ss:$8 sps:$4 sm:$0xff]  }
0x14bf   :  { %7658 = vmatprep.subr.bf16.mxu0 %v11714_v51  ;;  %7781 = vmatprep.subr.bf16.mxu1 %v11717_v57  ;;  %v11774_v51 = vld [vmem:[%s16871_s7 + $0x544] ss:$8 sps:$4 sm:$0xff]   ;;  %v11772_v57 = vld [vmem:[%s16871_s7 + $0x540] ss:$8 sps:$4 sm:$0xff]  }
0x14c2   :  { %7659 = vmatpush1.bf16.msra.mxu0 %v11712_v62  ;;  %7782 = vmatpush1.bf16.msra.mxu1 %v11715_v54  ;;  %v11832_v62 = vld [vmem:[%s16871_s7 + $0x670] ss:$8 sps:$4 sm:$0xff]   ;;  %v11834_v54 = vld [vmem:[%s16871_s7 + $0x674] ss:$8 sps:$4 sm:$0xff]  }
0x14c3   :  { %7660 = vmatprep.subr.bf16.mxu0 %v11720_v32  ;;  %7783 = vmatprep.subr.bf16.mxu1 %v11723_v3  ;;  %v11777_v32 = vld [vmem:[%s16871_s7 + $0x554] ss:$8 sps:$4 sm:$0xff]   ;;  %v11775_v3 = vld [vmem:[%s16871_s7 + $0x550] ss:$8 sps:$4 sm:$0xff]  }
0x14c6   :  { %7661 = vmatpush1.bf16.msra.mxu0 %v11718_v6  ;;  %7784 = vmatpush1.bf16.msra.mxu1 %v11721_v7  ;;  %v11838_v6 = vld [vmem:[%s16871_s7 + $0x680] ss:$8 sps:$4 sm:$0xff]   ;;  %v11840_v7 = vld [vmem:[%s16871_s7 + $0x684] ss:$8 sps:$4 sm:$0xff]  }
0x14c7   :  { %7662 = vmatprep.subr.bf16.mxu0 %v11726_v56  ;;  %7785 = vmatprep.subr.bf16.mxu1 %v11729_v48  ;;  %v11780_v56 = vld [vmem:[%s16871_s7 + $0x564] ss:$8 sps:$4 sm:$0xff]   ;;  %v11778_v48 = vld [vmem:[%s16871_s7 + $0x560] ss:$8 sps:$4 sm:$0xff]  }
0x14ca   :  { %7663 = vmatpush1.bf16.msra.mxu0 %v11724_v26  ;;  %7786 = vmatpush1.bf16.msra.mxu1 %v11727_v1  ;;  %v11844_v26 = vld [vmem:[%s16871_s7 + $0x690] ss:$8 sps:$4 sm:$0xff]   ;;  %v11846_v1 = vld [vmem:[%s16871_s7 + $0x694] ss:$8 sps:$4 sm:$0xff]  }
0x14cb   :  { %7726 = vmatprep.subr.bf16.mxu0 %v11732_v59  ;;  %8843 = vmatprep.subr.bf16.mxu1 %v11792_v63  ;;  %v11783_v59 = vld [vmem:[%s16871_s7 + $0x574] ss:$8 sps:$4 sm:$0xff]   ;;  %v11781_v63 = vld [vmem:[%s16871_s7 + $0x570] ss:$8 sps:$4 sm:$0xff]  }
0x14cd   :  { %7677 = vmatmul.mubr.bf16.vlgmr.msra.gmra.mrb[104].mxu0 %v16004_v58  ;;  %7800 = vmatmul.mubr.bf16.vlgmr.msra.gmra.mrb[104].mxu1 %v16004_v58 }
0x14ce   :  { %7727 = vmatpush1.bf16.msra.mxu0 %v11730_v2  ;;  %10117 = vmatprep.mubr.msk.bf16.mxu0 %vm664_vm0, %v15994_v52  ;;  %v11739_v52 = vld [vmem:[%s16870_s5 + $0x428] ss:$40 sps:$4 sm:$0xff]  }
0x14cf   :  { %7728 = vmatprep.subr.bf16.mxu0 %v11735_v9  ;;  %8844 = vmatpush1.bf16.msra.mxu1 %v11790_v42  ;;  %v11850_v2 = vld [vmem:[%s16871_s7 + $0x6a0] ss:$8 sps:$4 sm:$0xff]   ;;  %v11852_v9 = vld [vmem:[%s16871_s7 + $0x6a4] ss:$8 sps:$4 sm:$0xff]  }
0x14d0   :  { %8845 = vmatprep.subr.bf16.mxu1 %v11798_v35  ;;  %v11786_v42 = vld [vmem:[%s16871_s7 + $0x584] ss:$8 sps:$4 sm:$0xff]   ;;  %v11784_v35 = vld [vmem:[%s16871_s7 + $0x580] ss:$8 sps:$4 sm:$0xff]  }
0x14d2   :  { %7729 = vmatpush1.bf16.msra.mxu0 %v11733_v17  ;;  %v11856_v17 = vld [vmem:[%s16871_s7 + $0x6b0] ss:$8 sps:$4 sm:$0xff]  }
0x14d3   :  { %7730 = vmatprep.subr.bf16.mxu0 %v11738_v18  ;;  %8846 = vmatpush1.bf16.msra.mxu1 %v11796_v4  ;;  %v11858_v18 = vld [vmem:[%s16871_s7 + $0x6b4] ss:$8 sps:$4 sm:$0xff]  }
0x14d4   :  { %8847 = vmatprep.subr.bf16.mxu1 %v11804_v10  ;;  %v11789_v4 = vld [vmem:[%s16871_s7 + $0x594] ss:$8 sps:$4 sm:$0xff]   ;;  %v11787_v10 = vld [vmem:[%s16871_s7 + $0x590] ss:$8 sps:$4 sm:$0xff]  }
0x14d6   :  { %7731 = vmatpush1.bf16.msra.mxu0 %v11736_v19  ;;  %v11862_v19 = vld [vmem:[%s16871_s7 + $0x6c0] ss:$8 sps:$4 sm:$0xff]  }
0x14d7   :  { %7732 = vmatprep.subr.bf16.mxu0 %v11741_v21  ;;  %8848 = vmatpush1.bf16.msra.mxu1 %v11802_v13  ;;  %v11864_v21 = vld [vmem:[%s16871_s7 + $0x6c4] ss:$8 sps:$4 sm:$0xff]  }
0x14d8   :  { %8849 = vmatprep.subr.bf16.mxu1 %v11810_v28  ;;  %v11795_v13 = vld [vmem:[%s16871_s7 + $0x5a4] ss:$8 sps:$4 sm:$0xff]   ;;  %v11793_v28 = vld [vmem:[%s16871_s7 + $0x5a0] ss:$8 sps:$4 sm:$0xff]  }
0x14da   :  { %7733 = vmatpush1.bf16.msra.mxu0 %v11739_v52  ;;  %v11868_v52 = vld [vmem:[%s16871_s7 + $0x6d0] ss:$8 sps:$4 sm:$0xff]  }
0x14db   :  { %7734 = vmatprep.subr.bf16.mxu0 %v11744_v12  ;;  %8850 = vmatpush1.bf16.msra.mxu1 %v11808_v61  ;;  %v11870_v12 = vld [vmem:[%s16871_s7 + $0x6d4] ss:$8 sps:$4 sm:$0xff]  }
0x14dc   :  { %8851 = vmatprep.subr.bf16.mxu1 %v11816_v60  ;;  %v11801_v61 = vld [vmem:[%s16871_s7 + $0x5b4] ss:$8 sps:$4 sm:$0xff]   ;;  %v11799_v60 = vld [vmem:[%s16871_s7 + $0x5b0] ss:$8 sps:$4 sm:$0xff]  }
0x14de   :  { %7735 = vmatpush1.bf16.msra.mxu0 %v11742_v49  ;;  %v11876_v49 = vld [vmem:[%s16871_s7 + $0x6e4] ss:$8 sps:$4 sm:$0xff]  }
0x14df   :  { %7736 = vmatprep.subr.bf16.mxu0 %v11747_v0  ;;  %8852 = vmatpush1.bf16.msra.mxu1 %v11814_v45  ;;  %v11807_v0 = vld [vmem:[%s16871_s7 + $0x5c4] ss:$8 sps:$4 sm:$0xff]   ;;  %v11874_v45 = vld [vmem:[%s16871_s7 + $0x6e0] ss:$8 sps:$4 sm:$0xff]  }
0x14e0   :  { %8853 = vmatprep.subr.bf16.mxu1 %v11822_v55 }
0x14e2   :  { %7737 = vmatpush1.bf16.msra.mxu0 %v11745_v8  ;;  %v11805_v8 = vld [vmem:[%s16871_s7 + $0x5c0] ss:$8 sps:$4 sm:$0xff]  }
0x14e3   :  { %7738 = vmatprep.subr.bf16.mxu0 %v11750_v44  ;;  %8854 = vmatpush1.bf16.msra.mxu1 %v11820_v20  ;;  %v11882_v44 = vld [vmem:[%s16871_s7 + $0x6f4] ss:$8 sps:$4 sm:$0xff]  }
0x14e4   :  { %8855 = vmatprep.subr.bf16.mxu1 %v11828_v43 }
0x14e6   :  { %7739 = vmatpush1.bf16.msra.mxu0 %v11748_v11  ;;  %v11813_v11 = vld [vmem:[%s16871_s7 + $0x5d4] ss:$8 sps:$4 sm:$0xff]  }
0x14e7   :  { %7740 = vmatprep.subr.bf16.mxu0 %v11753_v22  ;;  %8856 = vmatpush1.bf16.msra.mxu1 %v11826_v36  ;;  %v11880_v22 = vld [vmem:[%s16871_s7 + $0x6f0] ss:$8 sps:$4 sm:$0xff]  }
0x14e8   :  { %8857 = vmatprep.subr.bf16.mxu1 %v11834_v54 }
0x14ea   :  { %7741 = vmatpush1.bf16.msra.mxu0 %v11751_v29  ;;  %v11811_v29 = vld [vmem:[%s16871_s7 + $0x5d0] ss:$8 sps:$4 sm:$0xff]  }
0x14eb   :  { %7742 = vmatprep.subr.bf16.mxu0 %v11756_v37  ;;  %8858 = vmatpush1.bf16.msra.mxu1 %v11832_v62  ;;  %v11888_v37 = vld [vmem:[%s16871_s7 + $0x804] ss:$8 sps:$4 sm:$0xff]  }
0x14ec   :  { %8859 = vmatprep.subr.bf16.mxu1 %v11840_v7 }
0x14ee   :  { %7743 = vmatpush1.bf16.msra.mxu0 %v11754_v47  ;;  %v11819_v47 = vld [vmem:[%s16871_s7 + $0x5e4] ss:$8 sps:$4 sm:$0xff]  }
0x14ef   :  { %7744 = vmatprep.subr.bf16.mxu0 %v11759_v16  ;;  %8860 = vmatpush1.bf16.msra.mxu1 %v11838_v6  ;;  %v11817_v16 = vld [vmem:[%s16871_s7 + $0x5e0] ss:$8 sps:$4 sm:$0xff]  }
0x14f0   :  { %8861 = vmatprep.subr.bf16.mxu1 %v11846_v1 }
0x14f2   :  { %7745 = vmatpush1.bf16.msra.mxu0 %v11757_v34  ;;  %v11825_v34 = vld [vmem:[%s16871_s7 + $0x5f4] ss:$8 sps:$4 sm:$0xff]  }
0x14f3   :  { %8802 = vmatprep.subr.bf16.mxu0 %v11762_v30  ;;  %8862 = vmatpush1.bf16.msra.mxu1 %v11844_v26  ;;  %v11823_v30 = vld [vmem:[%s16871_s7 + $0x5f0] ss:$8 sps:$4 sm:$0xff]   ;;  %v11837_v26 = vld [vmem:[%s16871_s7 + $0x714] ss:$8 sps:$4 sm:$0xff]  }
0x14f4   :  { %8863 = vmatprep.subr.bf16.mxu1 %v11852_v9  ;;  %v11849_v9 = vld [vmem:[%s16871_s7 + $0x734] ss:$8 sps:$4 sm:$0xff]  }
0x14f5   :  { %7759 = vmatmul.mubr.bf16.vlgmr.msra.gmra.mrb[108].mxu0 %v16004_v58  ;;  %v11771_v58 = vld [vmem:[%s16871_s7 + $0x534] ss:$8 sps:$4 sm:$0xff]  }
0x14f6   :  { %8803 = vmatpush1.bf16.msra.mxu0 %v11760_v31  ;;  %v11831_v31 = vld [vmem:[%s16871_s7 + $0x704] ss:$8 sps:$4 sm:$0xff]  }
0x14f7   :  { %8804 = vmatprep.subr.bf16.mxu0 %v11765_v40  ;;  %8864 = vmatpush1.bf16.msra.mxu1 %v11850_v2  ;;  %v16390_v40 = vld [vmem:[%s16874_s6 + $0xa] sm:$0xff] }
0x14f8   :  { %8865 = vmatprep.subr.bf16.mxu1 %v11858_v18  ;;  %v11841_v2 = vld [vmem:[%s16871_s7 + $0x720] ss:$8 sps:$4 sm:$0xff]   ;;  %v11861_v18 = vld [vmem:[%s16871_s7 + $0x754] ss:$8 sps:$4 sm:$0xff]  }
0x14fa   :  { %8805 = vmatpush1.bf16.msra.mxu0 %v11763_v53  ;;  %v7053_v53 = vrot.slane %v16390_v40, %v12698_v24 }
0x14fb   :  { %8806 = vmatprep.subr.bf16.mxu0 %v11768_v39  ;;  %8866 = vmatpush1.bf16.msra.mxu1 %v11856_v17  ;;  %v7057_v39 = vrot.slane %v16390_v40, %v12707_v27  ;;  %v11853_v17 = vld [vmem:[%s16871_s7 + $0x740] ss:$8 sps:$4 sm:$0xff]  }
0x14fc   :  { %8867 = vmatprep.subr.bf16.mxu1 %v11864_v21  ;;  %v11873_v21 = vld [vmem:[%s16871_s7 + $0x774] ss:$8 sps:$4 sm:$0xff]  }
0x14fe   :  { %8807 = vmatpush1.bf16.msra.mxu0 %v11766_v50  ;;  %v7073_v50 = vrot.slane %v16390_v40, %v3427_v5  ;;  %v11829_v5 = vld [vmem:[%s16871_s7 + $0x700] ss:$8 sps:$4 sm:$0xff]  }
0x14ff   :  { %8808 = vmatprep.subr.bf16.mxu0 %v11771_v58  ;;  %8868 = vmatpush1.bf16.msra.mxu1 %v11862_v19  ;;  %v11865_v19 = vld [vmem:[%s16871_s7 + $0x760] ss:$8 sps:$4 sm:$0xff]  }
0x1500   :  { %8869 = vmatprep.subr.bf16.mxu1 %v11870_v12  ;;  %v7065_v12 = vrot.slane %v16390_v40, %v12731_v46  ;;  %v11883_v46 = vld [vmem:[%s16871_s7 + $0x790] ss:$8 sps:$4 sm:$0xff]  }
0x1502   :  { %8809 = vmatpush1.bf16.msra.mxu0 %v11769_v33 }
0x1503   :  { %8810 = vmatprep.subr.bf16.mxu0 %v11774_v51  ;;  %8870 = vmatpush1.bf16.msra.mxu1 %v11868_v52  ;;  %v7061_v52 = vrot.slane %v16390_v40, %v12701_v25 }
0x1504   :  { %8871 = vmatprep.subr.bf16.mxu1 %v11876_v49 }
0x1506   :  { %8811 = vmatpush1.bf16.msra.mxu0 %v11772_v57 }
0x1507   :  { %8812 = vmatprep.subr.bf16.mxu0 %v11777_v32  ;;  %8872 = vmatpush1.bf16.msra.mxu1 %v11874_v45 }
0x1508   :  { %8873 = vmatprep.subr.bf16.mxu1 %v11882_v44 }
0x150a   :  { %8813 = vmatpush1.bf16.msra.mxu0 %v11775_v3 }
0x150b   :  { %8814 = vmatprep.subr.bf16.mxu0 %v11780_v56  ;;  %8874 = vmatpush1.bf16.msra.mxu1 %v11880_v22 }
0x150c   :  { %8925 = vmatprep.subr.bf16.mxu1 %v11888_v37 }
0x150e   :  { %8815 = vmatpush1.bf16.msra.mxu0 %v11778_v48 }
0x150f   :  { %8816 = vmatprep.subr.bf16.mxu0 %v11783_v59  ;;  %v11835_v59 = vld [vmem:[%s16871_s7 + $0x710] ss:$8 sps:$4 sm:$0xff]  }
0x1512   :  { %8817 = vmatpush1.bf16.msra.mxu0 %v11781_v63  ;;  %v11843_v63 = vld [vmem:[%s16871_s7 + $0x724] ss:$8 sps:$4 sm:$0xff]  }
0x1513   :  { %8818 = vmatprep.subr.bf16.mxu0 %v11786_v42  ;;  %v11847_v42 = vld [vmem:[%s16871_s7 + $0x730] ss:$8 sps:$4 sm:$0xff]  }
0x1516   :  { %8819 = vmatpush1.bf16.msra.mxu0 %v11784_v35  ;;  %v11855_v35 = vld [vmem:[%s16871_s7 + $0x744] ss:$8 sps:$4 sm:$0xff]  }
0x1517   :  { %8820 = vmatprep.subr.bf16.mxu0 %v11789_v4  ;;  %v11859_v4 = vld [vmem:[%s16871_s7 + $0x750] ss:$8 sps:$4 sm:$0xff]  }
0x151a   :  { %8821 = vmatpush1.bf16.msra.mxu0 %v11787_v10  ;;  %v11867_v10 = vld [vmem:[%s16871_s7 + $0x764] ss:$8 sps:$4 sm:$0xff]  }
0x151b   :  { %8822 = vmatprep.subr.bf16.mxu0 %v11795_v13  ;;  %v11871_v13 = vld [vmem:[%s16871_s7 + $0x770] ss:$8 sps:$4 sm:$0xff]  }
0x151e   :  { %8823 = vmatpush1.bf16.msra.mxu0 %v11793_v28  ;;  %v11879_v28 = vld [vmem:[%s16871_s7 + $0x784] ss:$8 sps:$4 sm:$0xff]  }
0x151f   :  { %8824 = vmatprep.subr.bf16.mxu0 %v11801_v61  ;;  %v11877_v61 = vld [vmem:[%s16871_s7 + $0x780] ss:$8 sps:$4 sm:$0xff]  }
0x1522   :  { %8825 = vmatpush1.bf16.msra.mxu0 %v11799_v60  ;;  %v11885_v60 = vld [vmem:[%s16871_s7 + $0x794] ss:$8 sps:$4 sm:$0xff]  }
0x1523   :  { %8826 = vmatprep.subr.bf16.mxu0 %v11807_v0 }
0x1526   :  { %8827 = vmatpush1.bf16.msra.mxu0 %v11805_v8 }
0x1527   :  { %8828 = vmatprep.subr.bf16.mxu0 %v11813_v11 }
0x152a   :  { %8829 = vmatpush1.bf16.msra.mxu0 %v11811_v29 }
0x152b   :  { %8830 = vmatprep.subr.bf16.mxu0 %v11819_v47 }
0x152e   :  { %8831 = vmatpush1.bf16.msra.mxu0 %v11817_v16  ;;  %v11891_v16 = vld [vmem:[%s16871_s7 + $0x7a4] ss:$8 sps:$4 sm:$0xff]  }
0x152f   :  { %8832 = vmatprep.subr.bf16.mxu0 %v11825_v34 }
0x1532   :  { %8833 = vmatpush1.bf16.msra.mxu0 %v11823_v30 }
0x1533   :  { %8884 = vmatprep.subr.bf16.mxu0 %v11831_v31  ;;  %v11886_v31 = vld [vmem:[%s16871_s7 + $0x800] ss:$8 sps:$4 sm:$0xff]  }
0x1578   :  { %v7637_v55 = vpop.f32.mrb[100].mxu0  ;;  %v16399_v58 = vpop.f32.mrb[100].mxu1 }
0x1579   :  { %v7638_v20 = vadd.f32 %v7637_v55, %v7053_v53  ;;  %v7639_v33 = vpop.f32.mrb[101].mxu0  ;;  %v7721_v36 = vpop.f32.mrb[101].mxu1  ;;  %v11889_v53 = vld [vmem:[%s16871_s7 + $0x7a0] ss:$8 sps:$4 sm:$0xff]   ;;  %v11897_v55 = vld [vmem:[%s16871_s7 + $0x7b4] ss:$8 sps:$4 sm:$0xff]  }
0x157a   :  { %v7640_v43 = vadd.f32 %v7639_v33, %v7057_v39  ;;  %v7722_v51 = vadd.f32 %v7721_v36, %v7073_v50  ;;  %v7641_v57 = vpop.f32.mrb[102].mxu0  ;;  %v7723_v62 = vpop.f32.mrb[102].mxu1  ;;  %v11894_v50 = vld [vmem:[%s16871_s7 + $0x814] ss:$8 sps:$4 sm:$0xff]   ;;  %v11895_v33 = vld [vmem:[%s16871_s7 + $0x7b0] ss:$8 sps:$4 sm:$0xff]  }
0x157b   :  { %v7808_v54 = vmax.f32 %v7638_v20, 0.0  ;;  %v7642_v32 = vpop.f32.mrb[103].mxu0  ;;  %v7724_v3 = vpop.f32.mrb[103].mxu1  ;;  %v11892_v20 = vld [vmem:[%s16871_s7 + $0x810] ss:$8 sps:$4 sm:$0xff]  }
0x157c   :  { %v7809_v6 = vmax.f32 %v7640_v43, 0.0  ;;  %v7813_v7 = vmax.f32 %v7722_v51, 0.0  ;;  %v11900_v36 = vld [vmem:[%s16871_s7 + $0x824] ss:$8 sps:$4 sm:$0xff]   ;;  %v11898_v51 = vld [vmem:[%s16871_s7 + $0x820] ss:$8 sps:$4 sm:$0xff]  }
0x157d   :  { %v7979_v48 = vpack.c.bf16 %v7808_v54, %v7808_v54  ;;  %v11903_v43 = vld [vmem:[%s16871_s7 + $0x7c4] ss:$8 sps:$4 sm:$0xff]   ;;  %v11901_v57 = vld [vmem:[%s16871_s7 + $0x7c0] ss:$8 sps:$4 sm:$0xff]   ;;  %v11906_v62 = vld [vmem:[%s16871_s7 + $0x834] ss:$8 sps:$4 sm:$0xff]  }
0x157e   :  { %v7980_v56 = vpack.c.bf16 %v7809_v6, %v7809_v6  ;;  %v7984_v1 = vpack.c.bf16 %v7813_v7, %v7813_v7  ;;  %v11909_v54 = vld [vmem:[%s16871_s7 + $0x7d4] ss:$8 sps:$4 sm:$0xff]   ;;  %v16506_v32 = vld [vmem:[%s16874_s6 + $0x12] sm:$0x3]  ;;  %v7069_v7 = vrot.slane %v16390_v40, %v3423_v38  ;;  %v11913_v38 = vld [vmem:[%s16871_s7 + $0x7e0] ss:$8 sps:$4 sm:$0xff]  }
0x157f   :  { %v11904_v3 = vld [vmem:[%s16871_s7 + $0x830] ss:$8 sps:$4 sm:$0xff]  }
0x1580   :  { %8834 = vmatprep.mubr.bf16.mxu0 %v7980_v56  ;;  %v11907_v6 = vld [vmem:[%s16871_s7 + $0x7d0] ss:$8 sps:$4 sm:$0xff]   ;;  %v11912_v56 = vld [vmem:[%s16871_s7 + $0x844] ss:$8 sps:$4 sm:$0xff]  }
0x1581   :  { %8835 = vmatmul.mubr.bf16.vlgmr.msra.gmra.mrb[112].mxu0 %v7979_v48  ;;  %v7089_v48 = vrot.slane %v16506_v32, %v12707_v27 }
0x1582   :  { %8885 = vmatpush1.bf16.msra.mxu0 %v11829_v5  ;;  %8916 = vmatprep.mubr.bf16.mxu0 %v7984_v1  ;;  %v11915_v5 = vld [vmem:[%s16871_s7 + $0x7e4] ss:$8 sps:$4 sm:$0xff]   ;;  %v7720_v1 = vadd.f32 %v16399_v58, %v7069_v7  ;;  %v11919_v58 = vld [vmem:[%s16871_s7 + $0x7f0] ss:$8 sps:$4 sm:$0xff]   ;;  %v16898_v7 = vsub.s32 6, %v12695_v23 }
0x1583   :  { %8886 = vmatprep.subr.bf16.mxu0 %v11837_v26  ;;  %v11910_v26 = vld [vmem:[%s16871_s7 + $0x840] ss:$8 sps:$4 sm:$0xff]  }
0x1584   :  { %v11973_v23 = vld [vmem:[%s16871_s7 + $0x980] ss:$8 sps:$4 sm:$0xff]  }
0x1586   :  { %8887 = vmatpush1.bf16.msra.mxu0 %v11835_v59  ;;  %v11918_v59 = vld [vmem:[%s16871_s7 + $0x854] ss:$8 sps:$4 sm:$0xff]  }
0x1587   :  { %8888 = vmatprep.subr.bf16.mxu0 %v11843_v63  ;;  %v11921_v63 = vld [vmem:[%s16871_s7 + $0x7f4] ss:$8 sps:$4 sm:$0xff]  }
0x158a   :  { %8889 = vmatpush1.bf16.msra.mxu0 %v11841_v2 }
0x158b   :  { %8890 = vmatprep.subr.bf16.mxu0 %v11849_v9  ;;  %v11916_v9 = vld [vmem:[%s16871_s7 + $0x850] ss:$8 sps:$4 sm:$0xff]  }
0x158e   :  { %8891 = vmatpush1.bf16.msra.mxu0 %v11847_v42  ;;  %v7812_v42 = vmax.f32 %v7720_v1, 0.0  ;;  %v11981_v1 = vld [vmem:[%s16871_s7 + $0x994] ss:$8 sps:$4 sm:$0xff]  }
0x158f   :  { %8892 = vmatprep.subr.bf16.mxu0 %v11855_v35  ;;  %v11924_v35 = vld [vmem:[%s16871_s7 + $0x864] ss:$8 sps:$4 sm:$0xff]  }
0x1592   :  { %8893 = vmatpush1.bf16.msra.mxu0 %v11853_v17  ;;  %v11927_v17 = vld [vmem:[%s16871_s7 + $0x904] ss:$8 sps:$4 sm:$0xff]  }
0x1593   :  { %8894 = vmatprep.subr.bf16.mxu0 %v11861_v18 }
0x1596   :  { %8895 = vmatpush1.bf16.msra.mxu0 %v11859_v4  ;;  %v11922_v4 = vld [vmem:[%s16871_s7 + $0x860] ss:$8 sps:$4 sm:$0xff]  }
0x1597   :  { %8896 = vmatprep.subr.bf16.mxu0 %v11867_v10  ;;  %v11925_v10 = vld [vmem:[%s16871_s7 + $0x900] ss:$8 sps:$4 sm:$0xff]  }
0x159a   :  { %8897 = vmatpush1.bf16.msra.mxu0 %v11865_v19  ;;  %v7983_v19 = vpack.c.bf16 %v7812_v42, %v7812_v42 }
0x159b   :  { %8898 = vmatprep.subr.bf16.mxu0 %v11873_v21  ;;  %v11930_v21 = vld [vmem:[%s16871_s7 + $0x874] ss:$8 sps:$4 sm:$0xff]  }
0x159e   :  { %8899 = vmatpush1.bf16.msra.mxu0 %v11871_v13  ;;  %v11933_v13 = vld [vmem:[%s16871_s7 + $0x914] ss:$8 sps:$4 sm:$0xff]  }
0x159f   :  { %8900 = vmatprep.subr.bf16.mxu0 %v11879_v28 }
0x15a0   :  { %v7678_v49 = vpop.f32.mrb[104].mxu0  ;;  %v16459_v0 = vpop.f32.mrb[104].mxu1 }
0x15a1   :  { %v7679_v45 = vadd.f32 %v7678_v49, %v7061_v52  ;;  %v7680_v8 = vpop.f32.mrb[105].mxu0  ;;  %v7803_v44 = vpop.f32.mrb[105].mxu1  ;;  %v11928_v52 = vld [vmem:[%s16871_s7 + $0x870] ss:$8 sps:$4 sm:$0xff]   ;;  %v11934_v49 = vld [vmem:[%s16871_s7 + $0x880] ss:$8 sps:$4 sm:$0xff]  }
0x15a2   :  { %v7681_v25 = vadd.f32 %v7680_v8, %v7065_v12  ;;  %v7682_v11 = vpop.f32.mrb[106].mxu0  ;;  %v7805_v22 = vpop.f32.mrb[106].mxu1  ;;  %8901 = vmatpush1.bf16.msra.mxu0 %v11877_v61  ;;  %v7804_v2 = vadd.f32 %v7803_v44, %v7089_v48  ;;  %v11931_v12 = vld [vmem:[%s16871_s7 + $0x910] ss:$8 sps:$4 sm:$0xff]   ;;  %v11936_v61 = vld [vmem:[%s16871_s7 + $0x884] ss:$8 sps:$4 sm:$0xff]  }
0x15a3   :  { %v7810_v29 = vmax.f32 %v7679_v45, 0.0  ;;  %v7683_v37 = vpop.f32.mrb[107].mxu0  ;;  %v7806_v47 = vpop.f32.mrb[107].mxu1  ;;  %8902 = vmatprep.subr.bf16.mxu0 %v11885_v60  ;;  %v11939_v60 = vld [vmem:[%s16871_s7 + $0x924] ss:$8 sps:$4 sm:$0xff]   ;;  %v7081_v45 = vrot.slane %v16390_v40, %v3435_v14 }
0x15a4   :  { %v7811_v34 = vmax.f32 %v7681_v25, 0.0  ;;  %v7817_v18 = vmax.f32 %v7804_v2, 0.0  ;;  %v11937_v8 = vld [vmem:[%s16871_s7 + $0x920] ss:$8 sps:$4 sm:$0xff]   ;;  %v11942_v44 = vld [vmem:[%s16871_s7 + $0x894] ss:$8 sps:$4 sm:$0xff]  }
0x15a5   :  { %v7981_v39 = vpack.c.bf16 %v7810_v29, %v7810_v29  ;;  %v11945_v25 = vld [vmem:[%s16871_s7 + $0x934] ss:$8 sps:$4 sm:$0xff]   ;;  %v11940_v14 = vld [vmem:[%s16871_s7 + $0x890] ss:$8 sps:$4 sm:$0xff]   ;;  %v11975_v48 = vld [vmem:[%s16871_s7 + $0x984] ss:$8 sps:$4 sm:$0xff]  }
0x15a6   :  { %v7982_v30 = vpack.c.bf16 %v7811_v34, %v7811_v34  ;;  %8903 = vmatpush1.bf16.msra.mxu0 %v11883_v46  ;;  %v7988_v28 = vpack.c.bf16 %v7817_v18, %v7817_v18  ;;  %v11943_v37 = vld [vmem:[%s16871_s7 + $0x930] ss:$8 sps:$4 sm:$0xff]   ;;  %v11951_v34 = vld [vmem:[%s16871_s7 + $0x944] ss:$8 sps:$4 sm:$0xff]  }
0x15a7   :  { %8904 = vmatprep.subr.bf16.mxu0 %v11891_v16  ;;  %v11948_v16 = vld [vmem:[%s16871_s7 + $0x8a4] ss:$8 sps:$4 sm:$0xff]   ;;  %v11985_v18 = vld [vmem:[%s16871_s7 + $0x9b0] ss:$8 sps:$4 sm:$0xff]  }
0x15a8   :  { %8875 = vmatprep.mubr.bf16.mxu1 %v7982_v30 }
0x15a9   :  { %8876 = vmatmul.mubr.bf16.vlgmr.msra.gmra.mrb[108].mxu1 %v7981_v39  ;;  %v11949_v39 = vld [vmem:[%s16871_s7 + $0x940] ss:$8 sps:$4 sm:$0xff]  }
0x15aa   :  { %8926 = vmatpush1.bf16.msra.mxu1 %v11886_v31  ;;  %8905 = vmatpush1.bf16.msra.mxu0 %v11889_v53  ;;  %v11946_v53 = vld [vmem:[%s16871_s7 + $0x8a0] ss:$8 sps:$4 sm:$0xff]  }
0x15ab   :  { %8927 = vmatprep.subr.bf16.mxu1 %v11894_v50  ;;  %8906 = vmatprep.subr.bf16.mxu0 %v11897_v55  ;;  %v11954_v50 = vld [vmem:[%s16871_s7 + $0x8b4] ss:$8 sps:$4 sm:$0xff]  }
0x15ac   :  { %v11957_v55 = vld [vmem:[%s16871_s7 + $0x954] ss:$8 sps:$4 sm:$0xff]  }
0x15ae   :  { %8928 = vmatpush1.bf16.msra.mxu1 %v11892_v20  ;;  %8907 = vmatpush1.bf16.msra.mxu0 %v11895_v33  ;;  %v11952_v20 = vld [vmem:[%s16871_s7 + $0x8b0] ss:$8 sps:$4 sm:$0xff]  }
0x15af   :  { %8929 = vmatprep.subr.bf16.mxu1 %v11900_v36  ;;  %8908 = vmatprep.subr.bf16.mxu0 %v11903_v43  ;;  %v11955_v33 = vld [vmem:[%s16871_s7 + $0x950] ss:$8 sps:$4 sm:$0xff]   ;;  %v11960_v36 = vld [vmem:[%s16871_s7 + $0x8c4] ss:$8 sps:$4 sm:$0xff]  }
0x15b0   :  { %v11963_v43 = vld [vmem:[%s16871_s7 + $0x964] ss:$8 sps:$4 sm:$0xff]  }
0x15b2   :  { %8930 = vmatpush1.bf16.msra.mxu1 %v11898_v51  ;;  %8909 = vmatpush1.bf16.msra.mxu0 %v11901_v57  ;;  %v11958_v51 = vld [vmem:[%s16871_s7 + $0x8c0] ss:$8 sps:$4 sm:$0xff]  }
0x15b3   :  { %8931 = vmatprep.subr.bf16.mxu1 %v11906_v62  ;;  %8910 = vmatprep.subr.bf16.mxu0 %v11909_v54  ;;  %v11961_v57 = vld [vmem:[%s16871_s7 + $0x960] ss:$8 sps:$4 sm:$0xff]   ;;  %v11966_v62 = vld [vmem:[%s16871_s7 + $0x8d4] ss:$8 sps:$4 sm:$0xff]  }
0x15b4   :  { %v11969_v54 = vld [vmem:[%s16871_s7 + $0x974] ss:$8 sps:$4 sm:$0xff]  }
0x15b6   :  { %8932 = vmatpush1.bf16.msra.mxu1 %v11904_v3  ;;  %8911 = vmatpush1.bf16.msra.mxu0 %v11907_v6  ;;  %v11964_v3 = vld [vmem:[%s16871_s7 + $0x8d0] ss:$8 sps:$4 sm:$0xff]  }
0x15b7   :  { %8933 = vmatprep.subr.bf16.mxu1 %v11912_v56  ;;  %8912 = vmatprep.subr.bf16.mxu0 %v11915_v5  ;;  %v11967_v6 = vld [vmem:[%s16871_s7 + $0x970] ss:$8 sps:$4 sm:$0xff]   ;;  %v7077_v56 = vrot.slane %v16390_v40, %v16898_v7  ;;  %v11972_v5 = vld [vmem:[%s16871_s7 + $0x8e4] ss:$8 sps:$4 sm:$0xff]  }
0x15ba   :  { %8934 = vmatpush1.bf16.msra.mxu1 %v11910_v26  ;;  %8913 = vmatpush1.bf16.msra.mxu0 %v11913_v38  ;;  %v11970_v26 = vld [vmem:[%s16871_s7 + $0x8e0] ss:$8 sps:$4 sm:$0xff]   ;;  %v11978_v38 = vld [vmem:[%s16871_s7 + $0x8f4] ss:$8 sps:$4 sm:$0xff]  }
0x15bb   :  { %8935 = vmatprep.subr.bf16.mxu1 %v11918_v59  ;;  %8914 = vmatprep.subr.bf16.mxu0 %v11921_v63  ;;  %v11976_v59 = vld [vmem:[%s16871_s7 + $0x8f0] ss:$8 sps:$4 sm:$0xff]  }
0x15bc   :  { %v11979_v63 = vld [vmem:[%s16871_s7 + $0x990] ss:$8 sps:$4 sm:$0xff]  }
0x15be   :  { %8936 = vmatpush1.bf16.msra.mxu1 %v11916_v9  ;;  %8915 = vmatpush1.bf16.msra.mxu0 %v11919_v58  ;;  %v11984_v9 = vld [vmem:[%s16871_s7 + $0x9a4] ss:$8 sps:$4 sm:$0xff]   ;;  %v11982_v58 = vld [vmem:[%s16871_s7 + $0x9a0] ss:$8 sps:$4 sm:$0xff]  }
0x15bf   :  { %8937 = vmatprep.subr.bf16.mxu1 %v11924_v35  ;;  %8966 = vmatprep.subr.bf16.mxu0 %v11927_v17  ;;  %v11987_v35 = vld [vmem:[%s16871_s7 + $0x9b4] ss:$8 sps:$4 sm:$0xff]   ;;  %v16682_v17 = vld [vmem:[%s16868_s18 + $0x4] ss:$8 sps:$4 sm:$0xff]  }
0x15c1   :  { %8917 = vmatmul.mubr.bf16.vlgmr.msra.gmra.mrb[116].mxu0 %v7983_v19  ;;  %v16700_v19 = vld [vmem:[%s16868_s18 + $0x14] ss:$8 sps:$4 sm:$0xff]  }
0x15c2   :  { %8938 = vmatpush1.bf16.msra.mxu1 %v11922_v4  ;;  %8967 = vmatpush1.bf16.msra.mxu0 %v11925_v10  ;;  %v16691_v4 = vld [vmem:[%s16868_s18] ss:$8 sps:$4 sm:$0xff]   ;;  %v11990_v10 = vld [vmem:[%s16871_s7 + $0x9c4] ss:$8 sps:$4 sm:$0xff]  }
0x15c3   :  { %8998 = vmatprep.mubr.bf16.mxu0 %v7988_v28  ;;  %8939 = vmatprep.subr.bf16.mxu1 %v11930_v21  ;;  %v11988_v21 = vld [vmem:[%s16871_s7 + $0x9c0] ss:$8 sps:$4 sm:$0xff]   ;;  %v11993_v28 = vld [vmem:[%s16871_s7 + $0x9d4] ss:$8 sps:$4 sm:$0xff]  }
0x15c4   :  { %8968 = vmatprep.subr.bf16.mxu0 %v11933_v13  ;;  %v16709_v13 = vld [vmem:[%s16868_s18 + $0x10] ss:$8 sps:$4 sm:$0xff]  }
0x15c6   :  { %8940 = vmatpush1.bf16.msra.mxu1 %v11928_v52  ;;  %8969 = vmatpush1.bf16.msra.mxu0 %v11931_v12  ;;  %v16718_v52 = vld [vmem:[%s16868_s18 + $0x24] ss:$8 sps:$4 sm:$0xff]   ;;  %v11991_v12 = vld [vmem:[%s16871_s7 + $0x9d0] ss:$8 sps:$4 sm:$0xff]  }
0x15c7   :  { %8941 = vmatprep.subr.bf16.mxu1 %v11936_v61  ;;  %8970 = vmatprep.subr.bf16.mxu0 %v11939_v60  ;;  %v16727_v61 = vld [vmem:[%s16868_s18 + $0x20] ss:$8 sps:$4 sm:$0xff]   ;;  %v7085_v60 = vrot.slane %v16506_v32, %v12698_v24  ;;  %v16747_v32 = vld [vmem:[%s16868_s18 + $0x30] ss:$8 sps:$4 sm:$0xff]  }
0x15c8   :  { %v7760_v11 = vpop.f32.mrb[108].mxu0 }
0x15c9   :  { %v7762_v22 = vpop.f32.mrb[109].mxu0  ;;  %v7761_v40 = vadd.f32 %v7760_v11, %v7077_v56  ;;  %v16757_v11 = vld [vmem:[%s16868_s18 + $0x44] ss:$8 sps:$4 sm:$0xff]  }
0x15ca   :  { %v7763_v46 = vadd.f32 %v7762_v22, %v7081_v45  ;;  %8942 = vmatpush1.bf16.msra.mxu1 %v11934_v49  ;;  %v7764_v29 = vpop.f32.mrb[110].mxu0  ;;  %8971 = vmatpush1.bf16.msra.mxu0 %v11937_v8  ;;  %v11996_v49 = vld [vmem:[%s16871_s7 + $0x9e4] ss:$8 sps:$4 sm:$0xff]   ;;  %v16738_v45 = vld [vmem:[%s16868_s18 + $0x34] ss:$8 sps:$4 sm:$0xff]  }
0x15cb   :  { %v7765_v47 = vpop.f32.mrb[111].mxu0  ;;  %8943 = vmatprep.subr.bf16.mxu1 %v11942_v44  ;;  %8972 = vmatprep.subr.bf16.mxu0 %v11945_v25  ;;  %v7814_v2 = vmax.f32 %v7761_v40, 0.0  ;;  %v11994_v8 = vld [vmem:[%s16871_s7 + $0x9e0] ss:$8 sps:$4 sm:$0xff]   ;;  %v7802_v44 = vadd.f32 %v16459_v0, %v7085_v60  ;;  %v11999_v25 = vld [vmem:[%s16871_s7 + $0x9f4] ss:$8 sps:$4 sm:$0xff]  }
0x15cc   :  { %v7815_v30 = vmax.f32 %v7763_v46, 0.0  ;;  %v11997_v22 = vld [vmem:[%s16871_s7 + $0x9f0] ss:$8 sps:$4 sm:$0xff]   ;;  %v16766_v0 = vld [vmem:[%s16868_s18 + $0x40] ss:$8 sps:$4 sm:$0xff]  }
0x15cd   :  { %v7985_v42 = vpack.c.bf16 %v7814_v2, %v7814_v2  ;;  %v7816_v46 = vmax.f32 %v7802_v44, 0.0  ;;  %v16772_v29 = vld [vmem:[%s16868_s18 + $0x54] ss:$8 sps:$4 sm:$0xff]   ;;  %v16784_v47 = vld [vmem:[%s16868_s18 + $0x64] ss:$8 sps:$4 sm:$0xff]  }
0x15ce   :  { %v7986_v31 = vpack.c.bf16 %v7815_v30, %v7815_v30  ;;  %8944 = vmatpush1.bf16.msra.mxu1 %v11940_v14  ;;  %8973 = vmatpush1.bf16.msra.mxu0 %v11943_v37  ;;  %v16778_v14 = vld [vmem:[%s16868_s18 + $0x50] ss:$8 sps:$4 sm:$0xff]  }
0x15cf   :  { %8945 = vmatprep.subr.bf16.mxu1 %v11948_v16  ;;  %8974 = vmatprep.subr.bf16.mxu0 %v11951_v34  ;;  %v7987_v37 = vpack.c.bf16 %v7816_v46, %v7816_v46  ;;  %v16790_v16 = vld [vmem:[%s16868_s18 + $0x60] ss:$8 sps:$4 sm:$0xff]   ;;  %v16796_v34 = vld [vmem:[%s16868_s18 + $0x74] ss:$8 sps:$4 sm:$0xff]   ;;  %v16802_v30 = vld [vmem:[%s16868_s18 + $0x70] ss:$8 sps:$4 sm:$0xff]  }
0x15d0   :  { %8957 = vmatprep.mubr.bf16.mxu1 %v7986_v31  ;;  %v12333_v31 = vld [vmem:[%s16868_s18 + $0x84] ss:$8 sps:$4 sm:$0xff]  }
0x15d2   :  { %8946 = vmatpush1.bf16.msra.mxu1 %v11946_v53  ;;  %8975 = vmatpush1.bf16.msra.mxu0 %v11949_v39  ;;  %v12334_v53 = vld [vmem:[%s16868_s18 + $0x80] ss:$8 sps:$4 sm:$0xff]   ;;  %v12335_v39 = vld [vmem:[%s16868_s18 + $0x94] ss:$8 sps:$4 sm:$0xff]  }
0x15d3   :  { %8947 = vmatprep.subr.bf16.mxu1 %v11954_v50  ;;  %8976 = vmatprep.subr.bf16.mxu0 %v11957_v55  ;;  %v12336_v50 = vld [vmem:[%s16868_s18 + $0x90] ss:$8 sps:$4 sm:$0xff]  }
0x15d6   :  { %8948 = vmatpush1.bf16.msra.mxu1 %v11952_v20  ;;  %8977 = vmatpush1.bf16.msra.mxu0 %v11955_v33 }
0x15d7   :  { %8949 = vmatprep.subr.bf16.mxu1 %v11960_v36  ;;  %8978 = vmatprep.subr.bf16.mxu0 %v11963_v43  ;;  %v10279_v43 = vld [vmem:[%s16875_s8 + $0x2] sm:$0x3] }
0x15da   :  { %8950 = vmatpush1.bf16.msra.mxu1 %v11958_v51  ;;  %8979 = vmatpush1.bf16.msra.mxu0 %v11961_v57  ;;  %v7995_v51 = vrot.slane %v10279_v43, %v12698_v24  ;;  %v7999_v57 = vrot.slane %v10279_v43, %v12707_v27 }
0x15db   :  { %8951 = vmatprep.subr.bf16.mxu1 %v11966_v62  ;;  %8980 = vmatprep.subr.bf16.mxu0 %v11969_v54 }
0x15de   :  { %8952 = vmatpush1.bf16.msra.mxu1 %v11964_v3  ;;  %8981 = vmatpush1.bf16.msra.mxu0 %v11967_v6 }
0x15df   :  { %8953 = vmatprep.subr.bf16.mxu1 %v11972_v5  ;;  %8982 = vmatprep.subr.bf16.mxu0 %v11975_v48 }
0x15e2   :  { %8954 = vmatpush1.bf16.msra.mxu1 %v11970_v26  ;;  %8983 = vmatpush1.bf16.msra.mxu0 %v11973_v23 }
0x15e3   :  { %8955 = vmatprep.subr.bf16.mxu1 %v11978_v38  ;;  %8984 = vmatprep.subr.bf16.mxu0 %v11981_v1 }
0x15e6   :  { %8956 = vmatpush1.bf16.msra.mxu1 %v11976_v59  ;;  %8985 = vmatpush1.bf16.msra.mxu0 %v11979_v63 }
0x15e7   :  { %8986 = vmatprep.subr.bf16.mxu0 %v11984_v9  ;;  %9018 = vmatprep.subr.bf16.mxu1 %v16682_v17 }
0x15e9   :  { %8958 = vmatmul.mubr.bf16.vlgmr.msra.gmra.mrb[112].mxu1 %v7985_v42 }
0x15ea   :  { %8987 = vmatpush1.bf16.msra.mxu0 %v11982_v58  ;;  %9019 = vmatpush1.bf16.msra.mxu1 %v16691_v4 }
0x15eb   :  { %8988 = vmatprep.subr.bf16.mxu0 %v11987_v35  ;;  %9020 = vmatprep.subr.bf16.mxu1 %v16700_v19 }
0x15ee   :  { %8989 = vmatpush1.bf16.msra.mxu0 %v11985_v18  ;;  %9021 = vmatpush1.bf16.msra.mxu1 %v16709_v13 }
0x15ef   :  { %8990 = vmatprep.subr.bf16.mxu0 %v11990_v10  ;;  %9022 = vmatprep.subr.bf16.mxu1 %v16718_v52 }
0x15f2   :  { %8991 = vmatpush1.bf16.msra.mxu0 %v11988_v21  ;;  %9023 = vmatpush1.bf16.msra.mxu1 %v16727_v61 }
0x15f3   :  { %8992 = vmatprep.subr.bf16.mxu0 %v11993_v28  ;;  %9024 = vmatprep.subr.bf16.mxu1 %v16738_v45 }
0x15f6   :  { %8993 = vmatpush1.bf16.msra.mxu0 %v11991_v12  ;;  %9025 = vmatpush1.bf16.msra.mxu1 %v16747_v32 }
0x15f7   :  { %8994 = vmatprep.subr.bf16.mxu0 %v11996_v49  ;;  %9026 = vmatprep.subr.bf16.mxu1 %v16757_v11 }
0x15fa   :  { %8995 = vmatpush1.bf16.msra.mxu0 %v11994_v8  ;;  %9027 = vmatpush1.bf16.msra.mxu1 %v16766_v0 }
0x15fb   :  { %8996 = vmatprep.subr.bf16.mxu0 %v11999_v25  ;;  %9028 = vmatprep.subr.bf16.mxu1 %v16772_v29 }
0x15fe   :  { %8997 = vmatpush1.bf16.msra.mxu0 %v11997_v22  ;;  %9029 = vmatpush1.bf16.msra.mxu1 %v16778_v14 }
0x15ff   :  { %9030 = vmatprep.subr.bf16.mxu1 %v16784_v47 }
0x1601   :  { %8999 = vmatmul.mubr.bf16.vlgmr.msra.gmra.mrb[120].mxu0 %v7987_v37  ;;  %v10440_v37 = vld [vmem:[%s16876_s11 + $0x2] sm:$0x3] }
0x1602   :  { %9031 = vmatpush1.bf16.msra.mxu1 %v16790_v16 }
0x1603   :  { %9032 = vmatprep.subr.bf16.mxu1 %v16796_v34 }
0x1606   :  { %9033 = vmatpush1.bf16.msra.mxu1 %v16802_v30 }
0x1607   :  { %9034 = vmatprep.subr.bf16.mxu1 %v12333_v31 }
0x160a   :  { %9035 = vmatpush1.bf16.msra.mxu1 %v12334_v53 }
0x160b   :  { %9036 = vmatprep.subr.bf16.mxu1 %v12335_v39 }
0x160e   :  { %9037 = vmatpush1.bf16.msra.mxu1 %v12336_v50 }
0x160f   :  { %9068 = vmatprep.subr.bf16.mxu1 %v16682_v17 }
0x1654   :  { %v8836_v55 = vpop.f32.mrb[112].mxu0 }
0x1655   :  { %v8838_v20 = vpop.f32.mrb[113].mxu0  ;;  %v8837_v62 = vadd.f32 %v8836_v55, %v7995_v51 }
0x1656   :  { %v8840_v33 = vpop.f32.mrb[114].mxu0  ;;  %v8839_v54 = vadd.f32 %v8838_v20, %v7999_v57 }
0x1657   :  { %v8841_v36 = vpop.f32.mrb[115].mxu0 }
0x167c   :  { %v8877_v3 = vpop.f32.mrb[108].mxu1 }
0x167d   :  { %v8878_v6 = vadd.f32 %v8877_v3, %v8837_v62  ;;  %v8879_v7 = vpop.f32.mrb[109].mxu1 }
0x167e   :  { %v8880_v56 = vadd.f32 %v8879_v7, %v8839_v54  ;;  %v8881_v5 = vpop.f32.mrb[110].mxu1 }
0x167f   :  { %v8882_v48 = vpop.f32.mrb[111].mxu1 }
0x1694   :  { %v8918_v26 = vpop.f32.mrb[116].mxu0 }
0x1695   :  { %v8919_v23 = vadd.f32 %v8918_v26, %v8878_v6  ;;  %v8920_v40 = vpop.f32.mrb[117].mxu0 }
0x1696   :  { %v8921_v38 = vadd.f32 %v8920_v40, %v8880_v56  ;;  %v8922_v1 = vpop.f32.mrb[118].mxu0 }
0x1697   :  { %v8923_v59 = vpop.f32.mrb[119].mxu0 }
0x16bc   :  { %v8959_v63 = vpop.f32.mrb[112].mxu1 }
0x16bd   :  { %v8960_v2 = vadd.f32 %v8959_v63, %v8919_v23  ;;  %v8961_v9 = vpop.f32.mrb[113].mxu1 }
0x16be   :  { %v8962_v58 = vadd.f32 %v8961_v9, %v8921_v38  ;;  %v8963_v42 = vpop.f32.mrb[114].mxu1 }
0x16bf   :  { %v8964_v35 = vpop.f32.mrb[115].mxu1 }
0x16d4   :  { %v9000_v17 = vpop.f32.mrb[120].mxu0 }
0x16d5   :  { %v9001_v18 = vadd.f32 %v9000_v17, %v8960_v2  ;;  %v9002_v10 = vpop.f32.mrb[121].mxu0 }
0x16d6   :  { %v9003_v21 = vadd.f32 %v9002_v10, %v8962_v58  ;;  %v9004_v28 = vpop.f32.mrb[122].mxu0 }
0x16d7   :  { %v9007_v12 = vadd.f32 %v9001_v18, %v15988_v15  ;;  %v9005_v60 = vpop.f32.mrb[123].mxu0 }
0x16d8   :  { %v9008_v49 = vadd.f32 %v9003_v21, %v15990_v41 }
0x16d9   :  { %v9013_v44 = vpack.c.bf16 %v9007_v12, %v9007_v12 }
0x16da   :  { %v9014_v8 = vpack.c.bf16 %v9008_v49, %v9008_v49 }
0x16dc   :  { %10442 = vmatprep.mubr.msk.bf16.mxu1 %vm664_vm0, %v9014_v8 }
0x16dd   :  { %9051 = vmatmul.mubr.bf16.vlgmr.msra.gmra.mrb[116].mxu1 %v9013_v44 }
0x16de   :  { %9069 = vmatpush1.bf16.msra.mxu1 %v16691_v4 }
0x16df   :  { %9070 = vmatprep.subr.bf16.mxu1 %v16700_v19 }
0x16e2   :  { %9071 = vmatpush1.bf16.msra.mxu1 %v16709_v13 }
0x16e3   :  { %9072 = vmatprep.subr.bf16.mxu1 %v16718_v52 }
0x16e6   :  { %9073 = vmatpush1.bf16.msra.mxu1 %v16727_v61 }
0x16e7   :  { %9074 = vmatprep.subr.bf16.mxu1 %v16738_v45 }
0x16ea   :  { %9075 = vmatpush1.bf16.msra.mxu1 %v16747_v32 }
0x16eb   :  { %9076 = vmatprep.subr.bf16.mxu1 %v16757_v11 }
0x16ee   :  { %9077 = vmatpush1.bf16.msra.mxu1 %v16766_v0 }
0x16ef   :  { %9078 = vmatprep.subr.bf16.mxu1 %v16772_v29 }
0x16f2   :  { %9079 = vmatpush1.bf16.msra.mxu1 %v16778_v14 }
0x16f3   :  { %9080 = vmatprep.subr.bf16.mxu1 %v16784_v47  ;;  %v10441_v47 = vld [vmem:[%s16877_s12 + $0x2] sm:$0x3] }
0x16f6   :  { %9081 = vmatpush1.bf16.msra.mxu1 %v16790_v16  ;;  %v9117_v16 = vrot.slane %v10440_v37, %v12698_v24 }
0x16f7   :  { %9082 = vmatprep.subr.bf16.mxu1 %v16796_v34 }
0x16fa   :  { %9083 = vmatpush1.bf16.msra.mxu1 %v16802_v30  ;;  %v9121_v30 = vrot.slane %v10440_v37, %v12707_v27 }
0x16fb   :  { %9084 = vmatprep.subr.bf16.mxu1 %v12333_v31 }
0x16fe   :  { %9085 = vmatpush1.bf16.msra.mxu1 %v12334_v53  ;;  %v9130_v53 = vrot.slane %v10441_v47, %v12698_v24 }
0x16ff   :  { %9086 = vmatprep.subr.bf16.mxu1 %v12335_v39 }
0x1702   :  { %9087 = vmatpush1.bf16.msra.mxu1 %v12336_v50  ;;  %v9134_v50 = vrot.slane %v10441_v47, %v12707_v27 }
0x17b0   :  { %v9052_v15 = vpop.f32.mrb[116].mxu1 }
0x17b1   :  { %v9059_v41 = vsub.f32 %v9007_v12, %v9052_v15  ;;  %v9054_v4 = vpop.f32.mrb[117].mxu1 }
0x17b2   :  { %v9060_v19 = vsub.f32 %v9008_v49, %v9054_v4  ;;  %v9056_v13 = vpop.f32.mrb[118].mxu1 }
0x17b3   :  { %v9061_v52 = vmul.f32 %v9059_v41, %v9059_v41  ;;  %v9057_v61 = vpop.f32.mrb[119].mxu1 }
0x17b4   :  { %v9062_v45 = vmul.f32 %v9060_v19, %v9060_v19 }
0x17b5   :  { %v9063_v25 = vpack.c.bf16 %v9061_v52, %v9061_v52 }
0x17b6   :  { %v9064_v32 = vpack.c.bf16 %v9062_v45, %v9062_v45 }
0x17b8   :  { %10443 = vmatprep.mubr.msk.bf16.mxu1 %vm664_vm0, %v9064_v32 }
0x17b9   :  { %9101 = vmatmul.mubr.bf16.vlgmr.msra.gmra.mrb[120].mxu1 %v9063_v25 }
0x188c   :  { %v9102_v11 = vpop.f32.mrb[120].mxu1 }
0x188d   :  { %v9103_v22 = vadd.f32 1e-05, %v9102_v11  ;;  %v9104_v0 = vpop.f32.mrb[121].mxu1 }
0x188e   :  { %v9105_v46 = vadd.f32 1e-05, %v9104_v0  ;;  %v9106_v29 = vpop.f32.mrb[122].mxu1 }
0x188f   :  { %12024 = vrsqrt.f32 %v9103_v22  ;;  %v9107_v14 = vpop.f32.mrb[123].mxu1 }
0x1890   :  { %12026 = vrsqrt.f32 %v9105_v46 }
0x1899   :  { %v12025_v34 = vpop.eup %12024 }
0x189a   :  { %v12027_v31 = vpop.eup %12026  ;;  %v9111_v39 = vmul.f32 %v12025_v34, %v9059_v41 }
0x189b   :  { %v9112_v55 = vmul.f32 %v12027_v31, %v9060_v19 }
0x189c   :  { %v9124_v20 = vmul.f32 %v9117_v16, %v9111_v39 }
0x189d   :  { %v9125_v33 = vmul.f32 %v9121_v30, %v9112_v55 }
0x189e   :  { %v9137_v36 = vadd.f32 %v9130_v53, %v9124_v20 }
0x189f   :  { %v9138_v43 = vadd.f32 %v9134_v50, %v9125_v33 }
0x18a0   :  { %9139 = vst [vmem:[%s16878_s19] sm:$0xff] %v9137_v36 }
0x18a1   :  { %9140 = vst.msk [vmem:[%s16878_s19 + $0x8] sm:$0xff] %vm664_vm0, %v9138_v43 }

</bundles_post_ra>
